<compile_context>
chip_gen: v7x
topology: tpu7x:2x2x1
jax: 0.10.0
libtpu: 0.0.40
codegen_flags: <defaults>
</compile_context>

<pallas_src>
import jax
import jax.numpy as jnp
from jax.experimental import pallas as pl
from jax.experimental.pallas import tpu as pltpu

# ---------------------------------------------------------------------------
# Model geometry (LeNet on 32x32x3, as implied by 16*5*5 flatten).
# ---------------------------------------------------------------------------
H = W = 32
C_IN, C1, C2 = 3, 6, 16
KS = 5                         # conv kernel size
HO1 = WO1 = 28                 # conv1 output spatial
HP1 = WP1 = 14                 # pool1 output spatial
HO2 = WO2 = 10                 # conv2 output spatial
HP2 = WP2 = 5                  # pool2 output spatial
F1, F2, F3 = 120, 84, 10

HW_HALF = H * (W // 2)                        # 512  per-parity flat input length
M1 = 16 * (HO1 - 1) + (WP1 - 1) + 1           # 446  conv1 accumulator width
MV1 = 32 * (HP1 - 1) + (WP1 - 1) + 1          # 430  pooled1 width (stride-32 grid)
M2 = 32 * (HO2 - 1) + (WO2 - 1) + 1           # 298  conv2 accumulator width
MH2 = M2 - 1                                  # 297  horizontal-max width
MV2 = 64 * (HP2 - 1) + 2 * (WP2 - 1) + 1      # 265  pooled2-usable width


# ---------------------------------------------------------------------------
# The fused kernel (one grid step == one image).
# ---------------------------------------------------------------------------
def _lenet_kernel(x_ref, w1_ref, b1_ref, w2_ref, b2_ref,
                  wf1_ref, bf1_ref, wf2_ref, bf2_ref, wf3_ref, bf3_ref,
                  o_ref):
    f32 = jnp.float32
    # Column-parity-split input halves, each (3, 512) with row stride 16.
    x_par = (x_ref[0, 0], x_ref[0, 1])

    # ---- conv1 (5x5, 3->6) + ReLU: 2 x 25 shifted (6,3)@(3,446) matmuls ----
    acc = [jnp.zeros((C1, M1), f32), jnp.zeros((C1, M1), f32)]
    for e in range(2):                       # output-column parity
        for kh in range(KS):
            for kw in range(KS):
                src = x_par[(e + kw) % 2]
                s = 16 * kh + (e + kw) // 2
                acc[e] = acc[e] + jnp.dot(
                    w1_ref[kh * KS + kw], src[:, s:s + M1],
                    preferred_element_type=f32)
    b1 = b1_ref[...]
    a_even = jnp.maximum(acc[0] + b1, 0.0)   # conv1 @ even output columns
    a_odd = jnp.maximum(acc[1] + b1, 0.0)    # conv1 @ odd output columns

    # ---- pool1 (2x2 / 2), fused -------------------------------------------
    h1 = jnp.maximum(a_even, a_odd)                        # horizontal max
    v1 = jnp.maximum(h1[:, 0:MV1], h1[:, 16:16 + MV1])     # vertical max
    # v1[c, 32*i + j] == pool1[i, j, c]  (conv2 input on a stride-32 grid)

    # ---- conv2 (5x5, 6->16) + ReLU: 25 shifted (16,6)@(6,298) matmuls ------
    acc2 = jnp.zeros((C2, M2), f32)
    for kh in range(KS):
        for kw in range(KS):
            s = 32 * kh + kw
            acc2 = acc2 + jnp.dot(w2_ref[kh * KS + kw], v1[:, s:s + M2],
                                  preferred_element_type=f32)
    a2 = jnp.maximum(acc2 + b2_ref[...], 0.0)              # (16, 298)

    # ---- pool2 (2x2 / 2), fused ---------------------------------------------
    h2 = jnp.maximum(a2[:, 0:MH2], a2[:, 1:1 + MH2])       # (16, 297)
    v2 = jnp.maximum(h2[:, 0:MV2], h2[:, 32:32 + MV2])     # (16, 265)
    # v2[c, 64*i + 2*j] == pool2[i, j, c]

    # ---- fc1 (400->120) + ReLU; pool2 decimation folded into the sum -------
    f1 = jnp.zeros((F1, 1), f32)
    for q in range(HP2 * WP2):               # 25 pooled positions, (h, w) major
        i, j = q // WP2, q % WP2
        col = 64 * i + 2 * j
        f1 = f1 + jnp.dot(wf1_ref[:, C2 * q:C2 * (q + 1)], v2[:, col:col + 1],
                          preferred_element_type=f32)
    f1 = jnp.maximum(f1 + bf1_ref[...], 0.0)               # (120, 1)

    # ---- fc2 (120->84) + ReLU ------------------------------------------------
    f2 = jnp.maximum(jnp.dot(wf2_ref[...], f1, preferred_element_type=f32)
                     + bf2_ref[...], 0.0)                  # (84, 1)

    # ---- fc3 (84->10) ----------------------------------------------------------
    o_ref[0] = jnp.dot(wf3_ref[...], f2,
                       preferred_element_type=f32) + bf3_ref[...]


# ---------------------------------------------------------------------------
# Wrapper: parameter re-orientation (tiny, once per call) + the pallas_call.
# ---------------------------------------------------------------------------
def _prep_params(p):
    """Re-orient PyTorch-layout params for the kernel (no per-layer .T inside)."""
    w1 = jnp.transpose(p["conv1_w"], (2, 3, 0, 1)).reshape(KS * KS, C1, C_IN)
    w2 = jnp.transpose(p["conv2_w"], (2, 3, 0, 1)).reshape(KS * KS, C2, C1)
    # PyTorch flattens NCHW as c*25 + h*5 + w; the kernel consumes pooled
    # positions (h, w)-major with channels minor -> column order q*16 + c.
    wf1 = jnp.transpose(p["fc1_w"].reshape(F1, C2, HP2 * WP2),
                        (0, 2, 1)).reshape(F1, C2 * HP2 * WP2)
    return (w1, p["conv1_b"].reshape(C1, 1),
            w2, p["conv2_b"].reshape(C2, 1),
            wf1, p["fc1_b"].reshape(F1, 1),
            p["fc2_w"], p["fc2_b"].reshape(F2, 1),
            p["fc3_w"], p["fc3_b"].reshape(F3, 1))


@jax.jit
def net_forward(x, params):
    n = x.shape[0]
    # x_split[n, e, c, 16*h + t] = x[n, c, h, 2*t + e]  (column-parity split)
    x_split = (x.reshape(n, C_IN, H, W // 2, 2)
               .transpose(0, 4, 1, 2, 3)
               .reshape(n, 2, C_IN, HW_HALF))
    prepped = _prep_params(params)

    def full(shape):
        return pl.BlockSpec(shape, lambda b: (0,) * len(shape))

    out = pl.pallas_call(
        _lenet_kernel,
        out_shape=jax.ShapeDtypeStruct((n, F3, 1), jnp.float32),
        grid=(n,),
        in_specs=[
            pl.BlockSpec((1, 2, C_IN, HW_HALF), lambda b: (b, 0, 0, 0)),
            full((KS * KS, C1, C_IN)), full((C1, 1)),
            full((KS * KS, C2, C1)), full((C2, 1)),
            full((F1, C2 * HP2 * WP2)), full((F1, 1)),
            full((F2, F1)), full((F2, 1)),
            full((F3, F2)), full((F3, 1)),
        ],
        out_specs=pl.BlockSpec((1, F3, 1), lambda b: (b, 0, 0)),
        compiler_params=pltpu.CompilerParams(
            dimension_semantics=("parallel",)),
    )(x_split, *prepped)
    return out.reshape(n, F3)


# ---------------------------------------------------------------------------
# Parameter init (PyTorch default uniform(-1/sqrt(fan_in), 1/sqrt(fan_in))).
# ---------------------------------------------------------------------------
def init_params(key):
    def uni(k, shape, fan_in):
        bound = 1.0 / jnp.sqrt(fan_in)
        return jax.random.uniform(k, shape, jnp.float32, -bound, bound)

    ks = jax.random.split(key, 10)
    return {
        "conv1_w": uni(ks[0], (C1, C_IN, KS, KS), C_IN * KS * KS),
        "conv1_b": uni(ks[1], (C1,), C_IN * KS * KS),
        "conv2_w": uni(ks[2], (C2, C1, KS, KS), C1 * KS * KS),
        "conv2_b": uni(ks[3], (C2,), C1 * KS * KS),
        "fc1_w":   uni(ks[4], (F1, 400), 400),
        "fc1_b":   uni(ks[5], (F1,), 400),
        "fc2_w":   uni(ks[6], (F2, F1), F1),
        "fc2_b":   uni(ks[7], (F2,), F1),
        "fc3_w":   uni(ks[8], (F3, F2), F2),
        "fc3_b":   uni(ks[9], (F3,), F2),
    }


# ---------------------------------------------------------------------------
# Pure-JAX reference (correctness sanity check against the fused kernel).
# ---------------------------------------------------------------------------
def ref_forward(x, p):
    def conv(x, w, b):
        y = jax.lax.conv_general_dilated(
            x, w, (1, 1), "VALID", dimension_numbers=("NCHW", "OIHW", "NCHW"))
        return jax.nn.relu(y + b[None, :, None, None])

    def pool(x):
        return jax.lax.reduce_window(
            x, -jnp.inf, jax.lax.max, (1, 1, 2, 2), (1, 1, 2, 2), "VALID")

    x = pool(conv(x, p["conv1_w"], p["conv1_b"]))
    x = pool(conv(x, p["conv2_w"], p["conv2_b"]))
    x = x.reshape(-1, 400)
    x = jax.nn.relu(x @ p["fc1_w"].T + p["fc1_b"])
    x = jax.nn.relu(x @ p["fc2_w"].T + p["fc2_b"])
    return x @ p["fc3_w"].T + p["fc3_b"]


if __name__ == "__main__":
    key = jax.random.PRNGKey(0)
    k_x, k_p = jax.random.split(key)

    # Net implies 32x32 spatial input (5x5 feature map after two conv+pool).
    x = jax.random.normal(k_x, (2, 3, 32, 32), jnp.float32)
    params = init_params(k_p)

    out = jax.block_until_ready(net_forward(x, params))
    ref = jax.block_until_ready(ref_forward(x, params))

    assert out.shape == (2, 10), out.shape
    err = float(jnp.max(jnp.abs(out - ref)))
    assert err < 1e-3, err
    print("KERNEL_OK")
</pallas_src>

<mosaic_0001>
module attributes {stable_mosaic.version = 11 : i64} {
  func.func @_lenet_kernel(%arg0: i32, %arg1: memref<1x2x3x512xf32, #tpu.memory_space<vmem>>, %arg2: memref<25x6x3xf32, #tpu.memory_space<vmem>>, %arg3: memref<6x1xf32, #tpu.memory_space<vmem>>, %arg4: memref<25x16x6xf32, #tpu.memory_space<vmem>>, %arg5: memref<16x1xf32, #tpu.memory_space<vmem>>, %arg6: memref<120x400xf32, #tpu.memory_space<vmem>>, %arg7: memref<120x1xf32, #tpu.memory_space<vmem>>, %arg8: memref<84x120xf32, #tpu.memory_space<vmem>>, %arg9: memref<84x1xf32, #tpu.memory_space<vmem>>, %arg10: memref<10x84xf32, #tpu.memory_space<vmem>>, %arg11: memref<10x1xf32, #tpu.memory_space<vmem>>, %arg12: memref<1x10x1xf32, #tpu.memory_space<vmem>>) attributes {dimension_semantics = [#tpu.dimension_semantics<parallel>], iteration_bounds = array<i64: 2>, scalar_prefetch = 0 : i64, scratch_operands = 0 : i64, tpu.core_type = #tpu.core_type<tc>, window_params = [{transform_indices = @transform_0, window_bounds = array<i64: 1, 2, 3, 512>}, {pipeline_mode = #tpu.pipeline_mode<synchronous>, transform_indices = @transform_1, window_bounds = array<i64: 25, 6, 3>}, {pipeline_mode = #tpu.pipeline_mode<synchronous>, transform_indices = @transform_2, window_bounds = array<i64: 6, 1>}, {pipeline_mode = #tpu.pipeline_mode<synchronous>, transform_indices = @transform_3, window_bounds = array<i64: 25, 16, 6>}, {pipeline_mode = #tpu.pipeline_mode<synchronous>, transform_indices = @transform_4, window_bounds = array<i64: 16, 1>}, {pipeline_mode = #tpu.pipeline_mode<synchronous>, transform_indices = @transform_5, window_bounds = array<i64: 120, 400>}, {pipeline_mode = #tpu.pipeline_mode<synchronous>, transform_indices = @transform_6, window_bounds = array<i64: 120, 1>}, {pipeline_mode = #tpu.pipeline_mode<synchronous>, transform_indices = @transform_7, window_bounds = array<i64: 84, 120>}, {pipeline_mode = #tpu.pipeline_mode<synchronous>, transform_indices = @transform_8, window_bounds = array<i64: 84, 1>}, {pipeline_mode = #tpu.pipeline_mode<synchronous>, transform_indices = @transform_9, window_bounds = array<i64: 10, 84>}, {pipeline_mode = #tpu.pipeline_mode<synchronous>, transform_indices = @transform_10, window_bounds = array<i64: 10, 1>}, {transform_indices = @transform_11, window_bounds = array<i64: 1, 10, 1>}]} {
    %c0 = arith.constant 0 : index
    %c0_0 = arith.constant 0 : index
    %c0_1 = arith.constant 0 : index
    %c0_2 = arith.constant 0 : index
    %0 = vector.load %arg1[%c0, %c0_0, %c0_1, %c0_2] : memref<1x2x3x512xf32, #tpu.memory_space<vmem>>, vector<1x1x3x512xf32>
    %1 = vector.shape_cast %0 : vector<1x1x3x512xf32> to vector<3x512xf32>
    %c0_3 = arith.constant 0 : index
    %c1 = arith.constant 1 : index
    %c0_4 = arith.constant 0 : index
    %c0_5 = arith.constant 0 : index
    %2 = vector.load %arg1[%c0_3, %c1, %c0_4, %c0_5] : memref<1x2x3x512xf32, #tpu.memory_space<vmem>>, vector<1x1x3x512xf32>
    %3 = vector.shape_cast %2 : vector<1x1x3x512xf32> to vector<3x512xf32>
    %cst = arith.constant 0.000000e+00 : f32
    %4 = vector.broadcast %cst : f32 to vector<6x446xf32>
    %cst_6 = arith.constant 0.000000e+00 : f32
    %5 = vector.broadcast %cst_6 : f32 to vector<6x446xf32>
    %c0_7 = arith.constant 0 : index
    %c0_8 = arith.constant 0 : index
    %c0_9 = arith.constant 0 : index
    %6 = vector.load %arg2[%c0_7, %c0_8, %c0_9] : memref<25x6x3xf32, #tpu.memory_space<vmem>>, vector<1x6x3xf32>
    %7 = vector.shape_cast %6 : vector<1x6x3xf32> to vector<6x3xf32>
    %8 = vector.extract_strided_slice %1 {offsets = [0, 0], sizes = [3, 446], strides = [1, 1]} : vector<3x512xf32> to vector<3x446xf32>
    %cst_10 = arith.constant dense<0.000000e+00> : vector<6x446xf32>
    %9 = tpu.matmul %7, %8, %cst_10 {dimension_numbers = #tpu.dot_dimension_numbers<[1], [0], [0], [1], [0, 0, 1, 1], [], []>} : vector<6x3xf32>, vector<3x446xf32>, vector<6x446xf32> -> vector<6x446xf32>
    %10 = arith.addf %4, %9 : vector<6x446xf32>
    %c1_11 = arith.constant 1 : index
    %c0_12 = arith.constant 0 : index
    %c0_13 = arith.constant 0 : index
    %11 = vector.load %arg2[%c1_11, %c0_12, %c0_13] : memref<25x6x3xf32, #tpu.memory_space<vmem>>, vector<1x6x3xf32>
    %12 = vector.shape_cast %11 : vector<1x6x3xf32> to vector<6x3xf32>
    %13 = vector.extract_strided_slice %3 {offsets = [0, 0], sizes = [3, 446], strides = [1, 1]} : vector<3x512xf32> to vector<3x446xf32>
    %cst_14 = arith.constant dense<0.000000e+00> : vector<6x446xf32>
    %14 = tpu.matmul %12, %13, %cst_14 {dimension_numbers = #tpu.dot_dimension_numbers<[1], [0], [0], [1], [0, 0, 1, 1], [], []>} : vector<6x3xf32>, vector<3x446xf32>, vector<6x446xf32> -> vector<6x446xf32>
    %15 = arith.addf %10, %14 : vector<6x446xf32>
    %c2 = arith.constant 2 : index
    %c0_15 = arith.constant 0 : index
    %c0_16 = arith.constant 0 : index
    %16 = vector.load %arg2[%c2, %c0_15, %c0_16] : memref<25x6x3xf32, #tpu.memory_space<vmem>>, vector<1x6x3xf32>
    %17 = vector.shape_cast %16 : vector<1x6x3xf32> to vector<6x3xf32>
    %18 = vector.extract_strided_slice %1 {offsets = [0, 1], sizes = [3, 446], strides = [1, 1]} : vector<3x512xf32> to vector<3x446xf32>
    %cst_17 = arith.constant dense<0.000000e+00> : vector<6x446xf32>
    %19 = tpu.matmul %17, %18, %cst_17 {dimension_numbers = #tpu.dot_dimension_numbers<[1], [0], [0], [1], [0, 0, 1, 1], [], []>} : vector<6x3xf32>, vector<3x446xf32>, vector<6x446xf32> -> vector<6x446xf32>
    %20 = arith.addf %15, %19 : vector<6x446xf32>
    %c3 = arith.constant 3 : index
    %c0_18 = arith.constant 0 : index
    %c0_19 = arith.constant 0 : index
    %21 = vector.load %arg2[%c3, %c0_18, %c0_19] : memref<25x6x3xf32, #tpu.memory_space<vmem>>, vector<1x6x3xf32>
    %22 = vector.shape_cast %21 : vector<1x6x3xf32> to vector<6x3xf32>
    %23 = vector.extract_strided_slice %3 {offsets = [0, 1], sizes = [3, 446], strides = [1, 1]} : vector<3x512xf32> to vector<3x446xf32>
    %cst_20 = arith.constant dense<0.000000e+00> : vector<6x446xf32>
    %24 = tpu.matmul %22, %23, %cst_20 {dimension_numbers = #tpu.dot_dimension_numbers<[1], [0], [0], [1], [0, 0, 1, 1], [], []>} : vector<6x3xf32>, vector<3x446xf32>, vector<6x446xf32> -> vector<6x446xf32>
    %25 = arith.addf %20, %24 : vector<6x446xf32>
    %c4 = arith.constant 4 : index
    %c0_21 = arith.constant 0 : index
    %c0_22 = arith.constant 0 : index
    %26 = vector.load %arg2[%c4, %c0_21, %c0_22] : memref<25x6x3xf32, #tpu.memory_space<vmem>>, vector<1x6x3xf32>
    %27 = vector.shape_cast %26 : vector<1x6x3xf32> to vector<6x3xf32>
    %28 = vector.extract_strided_slice %1 {offsets = [0, 2], sizes = [3, 446], strides = [1, 1]} : vector<3x512xf32> to vector<3x446xf32>
    %cst_23 = arith.constant dense<0.000000e+00> : vector<6x446xf32>
    %29 = tpu.matmul %27, %28, %cst_23 {dimension_numbers = #tpu.dot_dimension_numbers<[1], [0], [0], [1], [0, 0, 1, 1], [], []>} : vector<6x3xf32>, vector<3x446xf32>, vector<6x446xf32> -> vector<6x446xf32>
    %30 = arith.addf %25, %29 : vector<6x446xf32>
    %c5 = arith.constant 5 : index
    %c0_24 = arith.constant 0 : index
    %c0_25 = arith.constant 0 : index
    %31 = vector.load %arg2[%c5, %c0_24, %c0_25] : memref<25x6x3xf32, #tpu.memory_space<vmem>>, vector<1x6x3xf32>
    %32 = vector.shape_cast %31 : vector<1x6x3xf32> to vector<6x3xf32>
    %33 = vector.extract_strided_slice %1 {offsets = [0, 16], sizes = [3, 446], strides = [1, 1]} : vector<3x512xf32> to vector<3x446xf32>
    %cst_26 = arith.constant dense<0.000000e+00> : vector<6x446xf32>
    %34 = tpu.matmul %32, %33, %cst_26 {dimension_numbers = #tpu.dot_dimension_numbers<[1], [0], [0], [1], [0, 0, 1, 1], [], []>} : vector<6x3xf32>, vector<3x446xf32>, vector<6x446xf32> -> vector<6x446xf32>
    %35 = arith.addf %30, %34 : vector<6x446xf32>
    %c6 = arith.constant 6 : index
    %c0_27 = arith.constant 0 : index
    %c0_28 = arith.constant 0 : index
    %36 = vector.load %arg2[%c6, %c0_27, %c0_28] : memref<25x6x3xf32, #tpu.memory_space<vmem>>, vector<1x6x3xf32>
    %37 = vector.shape_cast %36 : vector<1x6x3xf32> to vector<6x3xf32>
    %38 = vector.extract_strided_slice %3 {offsets = [0, 16], sizes = [3, 446], strides = [1, 1]} : vector<3x512xf32> to vector<3x446xf32>
    %cst_29 = arith.constant dense<0.000000e+00> : vector<6x446xf32>
    %39 = tpu.matmul %37, %38, %cst_29 {dimension_numbers = #tpu.dot_dimension_numbers<[1], [0], [0], [1], [0, 0, 1, 1], [], []>} : vector<6x3xf32>, vector<3x446xf32>, vector<6x446xf32> -> vector<6x446xf32>
    %40 = arith.addf %35, %39 : vector<6x446xf32>
    %c7 = arith.constant 7 : index
    %c0_30 = arith.constant 0 : index
    %c0_31 = arith.constant 0 : index
    %41 = vector.load %arg2[%c7, %c0_30, %c0_31] : memref<25x6x3xf32, #tpu.memory_space<vmem>>, vector<1x6x3xf32>
    %42 = vector.shape_cast %41 : vector<1x6x3xf32> to vector<6x3xf32>
    %43 = vector.extract_strided_slice %1 {offsets = [0, 17], sizes = [3, 446], strides = [1, 1]} : vector<3x512xf32> to vector<3x446xf32>
    %cst_32 = arith.constant dense<0.000000e+00> : vector<6x446xf32>
    %44 = tpu.matmul %42, %43, %cst_32 {dimension_numbers = #tpu.dot_dimension_numbers<[1], [0], [0], [1], [0, 0, 1, 1], [], []>} : vector<6x3xf32>, vector<3x446xf32>, vector<6x446xf32> -> vector<6x446xf32>
    %45 = arith.addf %40, %44 : vector<6x446xf32>
    %c8 = arith.constant 8 : index
    %c0_33 = arith.constant 0 : index
    %c0_34 = arith.constant 0 : index
    %46 = vector.load %arg2[%c8, %c0_33, %c0_34] : memref<25x6x3xf32, #tpu.memory_space<vmem>>, vector<1x6x3xf32>
    %47 = vector.shape_cast %46 : vector<1x6x3xf32> to vector<6x3xf32>
    %48 = vector.extract_strided_slice %3 {offsets = [0, 17], sizes = [3, 446], strides = [1, 1]} : vector<3x512xf32> to vector<3x446xf32>
    %cst_35 = arith.constant dense<0.000000e+00> : vector<6x446xf32>
    %49 = tpu.matmul %47, %48, %cst_35 {dimension_numbers = #tpu.dot_dimension_numbers<[1], [0], [0], [1], [0, 0, 1, 1], [], []>} : vector<6x3xf32>, vector<3x446xf32>, vector<6x446xf32> -> vector<6x446xf32>
    %50 = arith.addf %45, %49 : vector<6x446xf32>
    %c9 = arith.constant 9 : index
    %c0_36 = arith.constant 0 : index
    %c0_37 = arith.constant 0 : index
    %51 = vector.load %arg2[%c9, %c0_36, %c0_37] : memref<25x6x3xf32, #tpu.memory_space<vmem>>, vector<1x6x3xf32>
    %52 = vector.shape_cast %51 : vector<1x6x3xf32> to vector<6x3xf32>
    %53 = vector.extract_strided_slice %1 {offsets = [0, 18], sizes = [3, 446], strides = [1, 1]} : vector<3x512xf32> to vector<3x446xf32>
    %cst_38 = arith.constant dense<0.000000e+00> : vector<6x446xf32>
    %54 = tpu.matmul %52, %53, %cst_38 {dimension_numbers = #tpu.dot_dimension_numbers<[1], [0], [0], [1], [0, 0, 1, 1], [], []>} : vector<6x3xf32>, vector<3x446xf32>, vector<6x446xf32> -> vector<6x446xf32>
    %55 = arith.addf %50, %54 : vector<6x446xf32>
    %c10 = arith.constant 10 : index
    %c0_39 = arith.constant 0 : index
    %c0_40 = arith.constant 0 : index
    %56 = vector.load %arg2[%c10, %c0_39, %c0_40] : memref<25x6x3xf32, #tpu.memory_space<vmem>>, vector<1x6x3xf32>
    %57 = vector.shape_cast %56 : vector<1x6x3xf32> to vector<6x3xf32>
    %58 = vector.extract_strided_slice %1 {offsets = [0, 32], sizes = [3, 446], strides = [1, 1]} : vector<3x512xf32> to vector<3x446xf32>
    %cst_41 = arith.constant dense<0.000000e+00> : vector<6x446xf32>
    %59 = tpu.matmul %57, %58, %cst_41 {dimension_numbers = #tpu.dot_dimension_numbers<[1], [0], [0], [1], [0, 0, 1, 1], [], []>} : vector<6x3xf32>, vector<3x446xf32>, vector<6x446xf32> -> vector<6x446xf32>
    %60 = arith.addf %55, %59 : vector<6x446xf32>
    %c11 = arith.constant 11 : index
    %c0_42 = arith.constant 0 : index
    %c0_43 = arith.constant 0 : index
    %61 = vector.load %arg2[%c11, %c0_42, %c0_43] : memref<25x6x3xf32, #tpu.memory_space<vmem>>, vector<1x6x3xf32>
    %62 = vector.shape_cast %61 : vector<1x6x3xf32> to vector<6x3xf32>
    %63 = vector.extract_strided_slice %3 {offsets = [0, 32], sizes = [3, 446], strides = [1, 1]} : vector<3x512xf32> to vector<3x446xf32>
    %cst_44 = arith.constant dense<0.000000e+00> : vector<6x446xf32>
    %64 = tpu.matmul %62, %63, %cst_44 {dimension_numbers = #tpu.dot_dimension_numbers<[1], [0], [0], [1], [0, 0, 1, 1], [], []>} : vector<6x3xf32>, vector<3x446xf32>, vector<6x446xf32> -> vector<6x446xf32>
    %65 = arith.addf %60, %64 : vector<6x446xf32>
    %c12 = arith.constant 12 : index
    %c0_45 = arith.constant 0 : index
    %c0_46 = arith.constant 0 : index
    %66 = vector.load %arg2[%c12, %c0_45, %c0_46] : memref<25x6x3xf32, #tpu.memory_space<vmem>>, vector<1x6x3xf32>
    %67 = vector.shape_cast %66 : vector<1x6x3xf32> to vector<6x3xf32>
    %68 = vector.extract_strided_slice %1 {offsets = [0, 33], sizes = [3, 446], strides = [1, 1]} : vector<3x512xf32> to vector<3x446xf32>
    %cst_47 = arith.constant dense<0.000000e+00> : vector<6x446xf32>
    %69 = tpu.matmul %67, %68, %cst_47 {dimension_numbers = #tpu.dot_dimension_numbers<[1], [0], [0], [1], [0, 0, 1, 1], [], []>} : vector<6x3xf32>, vector<3x446xf32>, vector<6x446xf32> -> vector<6x446xf32>
    %70 = arith.addf %65, %69 : vector<6x446xf32>
    %c13 = arith.constant 13 : index
    %c0_48 = arith.constant 0 : index
    %c0_49 = arith.constant 0 : index
    %71 = vector.load %arg2[%c13, %c0_48, %c0_49] : memref<25x6x3xf32, #tpu.memory_space<vmem>>, vector<1x6x3xf32>
    %72 = vector.shape_cast %71 : vector<1x6x3xf32> to vector<6x3xf32>
    %73 = vector.extract_strided_slice %3 {offsets = [0, 33], sizes = [3, 446], strides = [1, 1]} : vector<3x512xf32> to vector<3x446xf32>
    %cst_50 = arith.constant dense<0.000000e+00> : vector<6x446xf32>
    %74 = tpu.matmul %72, %73, %cst_50 {dimension_numbers = #tpu.dot_dimension_numbers<[1], [0], [0], [1], [0, 0, 1, 1], [], []>} : vector<6x3xf32>, vector<3x446xf32>, vector<6x446xf32> -> vector<6x446xf32>
    %75 = arith.addf %70, %74 : vector<6x446xf32>
    %c14 = arith.constant 14 : index
    %c0_51 = arith.constant 0 : index
    %c0_52 = arith.constant 0 : index
    %76 = vector.load %arg2[%c14, %c0_51, %c0_52] : memref<25x6x3xf32, #tpu.memory_space<vmem>>, vector<1x6x3xf32>
    %77 = vector.shape_cast %76 : vector<1x6x3xf32> to vector<6x3xf32>
    %78 = vector.extract_strided_slice %1 {offsets = [0, 34], sizes = [3, 446], strides = [1, 1]} : vector<3x512xf32> to vector<3x446xf32>
    %cst_53 = arith.constant dense<0.000000e+00> : vector<6x446xf32>
    %79 = tpu.matmul %77, %78, %cst_53 {dimension_numbers = #tpu.dot_dimension_numbers<[1], [0], [0], [1], [0, 0, 1, 1], [], []>} : vector<6x3xf32>, vector<3x446xf32>, vector<6x446xf32> -> vector<6x446xf32>
    %80 = arith.addf %75, %79 : vector<6x446xf32>
    %c15 = arith.constant 15 : index
    %c0_54 = arith.constant 0 : index
    %c0_55 = arith.constant 0 : index
    %81 = vector.load %arg2[%c15, %c0_54, %c0_55] : memref<25x6x3xf32, #tpu.memory_space<vmem>>, vector<1x6x3xf32>
    %82 = vector.shape_cast %81 : vector<1x6x3xf32> to vector<6x3xf32>
    %83 = vector.extract_strided_slice %1 {offsets = [0, 48], sizes = [3, 446], strides = [1, 1]} : vector<3x512xf32> to vector<3x446xf32>
    %cst_56 = arith.constant dense<0.000000e+00> : vector<6x446xf32>
    %84 = tpu.matmul %82, %83, %cst_56 {dimension_numbers = #tpu.dot_dimension_numbers<[1], [0], [0], [1], [0, 0, 1, 1], [], []>} : vector<6x3xf32>, vector<3x446xf32>, vector<6x446xf32> -> vector<6x446xf32>
    %85 = arith.addf %80, %84 : vector<6x446xf32>
    %c16 = arith.constant 16 : index
    %c0_57 = arith.constant 0 : index
    %c0_58 = arith.constant 0 : index
    %86 = vector.load %arg2[%c16, %c0_57, %c0_58] : memref<25x6x3xf32, #tpu.memory_space<vmem>>, vector<1x6x3xf32>
    %87 = vector.shape_cast %86 : vector<1x6x3xf32> to vector<6x3xf32>
    %88 = vector.extract_strided_slice %3 {offsets = [0, 48], sizes = [3, 446], strides = [1, 1]} : vector<3x512xf32> to vector<3x446xf32>
    %cst_59 = arith.constant dense<0.000000e+00> : vector<6x446xf32>
    %89 = tpu.matmul %87, %88, %cst_59 {dimension_numbers = #tpu.dot_dimension_numbers<[1], [0], [0], [1], [0, 0, 1, 1], [], []>} : vector<6x3xf32>, vector<3x446xf32>, vector<6x446xf32> -> vector<6x446xf32>
    %90 = arith.addf %85, %89 : vector<6x446xf32>
    %c17 = arith.constant 17 : index
    %c0_60 = arith.constant 0 : index
    %c0_61 = arith.constant 0 : index
    %91 = vector.load %arg2[%c17, %c0_60, %c0_61] : memref<25x6x3xf32, #tpu.memory_space<vmem>>, vector<1x6x3xf32>
    %92 = vector.shape_cast %91 : vector<1x6x3xf32> to vector<6x3xf32>
    %93 = vector.extract_strided_slice %1 {offsets = [0, 49], sizes = [3, 446], strides = [1, 1]} : vector<3x512xf32> to vector<3x446xf32>
    %cst_62 = arith.constant dense<0.000000e+00> : vector<6x446xf32>
    %94 = tpu.matmul %92, %93, %cst_62 {dimension_numbers = #tpu.dot_dimension_numbers<[1], [0], [0], [1], [0, 0, 1, 1], [], []>} : vector<6x3xf32>, vector<3x446xf32>, vector<6x446xf32> -> vector<6x446xf32>
    %95 = arith.addf %90, %94 : vector<6x446xf32>
    %c18 = arith.constant 18 : index
    %c0_63 = arith.constant 0 : index
    %c0_64 = arith.constant 0 : index
    %96 = vector.load %arg2[%c18, %c0_63, %c0_64] : memref<25x6x3xf32, #tpu.memory_space<vmem>>, vector<1x6x3xf32>
    %97 = vector.shape_cast %96 : vector<1x6x3xf32> to vector<6x3xf32>
    %98 = vector.extract_strided_slice %3 {offsets = [0, 49], sizes = [3, 446], strides = [1, 1]} : vector<3x512xf32> to vector<3x446xf32>
    %cst_65 = arith.constant dense<0.000000e+00> : vector<6x446xf32>
    %99 = tpu.matmul %97, %98, %cst_65 {dimension_numbers = #tpu.dot_dimension_numbers<[1], [0], [0], [1], [0, 0, 1, 1], [], []>} : vector<6x3xf32>, vector<3x446xf32>, vector<6x446xf32> -> vector<6x446xf32>
    %100 = arith.addf %95, %99 : vector<6x446xf32>
    %c19 = arith.constant 19 : index
    %c0_66 = arith.constant 0 : index
    %c0_67 = arith.constant 0 : index
    %101 = vector.load %arg2[%c19, %c0_66, %c0_67] : memref<25x6x3xf32, #tpu.memory_space<vmem>>, vector<1x6x3xf32>
    %102 = vector.shape_cast %101 : vector<1x6x3xf32> to vector<6x3xf32>
    %103 = vector.extract_strided_slice %1 {offsets = [0, 50], sizes = [3, 446], strides = [1, 1]} : vector<3x512xf32> to vector<3x446xf32>
    %cst_68 = arith.constant dense<0.000000e+00> : vector<6x446xf32>
    %104 = tpu.matmul %102, %103, %cst_68 {dimension_numbers = #tpu.dot_dimension_numbers<[1], [0], [0], [1], [0, 0, 1, 1], [], []>} : vector<6x3xf32>, vector<3x446xf32>, vector<6x446xf32> -> vector<6x446xf32>
    %105 = arith.addf %100, %104 : vector<6x446xf32>
    %c20 = arith.constant 20 : index
    %c0_69 = arith.constant 0 : index
    %c0_70 = arith.constant 0 : index
    %106 = vector.load %arg2[%c20, %c0_69, %c0_70] : memref<25x6x3xf32, #tpu.memory_space<vmem>>, vector<1x6x3xf32>
    %107 = vector.shape_cast %106 : vector<1x6x3xf32> to vector<6x3xf32>
    %108 = vector.extract_strided_slice %1 {offsets = [0, 64], sizes = [3, 446], strides = [1, 1]} : vector<3x512xf32> to vector<3x446xf32>
    %cst_71 = arith.constant dense<0.000000e+00> : vector<6x446xf32>
    %109 = tpu.matmul %107, %108, %cst_71 {dimension_numbers = #tpu.dot_dimension_numbers<[1], [0], [0], [1], [0, 0, 1, 1], [], []>} : vector<6x3xf32>, vector<3x446xf32>, vector<6x446xf32> -> vector<6x446xf32>
    %110 = arith.addf %105, %109 : vector<6x446xf32>
    %c21 = arith.constant 21 : index
    %c0_72 = arith.constant 0 : index
    %c0_73 = arith.constant 0 : index
    %111 = vector.load %arg2[%c21, %c0_72, %c0_73] : memref<25x6x3xf32, #tpu.memory_space<vmem>>, vector<1x6x3xf32>
    %112 = vector.shape_cast %111 : vector<1x6x3xf32> to vector<6x3xf32>
    %113 = vector.extract_strided_slice %3 {offsets = [0, 64], sizes = [3, 446], strides = [1, 1]} : vector<3x512xf32> to vector<3x446xf32>
    %cst_74 = arith.constant dense<0.000000e+00> : vector<6x446xf32>
    %114 = tpu.matmul %112, %113, %cst_74 {dimension_numbers = #tpu.dot_dimension_numbers<[1], [0], [0], [1], [0, 0, 1, 1], [], []>} : vector<6x3xf32>, vector<3x446xf32>, vector<6x446xf32> -> vector<6x446xf32>
    %115 = arith.addf %110, %114 : vector<6x446xf32>
    %c22 = arith.constant 22 : index
    %c0_75 = arith.constant 0 : index
    %c0_76 = arith.constant 0 : index
    %116 = vector.load %arg2[%c22, %c0_75, %c0_76] : memref<25x6x3xf32, #tpu.memory_space<vmem>>, vector<1x6x3xf32>
    %117 = vector.shape_cast %116 : vector<1x6x3xf32> to vector<6x3xf32>
    %118 = vector.extract_strided_slice %1 {offsets = [0, 65], sizes = [3, 446], strides = [1, 1]} : vector<3x512xf32> to vector<3x446xf32>
    %cst_77 = arith.constant dense<0.000000e+00> : vector<6x446xf32>
    %119 = tpu.matmul %117, %118, %cst_77 {dimension_numbers = #tpu.dot_dimension_numbers<[1], [0], [0], [1], [0, 0, 1, 1], [], []>} : vector<6x3xf32>, vector<3x446xf32>, vector<6x446xf32> -> vector<6x446xf32>
    %120 = arith.addf %115, %119 : vector<6x446xf32>
    %c23 = arith.constant 23 : index
    %c0_78 = arith.constant 0 : index
    %c0_79 = arith.constant 0 : index
    %121 = vector.load %arg2[%c23, %c0_78, %c0_79] : memref<25x6x3xf32, #tpu.memory_space<vmem>>, vector<1x6x3xf32>
    %122 = vector.shape_cast %121 : vector<1x6x3xf32> to vector<6x3xf32>
    %123 = vector.extract_strided_slice %3 {offsets = [0, 65], sizes = [3, 446], strides = [1, 1]} : vector<3x512xf32> to vector<3x446xf32>
    %cst_80 = arith.constant dense<0.000000e+00> : vector<6x446xf32>
    %124 = tpu.matmul %122, %123, %cst_80 {dimension_numbers = #tpu.dot_dimension_numbers<[1], [0], [0], [1], [0, 0, 1, 1], [], []>} : vector<6x3xf32>, vector<3x446xf32>, vector<6x446xf32> -> vector<6x446xf32>
    %125 = arith.addf %120, %124 : vector<6x446xf32>
    %c24 = arith.constant 24 : index
    %c0_81 = arith.constant 0 : index
    %c0_82 = arith.constant 0 : index
    %126 = vector.load %arg2[%c24, %c0_81, %c0_82] : memref<25x6x3xf32, #tpu.memory_space<vmem>>, vector<1x6x3xf32>
    %127 = vector.shape_cast %126 : vector<1x6x3xf32> to vector<6x3xf32>
    %128 = vector.extract_strided_slice %1 {offsets = [0, 66], sizes = [3, 446], strides = [1, 1]} : vector<3x512xf32> to vector<3x446xf32>
    %cst_83 = arith.constant dense<0.000000e+00> : vector<6x446xf32>
    %129 = tpu.matmul %127, %128, %cst_83 {dimension_numbers = #tpu.dot_dimension_numbers<[1], [0], [0], [1], [0, 0, 1, 1], [], []>} : vector<6x3xf32>, vector<3x446xf32>, vector<6x446xf32> -> vector<6x446xf32>
    %130 = arith.addf %125, %129 : vector<6x446xf32>
    %c0_84 = arith.constant 0 : index
    %c0_85 = arith.constant 0 : index
    %c0_86 = arith.constant 0 : index
    %131 = vector.load %arg2[%c0_84, %c0_85, %c0_86] : memref<25x6x3xf32, #tpu.memory_space<vmem>>, vector<1x6x3xf32>
    %132 = vector.shape_cast %131 : vector<1x6x3xf32> to vector<6x3xf32>
    %133 = vector.extract_strided_slice %3 {offsets = [0, 0], sizes = [3, 446], strides = [1, 1]} : vector<3x512xf32> to vector<3x446xf32>
    %cst_87 = arith.constant dense<0.000000e+00> : vector<6x446xf32>
    %134 = tpu.matmul %132, %133, %cst_87 {dimension_numbers = #tpu.dot_dimension_numbers<[1], [0], [0], [1], [0, 0, 1, 1], [], []>} : vector<6x3xf32>, vector<3x446xf32>, vector<6x446xf32> -> vector<6x446xf32>
    %135 = arith.addf %5, %134 : vector<6x446xf32>
    %c1_88 = arith.constant 1 : index
    %c0_89 = arith.constant 0 : index
    %c0_90 = arith.constant 0 : index
    %136 = vector.load %arg2[%c1_88, %c0_89, %c0_90] : memref<25x6x3xf32, #tpu.memory_space<vmem>>, vector<1x6x3xf32>
    %137 = vector.shape_cast %136 : vector<1x6x3xf32> to vector<6x3xf32>
    %138 = vector.extract_strided_slice %1 {offsets = [0, 1], sizes = [3, 446], strides = [1, 1]} : vector<3x512xf32> to vector<3x446xf32>
    %cst_91 = arith.constant dense<0.000000e+00> : vector<6x446xf32>
    %139 = tpu.matmul %137, %138, %cst_91 {dimension_numbers = #tpu.dot_dimension_numbers<[1], [0], [0], [1], [0, 0, 1, 1], [], []>} : vector<6x3xf32>, vector<3x446xf32>, vector<6x446xf32> -> vector<6x446xf32>
    %140 = arith.addf %135, %139 : vector<6x446xf32>
    %c2_92 = arith.constant 2 : index
    %c0_93 = arith.constant 0 : index
    %c0_94 = arith.constant 0 : index
    %141 = vector.load %arg2[%c2_92, %c0_93, %c0_94] : memref<25x6x3xf32, #tpu.memory_space<vmem>>, vector<1x6x3xf32>
    %142 = vector.shape_cast %141 : vector<1x6x3xf32> to vector<6x3xf32>
    %143 = vector.extract_strided_slice %3 {offsets = [0, 1], sizes = [3, 446], strides = [1, 1]} : vector<3x512xf32> to vector<3x446xf32>
    %cst_95 = arith.constant dense<0.000000e+00> : vector<6x446xf32>
    %144 = tpu.matmul %142, %143, %cst_95 {dimension_numbers = #tpu.dot_dimension_numbers<[1], [0], [0], [1], [0, 0, 1, 1], [], []>} : vector<6x3xf32>, vector<3x446xf32>, vector<6x446xf32> -> vector<6x446xf32>
    %145 = arith.addf %140, %144 : vector<6x446xf32>
    %c3_96 = arith.constant 3 : index
    %c0_97 = arith.constant 0 : index
    %c0_98 = arith.constant 0 : index
    %146 = vector.load %arg2[%c3_96, %c0_97, %c0_98] : memref<25x6x3xf32, #tpu.memory_space<vmem>>, vector<1x6x3xf32>
    %147 = vector.shape_cast %146 : vector<1x6x3xf32> to vector<6x3xf32>
    %148 = vector.extract_strided_slice %1 {offsets = [0, 2], sizes = [3, 446], strides = [1, 1]} : vector<3x512xf32> to vector<3x446xf32>
    %cst_99 = arith.constant dense<0.000000e+00> : vector<6x446xf32>
    %149 = tpu.matmul %147, %148, %cst_99 {dimension_numbers = #tpu.dot_dimension_numbers<[1], [0], [0], [1], [0, 0, 1, 1], [], []>} : vector<6x3xf32>, vector<3x446xf32>, vector<6x446xf32> -> vector<6x446xf32>
    %150 = arith.addf %145, %149 : vector<6x446xf32>
    %c4_100 = arith.constant 4 : index
    %c0_101 = arith.constant 0 : index
    %c0_102 = arith.constant 0 : index
    %151 = vector.load %arg2[%c4_100, %c0_101, %c0_102] : memref<25x6x3xf32, #tpu.memory_space<vmem>>, vector<1x6x3xf32>
    %152 = vector.shape_cast %151 : vector<1x6x3xf32> to vector<6x3xf32>
    %153 = vector.extract_strided_slice %3 {offsets = [0, 2], sizes = [3, 446], strides = [1, 1]} : vector<3x512xf32> to vector<3x446xf32>
    %cst_103 = arith.constant dense<0.000000e+00> : vector<6x446xf32>
    %154 = tpu.matmul %152, %153, %cst_103 {dimension_numbers = #tpu.dot_dimension_numbers<[1], [0], [0], [1], [0, 0, 1, 1], [], []>} : vector<6x3xf32>, vector<3x446xf32>, vector<6x446xf32> -> vector<6x446xf32>
    %155 = arith.addf %150, %154 : vector<6x446xf32>
    %c5_104 = arith.constant 5 : index
    %c0_105 = arith.constant 0 : index
    %c0_106 = arith.constant 0 : index
    %156 = vector.load %arg2[%c5_104, %c0_105, %c0_106] : memref<25x6x3xf32, #tpu.memory_space<vmem>>, vector<1x6x3xf32>
    %157 = vector.shape_cast %156 : vector<1x6x3xf32> to vector<6x3xf32>
    %158 = vector.extract_strided_slice %3 {offsets = [0, 16], sizes = [3, 446], strides = [1, 1]} : vector<3x512xf32> to vector<3x446xf32>
    %cst_107 = arith.constant dense<0.000000e+00> : vector<6x446xf32>
    %159 = tpu.matmul %157, %158, %cst_107 {dimension_numbers = #tpu.dot_dimension_numbers<[1], [0], [0], [1], [0, 0, 1, 1], [], []>} : vector<6x3xf32>, vector<3x446xf32>, vector<6x446xf32> -> vector<6x446xf32>
    %160 = arith.addf %155, %159 : vector<6x446xf32>
    %c6_108 = arith.constant 6 : index
    %c0_109 = arith.constant 0 : index
    %c0_110 = arith.constant 0 : index
    %161 = vector.load %arg2[%c6_108, %c0_109, %c0_110] : memref<25x6x3xf32, #tpu.memory_space<vmem>>, vector<1x6x3xf32>
    %162 = vector.shape_cast %161 : vector<1x6x3xf32> to vector<6x3xf32>
    %163 = vector.extract_strided_slice %1 {offsets = [0, 17], sizes = [3, 446], strides = [1, 1]} : vector<3x512xf32> to vector<3x446xf32>
    %cst_111 = arith.constant dense<0.000000e+00> : vector<6x446xf32>
    %164 = tpu.matmul %162, %163, %cst_111 {dimension_numbers = #tpu.dot_dimension_numbers<[1], [0], [0], [1], [0, 0, 1, 1], [], []>} : vector<6x3xf32>, vector<3x446xf32>, vector<6x446xf32> -> vector<6x446xf32>
    %165 = arith.addf %160, %164 : vector<6x446xf32>
    %c7_112 = arith.constant 7 : index
    %c0_113 = arith.constant 0 : index
    %c0_114 = arith.constant 0 : index
    %166 = vector.load %arg2[%c7_112, %c0_113, %c0_114] : memref<25x6x3xf32, #tpu.memory_space<vmem>>, vector<1x6x3xf32>
    %167 = vector.shape_cast %166 : vector<1x6x3xf32> to vector<6x3xf32>
    %168 = vector.extract_strided_slice %3 {offsets = [0, 17], sizes = [3, 446], strides = [1, 1]} : vector<3x512xf32> to vector<3x446xf32>
    %cst_115 = arith.constant dense<0.000000e+00> : vector<6x446xf32>
    %169 = tpu.matmul %167, %168, %cst_115 {dimension_numbers = #tpu.dot_dimension_numbers<[1], [0], [0], [1], [0, 0, 1, 1], [], []>} : vector<6x3xf32>, vector<3x446xf32>, vector<6x446xf32> -> vector<6x446xf32>
    %170 = arith.addf %165, %169 : vector<6x446xf32>
    %c8_116 = arith.constant 8 : index
    %c0_117 = arith.constant 0 : index
    %c0_118 = arith.constant 0 : index
    %171 = vector.load %arg2[%c8_116, %c0_117, %c0_118] : memref<25x6x3xf32, #tpu.memory_space<vmem>>, vector<1x6x3xf32>
    %172 = vector.shape_cast %171 : vector<1x6x3xf32> to vector<6x3xf32>
    %173 = vector.extract_strided_slice %1 {offsets = [0, 18], sizes = [3, 446], strides = [1, 1]} : vector<3x512xf32> to vector<3x446xf32>
    %cst_119 = arith.constant dense<0.000000e+00> : vector<6x446xf32>
    %174 = tpu.matmul %172, %173, %cst_119 {dimension_numbers = #tpu.dot_dimension_numbers<[1], [0], [0], [1], [0, 0, 1, 1], [], []>} : vector<6x3xf32>, vector<3x446xf32>, vector<6x446xf32> -> vector<6x446xf32>
    %175 = arith.addf %170, %174 : vector<6x446xf32>
    %c9_120 = arith.constant 9 : index
    %c0_121 = arith.constant 0 : index
    %c0_122 = arith.constant 0 : index
    %176 = vector.load %arg2[%c9_120, %c0_121, %c0_122] : memref<25x6x3xf32, #tpu.memory_space<vmem>>, vector<1x6x3xf32>
    %177 = vector.shape_cast %176 : vector<1x6x3xf32> to vector<6x3xf32>
    %178 = vector.extract_strided_slice %3 {offsets = [0, 18], sizes = [3, 446], strides = [1, 1]} : vector<3x512xf32> to vector<3x446xf32>
    %cst_123 = arith.constant dense<0.000000e+00> : vector<6x446xf32>
    %179 = tpu.matmul %177, %178, %cst_123 {dimension_numbers = #tpu.dot_dimension_numbers<[1], [0], [0], [1], [0, 0, 1, 1], [], []>} : vector<6x3xf32>, vector<3x446xf32>, vector<6x446xf32> -> vector<6x446xf32>
    %180 = arith.addf %175, %179 : vector<6x446xf32>
    %c10_124 = arith.constant 10 : index
    %c0_125 = arith.constant 0 : index
    %c0_126 = arith.constant 0 : index
    %181 = vector.load %arg2[%c10_124, %c0_125, %c0_126] : memref<25x6x3xf32, #tpu.memory_space<vmem>>, vector<1x6x3xf32>
    %182 = vector.shape_cast %181 : vector<1x6x3xf32> to vector<6x3xf32>
    %183 = vector.extract_strided_slice %3 {offsets = [0, 32], sizes = [3, 446], strides = [1, 1]} : vector<3x512xf32> to vector<3x446xf32>
    %cst_127 = arith.constant dense<0.000000e+00> : vector<6x446xf32>
    %184 = tpu.matmul %182, %183, %cst_127 {dimension_numbers = #tpu.dot_dimension_numbers<[1], [0], [0], [1], [0, 0, 1, 1], [], []>} : vector<6x3xf32>, vector<3x446xf32>, vector<6x446xf32> -> vector<6x446xf32>
    %185 = arith.addf %180, %184 : vector<6x446xf32>
    %c11_128 = arith.constant 11 : index
    %c0_129 = arith.constant 0 : index
    %c0_130 = arith.constant 0 : index
    %186 = vector.load %arg2[%c11_128, %c0_129, %c0_130] : memref<25x6x3xf32, #tpu.memory_space<vmem>>, vector<1x6x3xf32>
    %187 = vector.shape_cast %186 : vector<1x6x3xf32> to vector<6x3xf32>
    %188 = vector.extract_strided_slice %1 {offsets = [0, 33], sizes = [3, 446], strides = [1, 1]} : vector<3x512xf32> to vector<3x446xf32>
    %cst_131 = arith.constant dense<0.000000e+00> : vector<6x446xf32>
    %189 = tpu.matmul %187, %188, %cst_131 {dimension_numbers = #tpu.dot_dimension_numbers<[1], [0], [0], [1], [0, 0, 1, 1], [], []>} : vector<6x3xf32>, vector<3x446xf32>, vector<6x446xf32> -> vector<6x446xf32>
    %190 = arith.addf %185, %189 : vector<6x446xf32>
    %c12_132 = arith.constant 12 : index
    %c0_133 = arith.constant 0 : index
    %c0_134 = arith.constant 0 : index
    %191 = vector.load %arg2[%c12_132, %c0_133, %c0_134] : memref<25x6x3xf32, #tpu.memory_space<vmem>>, vector<1x6x3xf32>
    %192 = vector.shape_cast %191 : vector<1x6x3xf32> to vector<6x3xf32>
    %193 = vector.extract_strided_slice %3 {offsets = [0, 33], sizes = [3, 446], strides = [1, 1]} : vector<3x512xf32> to vector<3x446xf32>
    %cst_135 = arith.constant dense<0.000000e+00> : vector<6x446xf32>
    %194 = tpu.matmul %192, %193, %cst_135 {dimension_numbers = #tpu.dot_dimension_numbers<[1], [0], [0], [1], [0, 0, 1, 1], [], []>} : vector<6x3xf32>, vector<3x446xf32>, vector<6x446xf32> -> vector<6x446xf32>
    %195 = arith.addf %190, %194 : vector<6x446xf32>
    %c13_136 = arith.constant 13 : index
    %c0_137 = arith.constant 0 : index
    %c0_138 = arith.constant 0 : index
    %196 = vector.load %arg2[%c13_136, %c0_137, %c0_138] : memref<25x6x3xf32, #tpu.memory_space<vmem>>, vector<1x6x3xf32>
    %197 = vector.shape_cast %196 : vector<1x6x3xf32> to vector<6x3xf32>
    %198 = vector.extract_strided_slice %1 {offsets = [0, 34], sizes = [3, 446], strides = [1, 1]} : vector<3x512xf32> to vector<3x446xf32>
    %cst_139 = arith.constant dense<0.000000e+00> : vector<6x446xf32>
    %199 = tpu.matmul %197, %198, %cst_139 {dimension_numbers = #tpu.dot_dimension_numbers<[1], [0], [0], [1], [0, 0, 1, 1], [], []>} : vector<6x3xf32>, vector<3x446xf32>, vector<6x446xf32> -> vector<6x446xf32>
    %200 = arith.addf %195, %199 : vector<6x446xf32>
    %c14_140 = arith.constant 14 : index
    %c0_141 = arith.constant 0 : index
    %c0_142 = arith.constant 0 : index
    %201 = vector.load %arg2[%c14_140, %c0_141, %c0_142] : memref<25x6x3xf32, #tpu.memory_space<vmem>>, vector<1x6x3xf32>
    %202 = vector.shape_cast %201 : vector<1x6x3xf32> to vector<6x3xf32>
    %203 = vector.extract_strided_slice %3 {offsets = [0, 34], sizes = [3, 446], strides = [1, 1]} : vector<3x512xf32> to vector<3x446xf32>
    %cst_143 = arith.constant dense<0.000000e+00> : vector<6x446xf32>
    %204 = tpu.matmul %202, %203, %cst_143 {dimension_numbers = #tpu.dot_dimension_numbers<[1], [0], [0], [1], [0, 0, 1, 1], [], []>} : vector<6x3xf32>, vector<3x446xf32>, vector<6x446xf32> -> vector<6x446xf32>
    %205 = arith.addf %200, %204 : vector<6x446xf32>
    %c15_144 = arith.constant 15 : index
    %c0_145 = arith.constant 0 : index
    %c0_146 = arith.constant 0 : index
    %206 = vector.load %arg2[%c15_144, %c0_145, %c0_146] : memref<25x6x3xf32, #tpu.memory_space<vmem>>, vector<1x6x3xf32>
    %207 = vector.shape_cast %206 : vector<1x6x3xf32> to vector<6x3xf32>
    %208 = vector.extract_strided_slice %3 {offsets = [0, 48], sizes = [3, 446], strides = [1, 1]} : vector<3x512xf32> to vector<3x446xf32>
    %cst_147 = arith.constant dense<0.000000e+00> : vector<6x446xf32>
    %209 = tpu.matmul %207, %208, %cst_147 {dimension_numbers = #tpu.dot_dimension_numbers<[1], [0], [0], [1], [0, 0, 1, 1], [], []>} : vector<6x3xf32>, vector<3x446xf32>, vector<6x446xf32> -> vector<6x446xf32>
    %210 = arith.addf %205, %209 : vector<6x446xf32>
    %c16_148 = arith.constant 16 : index
    %c0_149 = arith.constant 0 : index
    %c0_150 = arith.constant 0 : index
    %211 = vector.load %arg2[%c16_148, %c0_149, %c0_150] : memref<25x6x3xf32, #tpu.memory_space<vmem>>, vector<1x6x3xf32>
    %212 = vector.shape_cast %211 : vector<1x6x3xf32> to vector<6x3xf32>
    %213 = vector.extract_strided_slice %1 {offsets = [0, 49], sizes = [3, 446], strides = [1, 1]} : vector<3x512xf32> to vector<3x446xf32>
    %cst_151 = arith.constant dense<0.000000e+00> : vector<6x446xf32>
    %214 = tpu.matmul %212, %213, %cst_151 {dimension_numbers = #tpu.dot_dimension_numbers<[1], [0], [0], [1], [0, 0, 1, 1], [], []>} : vector<6x3xf32>, vector<3x446xf32>, vector<6x446xf32> -> vector<6x446xf32>
    %215 = arith.addf %210, %214 : vector<6x446xf32>
    %c17_152 = arith.constant 17 : index
    %c0_153 = arith.constant 0 : index
    %c0_154 = arith.constant 0 : index
    %216 = vector.load %arg2[%c17_152, %c0_153, %c0_154] : memref<25x6x3xf32, #tpu.memory_space<vmem>>, vector<1x6x3xf32>
    %217 = vector.shape_cast %216 : vector<1x6x3xf32> to vector<6x3xf32>
    %218 = vector.extract_strided_slice %3 {offsets = [0, 49], sizes = [3, 446], strides = [1, 1]} : vector<3x512xf32> to vector<3x446xf32>
    %cst_155 = arith.constant dense<0.000000e+00> : vector<6x446xf32>
    %219 = tpu.matmul %217, %218, %cst_155 {dimension_numbers = #tpu.dot_dimension_numbers<[1], [0], [0], [1], [0, 0, 1, 1], [], []>} : vector<6x3xf32>, vector<3x446xf32>, vector<6x446xf32> -> vector<6x446xf32>
    %220 = arith.addf %215, %219 : vector<6x446xf32>
    %c18_156 = arith.constant 18 : index
    %c0_157 = arith.constant 0 : index
    %c0_158 = arith.constant 0 : index
    %221 = vector.load %arg2[%c18_156, %c0_157, %c0_158] : memref<25x6x3xf32, #tpu.memory_space<vmem>>, vector<1x6x3xf32>
    %222 = vector.shape_cast %221 : vector<1x6x3xf32> to vector<6x3xf32>
    %223 = vector.extract_strided_slice %1 {offsets = [0, 50], sizes = [3, 446], strides = [1, 1]} : vector<3x512xf32> to vector<3x446xf32>
    %cst_159 = arith.constant dense<0.000000e+00> : vector<6x446xf32>
    %224 = tpu.matmul %222, %223, %cst_159 {dimension_numbers = #tpu.dot_dimension_numbers<[1], [0], [0], [1], [0, 0, 1, 1], [], []>} : vector<6x3xf32>, vector<3x446xf32>, vector<6x446xf32> -> vector<6x446xf32>
    %225 = arith.addf %220, %224 : vector<6x446xf32>
    %c19_160 = arith.constant 19 : index
    %c0_161 = arith.constant 0 : index
    %c0_162 = arith.constant 0 : index
    %226 = vector.load %arg2[%c19_160, %c0_161, %c0_162] : memref<25x6x3xf32, #tpu.memory_space<vmem>>, vector<1x6x3xf32>
    %227 = vector.shape_cast %226 : vector<1x6x3xf32> to vector<6x3xf32>
    %228 = vector.extract_strided_slice %3 {offsets = [0, 50], sizes = [3, 446], strides = [1, 1]} : vector<3x512xf32> to vector<3x446xf32>
    %cst_163 = arith.constant dense<0.000000e+00> : vector<6x446xf32>
    %229 = tpu.matmul %227, %228, %cst_163 {dimension_numbers = #tpu.dot_dimension_numbers<[1], [0], [0], [1], [0, 0, 1, 1], [], []>} : vector<6x3xf32>, vector<3x446xf32>, vector<6x446xf32> -> vector<6x446xf32>
    %230 = arith.addf %225, %229 : vector<6x446xf32>
    %c20_164 = arith.constant 20 : index
    %c0_165 = arith.constant 0 : index
    %c0_166 = arith.constant 0 : index
    %231 = vector.load %arg2[%c20_164, %c0_165, %c0_166] : memref<25x6x3xf32, #tpu.memory_space<vmem>>, vector<1x6x3xf32>
    %232 = vector.shape_cast %231 : vector<1x6x3xf32> to vector<6x3xf32>
    %233 = vector.extract_strided_slice %3 {offsets = [0, 64], sizes = [3, 446], strides = [1, 1]} : vector<3x512xf32> to vector<3x446xf32>
    %cst_167 = arith.constant dense<0.000000e+00> : vector<6x446xf32>
    %234 = tpu.matmul %232, %233, %cst_167 {dimension_numbers = #tpu.dot_dimension_numbers<[1], [0], [0], [1], [0, 0, 1, 1], [], []>} : vector<6x3xf32>, vector<3x446xf32>, vector<6x446xf32> -> vector<6x446xf32>
    %235 = arith.addf %230, %234 : vector<6x446xf32>
    %c21_168 = arith.constant 21 : index
    %c0_169 = arith.constant 0 : index
    %c0_170 = arith.constant 0 : index
    %236 = vector.load %arg2[%c21_168, %c0_169, %c0_170] : memref<25x6x3xf32, #tpu.memory_space<vmem>>, vector<1x6x3xf32>
    %237 = vector.shape_cast %236 : vector<1x6x3xf32> to vector<6x3xf32>
    %238 = vector.extract_strided_slice %1 {offsets = [0, 65], sizes = [3, 446], strides = [1, 1]} : vector<3x512xf32> to vector<3x446xf32>
    %cst_171 = arith.constant dense<0.000000e+00> : vector<6x446xf32>
    %239 = tpu.matmul %237, %238, %cst_171 {dimension_numbers = #tpu.dot_dimension_numbers<[1], [0], [0], [1], [0, 0, 1, 1], [], []>} : vector<6x3xf32>, vector<3x446xf32>, vector<6x446xf32> -> vector<6x446xf32>
    %240 = arith.addf %235, %239 : vector<6x446xf32>
    %c22_172 = arith.constant 22 : index
    %c0_173 = arith.constant 0 : index
    %c0_174 = arith.constant 0 : index
    %241 = vector.load %arg2[%c22_172, %c0_173, %c0_174] : memref<25x6x3xf32, #tpu.memory_space<vmem>>, vector<1x6x3xf32>
    %242 = vector.shape_cast %241 : vector<1x6x3xf32> to vector<6x3xf32>
    %243 = vector.extract_strided_slice %3 {offsets = [0, 65], sizes = [3, 446], strides = [1, 1]} : vector<3x512xf32> to vector<3x446xf32>
    %cst_175 = arith.constant dense<0.000000e+00> : vector<6x446xf32>
    %244 = tpu.matmul %242, %243, %cst_175 {dimension_numbers = #tpu.dot_dimension_numbers<[1], [0], [0], [1], [0, 0, 1, 1], [], []>} : vector<6x3xf32>, vector<3x446xf32>, vector<6x446xf32> -> vector<6x446xf32>
    %245 = arith.addf %240, %244 : vector<6x446xf32>
    %c23_176 = arith.constant 23 : index
    %c0_177 = arith.constant 0 : index
    %c0_178 = arith.constant 0 : index
    %246 = vector.load %arg2[%c23_176, %c0_177, %c0_178] : memref<25x6x3xf32, #tpu.memory_space<vmem>>, vector<1x6x3xf32>
    %247 = vector.shape_cast %246 : vector<1x6x3xf32> to vector<6x3xf32>
    %248 = vector.extract_strided_slice %1 {offsets = [0, 66], sizes = [3, 446], strides = [1, 1]} : vector<3x512xf32> to vector<3x446xf32>
    %cst_179 = arith.constant dense<0.000000e+00> : vector<6x446xf32>
    %249 = tpu.matmul %247, %248, %cst_179 {dimension_numbers = #tpu.dot_dimension_numbers<[1], [0], [0], [1], [0, 0, 1, 1], [], []>} : vector<6x3xf32>, vector<3x446xf32>, vector<6x446xf32> -> vector<6x446xf32>
    %250 = arith.addf %245, %249 : vector<6x446xf32>
    %c24_180 = arith.constant 24 : index
    %c0_181 = arith.constant 0 : index
    %c0_182 = arith.constant 0 : index
    %251 = vector.load %arg2[%c24_180, %c0_181, %c0_182] : memref<25x6x3xf32, #tpu.memory_space<vmem>>, vector<1x6x3xf32>
    %252 = vector.shape_cast %251 : vector<1x6x3xf32> to vector<6x3xf32>
    %253 = vector.extract_strided_slice %3 {offsets = [0, 66], sizes = [3, 446], strides = [1, 1]} : vector<3x512xf32> to vector<3x446xf32>
    %cst_183 = arith.constant dense<0.000000e+00> : vector<6x446xf32>
    %254 = tpu.matmul %252, %253, %cst_183 {dimension_numbers = #tpu.dot_dimension_numbers<[1], [0], [0], [1], [0, 0, 1, 1], [], []>} : vector<6x3xf32>, vector<3x446xf32>, vector<6x446xf32> -> vector<6x446xf32>
    %255 = arith.addf %250, %254 : vector<6x446xf32>
    %c0_184 = arith.constant 0 : index
    %c0_185 = arith.constant 0 : index
    %256 = vector.load %arg3[%c0_184, %c0_185] : memref<6x1xf32, #tpu.memory_space<vmem>>, vector<6x1xf32>
    %257 = vector.broadcast %256 : vector<6x1xf32> to vector<6x446xf32>
    %258 = arith.addf %130, %257 : vector<6x446xf32>
    %cst_186 = arith.constant 0.000000e+00 : f32
    %259 = vector.broadcast %cst_186 : f32 to vector<6x446xf32>
    %260 = arith.maximumf %258, %259 : vector<6x446xf32>
    %261 = vector.broadcast %256 : vector<6x1xf32> to vector<6x446xf32>
    %262 = arith.addf %255, %261 : vector<6x446xf32>
    %cst_187 = arith.constant 0.000000e+00 : f32
    %263 = vector.broadcast %cst_187 : f32 to vector<6x446xf32>
    %264 = arith.maximumf %262, %263 : vector<6x446xf32>
    %265 = arith.maximumf %260, %264 : vector<6x446xf32>
    %266 = vector.extract_strided_slice %265 {offsets = [0, 0], sizes = [6, 430], strides = [1, 1]} : vector<6x446xf32> to vector<6x430xf32>
    %267 = vector.extract_strided_slice %265 {offsets = [0, 16], sizes = [6, 430], strides = [1, 1]} : vector<6x446xf32> to vector<6x430xf32>
    %268 = arith.maximumf %266, %267 : vector<6x430xf32>
    %cst_188 = arith.constant 0.000000e+00 : f32
    %269 = vector.broadcast %cst_188 : f32 to vector<16x298xf32>
    %c0_189 = arith.constant 0 : index
    %c0_190 = arith.constant 0 : index
    %c0_191 = arith.constant 0 : index
    %270 = vector.load %arg4[%c0_189, %c0_190, %c0_191] : memref<25x16x6xf32, #tpu.memory_space<vmem>>, vector<1x16x6xf32>
    %271 = vector.shape_cast %270 : vector<1x16x6xf32> to vector<16x6xf32>
    %272 = vector.extract_strided_slice %268 {offsets = [0, 0], sizes = [6, 298], strides = [1, 1]} : vector<6x430xf32> to vector<6x298xf32>
    %cst_192 = arith.constant dense<0.000000e+00> : vector<16x298xf32>
    %273 = tpu.matmul %271, %272, %cst_192 {dimension_numbers = #tpu.dot_dimension_numbers<[1], [0], [0], [1], [0, 0, 1, 1], [], []>} : vector<16x6xf32>, vector<6x298xf32>, vector<16x298xf32> -> vector<16x298xf32>
    %274 = arith.addf %269, %273 : vector<16x298xf32>
    %c1_193 = arith.constant 1 : index
    %c0_194 = arith.constant 0 : index
    %c0_195 = arith.constant 0 : index
    %275 = vector.load %arg4[%c1_193, %c0_194, %c0_195] : memref<25x16x6xf32, #tpu.memory_space<vmem>>, vector<1x16x6xf32>
    %276 = vector.shape_cast %275 : vector<1x16x6xf32> to vector<16x6xf32>
    %277 = vector.extract_strided_slice %268 {offsets = [0, 1], sizes = [6, 298], strides = [1, 1]} : vector<6x430xf32> to vector<6x298xf32>
    %cst_196 = arith.constant dense<0.000000e+00> : vector<16x298xf32>
    %278 = tpu.matmul %276, %277, %cst_196 {dimension_numbers = #tpu.dot_dimension_numbers<[1], [0], [0], [1], [0, 0, 1, 1], [], []>} : vector<16x6xf32>, vector<6x298xf32>, vector<16x298xf32> -> vector<16x298xf32>
    %279 = arith.addf %274, %278 : vector<16x298xf32>
    %c2_197 = arith.constant 2 : index
    %c0_198 = arith.constant 0 : index
    %c0_199 = arith.constant 0 : index
    %280 = vector.load %arg4[%c2_197, %c0_198, %c0_199] : memref<25x16x6xf32, #tpu.memory_space<vmem>>, vector<1x16x6xf32>
    %281 = vector.shape_cast %280 : vector<1x16x6xf32> to vector<16x6xf32>
    %282 = vector.extract_strided_slice %268 {offsets = [0, 2], sizes = [6, 298], strides = [1, 1]} : vector<6x430xf32> to vector<6x298xf32>
    %cst_200 = arith.constant dense<0.000000e+00> : vector<16x298xf32>
    %283 = tpu.matmul %281, %282, %cst_200 {dimension_numbers = #tpu.dot_dimension_numbers<[1], [0], [0], [1], [0, 0, 1, 1], [], []>} : vector<16x6xf32>, vector<6x298xf32>, vector<16x298xf32> -> vector<16x298xf32>
    %284 = arith.addf %279, %283 : vector<16x298xf32>
    %c3_201 = arith.constant 3 : index
    %c0_202 = arith.constant 0 : index
    %c0_203 = arith.constant 0 : index
    %285 = vector.load %arg4[%c3_201, %c0_202, %c0_203] : memref<25x16x6xf32, #tpu.memory_space<vmem>>, vector<1x16x6xf32>
    %286 = vector.shape_cast %285 : vector<1x16x6xf32> to vector<16x6xf32>
    %287 = vector.extract_strided_slice %268 {offsets = [0, 3], sizes = [6, 298], strides = [1, 1]} : vector<6x430xf32> to vector<6x298xf32>
    %cst_204 = arith.constant dense<0.000000e+00> : vector<16x298xf32>
    %288 = tpu.matmul %286, %287, %cst_204 {dimension_numbers = #tpu.dot_dimension_numbers<[1], [0], [0], [1], [0, 0, 1, 1], [], []>} : vector<16x6xf32>, vector<6x298xf32>, vector<16x298xf32> -> vector<16x298xf32>
    %289 = arith.addf %284, %288 : vector<16x298xf32>
    %c4_205 = arith.constant 4 : index
    %c0_206 = arith.constant 0 : index
    %c0_207 = arith.constant 0 : index
    %290 = vector.load %arg4[%c4_205, %c0_206, %c0_207] : memref<25x16x6xf32, #tpu.memory_space<vmem>>, vector<1x16x6xf32>
    %291 = vector.shape_cast %290 : vector<1x16x6xf32> to vector<16x6xf32>
    %292 = vector.extract_strided_slice %268 {offsets = [0, 4], sizes = [6, 298], strides = [1, 1]} : vector<6x430xf32> to vector<6x298xf32>
    %cst_208 = arith.constant dense<0.000000e+00> : vector<16x298xf32>
    %293 = tpu.matmul %291, %292, %cst_208 {dimension_numbers = #tpu.dot_dimension_numbers<[1], [0], [0], [1], [0, 0, 1, 1], [], []>} : vector<16x6xf32>, vector<6x298xf32>, vector<16x298xf32> -> vector<16x298xf32>
    %294 = arith.addf %289, %293 : vector<16x298xf32>
    %c5_209 = arith.constant 5 : index
    %c0_210 = arith.constant 0 : index
    %c0_211 = arith.constant 0 : index
    %295 = vector.load %arg4[%c5_209, %c0_210, %c0_211] : memref<25x16x6xf32, #tpu.memory_space<vmem>>, vector<1x16x6xf32>
    %296 = vector.shape_cast %295 : vector<1x16x6xf32> to vector<16x6xf32>
    %297 = vector.extract_strided_slice %268 {offsets = [0, 32], sizes = [6, 298], strides = [1, 1]} : vector<6x430xf32> to vector<6x298xf32>
    %cst_212 = arith.constant dense<0.000000e+00> : vector<16x298xf32>
    %298 = tpu.matmul %296, %297, %cst_212 {dimension_numbers = #tpu.dot_dimension_numbers<[1], [0], [0], [1], [0, 0, 1, 1], [], []>} : vector<16x6xf32>, vector<6x298xf32>, vector<16x298xf32> -> vector<16x298xf32>
    %299 = arith.addf %294, %298 : vector<16x298xf32>
    %c6_213 = arith.constant 6 : index
    %c0_214 = arith.constant 0 : index
    %c0_215 = arith.constant 0 : index
    %300 = vector.load %arg4[%c6_213, %c0_214, %c0_215] : memref<25x16x6xf32, #tpu.memory_space<vmem>>, vector<1x16x6xf32>
    %301 = vector.shape_cast %300 : vector<1x16x6xf32> to vector<16x6xf32>
    %302 = vector.extract_strided_slice %268 {offsets = [0, 33], sizes = [6, 298], strides = [1, 1]} : vector<6x430xf32> to vector<6x298xf32>
    %cst_216 = arith.constant dense<0.000000e+00> : vector<16x298xf32>
    %303 = tpu.matmul %301, %302, %cst_216 {dimension_numbers = #tpu.dot_dimension_numbers<[1], [0], [0], [1], [0, 0, 1, 1], [], []>} : vector<16x6xf32>, vector<6x298xf32>, vector<16x298xf32> -> vector<16x298xf32>
    %304 = arith.addf %299, %303 : vector<16x298xf32>
    %c7_217 = arith.constant 7 : index
    %c0_218 = arith.constant 0 : index
    %c0_219 = arith.constant 0 : index
    %305 = vector.load %arg4[%c7_217, %c0_218, %c0_219] : memref<25x16x6xf32, #tpu.memory_space<vmem>>, vector<1x16x6xf32>
    %306 = vector.shape_cast %305 : vector<1x16x6xf32> to vector<16x6xf32>
    %307 = vector.extract_strided_slice %268 {offsets = [0, 34], sizes = [6, 298], strides = [1, 1]} : vector<6x430xf32> to vector<6x298xf32>
    %cst_220 = arith.constant dense<0.000000e+00> : vector<16x298xf32>
    %308 = tpu.matmul %306, %307, %cst_220 {dimension_numbers = #tpu.dot_dimension_numbers<[1], [0], [0], [1], [0, 0, 1, 1], [], []>} : vector<16x6xf32>, vector<6x298xf32>, vector<16x298xf32> -> vector<16x298xf32>
    %309 = arith.addf %304, %308 : vector<16x298xf32>
    %c8_221 = arith.constant 8 : index
    %c0_222 = arith.constant 0 : index
    %c0_223 = arith.constant 0 : index
    %310 = vector.load %arg4[%c8_221, %c0_222, %c0_223] : memref<25x16x6xf32, #tpu.memory_space<vmem>>, vector<1x16x6xf32>
    %311 = vector.shape_cast %310 : vector<1x16x6xf32> to vector<16x6xf32>
    %312 = vector.extract_strided_slice %268 {offsets = [0, 35], sizes = [6, 298], strides = [1, 1]} : vector<6x430xf32> to vector<6x298xf32>
    %cst_224 = arith.constant dense<0.000000e+00> : vector<16x298xf32>
    %313 = tpu.matmul %311, %312, %cst_224 {dimension_numbers = #tpu.dot_dimension_numbers<[1], [0], [0], [1], [0, 0, 1, 1], [], []>} : vector<16x6xf32>, vector<6x298xf32>, vector<16x298xf32> -> vector<16x298xf32>
    %314 = arith.addf %309, %313 : vector<16x298xf32>
    %c9_225 = arith.constant 9 : index
    %c0_226 = arith.constant 0 : index
    %c0_227 = arith.constant 0 : index
    %315 = vector.load %arg4[%c9_225, %c0_226, %c0_227] : memref<25x16x6xf32, #tpu.memory_space<vmem>>, vector<1x16x6xf32>
    %316 = vector.shape_cast %315 : vector<1x16x6xf32> to vector<16x6xf32>
    %317 = vector.extract_strided_slice %268 {offsets = [0, 36], sizes = [6, 298], strides = [1, 1]} : vector<6x430xf32> to vector<6x298xf32>
    %cst_228 = arith.constant dense<0.000000e+00> : vector<16x298xf32>
    %318 = tpu.matmul %316, %317, %cst_228 {dimension_numbers = #tpu.dot_dimension_numbers<[1], [0], [0], [1], [0, 0, 1, 1], [], []>} : vector<16x6xf32>, vector<6x298xf32>, vector<16x298xf32> -> vector<16x298xf32>
    %319 = arith.addf %314, %318 : vector<16x298xf32>
    %c10_229 = arith.constant 10 : index
    %c0_230 = arith.constant 0 : index
    %c0_231 = arith.constant 0 : index
    %320 = vector.load %arg4[%c10_229, %c0_230, %c0_231] : memref<25x16x6xf32, #tpu.memory_space<vmem>>, vector<1x16x6xf32>
    %321 = vector.shape_cast %320 : vector<1x16x6xf32> to vector<16x6xf32>
    %322 = vector.extract_strided_slice %268 {offsets = [0, 64], sizes = [6, 298], strides = [1, 1]} : vector<6x430xf32> to vector<6x298xf32>
    %cst_232 = arith.constant dense<0.000000e+00> : vector<16x298xf32>
    %323 = tpu.matmul %321, %322, %cst_232 {dimension_numbers = #tpu.dot_dimension_numbers<[1], [0], [0], [1], [0, 0, 1, 1], [], []>} : vector<16x6xf32>, vector<6x298xf32>, vector<16x298xf32> -> vector<16x298xf32>
    %324 = arith.addf %319, %323 : vector<16x298xf32>
    %c11_233 = arith.constant 11 : index
    %c0_234 = arith.constant 0 : index
    %c0_235 = arith.constant 0 : index
    %325 = vector.load %arg4[%c11_233, %c0_234, %c0_235] : memref<25x16x6xf32, #tpu.memory_space<vmem>>, vector<1x16x6xf32>
    %326 = vector.shape_cast %325 : vector<1x16x6xf32> to vector<16x6xf32>
    %327 = vector.extract_strided_slice %268 {offsets = [0, 65], sizes = [6, 298], strides = [1, 1]} : vector<6x430xf32> to vector<6x298xf32>
    %cst_236 = arith.constant dense<0.000000e+00> : vector<16x298xf32>
    %328 = tpu.matmul %326, %327, %cst_236 {dimension_numbers = #tpu.dot_dimension_numbers<[1], [0], [0], [1], [0, 0, 1, 1], [], []>} : vector<16x6xf32>, vector<6x298xf32>, vector<16x298xf32> -> vector<16x298xf32>
    %329 = arith.addf %324, %328 : vector<16x298xf32>
    %c12_237 = arith.constant 12 : index
    %c0_238 = arith.constant 0 : index
    %c0_239 = arith.constant 0 : index
    %330 = vector.load %arg4[%c12_237, %c0_238, %c0_239] : memref<25x16x6xf32, #tpu.memory_space<vmem>>, vector<1x16x6xf32>
    %331 = vector.shape_cast %330 : vector<1x16x6xf32> to vector<16x6xf32>
    %332 = vector.extract_strided_slice %268 {offsets = [0, 66], sizes = [6, 298], strides = [1, 1]} : vector<6x430xf32> to vector<6x298xf32>
    %cst_240 = arith.constant dense<0.000000e+00> : vector<16x298xf32>
    %333 = tpu.matmul %331, %332, %cst_240 {dimension_numbers = #tpu.dot_dimension_numbers<[1], [0], [0], [1], [0, 0, 1, 1], [], []>} : vector<16x6xf32>, vector<6x298xf32>, vector<16x298xf32> -> vector<16x298xf32>
    %334 = arith.addf %329, %333 : vector<16x298xf32>
    %c13_241 = arith.constant 13 : index
    %c0_242 = arith.constant 0 : index
    %c0_243 = arith.constant 0 : index
    %335 = vector.load %arg4[%c13_241, %c0_242, %c0_243] : memref<25x16x6xf32, #tpu.memory_space<vmem>>, vector<1x16x6xf32>
    %336 = vector.shape_cast %335 : vector<1x16x6xf32> to vector<16x6xf32>
    %337 = vector.extract_strided_slice %268 {offsets = [0, 67], sizes = [6, 298], strides = [1, 1]} : vector<6x430xf32> to vector<6x298xf32>
    %cst_244 = arith.constant dense<0.000000e+00> : vector<16x298xf32>
    %338 = tpu.matmul %336, %337, %cst_244 {dimension_numbers = #tpu.dot_dimension_numbers<[1], [0], [0], [1], [0, 0, 1, 1], [], []>} : vector<16x6xf32>, vector<6x298xf32>, vector<16x298xf32> -> vector<16x298xf32>
    %339 = arith.addf %334, %338 : vector<16x298xf32>
    %c14_245 = arith.constant 14 : index
    %c0_246 = arith.constant 0 : index
    %c0_247 = arith.constant 0 : index
    %340 = vector.load %arg4[%c14_245, %c0_246, %c0_247] : memref<25x16x6xf32, #tpu.memory_space<vmem>>, vector<1x16x6xf32>
    %341 = vector.shape_cast %340 : vector<1x16x6xf32> to vector<16x6xf32>
    %342 = vector.extract_strided_slice %268 {offsets = [0, 68], sizes = [6, 298], strides = [1, 1]} : vector<6x430xf32> to vector<6x298xf32>
    %cst_248 = arith.constant dense<0.000000e+00> : vector<16x298xf32>
    %343 = tpu.matmul %341, %342, %cst_248 {dimension_numbers = #tpu.dot_dimension_numbers<[1], [0], [0], [1], [0, 0, 1, 1], [], []>} : vector<16x6xf32>, vector<6x298xf32>, vector<16x298xf32> -> vector<16x298xf32>
    %344 = arith.addf %339, %343 : vector<16x298xf32>
    %c15_249 = arith.constant 15 : index
    %c0_250 = arith.constant 0 : index
    %c0_251 = arith.constant 0 : index
    %345 = vector.load %arg4[%c15_249, %c0_250, %c0_251] : memref<25x16x6xf32, #tpu.memory_space<vmem>>, vector<1x16x6xf32>
    %346 = vector.shape_cast %345 : vector<1x16x6xf32> to vector<16x6xf32>
    %347 = vector.extract_strided_slice %268 {offsets = [0, 96], sizes = [6, 298], strides = [1, 1]} : vector<6x430xf32> to vector<6x298xf32>
    %cst_252 = arith.constant dense<0.000000e+00> : vector<16x298xf32>
    %348 = tpu.matmul %346, %347, %cst_252 {dimension_numbers = #tpu.dot_dimension_numbers<[1], [0], [0], [1], [0, 0, 1, 1], [], []>} : vector<16x6xf32>, vector<6x298xf32>, vector<16x298xf32> -> vector<16x298xf32>
    %349 = arith.addf %344, %348 : vector<16x298xf32>
    %c16_253 = arith.constant 16 : index
    %c0_254 = arith.constant 0 : index
    %c0_255 = arith.constant 0 : index
    %350 = vector.load %arg4[%c16_253, %c0_254, %c0_255] : memref<25x16x6xf32, #tpu.memory_space<vmem>>, vector<1x16x6xf32>
    %351 = vector.shape_cast %350 : vector<1x16x6xf32> to vector<16x6xf32>
    %352 = vector.extract_strided_slice %268 {offsets = [0, 97], sizes = [6, 298], strides = [1, 1]} : vector<6x430xf32> to vector<6x298xf32>
    %cst_256 = arith.constant dense<0.000000e+00> : vector<16x298xf32>
    %353 = tpu.matmul %351, %352, %cst_256 {dimension_numbers = #tpu.dot_dimension_numbers<[1], [0], [0], [1], [0, 0, 1, 1], [], []>} : vector<16x6xf32>, vector<6x298xf32>, vector<16x298xf32> -> vector<16x298xf32>
    %354 = arith.addf %349, %353 : vector<16x298xf32>
    %c17_257 = arith.constant 17 : index
    %c0_258 = arith.constant 0 : index
    %c0_259 = arith.constant 0 : index
    %355 = vector.load %arg4[%c17_257, %c0_258, %c0_259] : memref<25x16x6xf32, #tpu.memory_space<vmem>>, vector<1x16x6xf32>
    %356 = vector.shape_cast %355 : vector<1x16x6xf32> to vector<16x6xf32>
    %357 = vector.extract_strided_slice %268 {offsets = [0, 98], sizes = [6, 298], strides = [1, 1]} : vector<6x430xf32> to vector<6x298xf32>
    %cst_260 = arith.constant dense<0.000000e+00> : vector<16x298xf32>
    %358 = tpu.matmul %356, %357, %cst_260 {dimension_numbers = #tpu.dot_dimension_numbers<[1], [0], [0], [1], [0, 0, 1, 1], [], []>} : vector<16x6xf32>, vector<6x298xf32>, vector<16x298xf32> -> vector<16x298xf32>
    %359 = arith.addf %354, %358 : vector<16x298xf32>
    %c18_261 = arith.constant 18 : index
    %c0_262 = arith.constant 0 : index
    %c0_263 = arith.constant 0 : index
    %360 = vector.load %arg4[%c18_261, %c0_262, %c0_263] : memref<25x16x6xf32, #tpu.memory_space<vmem>>, vector<1x16x6xf32>
    %361 = vector.shape_cast %360 : vector<1x16x6xf32> to vector<16x6xf32>
    %362 = vector.extract_strided_slice %268 {offsets = [0, 99], sizes = [6, 298], strides = [1, 1]} : vector<6x430xf32> to vector<6x298xf32>
    %cst_264 = arith.constant dense<0.000000e+00> : vector<16x298xf32>
    %363 = tpu.matmul %361, %362, %cst_264 {dimension_numbers = #tpu.dot_dimension_numbers<[1], [0], [0], [1], [0, 0, 1, 1], [], []>} : vector<16x6xf32>, vector<6x298xf32>, vector<16x298xf32> -> vector<16x298xf32>
    %364 = arith.addf %359, %363 : vector<16x298xf32>
    %c19_265 = arith.constant 19 : index
    %c0_266 = arith.constant 0 : index
    %c0_267 = arith.constant 0 : index
    %365 = vector.load %arg4[%c19_265, %c0_266, %c0_267] : memref<25x16x6xf32, #tpu.memory_space<vmem>>, vector<1x16x6xf32>
    %366 = vector.shape_cast %365 : vector<1x16x6xf32> to vector<16x6xf32>
    %367 = vector.extract_strided_slice %268 {offsets = [0, 100], sizes = [6, 298], strides = [1, 1]} : vector<6x430xf32> to vector<6x298xf32>
    %cst_268 = arith.constant dense<0.000000e+00> : vector<16x298xf32>
    %368 = tpu.matmul %366, %367, %cst_268 {dimension_numbers = #tpu.dot_dimension_numbers<[1], [0], [0], [1], [0, 0, 1, 1], [], []>} : vector<16x6xf32>, vector<6x298xf32>, vector<16x298xf32> -> vector<16x298xf32>
    %369 = arith.addf %364, %368 : vector<16x298xf32>
    %c20_269 = arith.constant 20 : index
    %c0_270 = arith.constant 0 : index
    %c0_271 = arith.constant 0 : index
    %370 = vector.load %arg4[%c20_269, %c0_270, %c0_271] : memref<25x16x6xf32, #tpu.memory_space<vmem>>, vector<1x16x6xf32>
    %371 = vector.shape_cast %370 : vector<1x16x6xf32> to vector<16x6xf32>
    %372 = vector.extract_strided_slice %268 {offsets = [0, 128], sizes = [6, 298], strides = [1, 1]} : vector<6x430xf32> to vector<6x298xf32>
    %cst_272 = arith.constant dense<0.000000e+00> : vector<16x298xf32>
    %373 = tpu.matmul %371, %372, %cst_272 {dimension_numbers = #tpu.dot_dimension_numbers<[1], [0], [0], [1], [0, 0, 1, 1], [], []>} : vector<16x6xf32>, vector<6x298xf32>, vector<16x298xf32> -> vector<16x298xf32>
    %374 = arith.addf %369, %373 : vector<16x298xf32>
    %c21_273 = arith.constant 21 : index
    %c0_274 = arith.constant 0 : index
    %c0_275 = arith.constant 0 : index
    %375 = vector.load %arg4[%c21_273, %c0_274, %c0_275] : memref<25x16x6xf32, #tpu.memory_space<vmem>>, vector<1x16x6xf32>
    %376 = vector.shape_cast %375 : vector<1x16x6xf32> to vector<16x6xf32>
    %377 = vector.extract_strided_slice %268 {offsets = [0, 129], sizes = [6, 298], strides = [1, 1]} : vector<6x430xf32> to vector<6x298xf32>
    %cst_276 = arith.constant dense<0.000000e+00> : vector<16x298xf32>
    %378 = tpu.matmul %376, %377, %cst_276 {dimension_numbers = #tpu.dot_dimension_numbers<[1], [0], [0], [1], [0, 0, 1, 1], [], []>} : vector<16x6xf32>, vector<6x298xf32>, vector<16x298xf32> -> vector<16x298xf32>
    %379 = arith.addf %374, %378 : vector<16x298xf32>
    %c22_277 = arith.constant 22 : index
    %c0_278 = arith.constant 0 : index
    %c0_279 = arith.constant 0 : index
    %380 = vector.load %arg4[%c22_277, %c0_278, %c0_279] : memref<25x16x6xf32, #tpu.memory_space<vmem>>, vector<1x16x6xf32>
    %381 = vector.shape_cast %380 : vector<1x16x6xf32> to vector<16x6xf32>
    %382 = vector.extract_strided_slice %268 {offsets = [0, 130], sizes = [6, 298], strides = [1, 1]} : vector<6x430xf32> to vector<6x298xf32>
    %cst_280 = arith.constant dense<0.000000e+00> : vector<16x298xf32>
    %383 = tpu.matmul %381, %382, %cst_280 {dimension_numbers = #tpu.dot_dimension_numbers<[1], [0], [0], [1], [0, 0, 1, 1], [], []>} : vector<16x6xf32>, vector<6x298xf32>, vector<16x298xf32> -> vector<16x298xf32>
    %384 = arith.addf %379, %383 : vector<16x298xf32>
    %c23_281 = arith.constant 23 : index
    %c0_282 = arith.constant 0 : index
    %c0_283 = arith.constant 0 : index
    %385 = vector.load %arg4[%c23_281, %c0_282, %c0_283] : memref<25x16x6xf32, #tpu.memory_space<vmem>>, vector<1x16x6xf32>
    %386 = vector.shape_cast %385 : vector<1x16x6xf32> to vector<16x6xf32>
    %387 = vector.extract_strided_slice %268 {offsets = [0, 131], sizes = [6, 298], strides = [1, 1]} : vector<6x430xf32> to vector<6x298xf32>
    %cst_284 = arith.constant dense<0.000000e+00> : vector<16x298xf32>
    %388 = tpu.matmul %386, %387, %cst_284 {dimension_numbers = #tpu.dot_dimension_numbers<[1], [0], [0], [1], [0, 0, 1, 1], [], []>} : vector<16x6xf32>, vector<6x298xf32>, vector<16x298xf32> -> vector<16x298xf32>
    %389 = arith.addf %384, %388 : vector<16x298xf32>
    %c24_285 = arith.constant 24 : index
    %c0_286 = arith.constant 0 : index
    %c0_287 = arith.constant 0 : index
    %390 = vector.load %arg4[%c24_285, %c0_286, %c0_287] : memref<25x16x6xf32, #tpu.memory_space<vmem>>, vector<1x16x6xf32>
    %391 = vector.shape_cast %390 : vector<1x16x6xf32> to vector<16x6xf32>
    %392 = vector.extract_strided_slice %268 {offsets = [0, 132], sizes = [6, 298], strides = [1, 1]} : vector<6x430xf32> to vector<6x298xf32>
    %cst_288 = arith.constant dense<0.000000e+00> : vector<16x298xf32>
    %393 = tpu.matmul %391, %392, %cst_288 {dimension_numbers = #tpu.dot_dimension_numbers<[1], [0], [0], [1], [0, 0, 1, 1], [], []>} : vector<16x6xf32>, vector<6x298xf32>, vector<16x298xf32> -> vector<16x298xf32>
    %394 = arith.addf %389, %393 : vector<16x298xf32>
    %c0_289 = arith.constant 0 : index
    %c0_290 = arith.constant 0 : index
    %395 = vector.load %arg5[%c0_289, %c0_290] : memref<16x1xf32, #tpu.memory_space<vmem>>, vector<16x1xf32>
    %396 = vector.broadcast %395 : vector<16x1xf32> to vector<16x298xf32>
    %397 = arith.addf %394, %396 : vector<16x298xf32>
    %cst_291 = arith.constant 0.000000e+00 : f32
    %398 = vector.broadcast %cst_291 : f32 to vector<16x298xf32>
    %399 = arith.maximumf %397, %398 : vector<16x298xf32>
    %400 = vector.extract_strided_slice %399 {offsets = [0, 0], sizes = [16, 297], strides = [1, 1]} : vector<16x298xf32> to vector<16x297xf32>
    %401 = vector.extract_strided_slice %399 {offsets = [0, 1], sizes = [16, 297], strides = [1, 1]} : vector<16x298xf32> to vector<16x297xf32>
    %402 = arith.maximumf %400, %401 : vector<16x297xf32>
    %403 = vector.extract_strided_slice %402 {offsets = [0, 0], sizes = [16, 265], strides = [1, 1]} : vector<16x297xf32> to vector<16x265xf32>
    %404 = vector.extract_strided_slice %402 {offsets = [0, 32], sizes = [16, 265], strides = [1, 1]} : vector<16x297xf32> to vector<16x265xf32>
    %405 = arith.maximumf %403, %404 : vector<16x265xf32>
    %cst_292 = arith.constant 0.000000e+00 : f32
    %406 = vector.broadcast %cst_292 : f32 to vector<120x1xf32>
    %c0_293 = arith.constant 0 : index
    %c0_294 = arith.constant 0 : index
    %407 = vector.load %arg6[%c0_293, %c0_294] : memref<120x400xf32, #tpu.memory_space<vmem>>, vector<120x16xf32>
    %408 = vector.extract_strided_slice %405 {offsets = [0, 0], sizes = [16, 1], strides = [1, 1]} : vector<16x265xf32> to vector<16x1xf32>
    %cst_295 = arith.constant dense<0.000000e+00> : vector<120x1xf32>
    %409 = tpu.matmul %407, %408, %cst_295 {dimension_numbers = #tpu.dot_dimension_numbers<[1], [0], [0], [1], [0, 0, 1, 1], [], []>} : vector<120x16xf32>, vector<16x1xf32>, vector<120x1xf32> -> vector<120x1xf32>
    %410 = arith.addf %406, %409 : vector<120x1xf32>
    %c0_296 = arith.constant 0 : index
    %c16_297 = arith.constant 16 : index
    %411 = vector.load %arg6[%c0_296, %c16_297] : memref<120x400xf32, #tpu.memory_space<vmem>>, vector<120x16xf32>
    %412 = vector.extract_strided_slice %405 {offsets = [0, 2], sizes = [16, 1], strides = [1, 1]} : vector<16x265xf32> to vector<16x1xf32>
    %cst_298 = arith.constant dense<0.000000e+00> : vector<120x1xf32>
    %413 = tpu.matmul %411, %412, %cst_298 {dimension_numbers = #tpu.dot_dimension_numbers<[1], [0], [0], [1], [0, 0, 1, 1], [], []>} : vector<120x16xf32>, vector<16x1xf32>, vector<120x1xf32> -> vector<120x1xf32>
    %414 = arith.addf %410, %413 : vector<120x1xf32>
    %c0_299 = arith.constant 0 : index
    %c32 = arith.constant 32 : index
    %415 = vector.load %arg6[%c0_299, %c32] : memref<120x400xf32, #tpu.memory_space<vmem>>, vector<120x16xf32>
    %416 = vector.extract_strided_slice %405 {offsets = [0, 4], sizes = [16, 1], strides = [1, 1]} : vector<16x265xf32> to vector<16x1xf32>
    %cst_300 = arith.constant dense<0.000000e+00> : vector<120x1xf32>
    %417 = tpu.matmul %415, %416, %cst_300 {dimension_numbers = #tpu.dot_dimension_numbers<[1], [0], [0], [1], [0, 0, 1, 1], [], []>} : vector<120x16xf32>, vector<16x1xf32>, vector<120x1xf32> -> vector<120x1xf32>
    %418 = arith.addf %414, %417 : vector<120x1xf32>
    %c0_301 = arith.constant 0 : index
    %c48 = arith.constant 48 : index
    %419 = vector.load %arg6[%c0_301, %c48] : memref<120x400xf32, #tpu.memory_space<vmem>>, vector<120x16xf32>
    %420 = vector.extract_strided_slice %405 {offsets = [0, 6], sizes = [16, 1], strides = [1, 1]} : vector<16x265xf32> to vector<16x1xf32>
    %cst_302 = arith.constant dense<0.000000e+00> : vector<120x1xf32>
    %421 = tpu.matmul %419, %420, %cst_302 {dimension_numbers = #tpu.dot_dimension_numbers<[1], [0], [0], [1], [0, 0, 1, 1], [], []>} : vector<120x16xf32>, vector<16x1xf32>, vector<120x1xf32> -> vector<120x1xf32>
    %422 = arith.addf %418, %421 : vector<120x1xf32>
    %c0_303 = arith.constant 0 : index
    %c64 = arith.constant 64 : index
    %423 = vector.load %arg6[%c0_303, %c64] : memref<120x400xf32, #tpu.memory_space<vmem>>, vector<120x16xf32>
    %424 = vector.extract_strided_slice %405 {offsets = [0, 8], sizes = [16, 1], strides = [1, 1]} : vector<16x265xf32> to vector<16x1xf32>
    %cst_304 = arith.constant dense<0.000000e+00> : vector<120x1xf32>
    %425 = tpu.matmul %423, %424, %cst_304 {dimension_numbers = #tpu.dot_dimension_numbers<[1], [0], [0], [1], [0, 0, 1, 1], [], []>} : vector<120x16xf32>, vector<16x1xf32>, vector<120x1xf32> -> vector<120x1xf32>
    %426 = arith.addf %422, %425 : vector<120x1xf32>
    %c0_305 = arith.constant 0 : index
    %c80 = arith.constant 80 : index
    %427 = vector.load %arg6[%c0_305, %c80] : memref<120x400xf32, #tpu.memory_space<vmem>>, vector<120x16xf32>
    %428 = vector.extract_strided_slice %405 {offsets = [0, 64], sizes = [16, 1], strides = [1, 1]} : vector<16x265xf32> to vector<16x1xf32>
    %cst_306 = arith.constant dense<0.000000e+00> : vector<120x1xf32>
    %429 = tpu.matmul %427, %428, %cst_306 {dimension_numbers = #tpu.dot_dimension_numbers<[1], [0], [0], [1], [0, 0, 1, 1], [], []>} : vector<120x16xf32>, vector<16x1xf32>, vector<120x1xf32> -> vector<120x1xf32>
    %430 = arith.addf %426, %429 : vector<120x1xf32>
    %c0_307 = arith.constant 0 : index
    %c96 = arith.constant 96 : index
    %431 = vector.load %arg6[%c0_307, %c96] : memref<120x400xf32, #tpu.memory_space<vmem>>, vector<120x16xf32>
    %432 = vector.extract_strided_slice %405 {offsets = [0, 66], sizes = [16, 1], strides = [1, 1]} : vector<16x265xf32> to vector<16x1xf32>
    %cst_308 = arith.constant dense<0.000000e+00> : vector<120x1xf32>
    %433 = tpu.matmul %431, %432, %cst_308 {dimension_numbers = #tpu.dot_dimension_numbers<[1], [0], [0], [1], [0, 0, 1, 1], [], []>} : vector<120x16xf32>, vector<16x1xf32>, vector<120x1xf32> -> vector<120x1xf32>
    %434 = arith.addf %430, %433 : vector<120x1xf32>
    %c0_309 = arith.constant 0 : index
    %c112 = arith.constant 112 : index
    %435 = vector.load %arg6[%c0_309, %c112] : memref<120x400xf32, #tpu.memory_space<vmem>>, vector<120x16xf32>
    %436 = vector.extract_strided_slice %405 {offsets = [0, 68], sizes = [16, 1], strides = [1, 1]} : vector<16x265xf32> to vector<16x1xf32>
    %cst_310 = arith.constant dense<0.000000e+00> : vector<120x1xf32>
    %437 = tpu.matmul %435, %436, %cst_310 {dimension_numbers = #tpu.dot_dimension_numbers<[1], [0], [0], [1], [0, 0, 1, 1], [], []>} : vector<120x16xf32>, vector<16x1xf32>, vector<120x1xf32> -> vector<120x1xf32>
    %438 = arith.addf %434, %437 : vector<120x1xf32>
    %c0_311 = arith.constant 0 : index
    %c128 = arith.constant 128 : index
    %439 = vector.load %arg6[%c0_311, %c128] : memref<120x400xf32, #tpu.memory_space<vmem>>, vector<120x16xf32>
    %440 = vector.extract_strided_slice %405 {offsets = [0, 70], sizes = [16, 1], strides = [1, 1]} : vector<16x265xf32> to vector<16x1xf32>
    %cst_312 = arith.constant dense<0.000000e+00> : vector<120x1xf32>
    %441 = tpu.matmul %439, %440, %cst_312 {dimension_numbers = #tpu.dot_dimension_numbers<[1], [0], [0], [1], [0, 0, 1, 1], [], []>} : vector<120x16xf32>, vector<16x1xf32>, vector<120x1xf32> -> vector<120x1xf32>
    %442 = arith.addf %438, %441 : vector<120x1xf32>
    %c0_313 = arith.constant 0 : index
    %c144 = arith.constant 144 : index
    %443 = vector.load %arg6[%c0_313, %c144] : memref<120x400xf32, #tpu.memory_space<vmem>>, vector<120x16xf32>
    %444 = vector.extract_strided_slice %405 {offsets = [0, 72], sizes = [16, 1], strides = [1, 1]} : vector<16x265xf32> to vector<16x1xf32>
    %cst_314 = arith.constant dense<0.000000e+00> : vector<120x1xf32>
    %445 = tpu.matmul %443, %444, %cst_314 {dimension_numbers = #tpu.dot_dimension_numbers<[1], [0], [0], [1], [0, 0, 1, 1], [], []>} : vector<120x16xf32>, vector<16x1xf32>, vector<120x1xf32> -> vector<120x1xf32>
    %446 = arith.addf %442, %445 : vector<120x1xf32>
    %c0_315 = arith.constant 0 : index
    %c160 = arith.constant 160 : index
    %447 = vector.load %arg6[%c0_315, %c160] : memref<120x400xf32, #tpu.memory_space<vmem>>, vector<120x16xf32>
    %448 = vector.extract_strided_slice %405 {offsets = [0, 128], sizes = [16, 1], strides = [1, 1]} : vector<16x265xf32> to vector<16x1xf32>
    %cst_316 = arith.constant dense<0.000000e+00> : vector<120x1xf32>
    %449 = tpu.matmul %447, %448, %cst_316 {dimension_numbers = #tpu.dot_dimension_numbers<[1], [0], [0], [1], [0, 0, 1, 1], [], []>} : vector<120x16xf32>, vector<16x1xf32>, vector<120x1xf32> -> vector<120x1xf32>
    %450 = arith.addf %446, %449 : vector<120x1xf32>
    %c0_317 = arith.constant 0 : index
    %c176 = arith.constant 176 : index
    %451 = vector.load %arg6[%c0_317, %c176] : memref<120x400xf32, #tpu.memory_space<vmem>>, vector<120x16xf32>
    %452 = vector.extract_strided_slice %405 {offsets = [0, 130], sizes = [16, 1], strides = [1, 1]} : vector<16x265xf32> to vector<16x1xf32>
    %cst_318 = arith.constant dense<0.000000e+00> : vector<120x1xf32>
    %453 = tpu.matmul %451, %452, %cst_318 {dimension_numbers = #tpu.dot_dimension_numbers<[1], [0], [0], [1], [0, 0, 1, 1], [], []>} : vector<120x16xf32>, vector<16x1xf32>, vector<120x1xf32> -> vector<120x1xf32>
    %454 = arith.addf %450, %453 : vector<120x1xf32>
    %c0_319 = arith.constant 0 : index
    %c192 = arith.constant 192 : index
    %455 = vector.load %arg6[%c0_319, %c192] : memref<120x400xf32, #tpu.memory_space<vmem>>, vector<120x16xf32>
    %456 = vector.extract_strided_slice %405 {offsets = [0, 132], sizes = [16, 1], strides = [1, 1]} : vector<16x265xf32> to vector<16x1xf32>
    %cst_320 = arith.constant dense<0.000000e+00> : vector<120x1xf32>
    %457 = tpu.matmul %455, %456, %cst_320 {dimension_numbers = #tpu.dot_dimension_numbers<[1], [0], [0], [1], [0, 0, 1, 1], [], []>} : vector<120x16xf32>, vector<16x1xf32>, vector<120x1xf32> -> vector<120x1xf32>
    %458 = arith.addf %454, %457 : vector<120x1xf32>
    %c0_321 = arith.constant 0 : index
    %c208 = arith.constant 208 : index
    %459 = vector.load %arg6[%c0_321, %c208] : memref<120x400xf32, #tpu.memory_space<vmem>>, vector<120x16xf32>
    %460 = vector.extract_strided_slice %405 {offsets = [0, 134], sizes = [16, 1], strides = [1, 1]} : vector<16x265xf32> to vector<16x1xf32>
    %cst_322 = arith.constant dense<0.000000e+00> : vector<120x1xf32>
    %461 = tpu.matmul %459, %460, %cst_322 {dimension_numbers = #tpu.dot_dimension_numbers<[1], [0], [0], [1], [0, 0, 1, 1], [], []>} : vector<120x16xf32>, vector<16x1xf32>, vector<120x1xf32> -> vector<120x1xf32>
    %462 = arith.addf %458, %461 : vector<120x1xf32>
    %c0_323 = arith.constant 0 : index
    %c224 = arith.constant 224 : index
    %463 = vector.load %arg6[%c0_323, %c224] : memref<120x400xf32, #tpu.memory_space<vmem>>, vector<120x16xf32>
    %464 = vector.extract_strided_slice %405 {offsets = [0, 136], sizes = [16, 1], strides = [1, 1]} : vector<16x265xf32> to vector<16x1xf32>
    %cst_324 = arith.constant dense<0.000000e+00> : vector<120x1xf32>
    %465 = tpu.matmul %463, %464, %cst_324 {dimension_numbers = #tpu.dot_dimension_numbers<[1], [0], [0], [1], [0, 0, 1, 1], [], []>} : vector<120x16xf32>, vector<16x1xf32>, vector<120x1xf32> -> vector<120x1xf32>
    %466 = arith.addf %462, %465 : vector<120x1xf32>
    %c0_325 = arith.constant 0 : index
    %c240 = arith.constant 240 : index
    %467 = vector.load %arg6[%c0_325, %c240] : memref<120x400xf32, #tpu.memory_space<vmem>>, vector<120x16xf32>
    %468 = vector.extract_strided_slice %405 {offsets = [0, 192], sizes = [16, 1], strides = [1, 1]} : vector<16x265xf32> to vector<16x1xf32>
    %cst_326 = arith.constant dense<0.000000e+00> : vector<120x1xf32>
    %469 = tpu.matmul %467, %468, %cst_326 {dimension_numbers = #tpu.dot_dimension_numbers<[1], [0], [0], [1], [0, 0, 1, 1], [], []>} : vector<120x16xf32>, vector<16x1xf32>, vector<120x1xf32> -> vector<120x1xf32>
    %470 = arith.addf %466, %469 : vector<120x1xf32>
    %c0_327 = arith.constant 0 : index
    %c256 = arith.constant 256 : index
    %471 = vector.load %arg6[%c0_327, %c256] : memref<120x400xf32, #tpu.memory_space<vmem>>, vector<120x16xf32>
    %472 = vector.extract_strided_slice %405 {offsets = [0, 194], sizes = [16, 1], strides = [1, 1]} : vector<16x265xf32> to vector<16x1xf32>
    %cst_328 = arith.constant dense<0.000000e+00> : vector<120x1xf32>
    %473 = tpu.matmul %471, %472, %cst_328 {dimension_numbers = #tpu.dot_dimension_numbers<[1], [0], [0], [1], [0, 0, 1, 1], [], []>} : vector<120x16xf32>, vector<16x1xf32>, vector<120x1xf32> -> vector<120x1xf32>
    %474 = arith.addf %470, %473 : vector<120x1xf32>
    %c0_329 = arith.constant 0 : index
    %c272 = arith.constant 272 : index
    %475 = vector.load %arg6[%c0_329, %c272] : memref<120x400xf32, #tpu.memory_space<vmem>>, vector<120x16xf32>
    %476 = vector.extract_strided_slice %405 {offsets = [0, 196], sizes = [16, 1], strides = [1, 1]} : vector<16x265xf32> to vector<16x1xf32>
    %cst_330 = arith.constant dense<0.000000e+00> : vector<120x1xf32>
    %477 = tpu.matmul %475, %476, %cst_330 {dimension_numbers = #tpu.dot_dimension_numbers<[1], [0], [0], [1], [0, 0, 1, 1], [], []>} : vector<120x16xf32>, vector<16x1xf32>, vector<120x1xf32> -> vector<120x1xf32>
    %478 = arith.addf %474, %477 : vector<120x1xf32>
    %c0_331 = arith.constant 0 : index
    %c288 = arith.constant 288 : index
    %479 = vector.load %arg6[%c0_331, %c288] : memref<120x400xf32, #tpu.memory_space<vmem>>, vector<120x16xf32>
    %480 = vector.extract_strided_slice %405 {offsets = [0, 198], sizes = [16, 1], strides = [1, 1]} : vector<16x265xf32> to vector<16x1xf32>
    %cst_332 = arith.constant dense<0.000000e+00> : vector<120x1xf32>
    %481 = tpu.matmul %479, %480, %cst_332 {dimension_numbers = #tpu.dot_dimension_numbers<[1], [0], [0], [1], [0, 0, 1, 1], [], []>} : vector<120x16xf32>, vector<16x1xf32>, vector<120x1xf32> -> vector<120x1xf32>
    %482 = arith.addf %478, %481 : vector<120x1xf32>
    %c0_333 = arith.constant 0 : index
    %c304 = arith.constant 304 : index
    %483 = vector.load %arg6[%c0_333, %c304] : memref<120x400xf32, #tpu.memory_space<vmem>>, vector<120x16xf32>
    %484 = vector.extract_strided_slice %405 {offsets = [0, 200], sizes = [16, 1], strides = [1, 1]} : vector<16x265xf32> to vector<16x1xf32>
    %cst_334 = arith.constant dense<0.000000e+00> : vector<120x1xf32>
    %485 = tpu.matmul %483, %484, %cst_334 {dimension_numbers = #tpu.dot_dimension_numbers<[1], [0], [0], [1], [0, 0, 1, 1], [], []>} : vector<120x16xf32>, vector<16x1xf32>, vector<120x1xf32> -> vector<120x1xf32>
    %486 = arith.addf %482, %485 : vector<120x1xf32>
    %c0_335 = arith.constant 0 : index
    %c320 = arith.constant 320 : index
    %487 = vector.load %arg6[%c0_335, %c320] : memref<120x400xf32, #tpu.memory_space<vmem>>, vector<120x16xf32>
    %488 = vector.extract_strided_slice %405 {offsets = [0, 256], sizes = [16, 1], strides = [1, 1]} : vector<16x265xf32> to vector<16x1xf32>
    %cst_336 = arith.constant dense<0.000000e+00> : vector<120x1xf32>
    %489 = tpu.matmul %487, %488, %cst_336 {dimension_numbers = #tpu.dot_dimension_numbers<[1], [0], [0], [1], [0, 0, 1, 1], [], []>} : vector<120x16xf32>, vector<16x1xf32>, vector<120x1xf32> -> vector<120x1xf32>
    %490 = arith.addf %486, %489 : vector<120x1xf32>
    %c0_337 = arith.constant 0 : index
    %c336 = arith.constant 336 : index
    %491 = vector.load %arg6[%c0_337, %c336] : memref<120x400xf32, #tpu.memory_space<vmem>>, vector<120x16xf32>
    %492 = vector.extract_strided_slice %405 {offsets = [0, 258], sizes = [16, 1], strides = [1, 1]} : vector<16x265xf32> to vector<16x1xf32>
    %cst_338 = arith.constant dense<0.000000e+00> : vector<120x1xf32>
    %493 = tpu.matmul %491, %492, %cst_338 {dimension_numbers = #tpu.dot_dimension_numbers<[1], [0], [0], [1], [0, 0, 1, 1], [], []>} : vector<120x16xf32>, vector<16x1xf32>, vector<120x1xf32> -> vector<120x1xf32>
    %494 = arith.addf %490, %493 : vector<120x1xf32>
    %c0_339 = arith.constant 0 : index
    %c352 = arith.constant 352 : index
    %495 = vector.load %arg6[%c0_339, %c352] : memref<120x400xf32, #tpu.memory_space<vmem>>, vector<120x16xf32>
    %496 = vector.extract_strided_slice %405 {offsets = [0, 260], sizes = [16, 1], strides = [1, 1]} : vector<16x265xf32> to vector<16x1xf32>
    %cst_340 = arith.constant dense<0.000000e+00> : vector<120x1xf32>
    %497 = tpu.matmul %495, %496, %cst_340 {dimension_numbers = #tpu.dot_dimension_numbers<[1], [0], [0], [1], [0, 0, 1, 1], [], []>} : vector<120x16xf32>, vector<16x1xf32>, vector<120x1xf32> -> vector<120x1xf32>
    %498 = arith.addf %494, %497 : vector<120x1xf32>
    %c0_341 = arith.constant 0 : index
    %c368 = arith.constant 368 : index
    %499 = vector.load %arg6[%c0_341, %c368] : memref<120x400xf32, #tpu.memory_space<vmem>>, vector<120x16xf32>
    %500 = vector.extract_strided_slice %405 {offsets = [0, 262], sizes = [16, 1], strides = [1, 1]} : vector<16x265xf32> to vector<16x1xf32>
    %cst_342 = arith.constant dense<0.000000e+00> : vector<120x1xf32>
    %501 = tpu.matmul %499, %500, %cst_342 {dimension_numbers = #tpu.dot_dimension_numbers<[1], [0], [0], [1], [0, 0, 1, 1], [], []>} : vector<120x16xf32>, vector<16x1xf32>, vector<120x1xf32> -> vector<120x1xf32>
    %502 = arith.addf %498, %501 : vector<120x1xf32>
    %c0_343 = arith.constant 0 : index
    %c384 = arith.constant 384 : index
    %503 = vector.load %arg6[%c0_343, %c384] : memref<120x400xf32, #tpu.memory_space<vmem>>, vector<120x16xf32>
    %504 = vector.extract_strided_slice %405 {offsets = [0, 264], sizes = [16, 1], strides = [1, 1]} : vector<16x265xf32> to vector<16x1xf32>
    %cst_344 = arith.constant dense<0.000000e+00> : vector<120x1xf32>
    %505 = tpu.matmul %503, %504, %cst_344 {dimension_numbers = #tpu.dot_dimension_numbers<[1], [0], [0], [1], [0, 0, 1, 1], [], []>} : vector<120x16xf32>, vector<16x1xf32>, vector<120x1xf32> -> vector<120x1xf32>
    %506 = arith.addf %502, %505 : vector<120x1xf32>
    %c0_345 = arith.constant 0 : index
    %c0_346 = arith.constant 0 : index
    %507 = vector.load %arg7[%c0_345, %c0_346] : memref<120x1xf32, #tpu.memory_space<vmem>>, vector<120x1xf32>
    %508 = arith.addf %506, %507 : vector<120x1xf32>
    %cst_347 = arith.constant 0.000000e+00 : f32
    %509 = vector.broadcast %cst_347 : f32 to vector<120x1xf32>
    %510 = arith.maximumf %508, %509 : vector<120x1xf32>
    %c0_348 = arith.constant 0 : index
    %c0_349 = arith.constant 0 : index
    %511 = vector.load %arg8[%c0_348, %c0_349] : memref<84x120xf32, #tpu.memory_space<vmem>>, vector<84x120xf32>
    %cst_350 = arith.constant dense<0.000000e+00> : vector<84x1xf32>
    %512 = tpu.matmul %511, %510, %cst_350 {dimension_numbers = #tpu.dot_dimension_numbers<[1], [0], [0], [1], [0, 0, 1, 1], [], []>} : vector<84x120xf32>, vector<120x1xf32>, vector<84x1xf32> -> vector<84x1xf32>
    %c0_351 = arith.constant 0 : index
    %c0_352 = arith.constant 0 : index
    %513 = vector.load %arg9[%c0_351, %c0_352] : memref<84x1xf32, #tpu.memory_space<vmem>>, vector<84x1xf32>
    %514 = arith.addf %512, %513 : vector<84x1xf32>
    %cst_353 = arith.constant 0.000000e+00 : f32
    %515 = vector.broadcast %cst_353 : f32 to vector<84x1xf32>
    %516 = arith.maximumf %514, %515 : vector<84x1xf32>
    %c0_354 = arith.constant 0 : index
    %c0_355 = arith.constant 0 : index
    %517 = vector.load %arg10[%c0_354, %c0_355] : memref<10x84xf32, #tpu.memory_space<vmem>>, vector<10x84xf32>
    %cst_356 = arith.constant dense<0.000000e+00> : vector<10x1xf32>
    %518 = tpu.matmul %517, %516, %cst_356 {dimension_numbers = #tpu.dot_dimension_numbers<[1], [0], [0], [1], [0, 0, 1, 1], [], []>} : vector<10x84xf32>, vector<84x1xf32>, vector<10x1xf32> -> vector<10x1xf32>
    %c0_357 = arith.constant 0 : index
    %c0_358 = arith.constant 0 : index
    %519 = vector.load %arg11[%c0_357, %c0_358] : memref<10x1xf32, #tpu.memory_space<vmem>>, vector<10x1xf32>
    %520 = arith.addf %518, %519 : vector<10x1xf32>
    %c0_359 = arith.constant 0 : index
    %c0_360 = arith.constant 0 : index
    %c0_361 = arith.constant 0 : index
    %521 = vector.load %arg12[%c0_359, %c0_360, %c0_361] : memref<1x10x1xf32, #tpu.memory_space<vmem>>, vector<1x10x1xf32>
    %522 = vector.shape_cast %521 : vector<1x10x1xf32> to vector<10x1xf32>
    %523 = vector.shape_cast %520 : vector<10x1xf32> to vector<1x10x1xf32>
    tpu.vector_store %arg12[%c0_359, %c0_360, %c0_361], %523 {strides = array<i32>} : memref<1x10x1xf32, #tpu.memory_space<vmem>>, vector<1x10x1xf32>,
    return
  }
  func.func @transform_0(%arg0: i32) -> (i32, i32, i32, i32) {
    %c0_i32 = arith.constant 0 : i32
    %c0_i32_0 = arith.constant 0 : i32
    %c0_i32_1 = arith.constant 0 : i32
    %c0_i32_2 = arith.constant 0 : i32
    return %arg0, %c0_i32, %c0_i32_0, %c0_i32_1 : i32, i32, i32, i32
  }
  func.func @transform_1(%arg0: i32) -> (i32, i32, i32) {
    %c0_i32 = arith.constant 0 : i32
    %c0_i32_0 = arith.constant 0 : i32
    %c0_i32_1 = arith.constant 0 : i32
    %c0_i32_2 = arith.constant 0 : i32
    return %c0_i32, %c0_i32_0, %c0_i32_1 : i32, i32, i32
  }
  func.func @transform_2(%arg0: i32) -> (i32, i32) {
    %c0_i32 = arith.constant 0 : i32
    %c0_i32_0 = arith.constant 0 : i32
    %c0_i32_1 = arith.constant 0 : i32
    return %c0_i32, %c0_i32_0 : i32, i32
  }
  func.func @transform_3(%arg0: i32) -> (i32, i32, i32) {
    %c0_i32 = arith.constant 0 : i32
    %c0_i32_0 = arith.constant 0 : i32
    %c0_i32_1 = arith.constant 0 : i32
    %c0_i32_2 = arith.constant 0 : i32
    return %c0_i32, %c0_i32_0, %c0_i32_1 : i32, i32, i32
  }
  func.func @transform_4(%arg0: i32) -> (i32, i32) {
    %c0_i32 = arith.constant 0 : i32
    %c0_i32_0 = arith.constant 0 : i32
    %c0_i32_1 = arith.constant 0 : i32
    return %c0_i32, %c0_i32_0 : i32, i32
  }
  func.func @transform_5(%arg0: i32) -> (i32, i32) {
    %c0_i32 = arith.constant 0 : i32
    %c0_i32_0 = arith.constant 0 : i32
    %c0_i32_1 = arith.constant 0 : i32
    return %c0_i32, %c0_i32_0 : i32, i32
  }
  func.func @transform_6(%arg0: i32) -> (i32, i32) {
    %c0_i32 = arith.constant 0 : i32
    %c0_i32_0 = arith.constant 0 : i32
    %c0_i32_1 = arith.constant 0 : i32
    return %c0_i32, %c0_i32_0 : i32, i32
  }
  func.func @transform_7(%arg0: i32) -> (i32, i32) {
    %c0_i32 = arith.constant 0 : i32
    %c0_i32_0 = arith.constant 0 : i32
    %c0_i32_1 = arith.constant 0 : i32
    return %c0_i32, %c0_i32_0 : i32, i32
  }
  func.func @transform_8(%arg0: i32) -> (i32, i32) {
    %c0_i32 = arith.constant 0 : i32
    %c0_i32_0 = arith.constant 0 : i32
    %c0_i32_1 = arith.constant 0 : i32
    return %c0_i32, %c0_i32_0 : i32, i32
  }
  func.func @transform_9(%arg0: i32) -> (i32, i32) {
    %c0_i32 = arith.constant 0 : i32
    %c0_i32_0 = arith.constant 0 : i32
    %c0_i32_1 = arith.constant 0 : i32
    return %c0_i32, %c0_i32_0 : i32, i32
  }
  func.func @transform_10(%arg0: i32) -> (i32, i32) {
    %c0_i32 = arith.constant 0 : i32
    %c0_i32_0 = arith.constant 0 : i32
    %c0_i32_1 = arith.constant 0 : i32
    return %c0_i32, %c0_i32_0 : i32, i32
  }
  func.func @transform_11(%arg0: i32) -> (i32, i32, i32) {
    %c0_i32 = arith.constant 0 : i32
    %c0_i32_0 = arith.constant 0 : i32
    %c0_i32_1 = arith.constant 0 : i32
    return %arg0, %c0_i32, %c0_i32_0 : i32, i32, i32
  }
}

</mosaic_0001>

<bundles_post_ra>
// kernel: net_forward.1
= control target key start
LH: loop header
LB: loop body
LE: loop exit
PB: predicated region body
PF: predicated region fallthrough
CT: control target
= control target key end

     0   :  { %s22579_s17 = smov 0   ;;  %s28692_s0 = inlined_call_operand.vmem [shape: f32[2,2,3,512], index: 0, kind: input, shape index: {}]   ;;  %s28693_s1 = inlined_call_operand.vmem [shape: f32[25,6,3], index: 1, kind: input, shape index: {}]   ;;  %s28694_s2 = inlined_call_operand.vmem [shape: f32[6,1], index: 2, kind: input, shape index: {}]   ;;  %s28695_s3 = inlined_call_operand.vmem [shape: f32[25,16,6], index: 3, kind: input, shape index: {}]   ;;  %s28696_s4 = inlined_call_operand.vmem [shape: f32[16,1], index: 4, kind: input, shape index: {}]   ;;  %s28697_s5 = inlined_call_operand.vmem [shape: f32[120,400], index: 5, kind: input, shape index: {}]   ;;  %s28698_s6 = inlined_call_operand.vmem [shape: f32[120,1], index: 6, kind: input, shape index: {}]   ;;  %s28699_s7 = inlined_call_operand.vmem [shape: f32[84,120], index: 7, kind: input, shape index: {}]   ;;  %s28700_s8 = inlined_call_operand.vmem [shape: f32[84,1], index: 8, kind: input, shape index: {}]   ;;  %s28701_s9 = inlined_call_operand.vmem [shape: f32[10,84], index: 9, kind: input, shape index: {}]   ;;  %s28702_s10 = inlined_call_operand.vmem [shape: f32[10,1], index: 10, kind: input, shape index: {}]   ;;  %s28703_s11 = inlined_call_operand.vmem [shape: f32[2,10,1], index: 11, kind: output, shape index: {}]  }
   0x1 LB: > { %s18874_s18 = sadd.s32 4294967295, %s22482_s17   ;;  %p18878_p0 = scmp.ge.s32.totalorder %s22482_s17, 1  ;;  %s22482_s17 = sphi %s22579_s17, %s21_s17  }
   0x2   : > { %p337_p1 = scmp.lt.s32.totalorder %s22482_s17, 3 }
   0x4   : > { %p338_p2 = pnand %p18878_p0, %p337_p1 }
   0x6   : > { %341 = sbr.rel (%p338_p2) target bundleno = 3233 (0xca1), region = 64 }
   0xd   : > { %p377_p3 = scmp.lt.s32.totalorder %s18874_s18, 1  ;;  %v28704_v0 = vmov 0.0   ;;  %vm403_vm0 = vcmask 1042432   ;;  %s22485_s23 = smov 127   ;;  %v18885_v9 = vld [vmem:[%s28693_s1 + $0x8] sm:$0x3f] }
   0xe   : > { %547 = vmatprep.mubr.f32.mxu1 %v28704_v0  ;;  %476 = vmatprep.mubr.f32.mxu0 %v28704_v0  ;;  %vm399_vm1 = vcmask 23552   ;;  %v392_v10 = vld [vmem:[%s28693_s1] sm:$0x3f]  ;;  %s22486_s28 = smov 126   ;;  %s22487_s29 = smov 112   ;;  %vm721_vm2 = vcmask 1039360  }
   0xf   : > { %s28909_s18 = smov (!%p377_p3, %s18874_s18), 1  ;;  %s22488_s30 = smov 111   ;;  %v22783_v17 = vld [vmem:[%s28693_s1 + $0x10] sm:$0x3f]  ;;  %v22829_v26 = vld [vmem:[%s28693_s1 + $0x18] sm:$0x3f] }
  0x10   : > { %s19823_s19 = sshll.u32 %s28909_s18, 5  ;;  %s22489_s12 = smov 110   ;;  %vm1062_vm3 = vcmask 1031168   ;;  %v22868_v34 = vld [vmem:[%s28693_s1 + $0x20] sm:$0x3f]  ;;  %vm1233_vm4 = vcmask 916480  }
  0x11   : > { %s22595_s22 = scalar_lea.vmem %s28692_s0, %s19823_s19  ;;  %s22490_s13 = smov 96   ;;  %v22895_v42 = vld [vmem:[%s28693_s1 + $0x28] sm:$0x3f]  ;;  %v22933_v50 = vld [vmem:[%s28693_s1 + $0x30] sm:$0x3f]  ;;  %vm1574_vm5 = vcmask 908288  }
  0x12   : > { %v22598_v1 = vld [vmem:[%s22595_s22] sm:$0x77]  ;;  %v22601_v2 = vld [vmem:[%s22595_s22 + $0x8] sm:$0x77]  ;;  %v22604_v3 = vld [vmem:[%s22595_s22 + $0x10] sm:$0x77] }
  0x13   : > { %v22607_v4 = vld [vmem:[%s22595_s22 + $0x18] sm:$0x77]  ;;  %713 = vrot.lane.b32.xlu1 %v22598_v1, %s22485_s23  ;;  %v22613_v5 = vcombine.high %v22598_v1, %v22598_v1  ;;  %v22617_v6 = vcombine.high %v22601_v2, %v22601_v2  ;;  %v22621_v7 = vcombine.high %v22604_v3, %v22604_v3  ;;  %s22491_s14 = smov 95   ;;  %s22492_s15 = smov 94   ;;  %vm1915_vm6 = vcmask 900096  }
  0x14   : > { %v22625_v8 = vcombine.high %v22607_v4, %v22607_v4  ;;  %s22493_s16 = smov 80   ;;  %s22494_s19 = smov 79   ;;  %v22972_v58 = vld [vmem:[%s28693_s1 + $0x38] sm:$0x3f]  ;;  %vm2086_vm7 = vcmask 785408   ;;  %vm2427_vm8 = vcmask 777216  }
  0x15   : > { %715 = vrot.lane.b32.xlu0 %v22613_v5, %s22485_s23  ;;  %18886 = vmatprep.subr.msk.mxu0 %vm403_vm0, %v22621_v7  ;;  %s22495_s26 = smov 78   ;;  %s22497_s27 = smov 63   ;;  %vm2768_vm9 = vcmask 769024   ;;  %vm2939_vm10 = vcmask 654336   ;;  %vm3280_vm11 = vcmask 646144   ;;  %vm3621_vm12 = vcmask 637952  }
  0x16   : > { %18889 = vmatprep.subr.msk.mxu1 %vm403_vm0, %v22625_v8  ;;  %18887 = vmatpush1.msk.msra.mxu0 %vm403_vm0, %v22604_v3  ;;  %s22498_s25 = smov 62   ;;  %vm3792_vm13 = vcmask 523264   ;;  %vm4133_vm14 = vcmask 515072   ;;  %vm4474_vm15 = vcmask 506880   ;;  %s22501_s20 = smov 124  }
  0x17   : > { %719 = vrot.lane.b32.xlu1 %v22617_v6, %s22485_s23  ;;  %18890 = vmatpush1.msk.msra.mxu1 %vm403_vm0, %v22607_v4  ;;  %s22502_s21 = smov 93   ;;  %s22507_s24 = smov 31  }
  0x18   : > { %18891 = vmatmul.mubr.msk.f32.vlgmr.msra.gmra.mrb[0].mxu1 %vm399_vm1, %v18885_v9  ;;  %18888 = vmatmul.mubr.msk.f32.vlgmr.msra.gmra.mrb[0].mxu0 %vm399_vm1, %v18885_v9 }
  0x19   : > { %717 = vrot.lane.b32.xlu0 %v22601_v2, %s22485_s23  ;;  %18895 = vmatprep.subr.msk.mxu1 %vm403_vm0, %v22617_v6 }
  0x1a   : > { %18896 = vmatpush1.msk.msra.mxu1 %vm403_vm0, %v22601_v2  ;;  %704 = vmatprep.mubr.f32.mxu1 %v28704_v0 }
  0x1b   : > { %888 = vrot.lane.b32.xlu1 %v22607_v4, %s22485_s23  ;;  %18892 = vmatprep.subr.msk.mxu0 %vm403_vm0, %v22613_v5 }
  0x1c   : > { %18893 = vmatpush1.msk.msra.mxu0 %vm403_vm0, %v22598_v1  ;;  %633 = vmatprep.mubr.f32.mxu0 %v28704_v0 }
  0x1d   : > { %886 = vrot.lane.b32.xlu0 %v22621_v7, %s22485_s23 }
  0x1f   : > { %890 = vrot.lane.b32.xlu1 %v22625_v8, %s22485_s23 }
  0x20   : > { %18897 = vmatmul.mubr.msk.f32.vlgmr.msra.gmra.mrb[0].mxu1 %vm399_vm1, %v392_v10  ;;  %18894 = vmatmul.mubr.msk.f32.vlgmr.msra.gmra.mrb[0].mxu0 %vm399_vm1, %v392_v10 }
  0x21   : > { %884 = vrot.lane.b32.xlu0 %v22604_v3, %s22485_s23  ;;  %871 = vmatprep.mubr.f32.mxu1 %v28704_v0 }
  0x22   : > { %800 = vmatprep.mubr.f32.mxu0 %v28704_v0 }
  0x23   : > { %1058 = vrot.lane.b32.xlu1 %v22601_v2, %s22486_s28 }
  0x25   : > { %1056 = vrot.lane.b32.xlu0 %v22613_v5, %s22486_s28 }
  0x27   : > { %1060 = vrot.lane.b32.xlu1 %v22617_v6, %s22486_s28 }
  0x29   : > { %1054 = vrot.lane.b32.xlu0 %v22598_v1, %s22486_s28 }
  0x2b   : > { %1229 = vrot.lane.b32.xlu1 %v22601_v2, %s22487_s29 }
  0x2d   : > { %1227 = vrot.lane.b32.xlu0 %v22613_v5, %s22487_s29 }
  0x2f   : > { %1231 = vrot.lane.b32.xlu1 %v22617_v6, %s22487_s29 }
  0x31   : > { %1225 = vrot.lane.b32.xlu0 %v22598_v1, %s22487_s29 }
  0x33   : > { %1400 = vrot.lane.b32.xlu1 %v22607_v4, %s22487_s29 }
  0x35   : > { %1398 = vrot.lane.b32.xlu0 %v22621_v7, %s22487_s29 }
  0x37   : > { %1402 = vrot.lane.b32.xlu1 %v22625_v8, %s22487_s29 }
  0x39   : > { %1396 = vrot.lane.b32.xlu0 %v22604_v3, %s22487_s29 }
  0x3b   : > { %1570 = vrot.lane.b32.xlu1 %v22601_v2, %s22488_s30 }
  0x3d   : > { %1568 = vrot.lane.b32.xlu0 %v22613_v5, %s22488_s30 }
  0x3f   : > { %1572 = vrot.lane.b32.xlu1 %v22617_v6, %s22488_s30 }
  0x41   : > { %1566 = vrot.lane.b32.xlu0 %v22598_v1, %s22488_s30 }
  0x43   : > { %1741 = vrot.lane.b32.xlu1 %v22607_v4, %s22488_s30 }
  0x45   : > { %1739 = vrot.lane.b32.xlu0 %v22621_v7, %s22488_s30 }
  0x47   : > { %1743 = vrot.lane.b32.xlu1 %v22625_v8, %s22488_s30 }
  0x49   : > { %1737 = vrot.lane.b32.xlu0 %v22604_v3, %s22488_s30  ;;  %s22500_s30 = smov 125  }
  0x4b   : > { %1911 = vrot.lane.b32.xlu1 %v22601_v2, %s22489_s12 }
  0x4d   : > { %1909 = vrot.lane.b32.xlu0 %v22613_v5, %s22489_s12 }
  0x4f   : > { %1913 = vrot.lane.b32.xlu1 %v22617_v6, %s22489_s12 }
  0x51   : > { %1907 = vrot.lane.b32.xlu0 %v22598_v1, %s22489_s12 }
  0x53   : > { %2082 = vrot.lane.b32.xlu1 %v22601_v2, %s22490_s13 }
  0x55   : > { %2080 = vrot.lane.b32.xlu0 %v22613_v5, %s22490_s13 }
  0x57   : > { %2084 = vrot.lane.b32.xlu1 %v22617_v6, %s22490_s13 }
  0x59   : > { %2078 = vrot.lane.b32.xlu0 %v22598_v1, %s22490_s13 }
  0x5b   : > { %2253 = vrot.lane.b32.xlu1 %v22607_v4, %s22490_s13 }
  0x5d   : > { %2251 = vrot.lane.b32.xlu0 %v22621_v7, %s22490_s13 }
  0x5f   : > { %2255 = vrot.lane.b32.xlu1 %v22625_v8, %s22490_s13 }
  0x61   : > { %2249 = vrot.lane.b32.xlu0 %v22604_v3, %s22490_s13 }
  0x63   : > { %2423 = vrot.lane.b32.xlu1 %v22601_v2, %s22491_s14 }
  0x65   : > { %2421 = vrot.lane.b32.xlu0 %v22613_v5, %s22491_s14 }
  0x67   : > { %2425 = vrot.lane.b32.xlu1 %v22617_v6, %s22491_s14 }
  0x69   : > { %2419 = vrot.lane.b32.xlu0 %v22598_v1, %s22491_s14 }
  0x6b   : > { %2594 = vrot.lane.b32.xlu1 %v22607_v4, %s22491_s14 }
  0x6d   : > { %2592 = vrot.lane.b32.xlu0 %v22621_v7, %s22491_s14 }
  0x6f   : > { %2596 = vrot.lane.b32.xlu1 %v22625_v8, %s22491_s14 }
  0x71   : > { %2590 = vrot.lane.b32.xlu0 %v22604_v3, %s22491_s14 }
  0x73   : > { %2764 = vrot.lane.b32.xlu1 %v22601_v2, %s22492_s15 }
  0x75   : > { %2762 = vrot.lane.b32.xlu0 %v22613_v5, %s22492_s15 }
  0x77   : > { %2766 = vrot.lane.b32.xlu1 %v22617_v6, %s22492_s15 }
  0x79   : > { %2760 = vrot.lane.b32.xlu0 %v22598_v1, %s22492_s15 }
  0x7b   : > { %2935 = vrot.lane.b32.xlu1 %v22601_v2, %s22493_s16 }
  0x7d   : > { %2933 = vrot.lane.b32.xlu0 %v22613_v5, %s22493_s16 }
  0x7f   : > { %2937 = vrot.lane.b32.xlu1 %v22617_v6, %s22493_s16 }
  0x81   : > { %2931 = vrot.lane.b32.xlu0 %v22598_v1, %s22493_s16 }
  0x83   : > { %3106 = vrot.lane.b32.xlu1 %v22607_v4, %s22493_s16 }
  0x85   : > { %v714_v11 = vpop.permute.xlu1 %713  ;;  %3104 = vrot.lane.b32.xlu0 %v22621_v7, %s22493_s16 }
  0x87   : > { %3108 = vrot.lane.b32.xlu1 %v22625_v8, %s22493_s16  ;;  %v716_v12 = vpop.permute.xlu0 %715 }
  0x88   : > { %v22786_v18 = vsel %vm721_vm2, %v714_v11, %v716_v12  ;;  %v23011_v11 = vld [vmem:[%s28693_s1 + $0x40] sm:$0x3f] }
  0x89   : > { %v22765_v13 = vpop.permute.xlu1 %719  ;;  %3102 = vrot.lane.b32.xlu0 %v22604_v3, %s22493_s16 }
  0x8a   : > { %18902 = vmatprep.subr.msk.mxu1 %vm403_vm0, %v22765_v13 }
  0x8b   : > { %3276 = vrot.lane.b32.xlu1 %v22601_v2, %s22494_s19  ;;  %v718_v14 = vpop.permute.xlu0 %717 }
  0x8c   : > { %v22775_v15 = vsel %vm721_vm2, %v718_v14, %v22765_v13  ;;  %v22778_v16 = vsel %vm721_vm2, %v716_v12, %v718_v14 }
  0x8d   : > { %v889_v19 = vpop.permute.xlu1 %888  ;;  %3274 = vrot.lane.b32.xlu0 %v22613_v5, %s22494_s19  ;;  %18899 = vmatprep.subr.msk.mxu0 %vm403_vm0, %v22778_v16 }
  0x8e   : > { %18903 = vmatpush1.msk.msra.mxu1 %vm403_vm0, %v22775_v15  ;;  %18900 = vmatpush1.msk.msra.mxu0 %vm403_vm0, %v22786_v18 }
  0x8f   : > { %18904 = vmatmul.mubr.msk.f32.vlgmr.msra.gmra.mrb[0].mxu1 %vm399_vm1, %v22783_v17  ;;  %3278 = vrot.lane.b32.xlu1 %v22617_v6, %s22494_s19  ;;  %v887_v20 = vpop.permute.xlu0 %886 }
  0x90   : > { %18901 = vmatmul.mubr.msk.f32.vlgmr.msra.gmra.mrb[0].mxu0 %vm399_vm1, %v22783_v17  ;;  %v22803_v21 = vsel %vm721_vm2, %v887_v20, %v889_v19  ;;  %1041 = vmatprep.mubr.f32.mxu1 %v28704_v0 }
  0x91   : > { %v22806_v22 = vpop.permute.xlu1 %890  ;;  %3272 = vrot.lane.b32.xlu0 %v22598_v1, %s22494_s19  ;;  %18906 = vmatprep.subr.msk.mxu0 %vm403_vm0, %v22803_v21 }
  0x92   : > { %18909 = vmatprep.subr.msk.mxu1 %vm403_vm0, %v22806_v22  ;;  %v22816_v23 = vsel %vm721_vm2, %v889_v19, %v22806_v22  ;;  %970 = vmatprep.mubr.f32.mxu0 %v28704_v0 }
  0x93   : > { %3447 = vrot.lane.b32.xlu1 %v22607_v4, %s22494_s19  ;;  %18910 = vmatpush1.msk.msra.mxu1 %vm403_vm0, %v22816_v23  ;;  %v885_v24 = vpop.permute.xlu0 %884 }
  0x94   : > { %v22824_v25 = vsel %vm721_vm2, %v885_v24, %v887_v20 }
  0x95   : > { %v1059_v27 = vpop.permute.xlu1 %1058  ;;  %3445 = vrot.lane.b32.xlu0 %v22621_v7, %s22494_s19  ;;  %18907 = vmatpush1.msk.msra.mxu0 %vm403_vm0, %v22824_v25 }
  0x97   : > { %18911 = vmatmul.mubr.msk.f32.vlgmr.msra.gmra.mrb[0].mxu1 %vm399_vm1, %v22829_v26  ;;  %3449 = vrot.lane.b32.xlu1 %v22625_v8, %s22494_s19  ;;  %v1057_v28 = vpop.permute.xlu0 %1056 }
  0x98   : > { %18908 = vmatmul.mubr.msk.f32.vlgmr.msra.gmra.mrb[0].mxu0 %vm399_vm1, %v22829_v26  ;;  %v22842_v29 = vsel %vm1062_vm3, %v1057_v28, %v1059_v27  ;;  %1212 = vmatprep.mubr.f32.mxu1 %v28704_v0 }
  0x99   : > { %v22845_v30 = vpop.permute.xlu1 %1060  ;;  %3443 = vrot.lane.b32.xlu0 %v22604_v3, %s22494_s19  ;;  %18913 = vmatprep.subr.msk.mxu0 %vm403_vm0, %v22842_v29  ;;  %s22496_s19 = smov 64  }
  0x9a   : > { %18916 = vmatprep.subr.msk.mxu1 %vm403_vm0, %v22845_v30  ;;  %v22855_v31 = vsel %vm1062_vm3, %v1059_v27, %v22845_v30  ;;  %1141 = vmatprep.mubr.f32.mxu0 %v28704_v0 }
  0x9b   : > { %3617 = vrot.lane.b32.xlu1 %v22601_v2, %s22495_s26  ;;  %18917 = vmatpush1.msk.msra.mxu1 %vm403_vm0, %v22855_v31  ;;  %v1055_v32 = vpop.permute.xlu0 %1054 }
  0x9c   : > { %v22863_v33 = vsel %vm1062_vm3, %v1055_v32, %v1057_v28  ;;  %v23050_v32 = vld [vmem:[%s28693_s1 + $0x48] sm:$0x3f] }
  0x9d   : > { %v1230_v35 = vpop.permute.xlu1 %1229  ;;  %3615 = vrot.lane.b32.xlu0 %v22613_v5, %s22495_s26  ;;  %18914 = vmatpush1.msk.msra.mxu0 %vm403_vm0, %v22863_v33 }
  0x9f   : > { %18918 = vmatmul.mubr.msk.f32.vlgmr.msra.gmra.mrb[0].mxu1 %vm399_vm1, %v22868_v34  ;;  %3619 = vrot.lane.b32.xlu1 %v22617_v6, %s22495_s26  ;;  %v1228_v36 = vpop.permute.xlu0 %1227 }
  0xa0   : > { %18915 = vmatmul.mubr.msk.f32.vlgmr.msra.gmra.mrb[0].mxu0 %vm399_vm1, %v22868_v34  ;;  %v1235_v37 = vsel %vm1233_vm4, %v1228_v36, %v1230_v35  ;;  %1383 = vmatprep.mubr.f32.mxu1 %v28704_v0 }
  0xa1   : > { %v1232_v38 = vpop.permute.xlu1 %1231  ;;  %3613 = vrot.lane.b32.xlu0 %v22598_v1, %s22495_s26  ;;  %18920 = vmatprep.subr.msk.mxu0 %vm403_vm0, %v1235_v37 }
  0xa2   : > { %v1236_v39 = vsel %vm1233_vm4, %v1230_v35, %v1232_v38  ;;  %18923 = vmatprep.subr.msk.mxu1 %vm403_vm0, %v1232_v38  ;;  %1312 = vmatprep.mubr.f32.mxu0 %v28704_v0 }
  0xa3   : > { %3788 = vrot.lane.b32.xlu1 %v22601_v2, %s22496_s19  ;;  %18924 = vmatpush1.msk.msra.mxu1 %vm403_vm0, %v1236_v39  ;;  %v1226_v40 = vpop.permute.xlu0 %1225 }
  0xa4   : > { %v1234_v41 = vsel %vm1233_vm4, %v1226_v40, %v1228_v36 }
  0xa5   : > { %v1401_v43 = vpop.permute.xlu1 %1400  ;;  %3786 = vrot.lane.b32.xlu0 %v22613_v5, %s22496_s19  ;;  %18921 = vmatpush1.msk.msra.mxu0 %vm403_vm0, %v1234_v41 }
  0xa7   : > { %18925 = vmatmul.mubr.msk.f32.vlgmr.msra.gmra.mrb[0].mxu1 %vm399_vm1, %v22895_v42  ;;  %3790 = vrot.lane.b32.xlu1 %v22617_v6, %s22496_s19  ;;  %v1399_v44 = vpop.permute.xlu0 %1398 }
  0xa8   : > { %18922 = vmatmul.mubr.msk.f32.vlgmr.msra.gmra.mrb[0].mxu0 %vm399_vm1, %v22895_v42  ;;  %v22907_v45 = vsel %vm1233_vm4, %v1399_v44, %v1401_v43  ;;  %1553 = vmatprep.mubr.f32.mxu1 %v28704_v0 }
  0xa9   : > { %v22910_v46 = vpop.permute.xlu1 %1402  ;;  %3784 = vrot.lane.b32.xlu0 %v22598_v1, %s22496_s19  ;;  %18927 = vmatprep.subr.msk.mxu0 %vm403_vm0, %v22907_v45 }
  0xaa   : > { %18930 = vmatprep.subr.msk.mxu1 %vm403_vm0, %v22910_v46  ;;  %v22920_v47 = vsel %vm1233_vm4, %v1401_v43, %v22910_v46  ;;  %1482 = vmatprep.mubr.f32.mxu0 %v28704_v0 }
  0xab   : > { %3959 = vrot.lane.b32.xlu1 %v22607_v4, %s22496_s19  ;;  %18931 = vmatpush1.msk.msra.mxu1 %vm403_vm0, %v22920_v47  ;;  %v1397_v48 = vpop.permute.xlu0 %1396 }
  0xac   : > { %v22928_v49 = vsel %vm1233_vm4, %v1397_v48, %v1399_v44 }
  0xad   : > { %v1571_v51 = vpop.permute.xlu1 %1570  ;;  %3957 = vrot.lane.b32.xlu0 %v22621_v7, %s22496_s19  ;;  %18928 = vmatpush1.msk.msra.mxu0 %vm403_vm0, %v22928_v49 }
  0xaf   : > { %18932 = vmatmul.mubr.msk.f32.vlgmr.msra.gmra.mrb[0].mxu1 %vm399_vm1, %v22933_v50  ;;  %3961 = vrot.lane.b32.xlu1 %v22625_v8, %s22496_s19  ;;  %v1569_v52 = vpop.permute.xlu0 %1568 }
  0xb0   : > { %18929 = vmatmul.mubr.msk.f32.vlgmr.msra.gmra.mrb[0].mxu0 %vm399_vm1, %v22933_v50  ;;  %v22946_v53 = vsel %vm1574_vm5, %v1569_v52, %v1571_v51  ;;  %1724 = vmatprep.mubr.f32.mxu1 %v28704_v0 }
  0xb1   : > { %v22949_v54 = vpop.permute.xlu1 %1572  ;;  %3955 = vrot.lane.b32.xlu0 %v22604_v3, %s22496_s19  ;;  %18934 = vmatprep.subr.msk.mxu0 %vm403_vm0, %v22946_v53 }
  0xb2   : > { %18937 = vmatprep.subr.msk.mxu1 %vm403_vm0, %v22949_v54  ;;  %v22959_v55 = vsel %vm1574_vm5, %v1571_v51, %v22949_v54  ;;  %1653 = vmatprep.mubr.f32.mxu0 %v28704_v0 }
  0xb3   : > { %4129 = vrot.lane.b32.xlu1 %v22601_v2, %s22497_s27  ;;  %18938 = vmatpush1.msk.msra.mxu1 %vm403_vm0, %v22959_v55  ;;  %v1567_v56 = vpop.permute.xlu0 %1566 }
  0xb4   : > { %v22967_v57 = vsel %vm1574_vm5, %v1567_v56, %v1569_v52  ;;  %v23115_v52 = vld [vmem:[%s28693_s1 + $0x58] sm:$0x3f] }
  0xb5   : > { %v1742_v59 = vpop.permute.xlu1 %1741  ;;  %4127 = vrot.lane.b32.xlu0 %v22613_v5, %s22497_s27  ;;  %18935 = vmatpush1.msk.msra.mxu0 %vm403_vm0, %v22967_v57 }
  0xb7   : > { %18939 = vmatmul.mubr.msk.f32.vlgmr.msra.gmra.mrb[0].mxu1 %vm399_vm1, %v22972_v58  ;;  %4131 = vrot.lane.b32.xlu1 %v22617_v6, %s22497_s27  ;;  %v1740_v60 = vpop.permute.xlu0 %1739 }
  0xb8   : > { %18936 = vmatmul.mubr.msk.f32.vlgmr.msra.gmra.mrb[0].mxu0 %vm399_vm1, %v22972_v58  ;;  %v22985_v61 = vsel %vm1574_vm5, %v1740_v60, %v1742_v59  ;;  %1894 = vmatprep.mubr.f32.mxu1 %v28704_v0 }
  0xb9   : > { %v22988_v62 = vpop.permute.xlu1 %1743  ;;  %4125 = vrot.lane.b32.xlu0 %v22598_v1, %s22497_s27  ;;  %18941 = vmatprep.subr.msk.mxu0 %vm403_vm0, %v22985_v61 }
  0xba   : > { %18944 = vmatprep.subr.msk.mxu1 %vm403_vm0, %v22988_v62  ;;  %v22998_v63 = vsel %vm1574_vm5, %v1742_v59, %v22988_v62  ;;  %1823 = vmatprep.mubr.f32.mxu0 %v28704_v0 }
  0xbb   : > { %4300 = vrot.lane.b32.xlu1 %v22607_v4, %s22497_s27  ;;  %18945 = vmatpush1.msk.msra.mxu1 %vm403_vm0, %v22998_v63  ;;  %v1738_v9 = vpop.permute.xlu0 %1737 }
  0xbc   : > { %v23006_v10 = vsel %vm1574_vm5, %v1738_v9, %v1740_v60  ;;  %vm9139_vm5 = vcmask 1014784  }
  0xbd   : > { %v1912_v12 = vpop.permute.xlu1 %1911  ;;  %4298 = vrot.lane.b32.xlu0 %v22621_v7, %s22497_s27  ;;  %18942 = vmatpush1.msk.msra.mxu0 %vm403_vm0, %v23006_v10 }
  0xbf   : > { %18946 = vmatmul.mubr.msk.f32.vlgmr.msra.gmra.mrb[0].mxu1 %vm399_vm1, %v23011_v11  ;;  %4302 = vrot.lane.b32.xlu1 %v22625_v8, %s22497_s27  ;;  %v1910_v14 = vpop.permute.xlu0 %1909 }
  0xc0   : > { %18943 = vmatmul.mubr.msk.f32.vlgmr.msra.gmra.mrb[0].mxu0 %vm399_vm1, %v23011_v11  ;;  %v23024_v19 = vsel %vm1915_vm6, %v1910_v14, %v1912_v12  ;;  %2065 = vmatprep.mubr.f32.mxu1 %v28704_v0 }
  0xc1   : > { %v23027_v20 = vpop.permute.xlu1 %1913  ;;  %4296 = vrot.lane.b32.xlu0 %v22604_v3, %s22497_s27  ;;  %18948 = vmatprep.subr.msk.mxu0 %vm403_vm0, %v23024_v19 }
  0xc2   : > { %18951 = vmatprep.subr.msk.mxu1 %vm403_vm0, %v23027_v20  ;;  %v23037_v24 = vsel %vm1915_vm6, %v1912_v12, %v23027_v20  ;;  %1994 = vmatprep.mubr.f32.mxu0 %v28704_v0 }
  0xc3   : > { %4470 = vrot.lane.b32.xlu1 %v22601_v2, %s22498_s25  ;;  %18952 = vmatpush1.msk.msra.mxu1 %vm403_vm0, %v23037_v24  ;;  %v1908_v27 = vpop.permute.xlu0 %1907 }
  0xc4   : > { %v23045_v28 = vsel %vm1915_vm6, %v1908_v27, %v1910_v14 }
  0xc5   : > { %v2083_v35 = vpop.permute.xlu1 %2082  ;;  %4468 = vrot.lane.b32.xlu0 %v22613_v5, %s22498_s25  ;;  %18949 = vmatpush1.msk.msra.mxu0 %vm403_vm0, %v23045_v28 }
  0xc7   : > { %18953 = vmatmul.mubr.msk.f32.vlgmr.msra.gmra.mrb[0].mxu1 %vm399_vm1, %v23050_v32  ;;  %4472 = vrot.lane.b32.xlu1 %v22617_v6, %s22498_s25  ;;  %v2081_v2 = vpop.permute.xlu0 %2080 }
  0xc8   : > { %18950 = vmatmul.mubr.msk.f32.vlgmr.msra.gmra.mrb[0].mxu0 %vm399_vm1, %v23050_v32  ;;  %v2088_v36 = vsel %vm2086_vm7, %v2081_v2, %v2083_v35  ;;  %2236 = vmatprep.mubr.f32.mxu1 %v28704_v0 }
  0xc9   : > { %v2085_v37 = vpop.permute.xlu1 %2084  ;;  %4466 = vrot.lane.b32.xlu0 %v22598_v1, %s22498_s25  ;;  %18955 = vmatprep.subr.msk.mxu0 %vm403_vm0, %v2088_v36  ;;  %v23077_v1 = vld [vmem:[%s28693_s1 + $0x50] sm:$0x3f] }
  0xca   : > { %v2089_v5 = vsel %vm2086_vm7, %v2083_v35, %v2085_v37  ;;  %18958 = vmatprep.subr.msk.mxu1 %vm403_vm0, %v2085_v37  ;;  %2165 = vmatprep.mubr.f32.mxu0 %v28704_v0  ;;  %v23154_v35 = vld [vmem:[%s28693_s1 + $0x60] sm:$0x3f] }
  0xcb   : > { %18959 = vmatpush1.msk.msra.mxu1 %vm403_vm0, %v2089_v5  ;;  %v2079_v6 = vpop.permute.xlu0 %2078  ;;  %5215 = vrot.lane.b32.xlu1 %v22607_v4, %s22486_s28  ;;  %28771 = vst [vmem:[#allocation2_spill] sm:$0xff] %v23154_v35 }
  0xcc   : > { %v2087_v38 = vsel %vm2086_vm7, %v2079_v6, %v2081_v2 }
  0xcd   : > { %v2254_v39 = vpop.permute.xlu1 %2253  ;;  %18956 = vmatpush1.msk.msra.mxu0 %vm403_vm0, %v2087_v38  ;;  %5213 = vrot.lane.b32.xlu0 %v22621_v7, %s22486_s28 }
  0xcf   : > { %18960 = vmatmul.mubr.msk.f32.vlgmr.msra.gmra.mrb[0].mxu1 %vm399_vm1, %v23077_v1  ;;  %v2252_v40 = vpop.permute.xlu0 %2251  ;;  %5217 = vrot.lane.b32.xlu1 %v22625_v8, %s22486_s28 }
  0xd0   : > { %18957 = vmatmul.mubr.msk.f32.vlgmr.msra.gmra.mrb[0].mxu0 %vm399_vm1, %v23077_v1  ;;  %v23089_v41 = vsel %vm2086_vm7, %v2252_v40, %v2254_v39  ;;  %2406 = vmatprep.mubr.f32.mxu1 %v28704_v0 }
  0xd1   : > { %v23092_v43 = vpop.permute.xlu1 %2255  ;;  %18962 = vmatprep.subr.msk.mxu0 %vm403_vm0, %v23089_v41  ;;  %2335 = vmatprep.mubr.f32.mxu0 %v28704_v0 }
  0xd2   : > { %18965 = vmatprep.subr.msk.mxu1 %vm403_vm0, %v23092_v43  ;;  %v23101_v44 = vsel %vm2086_vm7, %v2254_v39, %v23092_v43  ;;  %5211 = vrot.lane.b32.xlu0 %v22604_v3, %s22486_s28 }
  0xd3   : > { %18966 = vmatpush1.msk.msra.mxu1 %vm403_vm0, %v23101_v44  ;;  %v2250_v48 = vpop.permute.xlu0 %2249  ;;  %5964 = vrot.lane.b32.xlu1 %v22607_v4, %s22489_s12 }
  0xd4   : > { %v23110_v51 = vsel %vm2086_vm7, %v2250_v48, %v2252_v40  ;;  %v23193_v40 = vld [vmem:[%s28693_s1 + $0x68] sm:$0x3f] }
  0xd5   : > { %v2424_v56 = vpop.permute.xlu1 %2423  ;;  %18963 = vmatpush1.msk.msra.mxu0 %vm403_vm0, %v23110_v51  ;;  %28772 = vst [vmem:[#allocation3_spill] sm:$0xff] %v23193_v40 }
  0xd6   : > { %5962 = vrot.lane.b32.xlu0 %v22621_v7, %s22489_s12 }
  0xd7   : > { %18967 = vmatmul.mubr.msk.f32.vlgmr.msra.gmra.mrb[0].mxu1 %vm399_vm1, %v23115_v52  ;;  %v2422_v59 = vpop.permute.xlu0 %2421  ;;  %5966 = vrot.lane.b32.xlu1 %v22625_v8, %s22489_s12 }
  0xd8   : > { %18964 = vmatmul.mubr.msk.f32.vlgmr.msra.gmra.mrb[0].mxu0 %vm399_vm1, %v23115_v52  ;;  %v23128_v60 = vsel %vm2427_vm8, %v2422_v59, %v2424_v56  ;;  %2577 = vmatprep.mubr.f32.mxu1 %v28704_v0 }
  0xd9   : > { %v23131_v9 = vpop.permute.xlu1 %2425  ;;  %18969 = vmatprep.subr.msk.mxu0 %vm403_vm0, %v23128_v60  ;;  %2506 = vmatprep.mubr.f32.mxu0 %v28704_v0 }
  0xda   : > { %18972 = vmatprep.subr.msk.mxu1 %vm403_vm0, %v23131_v9  ;;  %v23140_v12 = vsel %vm2427_vm8, %v2424_v56, %v23131_v9  ;;  %5960 = vrot.lane.b32.xlu0 %v22604_v3, %s22489_s12  ;;  %s22509_s12 = smov 29  }
  0xdb   : > { %18973 = vmatpush1.msk.msra.mxu1 %vm403_vm0, %v23140_v12  ;;  %v2420_v14 = vpop.permute.xlu0 %2419  ;;  %6713 = vrot.lane.b32.xlu1 %v22607_v4, %s22492_s15 }
  0xdc   : > { %v23149_v27 = vsel %vm2427_vm8, %v2420_v14, %v2422_v59 }
  0xdd   : > { %v2595_v2 = vpop.permute.xlu1 %2594  ;;  %18970 = vmatpush1.msk.msra.mxu0 %vm403_vm0, %v23149_v27 }
  0xde   : > { %6711 = vrot.lane.b32.xlu0 %v22621_v7, %s22492_s15 }
  0xdf   : > { %18974 = vmatmul.mubr.msk.f32.vlgmr.msra.gmra.mrb[0].mxu1 %vm399_vm1, %v23154_v35  ;;  %v2593_v36 = vpop.permute.xlu0 %2592  ;;  %6715 = vrot.lane.b32.xlu1 %v22625_v8, %s22492_s15 }
  0xe0   : > { %18971 = vmatmul.mubr.msk.f32.vlgmr.msra.gmra.mrb[0].mxu0 %vm399_vm1, %v23154_v35  ;;  %v23167_v37 = vsel %vm2427_vm8, %v2593_v36, %v2595_v2  ;;  %2747 = vmatprep.mubr.f32.mxu1 %v28704_v0  ;;  %v23257_v35 = vld [vmem:[%s28693_s1 + $0x78] sm:$0x3f] }
  0xe1   : > { %v23170_v5 = vpop.permute.xlu1 %2596  ;;  %18976 = vmatprep.subr.msk.mxu0 %vm403_vm0, %v23167_v37  ;;  %2676 = vmatprep.mubr.f32.mxu0 %v28704_v0  ;;  %28777 = vst [vmem:[#allocation7_spill] sm:$0xff] %v23257_v35 }
  0xe2   : > { %18979 = vmatprep.subr.msk.mxu1 %vm403_vm0, %v23170_v5  ;;  %v23179_v6 = vsel %vm2427_vm8, %v2595_v2, %v23170_v5  ;;  %6709 = vrot.lane.b32.xlu0 %v22604_v3, %s22492_s15 }
  0xe3   : > { %18980 = vmatpush1.msk.msra.mxu1 %vm403_vm0, %v23179_v6  ;;  %v2591_v38 = vpop.permute.xlu0 %2590  ;;  %7462 = vrot.lane.b32.xlu1 %v22607_v4, %s22495_s26 }
  0xe4   : > { %v23188_v39 = vsel %vm2427_vm8, %v2591_v38, %v2593_v36 }
  0xe5   : > { %v2765_v48 = vpop.permute.xlu1 %2764  ;;  %18977 = vmatpush1.msk.msra.mxu0 %vm403_vm0, %v23188_v39 }
  0xe6   : > { %7460 = vrot.lane.b32.xlu0 %v22621_v7, %s22495_s26 }
  0xe7   : > { %18981 = vmatmul.mubr.msk.f32.vlgmr.msra.gmra.mrb[0].mxu1 %vm399_vm1, %v23193_v40  ;;  %v2763_v56 = vpop.permute.xlu0 %2762  ;;  %7464 = vrot.lane.b32.xlu1 %v22625_v8, %s22495_s26 }
  0xe8   : > { %18978 = vmatmul.mubr.msk.f32.vlgmr.msra.gmra.mrb[0].mxu0 %vm399_vm1, %v23193_v40  ;;  %v23206_v59 = vsel %vm2768_vm9, %v2763_v56, %v2765_v48  ;;  %2918 = vmatprep.mubr.f32.mxu1 %v28704_v0 }
  0xe9   : > { %v23209_v14 = vpop.permute.xlu1 %2766  ;;  %18983 = vmatprep.subr.msk.mxu0 %vm403_vm0, %v23206_v59  ;;  %2847 = vmatprep.mubr.f32.mxu0 %v28704_v0  ;;  %v23232_v0 = vld [vmem:[%s28693_s1 + $0x70] sm:$0x3f] }
  0xea   : > { %18986 = vmatprep.subr.msk.mxu1 %vm403_vm0, %v23209_v14  ;;  %v23218_v2 = vsel %vm2768_vm9, %v2765_v48, %v23209_v14  ;;  %7458 = vrot.lane.b32.xlu0 %v22604_v3, %s22495_s26  ;;  %28775 = vst [vmem:[#allocation6_spill] sm:$0xff] %v23232_v0  ;;  %s22503_s26 = smov 92  }
  0xeb   : > { %28773 = vst [vmem:[#allocation4_spill] sm:$0xff] %v23218_v2  ;;  %18987 = vmatpush1.msk.msra.mxu1 %vm403_vm0, %v23218_v2  ;;  %v2761_v36 = vpop.permute.xlu0 %2760  ;;  %8211 = vrot.lane.b32.xlu1 %v22607_v4, %s22498_s25 }
  0xec   : > { %v23227_v38 = vsel %vm2768_vm9, %v2761_v36, %v2763_v56  ;;  %v28776_v36 = vmov 0.0  }
  0xed   : > { %28774 = vst [vmem:[#allocation5_spill] sm:$0xff] %v23227_v38  ;;  %v2936_v48 = vpop.permute.xlu1 %2935  ;;  %18984 = vmatpush1.msk.msra.mxu0 %vm403_vm0, %v23227_v38 }
  0xee   : > { %8209 = vrot.lane.b32.xlu0 %v22621_v7, %s22498_s25 }
  0xef   : > { %18988 = vmatmul.mubr.msk.f32.vlgmr.msra.gmra.mrb[0].mxu1 %vm399_vm1, %v23232_v0  ;;  %v2934_v4 = vpop.permute.xlu0 %2933  ;;  %8213 = vrot.lane.b32.xlu1 %v22625_v8, %s22498_s25 }
  0xf0   : > { %18985 = vmatmul.mubr.msk.f32.vlgmr.msra.gmra.mrb[0].mxu0 %vm399_vm1, %v23232_v0  ;;  %v2941_v56 = vsel %vm2939_vm10, %v2934_v4, %v2936_v48  ;;  %3089 = vmatprep.mubr.f32.mxu1 %v28776_v36 }
  0xf1   : > { %v2938_v40 = vpop.permute.xlu1 %2937  ;;  %18990 = vmatprep.subr.msk.mxu0 %vm403_vm0, %v2941_v56  ;;  %3018 = vmatprep.mubr.f32.mxu0 %v28776_v36 }
  0xf2   : > { %v2942_v38 = vsel %vm2939_vm10, %v2936_v48, %v2938_v40  ;;  %18993 = vmatprep.subr.msk.mxu1 %vm403_vm0, %v2938_v40  ;;  %8207 = vrot.lane.b32.xlu0 %v22604_v3, %s22498_s25 }
  0xf3   : > { %18994 = vmatpush1.msk.msra.mxu1 %vm403_vm0, %v2942_v38  ;;  %v2932_v2 = vpop.permute.xlu0 %2931 }
  0xf4   : > { %v2940_v0 = vsel %vm2939_vm10, %v2932_v2, %v2934_v4  ;;  %v23287_v4 = vld [vmem:[%s28693_s1 + $0x80] sm:$0x3f] }
  0xf5   : > { %v3107_v56 = vpop.permute.xlu1 %3106  ;;  %18991 = vmatpush1.msk.msra.mxu0 %vm403_vm0, %v2940_v0  ;;  %28782 = vst [vmem:[#allocation12_spill] sm:$0xff] %v23287_v4 }
  0xf7   : > { %18995 = vmatmul.mubr.msk.f32.vlgmr.msra.gmra.mrb[0].mxu1 %vm399_vm1, %v23257_v35  ;;  %v3105_v40 = vpop.permute.xlu0 %3104 }
  0xf8   : > { %18992 = vmatmul.mubr.msk.f32.vlgmr.msra.gmra.mrb[0].mxu0 %vm399_vm1, %v23257_v35  ;;  %v23265_v3 = vsel %vm2939_vm10, %v3105_v40, %v3107_v56  ;;  %3259 = vmatprep.mubr.f32.mxu1 %v28776_v36 }
  0xf9   : > { %28778 = vst [vmem:[#allocation8_spill] sm:$0xff] %v23265_v3  ;;  %v23268_v2 = vpop.permute.xlu1 %3108  ;;  %18997 = vmatprep.subr.msk.mxu0 %vm403_vm0, %v23265_v3  ;;  %3188 = vmatprep.mubr.f32.mxu0 %v28776_v36 }
  0xfa   : > { %28779 = vst [vmem:[#allocation9_spill] sm:$0xff] %v23268_v2  ;;  %19000 = vmatprep.subr.msk.mxu1 %vm403_vm0, %v23268_v2  ;;  %v23277_v0 = vsel %vm2939_vm10, %v3107_v56, %v23268_v2  ;;  %v23383_v2 = vld [vmem:[%s28693_s1 + $0x98] sm:$0x3f] }
  0xfb   : > { %28780 = vst [vmem:[#allocation10_spill] sm:$0xff] %v23277_v0  ;;  %19001 = vmatpush1.msk.msra.mxu1 %vm403_vm0, %v23277_v0  ;;  %v3103_v38 = vpop.permute.xlu0 %3102  ;;  %28797 = vst [vmem:[#allocation27_spill] sm:$0xff] %v23383_v2 }
  0xfc   : > { %v23282_v48 = vsel %vm2939_vm10, %v3103_v38, %v3105_v40  ;;  %vm11138_vm10 = vcmask 261120  }
  0xfd   : > { %28781 = vst [vmem:[#allocation11_spill] sm:$0xff] %v23282_v48  ;;  %v3277_v35 = vpop.permute.xlu1 %3276  ;;  %18998 = vmatpush1.msk.msra.mxu0 %vm403_vm0, %v23282_v48 }
  0xff   : > { %19002 = vmatmul.mubr.msk.f32.vlgmr.msra.gmra.mrb[0].mxu1 %vm399_vm1, %v23287_v4  ;;  %v3275_v56 = vpop.permute.xlu0 %3274 }
 0x100   : > { %18999 = vmatmul.mubr.msk.f32.vlgmr.msra.gmra.mrb[0].mxu0 %vm399_vm1, %v23287_v4  ;;  %v23296_v40 = vsel %vm3280_vm11, %v3275_v56, %v3277_v35  ;;  %3430 = vmatprep.mubr.f32.mxu1 %v28776_v36 }
 0x101   : > { %28783 = vst [vmem:[#allocation13_spill] sm:$0xff] %v23296_v40  ;;  %v23299_v38 = vpop.permute.xlu1 %3278  ;;  %19004 = vmatprep.subr.msk.mxu0 %vm403_vm0, %v23296_v40  ;;  %3359 = vmatprep.mubr.f32.mxu0 %v28776_v36  ;;  %v23318_v40 = vld [vmem:[%s28693_s1 + $0x88] sm:$0x3f] }
 0x102   : > { %28784 = vst [vmem:[#allocation14_spill] sm:$0xff] %v23299_v38  ;;  %19007 = vmatprep.subr.msk.mxu1 %vm403_vm0, %v23299_v38  ;;  %v23308_v48 = vsel %vm3280_vm11, %v3277_v35, %v23299_v38  ;;  %28787 = vst [vmem:[#allocation17_spill] sm:$0xff] %v23318_v40 }
 0x103   : > { %28785 = vst [vmem:[#allocation15_spill] sm:$0xff] %v23308_v48  ;;  %19008 = vmatpush1.msk.msra.mxu1 %vm403_vm0, %v23308_v48  ;;  %v3273_v4 = vpop.permute.xlu0 %3272 }
 0x104   : > { %v23313_v0 = vsel %vm3280_vm11, %v3273_v4, %v3275_v56 }
 0x105   : > { %28786 = vst [vmem:[#allocation16_spill] sm:$0xff] %v23313_v0  ;;  %v3448_v3 = vpop.permute.xlu1 %3447  ;;  %19005 = vmatpush1.msk.msra.mxu0 %vm403_vm0, %v23313_v0 }
 0x107   : > { %19009 = vmatmul.mubr.msk.f32.vlgmr.msra.gmra.mrb[0].mxu1 %vm399_vm1, %v23318_v40  ;;  %v3446_v35 = vpop.permute.xlu0 %3445 }
 0x108   : > { %19006 = vmatmul.mubr.msk.f32.vlgmr.msra.gmra.mrb[0].mxu0 %vm399_vm1, %v23318_v40  ;;  %v23327_v48 = vsel %vm3280_vm11, %v3446_v35, %v3448_v3  ;;  %3600 = vmatprep.mubr.f32.mxu1 %v28776_v36 }
 0x109   : > { %28788 = vst [vmem:[#allocation18_spill] sm:$0xff] %v23327_v48  ;;  %v23330_v4 = vpop.permute.xlu1 %3449  ;;  %19011 = vmatprep.subr.msk.mxu0 %vm403_vm0, %v23327_v48  ;;  %3529 = vmatprep.mubr.f32.mxu0 %v28776_v36  ;;  %v23349_v48 = vld [vmem:[%s28693_s1 + $0x90] sm:$0x3f] }
 0x10a   : > { %28789 = vst [vmem:[#allocation19_spill] sm:$0xff] %v23330_v4  ;;  %19014 = vmatprep.subr.msk.mxu1 %vm403_vm0, %v23330_v4  ;;  %v23339_v56 = vsel %vm3280_vm11, %v3448_v3, %v23330_v4  ;;  %28792 = vst [vmem:[#allocation22_spill] sm:$0xff] %v23349_v48  ;;  %v22499_v4 = vmov 0  }
 0x10b   : > { %28790 = vst [vmem:[#allocation20_spill] sm:$0xff] %v23339_v56  ;;  %19015 = vmatpush1.msk.msra.mxu1 %vm403_vm0, %v23339_v56  ;;  %v3444_v40 = vpop.permute.xlu0 %3443  ;;  %22297 = vset.pattern.permute.xlu0 %v22499_v4  ;;  %v8372_v56 = vld [vmem:[%s28694_s2] sm:$0x3f] }
 0x10c   : > { %v23344_v0 = vsel %vm3280_vm11, %v3444_v40, %v3446_v35  ;;  %22298 = vset.pattern.permute.xlu1 %v22499_v4  ;;  %8375 = vperm.xlu0 %22297, %v8372_v56   ;;  %vm10953_vm11 = vcmask 490496  }
 0x10d   : > { %28791 = vst [vmem:[#allocation21_spill] sm:$0xff] %v23344_v0  ;;  %v3618_v38 = vpop.permute.xlu1 %3617  ;;  %19012 = vmatpush1.msk.msra.mxu0 %vm403_vm0, %v23344_v0 }
 0x10f   : > { %19016 = vmatmul.mubr.msk.f32.vlgmr.msra.gmra.mrb[0].mxu1 %vm399_vm1, %v23349_v48  ;;  %v3616_v3 = vpop.permute.xlu0 %3615 }
 0x110   : > { %19013 = vmatmul.mubr.msk.f32.vlgmr.msra.gmra.mrb[0].mxu0 %vm399_vm1, %v23349_v48  ;;  %v23358_v40 = vsel %vm3621_vm12, %v3616_v3, %v3618_v38  ;;  %3771 = vmatprep.mubr.f32.mxu1 %v28776_v36 }
 0x111   : > { %28793 = vst [vmem:[#allocation23_spill] sm:$0xff] %v23358_v40  ;;  %v23361_v35 = vpop.permute.xlu1 %3619  ;;  %19018 = vmatprep.subr.msk.mxu0 %vm403_vm0, %v23358_v40  ;;  %3700 = vmatprep.mubr.f32.mxu0 %v28776_v36 }
 0x112   : > { %28794 = vst [vmem:[#allocation24_spill] sm:$0xff] %v23361_v35  ;;  %19021 = vmatprep.subr.msk.mxu1 %vm403_vm0, %v23361_v35  ;;  %v23370_v0 = vsel %vm3621_vm12, %v3618_v38, %v23361_v35 }
 0x113   : > { %28795 = vst [vmem:[#allocation25_spill] sm:$0xff] %v23370_v0  ;;  %19022 = vmatpush1.msk.msra.mxu1 %vm403_vm0, %v23370_v0  ;;  %v3614_v48 = vpop.permute.xlu0 %3613 }
 0x114   : > { %v23378_v40 = vsel %vm3621_vm12, %v3614_v48, %v3616_v3 }
 0x115   : > { %28796 = vst [vmem:[#allocation26_spill] sm:$0xff] %v23378_v40  ;;  %v3789_v38 = vpop.permute.xlu1 %3788  ;;  %19019 = vmatpush1.msk.msra.mxu0 %vm403_vm0, %v23378_v40 }
 0x117   : > { %19023 = vmatmul.mubr.msk.f32.vlgmr.msra.gmra.mrb[0].mxu1 %vm399_vm1, %v23383_v2  ;;  %v3787_v4 = vpop.permute.xlu0 %3786 }
 0x118   : > { %19020 = vmatmul.mubr.msk.f32.vlgmr.msra.gmra.mrb[0].mxu0 %vm399_vm1, %v23383_v2  ;;  %v3794_v48 = vsel %vm3792_vm13, %v3787_v4, %v3789_v38  ;;  %3942 = vmatprep.mubr.f32.mxu1 %v28776_v36  ;;  %v23402_v2 = vld [vmem:[%s28693_s1 + $0xa0] sm:$0x3f] }
 0x119   : > { %v3791_v3 = vpop.permute.xlu1 %3790  ;;  %19025 = vmatprep.subr.msk.mxu0 %vm403_vm0, %v3794_v48  ;;  %3871 = vmatprep.mubr.f32.mxu0 %v28776_v36  ;;  %28798 = vst [vmem:[#allocation28_spill] sm:$0xff] %v23402_v2 }
 0x11a   : > { %v3795_v56 = vsel %vm3792_vm13, %v3789_v38, %v3791_v3  ;;  %19028 = vmatprep.subr.msk.mxu1 %vm403_vm0, %v3791_v3 }
 0x11b   : > { %19029 = vmatpush1.msk.msra.mxu1 %vm403_vm0, %v3795_v56  ;;  %v3785_v40 = vpop.permute.xlu0 %3784  ;;  %v23432_v56 = vld [vmem:[%s28693_s1 + $0xa8] sm:$0x3f] }
 0x11c   : > { %v3793_v0 = vsel %vm3792_vm13, %v3785_v40, %v3787_v4  ;;  %28802 = vst [vmem:[#allocation32_spill] sm:$0xff] %v23432_v56 }
 0x11d   : > { %v3960_v35 = vpop.permute.xlu1 %3959  ;;  %19026 = vmatpush1.msk.msra.mxu0 %vm403_vm0, %v3793_v0 }
 0x11f   : > { %19030 = vmatmul.mubr.msk.f32.vlgmr.msra.gmra.mrb[0].mxu1 %vm399_vm1, %v23402_v2  ;;  %v3958_v48 = vpop.permute.xlu0 %3957 }
 0x120   : > { %19027 = vmatmul.mubr.msk.f32.vlgmr.msra.gmra.mrb[0].mxu0 %vm399_vm1, %v23402_v2  ;;  %v23410_v38 = vsel %vm3792_vm13, %v3958_v48, %v3960_v35  ;;  %4112 = vmatprep.mubr.f32.mxu1 %v28776_v36 }
 0x121   : > { %28799 = vst [vmem:[#allocation29_spill] sm:$0xff] %v23410_v38  ;;  %v23413_v40 = vpop.permute.xlu1 %3961  ;;  %19032 = vmatprep.subr.msk.mxu0 %vm403_vm0, %v23410_v38  ;;  %4041 = vmatprep.mubr.f32.mxu0 %v28776_v36 }
 0x122   : > { %19035 = vmatprep.subr.msk.mxu1 %vm403_vm0, %v23413_v40  ;;  %v23422_v0 = vsel %vm3792_vm13, %v3960_v35, %v23413_v40 }
 0x123   : > { %28800 = vst [vmem:[#allocation30_spill] sm:$0xff] %v23422_v0  ;;  %19036 = vmatpush1.msk.msra.mxu1 %vm403_vm0, %v23422_v0  ;;  %v3956_v4 = vpop.permute.xlu0 %3955 }
 0x124   : > { %v23427_v3 = vsel %vm3792_vm13, %v3956_v4, %v3958_v48 }
 0x125   : > { %28801 = vst [vmem:[#allocation31_spill] sm:$0xff] %v23427_v3  ;;  %v4130_v2 = vpop.permute.xlu1 %4129  ;;  %19033 = vmatpush1.msk.msra.mxu0 %vm403_vm0, %v23427_v3 }
 0x127   : > { %19037 = vmatmul.mubr.msk.f32.vlgmr.msra.gmra.mrb[0].mxu1 %vm399_vm1, %v23432_v56  ;;  %v4128_v35 = vpop.permute.xlu0 %4127 }
 0x128   : > { %19034 = vmatmul.mubr.msk.f32.vlgmr.msra.gmra.mrb[0].mxu0 %vm399_vm1, %v23432_v56  ;;  %v23441_v48 = vsel %vm4133_vm14, %v4128_v35, %v4130_v2  ;;  %4283 = vmatprep.mubr.f32.mxu1 %v28776_v36 }
 0x129   : > { %28803 = vst [vmem:[#allocation33_spill] sm:$0xff] %v23441_v48  ;;  %v23444_v4 = vpop.permute.xlu1 %4131  ;;  %19039 = vmatprep.subr.msk.mxu0 %vm403_vm0, %v23441_v48  ;;  %4212 = vmatprep.mubr.f32.mxu0 %v28776_v36  ;;  %v23463_v48 = vld [vmem:[%s28693_s1 + $0xb0] sm:$0x3f] }
 0x12a   : > { %28804 = vst [vmem:[#allocation34_spill] sm:$0xff] %v23444_v4  ;;  %19042 = vmatprep.subr.msk.mxu1 %vm403_vm0, %v23444_v4  ;;  %v23453_v3 = vsel %vm4133_vm14, %v4130_v2, %v23444_v4  ;;  %28807 = vst [vmem:[#allocation37_spill] sm:$0xff] %v23463_v48 }
 0x12b   : > { %28805 = vst [vmem:[#allocation35_spill] sm:$0xff] %v23453_v3  ;;  %19043 = vmatpush1.msk.msra.mxu1 %vm403_vm0, %v23453_v3  ;;  %v4126_v56 = vpop.permute.xlu0 %4125 }
 0x12c   : > { %v23458_v0 = vsel %vm4133_vm14, %v4126_v56, %v4128_v35 }
 0x12d   : > { %28806 = vst [vmem:[#allocation36_spill] sm:$0xff] %v23458_v0  ;;  %v4301_v38 = vpop.permute.xlu1 %4300  ;;  %19040 = vmatpush1.msk.msra.mxu0 %vm403_vm0, %v23458_v0 }
 0x12f   : > { %19044 = vmatmul.mubr.msk.f32.vlgmr.msra.gmra.mrb[0].mxu1 %vm399_vm1, %v23463_v48  ;;  %v4299_v2 = vpop.permute.xlu0 %4298 }
 0x130   : > { %19041 = vmatmul.mubr.msk.f32.vlgmr.msra.gmra.mrb[0].mxu0 %vm399_vm1, %v23463_v48  ;;  %v23472_v3 = vsel %vm4133_vm14, %v4299_v2, %v4301_v38  ;;  %4453 = vmatprep.mubr.f32.mxu1 %v28776_v36 }
 0x131   : > { %28808 = vst [vmem:[#allocation38_spill] sm:$0xff] %v23472_v3  ;;  %v23475_v56 = vpop.permute.xlu1 %4302  ;;  %19046 = vmatprep.subr.msk.mxu0 %vm403_vm0, %v23472_v3  ;;  %4382 = vmatprep.mubr.f32.mxu0 %v28776_v36  ;;  %v23494_v3 = vld [vmem:[%s28693_s1 + $0xb8] sm:$0x3f] }
 0x132   : > { %19049 = vmatprep.subr.msk.mxu1 %vm403_vm0, %v23475_v56  ;;  %v23484_v35 = vsel %vm4133_vm14, %v4301_v38, %v23475_v56  ;;  %28811 = vst [vmem:[#allocation41_spill] sm:$0xff] %v23494_v3 }
 0x133   : > { %28809 = vst [vmem:[#allocation39_spill] sm:$0xff] %v23484_v35  ;;  %19050 = vmatpush1.msk.msra.mxu1 %vm403_vm0, %v23484_v35  ;;  %v4297_v48 = vpop.permute.xlu0 %4296 }
 0x134   : > { %v23489_v0 = vsel %vm4133_vm14, %v4297_v48, %v4299_v2 }
 0x135   : > { %28810 = vst [vmem:[#allocation40_spill] sm:$0xff] %v23489_v0  ;;  %v4471_v4 = vpop.permute.xlu1 %4470  ;;  %19047 = vmatpush1.msk.msra.mxu0 %vm403_vm0, %v23489_v0 }
 0x137   : > { %19051 = vmatmul.mubr.msk.f32.vlgmr.msra.gmra.mrb[0].mxu1 %vm399_vm1, %v23494_v3  ;;  %v4469_v38 = vpop.permute.xlu0 %4468 }
 0x138   : > { %19048 = vmatmul.mubr.msk.f32.vlgmr.msra.gmra.mrb[0].mxu0 %vm399_vm1, %v23494_v3  ;;  %v23503_v48 = vsel %vm4474_vm15, %v4469_v38, %v4471_v4  ;;  %4624 = vmatprep.mubr.f32.mxu1 %v28776_v36 }
 0x139   : > { %28812 = vst [vmem:[#allocation42_spill] sm:$0xff] %v23503_v48  ;;  %v23506_v2 = vpop.permute.xlu1 %4472  ;;  %19053 = vmatprep.subr.msk.mxu0 %vm403_vm0, %v23503_v48  ;;  %4553 = vmatprep.mubr.f32.mxu0 %v28776_v36  ;;  %v23527_v48 = vld [vmem:[%s28693_s1 + $0xc0] sm:$0x3f] }
 0x13a   : > { %19056 = vmatprep.subr.msk.mxu1 %vm403_vm0, %v23506_v2  ;;  %v23515_v0 = vsel %vm4474_vm15, %v4471_v4, %v23506_v2 }
 0x13b   : > { %19057 = vmatpush1.msk.msra.mxu1 %vm403_vm0, %v23515_v0  ;;  %v4467_v3 = vpop.permute.xlu0 %4466 }
 0x13c   : > { %v23520_v35 = vsel %vm4474_vm15, %v4467_v3, %v4469_v38  ;;  %19062 = vmatprep.subr.msk.mxu1 %vm403_vm0, %v22765_v13  ;;  %v22443_v13 = vld [vmem:[%s28693_s1 + $0x8] sm:$0x3f]  ;;  %v28837_v38 = vld [vmem:[#allocation22_spill] sm:$0xff] }
 0x13d   : > { %19054 = vmatpush1.msk.msra.mxu0 %vm403_vm0, %v23520_v35 }
 0x13e   : > { %19059 = vmatprep.subr.msk.mxu0 %vm403_vm0, %v22778_v16  ;;  %v22445_v16 = vld [vmem:[%s22595_s22 + $0x10] sm:$0x77] }
 0x13f   : > { %19058 = vmatmul.mubr.msk.f32.vlgmr.msra.gmra.mrb[0].mxu1 %vm399_vm1, %v23527_v48 }
 0x140   : > { %19063 = vmatpush1.msk.msra.mxu1 %vm403_vm0, %v22775_v15  ;;  %19055 = vmatmul.mubr.msk.f32.vlgmr.msra.gmra.mrb[0].mxu0 %vm399_vm1, %v23527_v48  ;;  %v22444_v15 = vld [vmem:[%s22595_s22 + $0x18] sm:$0x77]  ;;  %s22508_s22 = smov 30  }
 0x141   : > { %19060 = vmatpush1.msk.msra.mxu0 %vm403_vm0, %v22786_v18  ;;  %4770 = vmatprep.mubr.f32.mxu1 %v28776_v36  ;;  %v5214_v18 = vpop.permute.xlu0 %5213 }
 0x142   : > { %19068 = vmatprep.subr.msk.mxu1 %vm403_vm0, %v22625_v8  ;;  %4699 = vmatprep.mubr.f32.mxu0 %v28776_v36  ;;  %v5216_v8 = vpop.permute.xlu1 %5215 }
 0x143   : > { %19064 = vmatmul.mubr.msk.f32.vlgmr.msra.gmra.mrb[2].mxu1 %vm399_vm1, %v22443_v13  ;;  %19065 = vmatprep.subr.msk.mxu0 %vm403_vm0, %v22621_v7  ;;  %v22446_v7 = vld [vmem:[%s28693_s1] sm:$0x3f] }
 0x144   : > { %19069 = vmatpush1.msk.msra.mxu1 %vm403_vm0, %v22444_v15  ;;  %19061 = vmatmul.mubr.msk.f32.vlgmr.msra.gmra.mrb[2].mxu0 %vm399_vm1, %v22443_v13  ;;  %v28838_v13 = vld [vmem:[#allocation29_spill] sm:$0xff]  ;;  %v28839_v15 = vld [vmem:[#allocation27_spill] sm:$0xff] }
 0x145   : > { %19066 = vmatpush1.msk.msra.mxu0 %vm403_vm0, %v22445_v16  ;;  %19074 = vmatprep.subr.msk.mxu1 %vm403_vm0, %v22806_v22  ;;  %v5220_v22 = vsel %vm1062_vm3, %v5214_v18, %v5216_v8  ;;  %v28840_v16 = vld [vmem:[#allocation30_spill] sm:$0xff] }
 0x146   : > { %19071 = vmatprep.subr.msk.mxu0 %vm403_vm0, %v22803_v21  ;;  %4912 = vmatprep.mubr.f32.mxu1 %v28776_v36  ;;  %v5218_v21 = vpop.permute.xlu1 %5217 }
 0x147   : > { %4841 = vmatprep.mubr.f32.mxu0 %v28776_v36 }
 0x14b   : > { %19070 = vmatmul.mubr.msk.f32.vlgmr.msra.gmra.mrb[2].mxu1 %vm399_vm1, %v22446_v7 }
 0x14c   : > { %19075 = vmatpush1.msk.msra.mxu1 %vm403_vm0, %v22816_v23  ;;  %19067 = vmatmul.mubr.msk.f32.vlgmr.msra.gmra.mrb[2].mxu0 %vm399_vm1, %v22446_v7  ;;  %v5212_v23 = vpop.permute.xlu0 %5211  ;;  %v28841_v7 = vld [vmem:[#allocation31_spill] sm:$0xff] }
 0x14d   : > { %19072 = vmatpush1.msk.msra.mxu0 %vm403_vm0, %v22824_v25  ;;  %19080 = vmatprep.subr.msk.mxu1 %vm403_vm0, %v22845_v30  ;;  %v5221_v25 = vsel %vm1062_vm3, %v5216_v8, %v5218_v21  ;;  %v28843_v8 = vld [vmem:[#allocation33_spill] sm:$0xff] }
 0x14e   : > { %19077 = vmatprep.subr.msk.mxu0 %vm403_vm0, %v22842_v29  ;;  %5054 = vmatprep.mubr.f32.mxu1 %v28776_v36  ;;  %v5219_v29 = vsel %vm1062_vm3, %v5212_v23, %v5214_v18  ;;  %v28844_v18 = vld [vmem:[#allocation28_spill] sm:$0xff]  ;;  %v28847_v23 = vld [vmem:[#allocation38_spill] sm:$0xff] }
 0x14f   : > { %4983 = vmatprep.mubr.f32.mxu0 %v28776_v36 }
 0x153   : > { %19076 = vmatmul.mubr.msk.f32.vlgmr.msra.gmra.mrb[2].mxu1 %vm399_vm1, %v22783_v17 }
 0x154   : > { %19081 = vmatpush1.msk.msra.mxu1 %vm403_vm0, %v22855_v31  ;;  %19073 = vmatmul.mubr.msk.f32.vlgmr.msra.gmra.mrb[2].mxu0 %vm399_vm1, %v22783_v17  ;;  %v5965_v17 = vpop.permute.xlu1 %5964 }
 0x155   : > { %19078 = vmatpush1.msk.msra.mxu0 %vm403_vm0, %v22863_v33  ;;  %5200 = vmatprep.mubr.f32.mxu1 %v28776_v36 }
 0x156   : > { %19086 = vmatprep.subr.msk.mxu1 %vm403_vm0, %v5218_v21  ;;  %5129 = vmatprep.mubr.f32.mxu0 %v28776_v36  ;;  %v28845_v21 = vld [vmem:[#allocation35_spill] sm:$0xff] }
 0x157   : > { %19083 = vmatprep.subr.msk.mxu0 %vm403_vm0, %v5220_v22  ;;  %v28846_v22 = vld [vmem:[#allocation36_spill] sm:$0xff] }
 0x158   : > { %v5967_v30 = vpop.permute.xlu1 %5966 }
 0x15b   : > { %19082 = vmatmul.mubr.msk.f32.vlgmr.msra.gmra.mrb[2].mxu1 %vm399_vm1, %v22829_v26 }
 0x15c   : > { %19087 = vmatpush1.msk.msra.mxu1 %vm403_vm0, %v5221_v25  ;;  %19079 = vmatmul.mubr.msk.f32.vlgmr.msra.gmra.mrb[2].mxu0 %vm399_vm1, %v22829_v26  ;;  %v5963_v26 = vpop.permute.xlu0 %5962  ;;  %v28848_v25 = vld [vmem:[#allocation32_spill] sm:$0xff] }
 0x15d   : > { %19092 = vmatprep.subr.msk.mxu1 %vm403_vm0, %v22910_v46  ;;  %19084 = vmatpush1.msk.msra.mxu0 %vm403_vm0, %v5219_v29  ;;  %v5969_v31 = vsel %vm1915_vm6, %v5963_v26, %v5965_v17  ;;  %v28849_v29 = vld [vmem:[#allocation39_spill] sm:$0xff] }
 0x15e   : > { %19089 = vmatprep.subr.msk.mxu0 %vm403_vm0, %v22907_v45  ;;  %5365 = vmatprep.mubr.f32.mxu1 %v28776_v36  ;;  %v6714_v45 = vpop.permute.xlu1 %6713 }
 0x15f   : > { %5294 = vmatprep.mubr.f32.mxu0 %v28776_v36 }
 0x160   : > { %v5961_v33 = vpop.permute.xlu0 %5960 }
 0x163   : > { %19088 = vmatmul.mubr.msk.f32.vlgmr.msra.gmra.mrb[2].mxu1 %vm399_vm1, %v22868_v34 }
 0x164   : > { %19093 = vmatpush1.msk.msra.mxu1 %vm403_vm0, %v22920_v47  ;;  %19085 = vmatmul.mubr.msk.f32.vlgmr.msra.gmra.mrb[2].mxu0 %vm399_vm1, %v22868_v34  ;;  %v5970_v34 = vsel %vm1915_vm6, %v5965_v17, %v5967_v30  ;;  %v6712_v46 = vpop.permute.xlu0 %6711  ;;  %v28813_v47 = vld [vmem:[#allocation2_spill] sm:$0xff]  ;;  %v28850_v17 = vld [vmem:[#allocation40_spill] sm:$0xff] }
 0x165   : > { %19090 = vmatpush1.msk.msra.mxu0 %vm403_vm0, %v22928_v49  ;;  %19098 = vmatprep.subr.msk.mxu1 %vm403_vm0, %v22949_v54  ;;  %v6716_v49 = vpop.permute.xlu1 %6715  ;;  %v28815_v54 = vld [vmem:[#allocation5_spill] sm:$0xff] }
 0x166   : > { %19095 = vmatprep.subr.msk.mxu0 %vm403_vm0, %v22946_v53  ;;  %5511 = vmatprep.mubr.f32.mxu1 %v28776_v36  ;;  %v6718_v53 = vsel %vm2768_vm9, %v6712_v46, %v6714_v45 }
 0x167   : > { %5440 = vmatprep.mubr.f32.mxu0 %v28776_v36 }
 0x16b   : > { %19094 = vmatmul.mubr.msk.f32.vlgmr.msra.gmra.mrb[2].mxu1 %vm399_vm1, %v22895_v42 }
 0x16c   : > { %19099 = vmatpush1.msk.msra.mxu1 %vm403_vm0, %v22959_v55  ;;  %19091 = vmatmul.mubr.msk.f32.vlgmr.msra.gmra.mrb[2].mxu0 %vm399_vm1, %v22895_v42  ;;  %v5968_v42 = vsel %vm1915_vm6, %v5961_v33, %v5963_v26  ;;  %v6710_v55 = vpop.permute.xlu0 %6709  ;;  %v28851_v26 = vld [vmem:[#allocation42_spill] sm:$0xff]  ;;  %vm9864_vm6 = vcmask 760832  }
 0x16d   : > { %19096 = vmatpush1.msk.msra.mxu0 %vm403_vm0, %v22967_v57  ;;  %19104 = vmatprep.subr.msk.mxu1 %vm403_vm0, %v22988_v62  ;;  %v6719_v57 = vsel %vm2768_vm9, %v6714_v45, %v6716_v49  ;;  %v28817_v62 = vld [vmem:[#allocation9_spill] sm:$0xff] }
 0x16e   : > { %19101 = vmatprep.subr.msk.mxu0 %vm403_vm0, %v22985_v61  ;;  %5657 = vmatprep.mubr.f32.mxu1 %v28776_v36  ;;  %v28816_v61 = vld [vmem:[#allocation3_spill] sm:$0xff]  ;;  %v28853_v45 = vld [vmem:[#allocation41_spill] sm:$0xff] }
 0x16f   : > { %5586 = vmatprep.mubr.f32.mxu0 %v28776_v36 }
 0x173   : > { %19100 = vmatmul.mubr.msk.f32.vlgmr.msra.gmra.mrb[2].mxu1 %vm399_vm1, %v22933_v50 }
 0x174   : > { %19105 = vmatpush1.msk.msra.mxu1 %vm403_vm0, %v22998_v63  ;;  %19097 = vmatmul.mubr.msk.f32.vlgmr.msra.gmra.mrb[2].mxu0 %vm399_vm1, %v22933_v50  ;;  %v28814_v50 = vld [vmem:[#allocation4_spill] sm:$0xff] }
 0x175   : > { %19102 = vmatpush1.msk.msra.mxu0 %vm403_vm0, %v23006_v10  ;;  %19110 = vmatprep.subr.msk.mxu1 %vm403_vm0, %v23027_v20  ;;  %v28818_v63 = vld [vmem:[#allocation8_spill] sm:$0xff]  ;;  %v28819_v10 = vld [vmem:[#allocation6_spill] sm:$0xff] }
 0x176   : > { %19107 = vmatprep.subr.msk.mxu0 %vm403_vm0, %v23024_v19  ;;  %5803 = vmatprep.mubr.f32.mxu1 %v28776_v36  ;;  %v28821_v19 = vld [vmem:[#allocation11_spill] sm:$0xff]  ;;  %v28822_v20 = vld [vmem:[#allocation14_spill] sm:$0xff] }
 0x177   : > { %5732 = vmatprep.mubr.f32.mxu0 %v28776_v36 }
 0x17b   : > { %19106 = vmatmul.mubr.msk.f32.vlgmr.msra.gmra.mrb[2].mxu1 %vm399_vm1, %v22972_v58 }
 0x17c   : > { %19111 = vmatpush1.msk.msra.mxu1 %vm403_vm0, %v23037_v24  ;;  %19103 = vmatmul.mubr.msk.f32.vlgmr.msra.gmra.mrb[2].mxu0 %vm399_vm1, %v22972_v58  ;;  %v6717_v58 = vsel %vm2768_vm9, %v6710_v55, %v6712_v46  ;;  %v28823_v24 = vld [vmem:[#allocation13_spill] sm:$0xff] }
 0x17d   : > { %19108 = vmatpush1.msk.msra.mxu0 %vm403_vm0, %v23045_v28  ;;  %5949 = vmatprep.mubr.f32.mxu1 %v28776_v36  ;;  %v28824_v28 = vld [vmem:[#allocation7_spill] sm:$0xff] }
 0x17e   : > { %19116 = vmatprep.subr.msk.mxu1 %vm403_vm0, %v5967_v30  ;;  %5878 = vmatprep.mubr.f32.mxu0 %v28776_v36 }
 0x17f   : > { %19113 = vmatprep.subr.msk.mxu0 %vm403_vm0, %v5969_v31  ;;  %v28852_v31 = vld [vmem:[#allocation37_spill] sm:$0xff] }
 0x183   : > { %19112 = vmatmul.mubr.msk.f32.vlgmr.msra.gmra.mrb[2].mxu1 %vm399_vm1, %v23011_v11 }
 0x184   : > { %19117 = vmatpush1.msk.msra.mxu1 %vm403_vm0, %v5970_v34  ;;  %19109 = vmatmul.mubr.msk.f32.vlgmr.msra.gmra.mrb[2].mxu0 %vm399_vm1, %v23011_v11  ;;  %v28820_v11 = vld [vmem:[#allocation10_spill] sm:$0xff] }
 0x185   : > { %19114 = vmatpush1.msk.msra.mxu0 %vm403_vm0, %v5968_v42  ;;  %19122 = vmatprep.subr.msk.mxu1 %vm403_vm0, %v23092_v43  ;;  %v28828_v43 = vld [vmem:[#allocation18_spill] sm:$0xff] }
 0x186   : > { %19119 = vmatprep.subr.msk.mxu0 %vm403_vm0, %v23089_v41  ;;  %6114 = vmatprep.mubr.f32.mxu1 %v28776_v36  ;;  %v28827_v41 = vld [vmem:[#allocation19_spill] sm:$0xff] }
 0x187   : > { %6043 = vmatprep.mubr.f32.mxu0 %v28776_v36 }
 0x18b   : > { %19118 = vmatmul.mubr.msk.f32.vlgmr.msra.gmra.mrb[2].mxu1 %vm399_vm1, %v23050_v32 }
 0x18c   : > { %19123 = vmatpush1.msk.msra.mxu1 %vm403_vm0, %v23101_v44  ;;  %19115 = vmatmul.mubr.msk.f32.vlgmr.msra.gmra.mrb[2].mxu0 %vm399_vm1, %v23050_v32  ;;  %v28825_v32 = vld [vmem:[#allocation15_spill] sm:$0xff]  ;;  %v28829_v44 = vld [vmem:[#allocation12_spill] sm:$0xff] }
 0x18d   : > { %19120 = vmatpush1.msk.msra.mxu0 %vm403_vm0, %v23110_v51  ;;  %19128 = vmatprep.subr.msk.mxu1 %vm403_vm0, %v23131_v9  ;;  %v28830_v51 = vld [vmem:[#allocation20_spill] sm:$0xff]  ;;  %v7463_v9 = vpop.permute.xlu1 %7462 }
 0x18e   : > { %19125 = vmatprep.subr.msk.mxu0 %vm403_vm0, %v23128_v60  ;;  %6260 = vmatprep.mubr.f32.mxu1 %v28776_v36  ;;  %v28832_v60 = vld [vmem:[#allocation24_spill] sm:$0xff] }
 0x18f   : > { %6189 = vmatprep.mubr.f32.mxu0 %v28776_v36 }
 0x193   : > { %19124 = vmatmul.mubr.msk.f32.vlgmr.msra.gmra.mrb[2].mxu1 %vm399_vm1, %v23077_v1 }
 0x194   : > { %19129 = vmatpush1.msk.msra.mxu1 %vm403_vm0, %v23140_v12  ;;  %19121 = vmatmul.mubr.msk.f32.vlgmr.msra.gmra.mrb[2].mxu0 %vm399_vm1, %v23077_v1  ;;  %v28826_v1 = vld [vmem:[#allocation16_spill] sm:$0xff]  ;;  %v28833_v12 = vld [vmem:[#allocation23_spill] sm:$0xff] }
 0x195   : > { %19126 = vmatpush1.msk.msra.mxu0 %vm403_vm0, %v23149_v27  ;;  %19134 = vmatprep.subr.msk.mxu1 %vm403_vm0, %v23170_v5  ;;  %v7461_v27 = vpop.permute.xlu0 %7460  ;;  %v7465_v5 = vpop.permute.xlu1 %7464 }
 0x196   : > { %19131 = vmatprep.subr.msk.mxu0 %vm403_vm0, %v23167_v37  ;;  %6406 = vmatprep.mubr.f32.mxu1 %v28776_v36  ;;  %v28834_v37 = vld [vmem:[#allocation17_spill] sm:$0xff]  ;;  %v7468_v3 = vsel %vm3621_vm12, %v7463_v9, %v7465_v5 }
 0x197   : > { %6335 = vmatprep.mubr.f32.mxu0 %v28776_v36 }
 0x19b   : > { %19130 = vmatmul.mubr.msk.f32.vlgmr.msra.gmra.mrb[2].mxu1 %vm399_vm1, %v23115_v52 }
 0x19c   : > { %19135 = vmatpush1.msk.msra.mxu1 %vm403_vm0, %v23179_v6  ;;  %19127 = vmatmul.mubr.msk.f32.vlgmr.msra.gmra.mrb[2].mxu0 %vm399_vm1, %v23115_v52  ;;  %v28831_v52 = vld [vmem:[#allocation21_spill] sm:$0xff] }
 0x19d   : > { %19132 = vmatpush1.msk.msra.mxu0 %vm403_vm0, %v23188_v39  ;;  %19140 = vmatprep.subr.msk.mxu1 %vm403_vm0, %v23209_v14  ;;  %v28835_v6 = vld [vmem:[#allocation25_spill] sm:$0xff]  ;;  %v7467_v39 = vsel %vm3621_vm12, %v7461_v27, %v7463_v9  ;;  %v7459_v14 = vpop.permute.xlu0 %7458 }
 0x19e   : > { %19137 = vmatprep.subr.msk.mxu0 %vm403_vm0, %v23206_v59  ;;  %6552 = vmatprep.mubr.f32.mxu1 %v28776_v36  ;;  %v28836_v59 = vld [vmem:[#allocation26_spill] sm:$0xff]  ;;  %v7466_v4 = vsel %vm3621_vm12, %v7459_v14, %v7461_v27  ;;  %vm11323_vm12 = vcmask 252928  }
 0x19f   : > { %6481 = vmatprep.mubr.f32.mxu0 %v28776_v36 }
 0x1a1   : > { %v8210_v30 = vpop.permute.xlu0 %8209 }
 0x1a3   : > { %19136 = vmatmul.mubr.msk.f32.vlgmr.msra.gmra.mrb[2].mxu1 %vm399_vm1, %v28813_v47 }
 0x1a4   : > { %19141 = vmatpush1.msk.msra.mxu1 %vm403_vm0, %v28814_v50  ;;  %19133 = vmatmul.mubr.msk.f32.vlgmr.msra.gmra.mrb[2].mxu0 %vm399_vm1, %v28813_v47 }
 0x1a5   : > { %19138 = vmatpush1.msk.msra.mxu0 %vm403_vm0, %v28815_v54  ;;  %6698 = vmatprep.mubr.f32.mxu1 %v28776_v36  ;;  %v8208_v34 = vpop.permute.xlu0 %8207 }
 0x1a6   : > { %19146 = vmatprep.subr.msk.mxu1 %vm403_vm0, %v6716_v49  ;;  %6627 = vmatprep.mubr.f32.mxu0 %v28776_v36 }
 0x1a7   : > { %19143 = vmatprep.subr.msk.mxu0 %vm403_vm0, %v6718_v53 }
 0x1a9   : > { %v8376_v50 = vpop.permute.xlu0 %8375 }
 0x1ab   : > { %19142 = vmatmul.mubr.msk.f32.vlgmr.msra.gmra.mrb[2].mxu1 %vm399_vm1, %v28816_v61 }
 0x1ac   : > { %19147 = vmatpush1.msk.msra.mxu1 %vm403_vm0, %v6719_v57  ;;  %19139 = vmatmul.mubr.msk.f32.vlgmr.msra.gmra.mrb[2].mxu0 %vm399_vm1, %v28816_v61 }
 0x1ad   : > { %19144 = vmatpush1.msk.msra.mxu0 %vm403_vm0, %v6717_v58  ;;  %19152 = vmatprep.subr.msk.mxu1 %vm403_vm0, %v28817_v62 }
 0x1ae   : > { %19149 = vmatprep.subr.msk.mxu0 %vm403_vm0, %v28818_v63  ;;  %6863 = vmatprep.mubr.f32.mxu1 %v28776_v36 }
 0x1af   : > { %6792 = vmatprep.mubr.f32.mxu0 %v28776_v36 }
 0x1b3   : > { %19148 = vmatmul.mubr.msk.f32.vlgmr.msra.gmra.mrb[2].mxu1 %vm399_vm1, %v28819_v10 }
 0x1b4   : > { %19153 = vmatpush1.msk.msra.mxu1 %vm403_vm0, %v28820_v11  ;;  %19145 = vmatmul.mubr.msk.f32.vlgmr.msra.gmra.mrb[2].mxu0 %vm399_vm1, %v28819_v10 }
 0x1b5   : > { %19150 = vmatpush1.msk.msra.mxu0 %vm403_vm0, %v28821_v19  ;;  %19158 = vmatprep.subr.msk.mxu1 %vm403_vm0, %v28822_v20 }
 0x1b6   : > { %19155 = vmatprep.subr.msk.mxu0 %vm403_vm0, %v28823_v24  ;;  %7009 = vmatprep.mubr.f32.mxu1 %v28776_v36 }
 0x1b7   : > { %6938 = vmatprep.mubr.f32.mxu0 %v28776_v36 }
 0x1bb   : > { %19154 = vmatmul.mubr.msk.f32.vlgmr.msra.gmra.mrb[2].mxu1 %vm399_vm1, %v28824_v28 }
 0x1bc   : > { %19159 = vmatpush1.msk.msra.mxu1 %vm403_vm0, %v28825_v32  ;;  %19151 = vmatmul.mubr.msk.f32.vlgmr.msra.gmra.mrb[2].mxu0 %vm399_vm1, %v28824_v28 }
 0x1bd   : > { %19156 = vmatpush1.msk.msra.mxu0 %vm403_vm0, %v28826_v1  ;;  %19164 = vmatprep.subr.msk.mxu1 %vm403_vm0, %v28827_v41 }
 0x1be   : > { %19161 = vmatprep.subr.msk.mxu0 %vm403_vm0, %v28828_v43  ;;  %7155 = vmatprep.mubr.f32.mxu1 %v28776_v36 }
 0x1bf   : > { %7084 = vmatprep.mubr.f32.mxu0 %v28776_v36 }
 0x1c3   : > { %19160 = vmatmul.mubr.msk.f32.vlgmr.msra.gmra.mrb[2].mxu1 %vm399_vm1, %v28829_v44 }
 0x1c4   : > { %19165 = vmatpush1.msk.msra.mxu1 %vm403_vm0, %v28830_v51  ;;  %19157 = vmatmul.mubr.msk.f32.vlgmr.msra.gmra.mrb[2].mxu0 %vm399_vm1, %v28829_v44 }
 0x1c5   : > { %19162 = vmatpush1.msk.msra.mxu0 %vm403_vm0, %v28831_v52  ;;  %19170 = vmatprep.subr.msk.mxu1 %vm403_vm0, %v28832_v60 }
 0x1c6   : > { %19167 = vmatprep.subr.msk.mxu0 %vm403_vm0, %v28833_v12  ;;  %7301 = vmatprep.mubr.f32.mxu1 %v28776_v36  ;;  %v23891_v12 = vld [vmem:[%s28695_s3 + $0x10] sm:$0xff] }
 0x1c7   : > { %7230 = vmatprep.mubr.f32.mxu0 %v28776_v36 }
 0x1cb   : > { %19166 = vmatmul.mubr.msk.f32.vlgmr.msra.gmra.mrb[2].mxu1 %vm399_vm1, %v28834_v37 }
 0x1cc   : > { %19171 = vmatpush1.msk.msra.mxu1 %vm403_vm0, %v28835_v6  ;;  %19163 = vmatmul.mubr.msk.f32.vlgmr.msra.gmra.mrb[2].mxu0 %vm399_vm1, %v28834_v37 }
 0x1cd   : > { %19168 = vmatpush1.msk.msra.mxu0 %vm403_vm0, %v28836_v59  ;;  %7447 = vmatprep.mubr.f32.mxu1 %v28776_v36 }
 0x1ce   : > { %19176 = vmatprep.subr.msk.mxu1 %vm403_vm0, %v7465_v5  ;;  %7376 = vmatprep.mubr.f32.mxu0 %v28776_v36 }
 0x1cf   : > { %19173 = vmatprep.subr.msk.mxu0 %vm403_vm0, %v7467_v39 }
 0x1d3   : > { %19172 = vmatmul.mubr.msk.f32.vlgmr.msra.gmra.mrb[2].mxu1 %vm399_vm1, %v28837_v38 }
 0x1d4   : > { %19177 = vmatpush1.msk.msra.mxu1 %vm403_vm0, %v7468_v3  ;;  %19169 = vmatmul.mubr.msk.f32.vlgmr.msra.gmra.mrb[2].mxu0 %vm399_vm1, %v28837_v38 }
 0x1d5   : > { %19174 = vmatpush1.msk.msra.mxu0 %vm403_vm0, %v7466_v4  ;;  %19182 = vmatprep.subr.msk.mxu1 %vm403_vm0, %v23413_v40  ;;  %v28842_v40 = vld [vmem:[#allocation34_spill] sm:$0xff] }
 0x1d6   : > { %19179 = vmatprep.subr.msk.mxu0 %vm403_vm0, %v28838_v13  ;;  %7612 = vmatprep.mubr.f32.mxu1 %v28776_v36 }
 0x1d7   : > { %7541 = vmatprep.mubr.f32.mxu0 %v28776_v36 }
 0x1db   : > { %19178 = vmatmul.mubr.msk.f32.vlgmr.msra.gmra.mrb[2].mxu1 %vm399_vm1, %v28839_v15 }
 0x1dc   : > { %19183 = vmatpush1.msk.msra.mxu1 %vm403_vm0, %v28840_v16  ;;  %19175 = vmatmul.mubr.msk.f32.vlgmr.msra.gmra.mrb[2].mxu0 %vm399_vm1, %v28839_v15  ;;  %v19210_v16 = vld [vmem:[%s28695_s3 + $0x18] sm:$0xff] }
 0x1dd   : > { %19180 = vmatpush1.msk.msra.mxu0 %vm403_vm0, %v28841_v7  ;;  %19188 = vmatprep.subr.msk.mxu1 %vm403_vm0, %v28842_v40  ;;  %v8421_v7 = vld [vmem:[%s28695_s3] sm:$0xff] }
 0x1de   : > { %19185 = vmatprep.subr.msk.mxu0 %vm403_vm0, %v28843_v8  ;;  %7758 = vmatprep.mubr.f32.mxu1 %v28776_v36 }
 0x1df   : > { %7687 = vmatprep.mubr.f32.mxu0 %v28776_v36 }
 0x1e3   : > { %19184 = vmatmul.mubr.msk.f32.vlgmr.msra.gmra.mrb[2].mxu1 %vm399_vm1, %v28844_v18 }
 0x1e4   : > { %19189 = vmatpush1.msk.msra.mxu1 %vm403_vm0, %v28845_v21  ;;  %19181 = vmatmul.mubr.msk.f32.vlgmr.msra.gmra.mrb[2].mxu0 %vm399_vm1, %v28844_v18 }
 0x1e5   : > { %19186 = vmatpush1.msk.msra.mxu0 %vm403_vm0, %v28846_v22  ;;  %19194 = vmatprep.subr.msk.mxu1 %vm403_vm0, %v23475_v56  ;;  %v8212_v56 = vpop.permute.xlu1 %8211 }
 0x1e6   : > { %19191 = vmatprep.subr.msk.mxu0 %vm403_vm0, %v28847_v23  ;;  %7904 = vmatprep.mubr.f32.mxu1 %v28776_v36 }
 0x1e7   : > { %7833 = vmatprep.mubr.f32.mxu0 %v28776_v36 }
 0x1e9   : > { %v8214_v33 = vpop.permute.xlu1 %8213 }
 0x1ea   : > { %v8217_v42 = vsel %vm4474_vm15, %v8212_v56, %v8214_v33 }
 0x1eb   : > { %19190 = vmatmul.mubr.msk.f32.vlgmr.msra.gmra.mrb[2].mxu1 %vm399_vm1, %v28848_v25 }
 0x1ec   : > { %19195 = vmatpush1.msk.msra.mxu1 %vm403_vm0, %v28849_v29  ;;  %19187 = vmatmul.mubr.msk.f32.vlgmr.msra.gmra.mrb[2].mxu0 %vm399_vm1, %v28848_v25  ;;  %v8422_v25 = vld [vmem:[%s28695_s3 + $0x8] sm:$0xff] }
 0x1ed   : > { %19192 = vmatpush1.msk.msra.mxu0 %vm403_vm0, %v28850_v17  ;;  %19200 = vmatprep.subr.msk.mxu1 %vm403_vm0, %v23506_v2  ;;  %v8216_v2 = vsel %vm4474_vm15, %v8210_v30, %v8212_v56 }
 0x1ee   : > { %19197 = vmatprep.subr.msk.mxu0 %vm403_vm0, %v28851_v26  ;;  %8050 = vmatprep.mubr.f32.mxu1 %v28776_v36  ;;  %v19225_v26 = vld [vmem:[%s28695_s3 + $0x20] sm:$0xff] }
 0x1ef   : > { %7979 = vmatprep.mubr.f32.mxu0 %v28776_v36 }
 0x1f3   : > { %19196 = vmatmul.mubr.msk.f32.vlgmr.msra.gmra.mrb[2].mxu1 %vm399_vm1, %v28852_v31 }
 0x1f4   : > { %19201 = vmatpush1.msk.msra.mxu1 %vm403_vm0, %v23515_v0  ;;  %19193 = vmatmul.mubr.msk.f32.vlgmr.msra.gmra.mrb[2].mxu0 %vm399_vm1, %v28852_v31  ;;  %v8215_v0 = vsel %vm4474_vm15, %v8208_v34, %v8210_v30 }
 0x1f5   : > { %19198 = vmatpush1.msk.msra.mxu0 %vm403_vm0, %v23520_v35  ;;  %8196 = vmatprep.mubr.f32.mxu1 %v28776_v36 }
 0x1f6   : > { %8125 = vmatprep.mubr.f32.mxu0 %v28776_v36  ;;  %19206 = vmatprep.subr.msk.mxu1 %vm403_vm0, %v8214_v33  ;;  %v19226_v33 = vld [vmem:[%s28695_s3 + $0x28] sm:$0xff] }
 0x1f7   : > { %19203 = vmatprep.subr.msk.mxu0 %vm403_vm0, %v8216_v2  ;;  %v12917_v2 = vld [vmem:[%s28696_s4] sm:$0xff] }
 0x1fb   : > { %19202 = vmatmul.mubr.msk.f32.vlgmr.msra.gmra.mrb[2].mxu1 %vm399_vm1, %v28853_v45 }
 0x1fc   : > { %19199 = vmatmul.mubr.msk.f32.vlgmr.msra.gmra.mrb[2].mxu0 %vm399_vm1, %v28853_v45  ;;  %19207 = vmatpush1.msk.msra.mxu1 %vm403_vm0, %v8217_v42 }
 0x1fd   : > { %19204 = vmatpush1.msk.msra.mxu0 %vm403_vm0, %v8215_v0  ;;  %8361 = vmatprep.mubr.f32.mxu1 %v28776_v36  ;;  %vm8437_vm0 = vcmask 48128   ;;  %v19234_v0 = vld [vmem:[%s28695_s3 + $0x30] sm:$0xff] }
 0x1fe   : > { %8290 = vmatprep.mubr.f32.mxu0 %v28776_v36 }
 0x203   : > { %19208 = vmatmul.mubr.msk.f32.vlgmr.msra.gmra.mrb[2].mxu1 %vm399_vm1, %v23527_v48 }
 0x204   : > { %19205 = vmatmul.mubr.msk.f32.vlgmr.msra.gmra.mrb[2].mxu0 %vm399_vm1, %v23527_v48  ;;  %20366 = vmatprep.mubr.msk.f32.mxu1 %vm8437_vm0, %v23891_v12  ;;  %vm8444_vm1 = vcmask 1045504  }
 0x205   : > { %8515 = vmatprep.mubr.f32.mxu0 %v28776_v36 }
 0x212   : > { %v4626_v35 = vpop.f32.mrb[0].mxu1 }
 0x213   : > { %v4555_v46 = vpop.f32.mrb[0].mxu0  ;;  %v4628_v47 = vpop.f32.mrb[1].mxu1  ;;  %v8380_v53 = vadd.f32 %v8376_v50, %v4626_v35 }
 0x214   : > { %v4557_v49 = vpop.f32.mrb[1].mxu0  ;;  %v8378_v54 = vadd.f32 %v8376_v50, %v4555_v46  ;;  %v8381_v55 = vadd.f32 %v8376_v50, %v4628_v47 }
 0x215   : > { %v8379_v58 = vadd.f32 %v8376_v50, %v4557_v49  ;;  %v8384_v20 = vmax.f32 %v8380_v53, 0.0  ;;  %v19235_v49 = vld [vmem:[%s28695_s3 + $0x38] sm:$0xff] }
 0x216   : > { %v8382_v28 = vmax.f32 %v8378_v54, 0.0  ;;  %v8385_v32 = vmax.f32 %v8381_v55, 0.0  ;;  %v19243_v54 = vld [vmem:[%s28695_s3 + $0x40] sm:$0xff] }
 0x217   : > { %v8383_v43 = vmax.f32 %v8379_v58, 0.0 }
 0x2d6   : > { %v8363_v57 = vpop.f32.mrb[2].mxu1 }
 0x2d7   : > { %v8388_v61 = vadd.f32 %v8376_v50, %v8363_v57  ;;  %v8292_v62 = vpop.f32.mrb[2].mxu0  ;;  %v8365_v63 = vpop.f32.mrb[3].mxu1 }
 0x2d8   : > { %v8386_v10 = vadd.f32 %v8376_v50, %v8292_v62  ;;  %v8389_v11 = vadd.f32 %v8376_v50, %v8365_v63  ;;  %v8294_v19 = vpop.f32.mrb[3].mxu0  ;;  %v19244_v62 = vld [vmem:[%s28695_s3 + $0x48] sm:$0xff] }
 0x2d9   : > { %v8392_v48 = vmax.f32 %v8388_v61, 0.0  ;;  %v8387_v24 = vadd.f32 %v8376_v50, %v8294_v19 }
 0x2da   : > { %v8390_v1 = vmax.f32 %v8386_v10, 0.0  ;;  %v8393_v41 = vmax.f32 %v8389_v11, 0.0  ;;  %v19252_v11 = vld [vmem:[%s28695_s3 + $0x50] sm:$0xff] }
 0x2db   : > { %v8396_v44 = vmax.f32 %v8384_v20, %v8392_v48  ;;  %v8391_v51 = vmax.f32 %v8387_v24, 0.0 }
 0x2dc   : > { %v8394_v52 = vmax.f32 %v8382_v28, %v8390_v1  ;;  %v23881_v60 = vmax.f32 %v8385_v32, %v8393_v41  ;;  %v19253_v28 = vld [vmem:[%s28695_s3 + $0x58] sm:$0xff]  ;;  %v19261_v41 = vld [vmem:[%s28695_s3 + $0x60] sm:$0xff] }
 0x2dd   : > { %v8395_v9 = vmax.f32 %v8383_v43, %v8391_v51  ;;  %8406 = vrot.lane.b32.xlu1 %v8396_v44, %s22487_s29 }
 0x2de   : > { %8408 = vrot.lane.b32.xlu0 %v23881_v60, %s22487_s29 }
 0x2e1   : > { %8404 = vrot.lane.b32.xlu1 %v8395_v9, %s22487_s29 }
 0x2e5   : > { %8402 = vrot.lane.b32.xlu1 %v8394_v52, %s22487_s29 }
 0x34f   : > { %v8407_v27 = vpop.permute.xlu1 %8406 }
 0x350   : > { %v8409_v37 = vpop.permute.xlu0 %8408 }
 0x351   : > { %v8412_v5 = vsel %vm1233_vm4, %v8407_v27, %v8409_v37  ;;  %v23982_v13 = vmax.f32 %v23881_v60, %v8409_v37  ;;  %v19262_v60 = vld [vmem:[%s28695_s3 + $0x68] sm:$0xff] }
 0x352   : > { %v23896_v6 = vmax.f32 %v8396_v44, %v8412_v5 }
 0x353   : > { %v8405_v39 = vpop.permute.xlu1 %8404 }
 0x354   : > { %v8411_v59 = vsel %vm1233_vm4, %v8405_v39, %v8407_v27  ;;  %8433 = vrot.lane.b32.xlu1 %v23896_v6, %s22485_s23  ;;  %v19270_v27 = vld [vmem:[%s28695_s3 + $0x70] sm:$0xff] }
 0x355   : > { %v23901_v14 = vmax.f32 %v8395_v9, %v8411_v59 }
 0x357   : > { %8431 = vrot.lane.b32.xlu0 %v23901_v14, %s22485_s23  ;;  %v8403_v3 = vpop.permute.xlu1 %8402 }
 0x358   : > { %v8410_v4 = vsel %vm1233_vm4, %v8403_v3, %v8405_v39  ;;  %8772 = vrot.lane.b32.xlu1 %v23901_v14, %s22486_s28  ;;  %vm8957_vm4 = vcmask 1022976   ;;  %v19271_v3 = vld [vmem:[%s28695_s3 + $0x78] sm:$0xff] }
 0x359   : > { %v23908_v38 = vmax.f32 %v8394_v52, %v8410_v4 }
 0x35b   : > { %8429 = vrot.lane.b32.xlu0 %v23908_v38, %s22485_s23 }
 0x35c   : > { %8770 = vrot.lane.b32.xlu1 %v23908_v38, %s22486_s28 }
 0x35f   : > { %8774 = vrot.lane.b32.xlu0 %v23896_v6, %s22486_s28 }
 0x360   : > { %8955 = vrot.lane.b32.xlu1 %v23896_v6, %s22500_s30 }
 0x363   : > { %8953 = vrot.lane.b32.xlu0 %v23901_v14, %s22500_s30 }
 0x364   : > { %9135 = vrot.lane.b32.xlu1 %v23901_v14, %s22501_s20 }
 0x367   : > { %8951 = vrot.lane.b32.xlu0 %v23908_v38, %s22500_s30 }
 0x368   : > { %9133 = vrot.lane.b32.xlu1 %v23908_v38, %s22501_s20 }
 0x36b   : > { %9137 = vrot.lane.b32.xlu0 %v23896_v6, %s22501_s20 }
 0x36c   : > { %9319 = vrot.lane.b32.xlu1 %v23896_v6, %s22490_s13 }
 0x36f   : > { %9317 = vrot.lane.b32.xlu0 %v23901_v14, %s22490_s13 }
 0x370   : > { %9498 = vrot.lane.b32.xlu1 %v23901_v14, %s22491_s14 }
 0x373   : > { %9315 = vrot.lane.b32.xlu0 %v23908_v38, %s22490_s13 }
 0x374   : > { %9496 = vrot.lane.b32.xlu1 %v23908_v38, %s22491_s14 }
 0x377   : > { %9500 = vrot.lane.b32.xlu0 %v23896_v6, %s22491_s14  ;;  %s22504_s14 = smov 61  }
 0x378   : > { %9681 = vrot.lane.b32.xlu1 %v23896_v6, %s22492_s15 }
 0x37b   : > { %9679 = vrot.lane.b32.xlu0 %v23901_v14, %s22492_s15 }
 0x37c   : > { %9860 = vrot.lane.b32.xlu1 %v23901_v14, %s22502_s21 }
 0x37f   : > { %9677 = vrot.lane.b32.xlu0 %v23908_v38, %s22492_s15  ;;  %s22505_s15 = smov 60  }
 0x380   : > { %9858 = vrot.lane.b32.xlu1 %v23908_v38, %s22502_s21 }
 0x383   : > { %9862 = vrot.lane.b32.xlu0 %v23896_v6, %s22502_s21  ;;  %s28768_s21 = smov 120  }
 0x384   : > { %10044 = vrot.lane.b32.xlu1 %v23896_v6, %s22503_s26 }
 0x387   : > { %10042 = vrot.lane.b32.xlu0 %v23901_v14, %s22503_s26 }
 0x388   : > { %10224 = vrot.lane.b32.xlu1 %v23901_v14, %s22496_s19 }
 0x38b   : > { %10040 = vrot.lane.b32.xlu0 %v23908_v38, %s22503_s26  ;;  %s22515_s26 = smov 48  }
 0x38c   : > { %10222 = vrot.lane.b32.xlu1 %v23908_v38, %s22496_s19 }
 0x38f   : > { %10226 = vrot.lane.b32.xlu0 %v23896_v6, %s22496_s19 }
 0x390   : > { %10407 = vrot.lane.b32.xlu1 %v23896_v6, %s22497_s27 }
 0x393   : > { %10405 = vrot.lane.b32.xlu0 %v23901_v14, %s22497_s27 }
 0x394   : > { %10586 = vrot.lane.b32.xlu1 %v23901_v14, %s22498_s25 }
 0x397   : > { %10403 = vrot.lane.b32.xlu0 %v23908_v38, %s22497_s27  ;;  %s22506_s27 = smov 32  }
 0x398   : > { %10584 = vrot.lane.b32.xlu1 %v23908_v38, %s22498_s25 }
 0x39b   : > { %10588 = vrot.lane.b32.xlu0 %v23896_v6, %s22498_s25 }
 0x39c   : > { %10769 = vrot.lane.b32.xlu1 %v23896_v6, %s22504_s14 }
 0x39f   : > { %10767 = vrot.lane.b32.xlu0 %v23901_v14, %s22504_s14 }
 0x3a0   : > { %10949 = vrot.lane.b32.xlu1 %v23901_v14, %s22505_s15 }
 0x3a3   : > { %10765 = vrot.lane.b32.xlu0 %v23908_v38, %s22504_s14  ;;  %s22516_s14 = smov 16  }
 0x3a4   : > { %10947 = vrot.lane.b32.xlu1 %v23908_v38, %s22505_s15 }
 0x3a7   : > { %10951 = vrot.lane.b32.xlu0 %v23896_v6, %s22505_s15 }
 0x3a8   : > { %11134 = vrot.lane.b32.xlu1 %v23896_v6, %s22506_s27 }
 0x3ab   : > { %11132 = vrot.lane.b32.xlu0 %v23901_v14, %s22506_s27 }
 0x3ac   : > { %11136 = vrot.lane.b32.xlu1 %v23982_v13, %s22506_s27 }
 0x3af   : > { %11130 = vrot.lane.b32.xlu0 %v23908_v38, %s22506_s27 }
 0x3b0   : > { %11319 = vrot.lane.b32.xlu1 %v23896_v6, %s22507_s24 }
 0x3b3   : > { %11317 = vrot.lane.b32.xlu0 %v23901_v14, %s22507_s24 }
 0x3b4   : > { %11321 = vrot.lane.b32.xlu1 %v23982_v13, %s22507_s24 }
 0x3b7   : > { %11315 = vrot.lane.b32.xlu0 %v23908_v38, %s22507_s24  ;;  %s22518_s24 = smov 58  }
 0x3b8   : > { %11504 = vrot.lane.b32.xlu1 %v23896_v6, %s22508_s22 }
 0x3bb   : > { %11502 = vrot.lane.b32.xlu0 %v23901_v14, %s22508_s22 }
 0x3bc   : > { %11506 = vrot.lane.b32.xlu1 %v23982_v13, %s22508_s22 }
 0x3bf   : > { %11500 = vrot.lane.b32.xlu0 %v23908_v38, %s22508_s22  ;;  %s22510_s22 = smov 28  }
 0x3c0   : > { %11689 = vrot.lane.b32.xlu1 %v23896_v6, %s22509_s12 }
 0x3c3   : > { %11687 = vrot.lane.b32.xlu0 %v23901_v14, %s22509_s12 }
 0x3c4   : > { %11691 = vrot.lane.b32.xlu1 %v23982_v13, %s22509_s12 }
 0x3c6   : > { %v24001_v15 = vpop.permute.xlu1 %8433 }
 0x3c7   : > { %11685 = vrot.lane.b32.xlu0 %v23908_v38, %s22509_s12  ;;  %20364 = vmatprep.subr.msk.mxu1 %vm8444_vm1, %v24001_v15 }
 0x3c8   : > { %11874 = vrot.lane.b32.xlu1 %v23896_v6, %s22510_s22  ;;  %20365 = vmatpush3.msk.msra.mxu1 %vm8444_vm1, %v24001_v15 }
 0x3c9   : > { %v8432_v40 = vpop.permute.xlu0 %8431  ;;  %20367 = vmatmul.mubr.msk.f32.vlgmr.msra.gmra.mrb[4].mxu1 %vm8437_vm0, %v19210_v16  ;;  %20369 = vmatprep.subr.msk.mxu1 %vm8444_vm1, %v23896_v6 }
 0x3ca   : > { %20370 = vmatpush3.msk.msra.mxu1 %vm8444_vm1, %v23896_v6  ;;  %v8773_v8 = vpop.permute.xlu1 %8772  ;;  %v24022_v18 = vsel %vm721_vm2, %v8432_v40, %v24001_v15  ;;  %20371 = vmatprep.mubr.msk.f32.mxu1 %vm8437_vm0, %v8421_v7 }
 0x3cb   : > { %11872 = vrot.lane.b32.xlu0 %v23901_v14, %s22510_s22  ;;  %19211 = vmatprep.subr.msk.mxu0 %vm8444_vm1, %v24022_v18 }
 0x3cc   : > { %11876 = vrot.lane.b32.xlu1 %v23982_v13, %s22510_s22 }
 0x3cd   : > { %v8430_v21 = vpop.permute.xlu0 %8429 }
 0x3ce   : > { %v8435_v22 = vsel %vm721_vm2, %v8430_v21, %v8432_v40  ;;  %v8771_v23 = vpop.permute.xlu1 %8770 }
 0x3cf   : > { %11870 = vrot.lane.b32.xlu0 %v23908_v38, %s22510_s22  ;;  %19212 = vmatpush1.msk.msra.mxu0 %vm8444_vm1, %v8435_v22  ;;  %v8776_v34 = vsel %vm1062_vm3, %v8771_v23, %v8773_v8  ;;  %v19280_v22 = vld [vmem:[%s28695_s3 + $0x88] sm:$0xff]  ;;  %s19824_s22 = sshll.u32 %s28909_s18, 4 }
 0x3d0   : > { %12398 = vrot.lane.b32.xlu1 %v23982_v13, %s22486_s28  ;;  %19213 = vmatmul.mubr.msk.f32.vlgmr.msra.gmra.mrb[4].mxu0 %vm8437_vm0, %v23891_v12 }
 0x3d1   : > { %19218 = vmatprep.subr.msk.mxu0 %vm8444_vm1, %v23901_v14  ;;  %v24041_v29 = vpop.permute.xlu0 %8774  ;;  %20372 = vmatmul.mubr.msk.f32.vlgmr.msra.gmra.mrb[4].mxu1 %vm8437_vm0, %v8422_v25 }
 0x3d2   : > { %19219 = vmatpush1.msk.msra.mxu0 %vm8444_vm1, %v23908_v38  ;;  %20374 = vmatprep.subr.msk.mxu1 %vm8444_vm1, %v24041_v29  ;;  %v24048_v17 = vpop.permute.xlu1 %8955  ;;  %v24052_v56 = vsel %vm1062_vm3, %v8773_v8, %v24041_v29 }
 0x3d3   : > { %12224 = vrot.lane.b32.xlu0 %v23982_v13, %s22485_s23  ;;  %8521 = vmatprep.mubr.f32.mxu0 %v28776_v36 }
 0x3d4   : > { %19227 = vmatprep.subr.msk.mxu0 %vm8444_vm1, %v24052_v56  ;;  %20375 = vmatpush3.msk.msra.mxu1 %vm8444_vm1, %v24041_v29 }
 0x3d5   : > { %12746 = vrot.lane.b32.xlu1 %v23982_v13, %s22501_s20  ;;  %19214 = vmatmul.mubr.msk.f32.gmra.mrb[6].mxu0 %vm8437_vm0, %v19210_v16  ;;  %v8954_v30 = vpop.permute.xlu0 %8953  ;;  %v19279_v16 = vld [vmem:[%s28695_s3 + $0x80] sm:$0xff] }
 0x3d6   : > { %20379 = vmatprep.subr.msk.mxu1 %vm8444_vm1, %v24048_v17  ;;  %v9136_v31 = vpop.permute.xlu1 %9135  ;;  %8679 = vmatprep.mubr.f32.mxu0 %v28776_v36  ;;  %v24088_v45 = vsel %vm8957_vm4, %v8954_v30, %v24048_v17 }
 0x3d7   : > { %12572 = vrot.lane.b32.xlu0 %v23982_v13, %s22500_s30  ;;  %20376 = vmatprep.mubr.msk.f32.mxu1 %vm8437_vm0, %v19225_v26  ;;  %s22517_s30 = smov 56  }
 0x3d9   : > { %19220 = vmatmul.mubr.msk.f32.vlgmr.msra.gmra.mrb[4].mxu0 %vm8437_vm0, %v8421_v7  ;;  %v8952_v42 = vpop.permute.xlu0 %8951  ;;  %20377 = vmatmul.mubr.msk.f32.vlgmr.msra.gmra.mrb[4].mxu1 %vm8437_vm0, %v19226_v33 }
 0x3da   : > { %19228 = vmatpush1.msk.msra.mxu0 %vm8444_vm1, %v8776_v34  ;;  %20380 = vmatpush3.msk.msra.mxu1 %vm8444_vm1, %v24048_v17  ;;  %v9134_v35 = vpop.permute.xlu1 %9133  ;;  %v8958_v50 = vsel %vm8957_vm4, %v8952_v42, %v8954_v30  ;;  %v19289_v34 = vld [vmem:[%s28695_s3 + $0x98] sm:$0xff] }
 0x3db   : > { %19236 = vmatprep.subr.msk.mxu0 %vm8444_vm1, %v24088_v45  ;;  %12921 = vperm.xlu0 %22297, %v12917_v2   ;;  %v9140_v63 = vsel %vm9139_vm5, %v9134_v35, %v9136_v31 }
 0x3dc   : > { %8685 = vmatprep.mubr.f32.mxu0 %v28776_v36  ;;  %20381 = vmatprep.mubr.msk.f32.mxu1 %vm8437_vm0, %v19234_v0 }
 0x3dd   : > { %19221 = vmatmul.mubr.msk.f32.gmra.mrb[6].mxu0 %vm8437_vm0, %v8422_v25  ;;  %v24097_v46 = vpop.permute.xlu0 %9137 }
 0x3de   : > { %20384 = vmatprep.subr.msk.mxu1 %vm8444_vm1, %v24097_v46  ;;  %v9320_v47 = vpop.permute.xlu1 %9319  ;;  %8854 = vmatprep.mubr.f32.mxu0 %v28776_v36  ;;  %v24114_v55 = vsel %vm9139_vm5, %v9136_v31, %v24097_v46 }
 0x3e1   : > { %19229 = vmatmul.mubr.msk.f32.vlgmr.msra.gmra.mrb[4].mxu0 %vm8437_vm0, %v19225_v26  ;;  %v9318_v53 = vpop.permute.xlu0 %9317  ;;  %20382 = vmatmul.mubr.msk.f32.vlgmr.msra.gmra.mrb[4].mxu1 %vm8437_vm0, %v19235_v49  ;;  %v19288_v26 = vld [vmem:[%s28695_s3 + $0x90] sm:$0xff] }
 0x3e2   : > { %19237 = vmatpush1.msk.msra.mxu0 %vm8444_vm1, %v8958_v50  ;;  %20385 = vmatpush3.msk.msra.mxu1 %vm8444_vm1, %v24097_v46  ;;  %v9499_v57 = vpop.permute.xlu1 %9498  ;;  %v9322_v19 = vsel %vm2086_vm7, %v9318_v53, %v9320_v47  ;;  %v12918_v50 = vld [vmem:[%s28696_s4 + $0x8] sm:$0xff] }
 0x3e3   : > { %19245 = vmatprep.subr.msk.mxu0 %vm8444_vm1, %v24114_v55  ;;  %20389 = vmatprep.subr.msk.mxu1 %vm8444_vm1, %v9320_v47 }
 0x3e4   : > { %8860 = vmatprep.mubr.f32.mxu0 %v28776_v36  ;;  %20386 = vmatprep.mubr.msk.f32.mxu1 %vm8437_vm0, %v19243_v54 }
 0x3e5   : > { %19230 = vmatmul.mubr.msk.f32.gmra.mrb[6].mxu0 %vm8437_vm0, %v19226_v33  ;;  %v9316_v58 = vpop.permute.xlu0 %9315  ;;  %12926 = vperm.xlu1 %22298, %v12918_v50   ;;  %v19361_v50 = vld [vmem:[%s28695_s3 + $0x118] sm:$0xff] }
 0x3e6   : > { %v9497_v61 = vpop.permute.xlu1 %9496  ;;  %9036 = vmatprep.mubr.f32.mxu0 %v28776_v36  ;;  %v9321_v32 = vsel %vm2086_vm7, %v9316_v58, %v9318_v53  ;;  %v19306_v58 = vld [vmem:[%s28695_s3 + $0xb0] sm:$0xff] }
 0x3e7   : > { %v9502_v9 = vsel %vm2427_vm8, %v9497_v61, %v9499_v57 }
 0x3e9   : > { %19238 = vmatmul.mubr.msk.f32.vlgmr.msra.gmra.mrb[4].mxu0 %vm8437_vm0, %v19234_v0  ;;  %v9501_v10 = vpop.permute.xlu0 %9500  ;;  %20387 = vmatmul.mubr.msk.f32.vlgmr.msra.gmra.mrb[4].mxu1 %vm8437_vm0, %v19244_v62  ;;  %v19297_v0 = vld [vmem:[%s28695_s3 + $0xa0] sm:$0xff] }
 0x3ea   : > { %19246 = vmatpush1.msk.msra.mxu0 %vm8444_vm1, %v9140_v63  ;;  %20390 = vmatpush3.msk.msra.mxu1 %vm8444_vm1, %v9320_v47  ;;  %v9682_v20 = vpop.permute.xlu1 %9681  ;;  %v9503_v43 = vsel %vm2427_vm8, %v9499_v57, %v9501_v10  ;;  %vm10046_vm8 = vcmask 752640  }
 0x3eb   : > { %19254 = vmatprep.subr.msk.mxu0 %vm8444_vm1, %v9322_v19  ;;  %20394 = vmatprep.subr.msk.mxu1 %vm8444_vm1, %v9501_v10 }
 0x3ec   : > { %9042 = vmatprep.mubr.f32.mxu0 %v28776_v36  ;;  %20391 = vmatprep.mubr.msk.f32.mxu1 %vm8437_vm0, %v19252_v11 }
 0x3ed   : > { %19239 = vmatmul.mubr.msk.f32.gmra.mrb[6].mxu0 %vm8437_vm0, %v19235_v49  ;;  %v9680_v48 = vpop.permute.xlu0 %9679 }
 0x3ee   : > { %v9861_v24 = vpop.permute.xlu1 %9860  ;;  %9218 = vmatprep.mubr.f32.mxu0 %v28776_v36  ;;  %v9684_v37 = vsel %vm2768_vm9, %v9680_v48, %v9682_v20 }
 0x3f1   : > { %19247 = vmatmul.mubr.msk.f32.vlgmr.msra.gmra.mrb[4].mxu0 %vm8437_vm0, %v19243_v54  ;;  %v9678_v1 = vpop.permute.xlu0 %9677  ;;  %20392 = vmatmul.mubr.msk.f32.vlgmr.msra.gmra.mrb[4].mxu1 %vm8437_vm0, %v19253_v28  ;;  %v19298_v54 = vld [vmem:[%s28695_s3 + $0xa8] sm:$0xff] }
 0x3f2   : > { %19255 = vmatpush1.msk.msra.mxu0 %vm8444_vm1, %v9321_v32  ;;  %20395 = vmatpush3.msk.msra.mxu1 %vm8444_vm1, %v9501_v10  ;;  %v9859_v44 = vpop.permute.xlu1 %9858  ;;  %v9683_v4 = vsel %vm2768_vm9, %v9678_v1, %v9680_v48  ;;  %v19307_v10 = vld [vmem:[%s28695_s3 + $0xb8] sm:$0xff]  ;;  %v19315_v48 = vld [vmem:[%s28695_s3 + $0xc0] sm:$0xff]  ;;  %v19316_v1 = vld [vmem:[%s28695_s3 + $0xc8] sm:$0xff]  ;;  %vm10771_vm9 = vcmask 498688  }
 0x3f3   : > { %19263 = vmatprep.subr.msk.mxu0 %vm8444_vm1, %v9503_v43  ;;  %20399 = vmatprep.subr.msk.mxu1 %vm8444_vm1, %v9682_v20  ;;  %v9865_v23 = vsel %vm9864_vm6, %v9859_v44, %v9861_v24  ;;  %v19324_v43 = vld [vmem:[%s28695_s3 + $0xd0] sm:$0xff] }
 0x3f4   : > { %9224 = vmatprep.mubr.f32.mxu0 %v28776_v36  ;;  %20396 = vmatprep.mubr.msk.f32.mxu1 %vm8437_vm0, %v19261_v41 }
 0x3f5   : > { %19248 = vmatmul.mubr.msk.f32.gmra.mrb[6].mxu0 %vm8437_vm0, %v19244_v62  ;;  %v9863_v51 = vpop.permute.xlu0 %9862 }
 0x3f6   : > { %v10045_v52 = vpop.permute.xlu1 %10044  ;;  %9399 = vmatprep.mubr.f32.mxu0 %v28776_v36  ;;  %v9866_v7 = vsel %vm9864_vm6, %v9861_v24, %v9863_v51 }
 0x3f9   : > { %19256 = vmatmul.mubr.msk.f32.vlgmr.msra.gmra.mrb[4].mxu0 %vm8437_vm0, %v19252_v11  ;;  %v10043_v12 = vpop.permute.xlu0 %10042  ;;  %20397 = vmatmul.mubr.msk.f32.vlgmr.msra.gmra.mrb[4].mxu1 %vm8437_vm0, %v19262_v60 }
 0x3fa   : > { %19264 = vmatpush1.msk.msra.mxu0 %vm8444_vm1, %v9502_v9  ;;  %20400 = vmatpush3.msk.msra.mxu1 %vm8444_vm1, %v9682_v20  ;;  %v24173_v5 = vpop.permute.xlu1 %10224  ;;  %v10048_v30 = vsel %vm10046_vm8, %v10043_v12, %v10045_v52 }
 0x3fb   : > { %19272 = vmatprep.subr.msk.mxu0 %vm8444_vm1, %v9684_v37  ;;  %20404 = vmatprep.subr.msk.mxu1 %vm8444_vm1, %v9863_v51 }
 0x3fc   : > { %9405 = vmatprep.mubr.f32.mxu0 %v28776_v36  ;;  %20401 = vmatprep.mubr.msk.f32.mxu1 %vm8437_vm0, %v19270_v27 }
 0x3fd   : > { %19257 = vmatmul.mubr.msk.f32.gmra.mrb[6].mxu0 %vm8437_vm0, %v19253_v28  ;;  %v10041_v39 = vpop.permute.xlu0 %10040 }
 0x3fe   : > { %v10223_v59 = vpop.permute.xlu1 %10222  ;;  %9580 = vmatprep.mubr.f32.mxu0 %v28776_v36  ;;  %v10047_v42 = vsel %vm10046_vm8, %v10041_v39, %v10043_v12 }
 0x3ff   : > { %v10228_v57 = vsel %vm3792_vm13, %v10223_v59, %v24173_v5  ;;  %v19334_v59 = vld [vmem:[%s28695_s3 + $0xe8] sm:$0xff] }
 0x401   : > { %19265 = vmatmul.mubr.msk.f32.vlgmr.msra.gmra.mrb[4].mxu0 %vm8437_vm0, %v19261_v41  ;;  %v10227_v38 = vpop.permute.xlu0 %10226  ;;  %20402 = vmatmul.mubr.msk.f32.vlgmr.msra.gmra.mrb[4].mxu1 %vm8437_vm0, %v19271_v3 }
 0x402   : > { %19273 = vmatpush1.msk.msra.mxu0 %vm8444_vm1, %v9683_v4  ;;  %20405 = vmatpush3.msk.msra.mxu1 %vm8444_vm1, %v9863_v51  ;;  %v10408_v40 = vpop.permute.xlu1 %10407  ;;  %v10229_v35 = vsel %vm3792_vm13, %v24173_v5, %v10227_v38  ;;  %vm11508_vm13 = vcmask 244736  }
 0x403   : > { %19281 = vmatprep.subr.msk.mxu0 %vm8444_vm1, %v9866_v7  ;;  %20409 = vmatprep.subr.msk.mxu1 %vm8444_vm1, %v10045_v52 }
 0x404   : > { %9586 = vmatprep.mubr.f32.mxu0 %v28776_v36  ;;  %20406 = vmatprep.mubr.msk.f32.mxu1 %vm8437_vm0, %v19279_v16 }
 0x405   : > { %19266 = vmatmul.mubr.msk.f32.gmra.mrb[6].mxu0 %vm8437_vm0, %v19262_v60  ;;  %v10406_v8 = vpop.permute.xlu0 %10405  ;;  %v19325_v60 = vld [vmem:[%s28695_s3 + $0xd8] sm:$0xff] }
 0x406   : > { %v24198_v21 = vpop.permute.xlu1 %10586  ;;  %9761 = vmatprep.mubr.f32.mxu0 %v28776_v36  ;;  %v10410_v62 = vsel %vm4133_vm14, %v10406_v8, %v10408_v40 }
 0x409   : > { %19274 = vmatmul.mubr.msk.f32.vlgmr.msra.gmra.mrb[4].mxu0 %vm8437_vm0, %v19270_v27  ;;  %v10404_v25 = vpop.permute.xlu0 %10403  ;;  %20407 = vmatmul.mubr.msk.f32.vlgmr.msra.gmra.mrb[4].mxu1 %vm8437_vm0, %v19280_v22  ;;  %v19333_v27 = vld [vmem:[%s28695_s3 + $0xe0] sm:$0xff] }
 0x40a   : > { %19282 = vmatpush1.msk.msra.mxu0 %vm8444_vm1, %v9865_v23  ;;  %20410 = vmatpush3.msk.msra.mxu1 %vm8444_vm1, %v10045_v52  ;;  %v24213_v31 = vpop.permute.xlu1 %10584  ;;  %v10409_v20 = vsel %vm4133_vm14, %v10404_v25, %v10406_v8  ;;  %v19351_v25 = vld [vmem:[%s28695_s3 + $0x100] sm:$0xff]  ;;  %vm11693_vm14 = vcmask 236544  }
 0x40b   : > { %19290 = vmatprep.subr.msk.mxu0 %vm8444_vm1, %v10048_v30  ;;  %20414 = vmatprep.subr.msk.mxu1 %vm8444_vm1, %v10227_v38  ;;  %v10590_v41 = vsel %vm4474_vm15, %v24213_v31, %v24198_v21 }
 0x40c   : > { %9767 = vmatprep.mubr.f32.mxu0 %v28776_v36  ;;  %20411 = vmatprep.mubr.msk.f32.mxu1 %vm8437_vm0, %v19288_v26 }
 0x40d   : > { %19275 = vmatmul.mubr.msk.f32.gmra.mrb[6].mxu0 %vm8437_vm0, %v19271_v3  ;;  %v10589_v33 = vpop.permute.xlu0 %10588 }
 0x40e   : > { %v24220_v2 = vpop.permute.xlu1 %10769  ;;  %9943 = vmatprep.mubr.f32.mxu0 %v28776_v36  ;;  %v10591_v24 = vsel %vm4474_vm15, %v24198_v21, %v10589_v33  ;;  %vm11878_vm15 = vcmask 228352  }
 0x411   : > { %19283 = vmatmul.mubr.msk.f32.vlgmr.msra.gmra.mrb[4].mxu0 %vm8437_vm0, %v19279_v16  ;;  %20412 = vmatmul.mubr.msk.f32.vlgmr.msra.gmra.mrb[4].mxu1 %vm8437_vm0, %v19289_v34  ;;  %v10768_v49 = vpop.permute.xlu0 %10767  ;;  %v19342_v16 = vld [vmem:[%s28695_s3 + $0xf0] sm:$0xff] }
 0x412   : > { %19291 = vmatpush1.msk.msra.mxu0 %vm8444_vm1, %v10047_v42  ;;  %20415 = vmatpush3.msk.msra.mxu1 %vm8444_vm1, %v10227_v38  ;;  %v24236_v47 = vpop.permute.xlu1 %10949  ;;  %v10773_v44 = vsel %vm10771_vm9, %v10768_v49, %v24220_v2 }
 0x413   : > { %19299 = vmatprep.subr.msk.mxu0 %vm8444_vm1, %v10229_v35  ;;  %20419 = vmatprep.subr.msk.mxu1 %vm8444_vm1, %v10408_v40 }
 0x414   : > { %9949 = vmatprep.mubr.f32.mxu0 %v28776_v36  ;;  %20416 = vmatprep.mubr.msk.f32.mxu1 %vm8437_vm0, %v19297_v0 }
 0x415   : > { %19284 = vmatmul.mubr.msk.f32.gmra.mrb[6].mxu0 %vm8437_vm0, %v19280_v22  ;;  %v10766_v61 = vpop.permute.xlu0 %10765  ;;  %v19343_v22 = vld [vmem:[%s28695_s3 + $0xf8] sm:$0xff] }
 0x416   : > { %v24246_v53 = vpop.permute.xlu1 %10947  ;;  %10125 = vmatprep.mubr.f32.mxu0 %v28776_v36  ;;  %v10772_v9 = vsel %vm10771_vm9, %v10766_v61, %v10768_v49 }
 0x417   : > { %v10954_v38 = vsel %vm10953_vm11, %v24246_v53, %v24236_v47 }
 0x419   : > { %19292 = vmatmul.mubr.msk.f32.vlgmr.msra.gmra.mrb[4].mxu0 %vm8437_vm0, %v19288_v26  ;;  %20417 = vmatmul.mubr.msk.f32.vlgmr.msra.gmra.mrb[4].mxu1 %vm8437_vm0, %v19298_v54  ;;  %v10952_v19 = vpop.permute.xlu0 %10951 }
 0x41a   : > { %19300 = vmatpush1.msk.msra.mxu0 %vm8444_vm1, %v10228_v57  ;;  %20420 = vmatpush3.msk.msra.mxu1 %vm8444_vm1, %v10408_v40  ;;  %v24262_v63 = vpop.permute.xlu1 %11134  ;;  %v10955_v39 = vsel %vm10953_vm11, %v24236_v47, %v10952_v19 }
 0x41b   : > { %19308 = vmatprep.subr.msk.mxu0 %vm8444_vm1, %v10410_v62  ;;  %20424 = vmatprep.subr.msk.mxu1 %vm8444_vm1, %v10589_v33 }
 0x41c   : > { %10131 = vmatprep.mubr.f32.mxu0 %v28776_v36  ;;  %20421 = vmatprep.mubr.msk.f32.mxu1 %vm8437_vm0, %v19306_v58 }
 0x41d   : > { %19293 = vmatmul.mubr.msk.f32.gmra.mrb[6].mxu0 %vm8437_vm0, %v19289_v34  ;;  %v11133_v32 = vpop.permute.xlu0 %11132 }
 0x41e   : > { %10306 = vmatprep.mubr.f32.mxu0 %v28776_v36  ;;  %v11137_v11 = vpop.permute.xlu1 %11136  ;;  %v11140_v40 = vsel %vm11138_vm10, %v11133_v32, %v24262_v63 }
 0x41f   : > { %v11141_v37 = vsel %vm11138_vm10, %v24262_v63, %v11137_v11 }
 0x421   : > { %19301 = vmatmul.mubr.msk.f32.vlgmr.msra.gmra.mrb[4].mxu0 %vm8437_vm0, %v19297_v0  ;;  %20422 = vmatmul.mubr.msk.f32.vlgmr.msra.gmra.mrb[4].mxu1 %vm8437_vm0, %v19307_v10  ;;  %v11131_v52 = vpop.permute.xlu0 %11130  ;;  %v19360_v0 = vld [vmem:[%s28695_s3 + $0x110] sm:$0xff] }
 0x422   : > { %19309 = vmatpush1.msk.msra.mxu0 %vm8444_vm1, %v10409_v20  ;;  %20425 = vmatpush3.msk.msra.mxu1 %vm8444_vm1, %v10589_v33  ;;  %v24288_v28 = vpop.permute.xlu1 %11319  ;;  %v11139_v23 = vsel %vm11138_vm10, %v11131_v52, %v11133_v32  ;;  %v19387_v32 = vld [vmem:[%s28695_s3 + $0x140] sm:$0xff] }
 0x423   : > { %19317 = vmatprep.subr.msk.mxu0 %vm8444_vm1, %v10591_v24  ;;  %20429 = vmatprep.subr.msk.mxu1 %vm8444_vm1, %v24220_v2  ;;  %v19379_v24 = vld [vmem:[%s28695_s3 + $0x138] sm:$0xff] }
 0x424   : > { %10312 = vmatprep.mubr.f32.mxu0 %v28776_v36  ;;  %20426 = vmatprep.mubr.msk.f32.mxu1 %vm8437_vm0, %v19315_v48 }
 0x425   : > { %19302 = vmatmul.mubr.msk.f32.gmra.mrb[6].mxu0 %vm8437_vm0, %v19298_v54  ;;  %v11318_v5 = vpop.permute.xlu0 %11317 }
 0x426   : > { %10487 = vmatprep.mubr.f32.mxu0 %v28776_v36  ;;  %v11322_v51 = vpop.permute.xlu1 %11321  ;;  %v11325_v30 = vsel %vm11323_vm12, %v11318_v5, %v24288_v28 }
 0x427   : > { %v11326_v7 = vsel %vm11323_vm12, %v24288_v28, %v11322_v51 }
 0x429   : > { %19310 = vmatmul.mubr.msk.f32.vlgmr.msra.gmra.mrb[4].mxu0 %vm8437_vm0, %v19306_v58  ;;  %20427 = vmatmul.mubr.msk.f32.vlgmr.msra.gmra.mrb[4].mxu1 %vm8437_vm0, %v19316_v1  ;;  %v11316_v4 = vpop.permute.xlu0 %11315  ;;  %v19369_v58 = vld [vmem:[%s28695_s3 + $0x120] sm:$0xff] }
 0x42a   : > { %19318 = vmatpush1.msk.msra.mxu0 %vm8444_vm1, %v10590_v41  ;;  %20430 = vmatpush3.msk.msra.mxu1 %vm8444_vm1, %v24220_v2  ;;  %v24318_v12 = vpop.permute.xlu1 %11504  ;;  %v19352_v2 = vld [vmem:[%s28695_s3 + $0x108] sm:$0xff]  ;;  %v11324_v34 = vsel %vm11323_vm12, %v11316_v4, %v11318_v5 }
 0x42b   : > { %19326 = vmatprep.subr.msk.mxu0 %vm8444_vm1, %v10773_v44  ;;  %20434 = vmatprep.subr.msk.mxu1 %vm8444_vm1, %v10952_v19  ;;  %v19388_v41 = vld [vmem:[%s28695_s3 + $0x148] sm:$0xff] }
 0x42c   : > { %10493 = vmatprep.mubr.f32.mxu0 %v28776_v36  ;;  %20431 = vmatprep.mubr.msk.f32.mxu1 %vm8437_vm0, %v19324_v43 }
 0x42d   : > { %19311 = vmatmul.mubr.msk.f32.gmra.mrb[6].mxu0 %vm8437_vm0, %v19307_v10  ;;  %v11503_v21 = vpop.permute.xlu0 %11502  ;;  %v19370_v10 = vld [vmem:[%s28695_s3 + $0x128] sm:$0xff] }
 0x42e   : > { %10668 = vmatprep.mubr.f32.mxu0 %v28776_v36  ;;  %v11507_v3 = vpop.permute.xlu1 %11506  ;;  %v11510_v49 = vsel %vm11508_vm13, %v11503_v21, %v24318_v12 }
 0x42f   : > { %v11511_v26 = vsel %vm11508_vm13, %v24318_v12, %v11507_v3  ;;  %v19424_v12 = vld [vmem:[%s28695_s3 + $0x188] sm:$0xff] }
 0x431   : > { %19319 = vmatmul.mubr.msk.f32.vlgmr.msra.gmra.mrb[4].mxu0 %vm8437_vm0, %v19315_v48  ;;  %20432 = vmatmul.mubr.msk.f32.vlgmr.msra.gmra.mrb[4].mxu1 %vm8437_vm0, %v19325_v60  ;;  %v11501_v33 = vpop.permute.xlu0 %11500 }
 0x432   : > { %19327 = vmatpush1.msk.msra.mxu0 %vm8444_vm1, %v10772_v9  ;;  %20435 = vmatpush3.msk.msra.mxu1 %vm8444_vm1, %v10952_v19  ;;  %v11690_v8 = vpop.permute.xlu1 %11689  ;;  %v11509_v57 = vsel %vm11508_vm13, %v11501_v33, %v11503_v21  ;;  %v19378_v19 = vld [vmem:[%s28695_s3 + $0x130] sm:$0xff] }
 0x433   : > { %19335 = vmatprep.subr.msk.mxu0 %vm8444_vm1, %v10955_v39  ;;  %20439 = vmatprep.subr.msk.mxu1 %vm8444_vm1, %v11141_v37 }
 0x434   : > { %10674 = vmatprep.mubr.f32.mxu0 %v28776_v36  ;;  %20436 = vmatprep.mubr.msk.f32.mxu1 %vm8437_vm0, %v19333_v27 }
 0x435   : > { %19320 = vmatmul.mubr.msk.f32.gmra.mrb[6].mxu0 %vm8437_vm0, %v19316_v1  ;;  %v11688_v35 = vpop.permute.xlu0 %11687 }
 0x436   : > { %10850 = vmatprep.mubr.f32.mxu0 %v28776_v36  ;;  %v11692_v31 = vpop.permute.xlu1 %11691  ;;  %v11695_v62 = vsel %vm11693_vm14, %v11688_v35, %v11690_v8 }
 0x437   : > { %v11696_v47 = vsel %vm11693_vm14, %v11690_v8, %v11692_v31 }
 0x439   : > { %19328 = vmatmul.mubr.msk.f32.vlgmr.msra.gmra.mrb[4].mxu0 %vm8437_vm0, %v19324_v43  ;;  %20437 = vmatmul.mubr.msk.f32.vlgmr.msra.gmra.mrb[4].mxu1 %vm8437_vm0, %v19334_v59  ;;  %v11686_v54 = vpop.permute.xlu0 %11685 }
 0x43a   : > { %19336 = vmatpush1.msk.msra.mxu0 %vm8444_vm1, %v10954_v38  ;;  %20440 = vmatpush3.msk.msra.mxu1 %vm8444_vm1, %v11141_v37  ;;  %v11875_v42 = vpop.permute.xlu1 %11874  ;;  %v11694_v11 = vsel %vm11693_vm14, %v11686_v54, %v11688_v35 }
 0x43b   : > { %19344 = vmatprep.subr.msk.mxu0 %vm8444_vm1, %v11140_v40  ;;  %20444 = vmatprep.subr.msk.mxu1 %vm8444_vm1, %v11326_v7 }
 0x43c   : > { %10856 = vmatprep.mubr.f32.mxu0 %v28776_v36  ;;  %20441 = vmatprep.mubr.msk.f32.mxu1 %vm8437_vm0, %v19342_v16 }
 0x43d   : > { %19329 = vmatmul.mubr.msk.f32.gmra.mrb[6].mxu0 %vm8437_vm0, %v19325_v60  ;;  %v11873_v63 = vpop.permute.xlu0 %11872 }
 0x43e   : > { %11032 = vmatprep.mubr.f32.mxu0 %v28776_v36  ;;  %v11877_v53 = vpop.permute.xlu1 %11876  ;;  %v11880_v20 = vsel %vm11878_vm15, %v11873_v63, %v11875_v42 }
 0x43f   : > { %v11881_v61 = vsel %vm11878_vm15, %v11875_v42, %v11877_v53 }
 0x441   : > { %19337 = vmatmul.mubr.msk.f32.vlgmr.msra.gmra.mrb[4].mxu0 %vm8437_vm0, %v19333_v27  ;;  %20442 = vmatmul.mubr.msk.f32.vlgmr.msra.gmra.mrb[4].mxu1 %vm8437_vm0, %v19343_v22  ;;  %v11871_v48 = vpop.permute.xlu0 %11870 }
 0x442   : > { %19345 = vmatpush1.msk.msra.mxu0 %vm8444_vm1, %v11139_v23  ;;  %20445 = vmatpush3.msk.msra.mxu1 %vm8444_vm1, %v11326_v7  ;;  %v11879_v28 = vsel %vm11878_vm15, %v11871_v48, %v11873_v63  ;;  %v24586_v48 = vld [vmem:[%s28697_s5] sm:$0xff] }
 0x443   : > { %19353 = vmatprep.subr.msk.mxu0 %vm8444_vm1, %v11325_v30  ;;  %20449 = vmatprep.subr.msk.mxu1 %vm8444_vm1, %v11511_v26 }
 0x444   : > { %11038 = vmatprep.mubr.f32.mxu0 %v28776_v36  ;;  %20446 = vmatprep.mubr.msk.f32.mxu1 %vm8437_vm0, %v19351_v25 }
 0x445   : > { %19338 = vmatmul.mubr.msk.f32.gmra.mrb[6].mxu0 %vm8437_vm0, %v19334_v59  ;;  %v12225_v1 = vpop.permute.xlu0 %12224 }
 0x446   : > { %11218 = vmatprep.mubr.f32.mxu0 %v28776_v36  ;;  %v12226_v43 = vsel %vm721_vm2, %v24001_v15, %v12225_v1  ;;  %v19405_v15 = vld [vmem:[%s28695_s3 + $0x160] sm:$0xff] }
 0x449   : > { %19346 = vmatmul.mubr.msk.f32.vlgmr.msra.gmra.mrb[4].mxu0 %vm8437_vm0, %v19342_v16  ;;  %20447 = vmatmul.mubr.msk.f32.vlgmr.msra.gmra.mrb[4].mxu1 %vm8437_vm0, %v19352_v2  ;;  %v12573_v44 = vpop.permute.xlu0 %12572 }
 0x44a   : > { %19354 = vmatpush1.msk.msra.mxu0 %vm8444_vm1, %v11324_v34  ;;  %20450 = vmatpush3.msk.msra.mxu1 %vm8444_vm1, %v11511_v26  ;;  %v12574_v60 = vsel %vm8957_vm4, %v24048_v17, %v12573_v44  ;;  %v19423_v17 = vld [vmem:[%s28695_s3 + $0x180] sm:$0xff]  ;;  %vm18817_vm4 = vcmask 1024  }
 0x44b   : > { %19362 = vmatprep.subr.msk.mxu0 %vm8444_vm1, %v11510_v49  ;;  %20454 = vmatprep.subr.msk.mxu1 %vm8444_vm1, %v11696_v47 }
 0x44c   : > { %11224 = vmatprep.mubr.f32.mxu0 %v28776_v36  ;;  %20451 = vmatprep.mubr.msk.f32.mxu1 %vm8437_vm0, %v19360_v0 }
 0x44d   : > { %19347 = vmatmul.mubr.msk.f32.gmra.mrb[6].mxu0 %vm8437_vm0, %v19343_v22 }
 0x44e   : > { %11403 = vmatprep.mubr.f32.mxu0 %v28776_v36 }
 0x451   : > { %19355 = vmatmul.mubr.msk.f32.vlgmr.msra.gmra.mrb[4].mxu0 %vm8437_vm0, %v19351_v25  ;;  %20452 = vmatmul.mubr.msk.f32.vlgmr.msra.gmra.mrb[4].mxu1 %vm8437_vm0, %v19361_v50 }
 0x452   : > { %19363 = vmatpush1.msk.msra.mxu0 %vm8444_vm1, %v11509_v57  ;;  %20455 = vmatpush3.msk.msra.mxu1 %vm8444_vm1, %v11696_v47 }
 0x453   : > { %19371 = vmatprep.subr.msk.mxu0 %vm8444_vm1, %v11695_v62  ;;  %20459 = vmatprep.subr.msk.mxu1 %vm8444_vm1, %v11881_v61 }
 0x454   : > { %11409 = vmatprep.mubr.f32.mxu0 %v28776_v36  ;;  %20456 = vmatprep.mubr.msk.f32.mxu1 %vm8437_vm0, %v19369_v58 }
 0x455   : > { %19356 = vmatmul.mubr.msk.f32.gmra.mrb[6].mxu0 %vm8437_vm0, %v19352_v2 }
 0x456   : > { %11588 = vmatprep.mubr.f32.mxu0 %v28776_v36 }
 0x459   : > { %19364 = vmatmul.mubr.msk.f32.vlgmr.msra.gmra.mrb[4].mxu0 %vm8437_vm0, %v19360_v0  ;;  %20457 = vmatmul.mubr.msk.f32.vlgmr.msra.gmra.mrb[4].mxu1 %vm8437_vm0, %v19370_v10 }
 0x45a   : > { %19372 = vmatpush1.msk.msra.mxu0 %vm8444_vm1, %v11694_v11  ;;  %20460 = vmatpush3.msk.msra.mxu1 %vm8444_vm1, %v11881_v61  ;;  %v12922_v27 = vpop.permute.xlu0 %12921 }
 0x45b   : > { %19380 = vmatprep.subr.msk.mxu0 %vm8444_vm1, %v11880_v20  ;;  %20464 = vmatprep.subr.msk.mxu1 %vm8444_vm1, %v23982_v13 }
 0x45c   : > { %11594 = vmatprep.mubr.f32.mxu0 %v28776_v36  ;;  %20461 = vmatprep.mubr.msk.f32.mxu1 %vm8437_vm0, %v19378_v19 }
 0x45d   : > { %19365 = vmatmul.mubr.msk.f32.gmra.mrb[6].mxu0 %vm8437_vm0, %v19361_v50 }
 0x45e   : > { %11773 = vmatprep.mubr.f32.mxu0 %v28776_v36 }
 0x461   : > { %19373 = vmatmul.mubr.msk.f32.vlgmr.msra.gmra.mrb[4].mxu0 %vm8437_vm0, %v19369_v58  ;;  %20462 = vmatmul.mubr.msk.f32.vlgmr.msra.gmra.mrb[4].mxu1 %vm8437_vm0, %v19379_v24 }
 0x462   : > { %19381 = vmatpush1.msk.msra.mxu0 %vm8444_vm1, %v11879_v28  ;;  %20465 = vmatpush3.msk.msra.mxu1 %vm8444_vm1, %v23982_v13  ;;  %v12399_v13 = vpop.permute.xlu1 %12398  ;;  %v24600_v28 = vld [vmem:[%s28697_s5 + $0x80] sm:$0xff] }
 0x463   : > { %19389 = vmatprep.subr.msk.mxu0 %vm8444_vm1, %v23896_v6  ;;  %20469 = vmatprep.subr.msk.mxu1 %vm8444_vm1, %v12225_v1  ;;  %v19396_v6 = vld [vmem:[%s28695_s3 + $0x150] sm:$0xff]  ;;  %v12400_v51 = vsel %vm1062_vm3, %v24041_v29, %v12399_v13  ;;  %vm13077_vm3 = vcmask 130048  }
 0x464   : > { %11779 = vmatprep.mubr.f32.mxu0 %v28776_v36  ;;  %20466 = vmatprep.mubr.msk.f32.mxu1 %vm8437_vm0, %v19387_v32  ;;  %v19414_v29 = vld [vmem:[%s28695_s3 + $0x170] sm:$0xff] }
 0x465   : > { %19374 = vmatmul.mubr.msk.f32.gmra.mrb[6].mxu0 %vm8437_vm0, %v19370_v10 }
 0x466   : > { %11958 = vmatprep.mubr.f32.mxu0 %v28776_v36  ;;  %v12747_v52 = vpop.permute.xlu1 %12746 }
 0x467   : > { %v12748_v9 = vsel %vm9139_vm5, %v24097_v46, %v12747_v52  ;;  %vm18815_vm5 = vcmask 7168  }
 0x469   : > { %19382 = vmatmul.mubr.msk.f32.vlgmr.msra.gmra.mrb[4].mxu0 %vm8437_vm0, %v19378_v19  ;;  %20467 = vmatmul.mubr.msk.f32.vlgmr.msra.gmra.mrb[4].mxu1 %vm8437_vm0, %v19388_v41 }
 0x46a   : > { %19390 = vmatpush1.msk.msra.mxu0 %vm8444_vm1, %v23901_v14  ;;  %20470 = vmatpush3.msk.msra.mxu1 %vm8444_vm1, %v12225_v1  ;;  %v19397_v14 = vld [vmem:[%s28695_s3 + $0x158] sm:$0xff]  ;;  %v12927_v5 = vpop.permute.xlu1 %12926  ;;  %v24614_v1 = vld [vmem:[%s28697_s5 + $0x100] sm:$0xff] }
 0x46b   : > { %19398 = vmatprep.subr.msk.mxu0 %vm8444_vm1, %v12226_v43  ;;  %20474 = vmatprep.subr.msk.mxu1 %vm8444_vm1, %v12399_v13  ;;  %v28762_v43 = vmov 0.0|0.0  }
 0x46c   : > { %11964 = vmatprep.mubr.f32.mxu0 %v28776_v36  ;;  %20471 = vmatprep.mubr.msk.f32.mxu1 %vm8437_vm0, %v19396_v6 }
 0x46d   : > { %19383 = vmatmul.mubr.msk.f32.gmra.mrb[6].mxu0 %vm8437_vm0, %v19379_v24  ;;  %v24593_v24 = vld [vmem:[%s28697_s5 + $0x40] sm:$0xff] }
 0x46e   : > { %12127 = vmatprep.mubr.f32.mxu0 %v28776_v36 }
 0x471   : > { %19391 = vmatmul.mubr.msk.f32.vlgmr.msra.gmra.mrb[4].mxu0 %vm8437_vm0, %v19387_v32  ;;  %20472 = vmatmul.mubr.msk.f32.vlgmr.msra.gmra.mrb[4].mxu1 %vm8437_vm0, %v19397_v14  ;;  %v24607_v32 = vld [vmem:[%s28697_s5 + $0xc0] sm:$0xff] }
 0x472   : > { %19399 = vmatpush1.msk.msra.mxu0 %vm8444_vm1, %v24022_v18  ;;  %20475 = vmatpush3.msk.msra.mxu1 %vm8444_vm1, %v12399_v13  ;;  %v19406_v18 = vld [vmem:[%s28695_s3 + $0x168] sm:$0xff]  ;;  %v24635_v13 = vld [vmem:[%s28697_s5 + $0x1c0] sm:$0xff] }
 0x473   : > { %19407 = vmatprep.subr.msk.mxu0 %vm8444_vm1, %v12400_v51  ;;  %20479 = vmatprep.subr.msk.mxu1 %vm8444_vm1, %v12573_v44 }
 0x474   : > { %12133 = vmatprep.mubr.f32.mxu0 %v28776_v36  ;;  %20476 = vmatprep.mubr.msk.f32.mxu1 %vm8437_vm0, %v19405_v15 }
 0x475   : > { %19392 = vmatmul.mubr.msk.f32.gmra.mrb[6].mxu0 %vm8437_vm0, %v19388_v41  ;;  %v24621_v41 = vld [vmem:[%s28697_s5 + $0x140] sm:$0xff] }
 0x476   : > { %12301 = vmatprep.mubr.f32.mxu0 %v28776_v36 }
 0x479   : > { %19400 = vmatmul.mubr.msk.f32.vlgmr.msra.gmra.mrb[4].mxu0 %vm8437_vm0, %v19396_v6  ;;  %20477 = vmatmul.mubr.msk.f32.vlgmr.msra.gmra.mrb[4].mxu1 %vm8437_vm0, %v19406_v18  ;;  %v24628_v6 = vld [vmem:[%s28697_s5 + $0x180] sm:$0xff] }
 0x47a   : > { %19408 = vmatpush1.msk.msra.mxu0 %vm8444_vm1, %v24052_v56  ;;  %20480 = vmatpush3.msk.msra.mxu1 %vm8444_vm1, %v12573_v44  ;;  %v19415_v56 = vld [vmem:[%s28695_s3 + $0x178] sm:$0xff] }
 0x47b   : > { %19416 = vmatprep.subr.msk.mxu0 %vm8444_vm1, %v12574_v60  ;;  %20484 = vmatprep.subr.msk.mxu1 %vm8444_vm1, %v12747_v52 }
 0x47c   : > { %12307 = vmatprep.mubr.f32.mxu0 %v28776_v36  ;;  %20481 = vmatprep.mubr.msk.f32.mxu1 %vm8437_vm0, %v19414_v29 }
 0x47d   : > { %19401 = vmatmul.mubr.msk.f32.gmra.mrb[6].mxu0 %vm8437_vm0, %v19397_v14 }
 0x47e   : > { %12475 = vmatprep.mubr.f32.mxu0 %v28776_v36 }
 0x481   : > { %19409 = vmatmul.mubr.msk.f32.vlgmr.msra.gmra.mrb[4].mxu0 %vm8437_vm0, %v19405_v15  ;;  %20482 = vmatmul.mubr.msk.f32.vlgmr.msra.gmra.mrb[4].mxu1 %vm8437_vm0, %v19415_v56 }
 0x482   : > { %19417 = vmatpush1.msk.msra.mxu0 %vm8444_vm1, %v24088_v45  ;;  %20485 = vmatpush3.msk.msra.mxu1 %vm8444_vm1, %v12747_v52 }
 0x483   : > { %19425 = vmatprep.subr.msk.mxu0 %vm8444_vm1, %v12748_v9  ;;  %12481 = vmatprep.mubr.f32.mxu0 %v28776_v36 }
 0x484   : > { %20486 = vmatprep.mubr.msk.f32.mxu1 %vm8437_vm0, %v19423_v17  ;;  %21802 = vmatprep.subr.bf16.mxu1 %v28762_v43 }
 0x485   : > { %19410 = vmatmul.mubr.msk.f32.gmra.mrb[6].mxu0 %vm8437_vm0, %v19406_v18 }
 0x486   : > { %12649 = vmatprep.mubr.f32.mxu0 %v28776_v36 }
 0x489   : > { %19418 = vmatmul.mubr.msk.f32.vlgmr.msra.gmra.mrb[4].mxu0 %vm8437_vm0, %v19414_v29  ;;  %20487 = vmatmul.mubr.msk.f32.vlgmr.msra.gmra.mrb[4].mxu1 %vm8437_vm0, %v19424_v12 }
 0x48a   : > { %19426 = vmatpush1.msk.msra.mxu0 %vm8444_vm1, %v24114_v55  ;;  %12655 = vmatprep.mubr.f32.mxu0 %v28776_v36  ;;  %vm18736_vm1 = vcmask 1043456  }
 0x48b   : > { %21808 = vmatprep.subr.bf16.mxu0 %v28762_v43 }
 0x48d   : > { %19419 = vmatmul.mubr.msk.f32.gmra.mrb[6].mxu0 %vm8437_vm0, %v19415_v56 }
 0x48e   : > { %12823 = vmatprep.mubr.f32.mxu0 %v28776_v36 }
 0x491   : > { %19427 = vmatmul.mubr.msk.f32.vlgmr.msra.gmra.mrb[4].mxu0 %vm8437_vm0, %v19423_v17 }
 0x492   : > { %12829 = vmatprep.mubr.f32.mxu0 %v28776_v36 }
 0x495   : > { %19428 = vmatmul.mubr.msk.f32.gmra.mrb[6].mxu0 %vm8437_vm0, %v19424_v12  ;;  %vm18729_vm0 = vcmask 687104  }
 0x55c   : > { %v20488_v45 = vpop.f32.mrb[4].mxu1 }
 0x55d   : > { %v12902_v46 = vpop.f32.mrb[5].mxu1  ;;  %v24548_v38 = vadd.f32 %v20488_v45, %v12927_v5  ;;  %v24694_v45 = vld [vmem:[%s28697_s5 + $0x20] sm:$0xff] }
 0x55e   : > { %v24546_v3 = vadd.f32 %v12922_v27, %v12902_v46  ;;  %v24703_v46 = vld [vmem:[%s28697_s5 + $0x60] sm:$0xff] }
 0x55f   : > { %v28761_v26 = vmax.f32 %v24548_v38, 0.0 }
 0x560   : > { %v12937_v23 = vmax.f32 %v24546_v3, 0.0 }
 0x564   : > { %v12825_v37 = vpop.f32.mrb[4].mxu0 }
 0x565   : > { %v12929_v39 = vadd.f32 %v12922_v27, %v12825_v37  ;;  %v12827_v59 = vpop.f32.mrb[5].mxu0 }
 0x566   : > { %v12930_v55 = vadd.f32 %v12922_v27, %v12827_v59  ;;  %v24712_v27 = vld [vmem:[%s28697_s5 + $0xa0] sm:$0xff] }
 0x567   : > { %v12935_v4 = vmax.f32 %v12929_v39, 0.0  ;;  %v24732_v39 = vld [vmem:[%s28697_s5 + $0x120] sm:$0xff] }
 0x568   : > { %v12936_v16 = vmax.f32 %v12930_v55, 0.0  ;;  %v12831_v7 = vpop.f32.mrb[6].mxu0  ;;  %v24743_v55 = vld [vmem:[%s28697_s5 + $0x160] sm:$0xff] }
 0x569   : > { %v12932_v40 = vadd.f32 %v12927_v5, %v12831_v7  ;;  %v12833_v8 = vpop.f32.mrb[7].mxu0 }
 0x56a   : > { %v22299_v21 = vpack.i.bf16 %v12936_v16, %v12935_v4  ;;  %v12933_v22 = vadd.f32 %v12927_v5, %v12833_v8  ;;  %v24723_v5 = vld [vmem:[%s28697_s5 + $0xe0] sm:$0xff] }
 0x56b   : > { %v12938_v25 = vmax.f32 %v12932_v40, 0.0 }
 0x56c   : > { %v12939_v30 = vmax.f32 %v12933_v22, 0.0  ;;  %22300 = vrot.lane.b32.xlu0 %v22299_v21, %s22485_s23 }
 0x56d   : > { %v22304_v31 = vpack.i.bf16 %v12938_v25, %v12937_v23 }
 0x56e   : > { %v22309_v33 = vpack.i.bf16 %v28761_v26, %v12939_v30  ;;  %v25127_v26 = vld [vmem:[%s28697_s5 + $0xe8] sm:$0xff] }
 0x56f   : > { %22305 = vrot.lane.b32.xlu1 %v22304_v31, %s22485_s23 }
 0x570   : > { %22310 = vrot.lane.b32.xlu0 %v22309_v33, %s22485_s23  ;;  %s28769_s23 = smov 122  }
 0x5de   : > { %v22301_v2 = vpop.permute.xlu0 %22300 }
 0x5df   : > { %v22303_v34 = vunpack.i.h.bf16 %v22301_v2  ;;  %v22302_v42 = vunpack.i.l.bf16 %v22301_v2 }
 0x5e1   : > { %v24559_v0 = vpop.permute.xlu1 %22305  ;;  %v12959_v35 = vsel %vm721_vm2, %v22302_v42, %v22303_v34 }
 0x5e2   : > { %v22308_v47 = vunpack.i.h.bf16 %v24559_v0  ;;  %v22307_v49 = vunpack.i.l.bf16 %v24559_v0  ;;  %v24564_v50 = vpop.permute.xlu0 %22310  ;;  %v12969_v58 = vmax.f32 %v12935_v4, %v12959_v35 }
 0x5e3   : > { %v22313_v53 = vunpack.i.h.bf16 %v24564_v50  ;;  %v22312_v54 = vunpack.i.l.bf16 %v24564_v50 }
 0x5e4   : > { %v12960_v57 = vsel %vm721_vm2, %v22303_v34, %v22307_v49 }
 0x5e5   : > { %v24571_v61 = vmax.f32 %v12936_v16, %v12960_v57  ;;  %v12961_v62 = vsel %vm721_vm2, %v22308_v47, %v22312_v54  ;;  %v12962_v63 = vsel %vm721_vm2, %v22312_v54, %v22313_v53  ;;  %vm22512_vm2 = vmmov 0   ;;  %v24754_v16 = vld [vmem:[%s28697_s5 + $0x1a0] sm:$0xff] }
 0x5e6   : > { %v12972_v10 = vmax.f32 %v12938_v25, %v12961_v62  ;;  %v24577_v11 = vmax.f32 %v12939_v30, %v12962_v63  ;;  %20493 = vmatprep.mubr.msk.f32.mxu1 %vm22512_vm2, %v28776_v36  ;;  %20591 = vmatprep.mubr.msk.f32.mxu0 %vm22512_vm2, %v28776_v36 }
 0x5e7   : > { %v22314_v19 = vpack.i.bf16 %v24571_v61, %v12969_v58 }
 0x5e8   : > { %v22319_v20 = vpack.i.bf16 %v24577_v11, %v12972_v10 }
 0x5e9   : > { %22315 = vrot.lane.b32.xlu1 %v22314_v19, %s22490_s13 }
 0x5ea   : > { %22320 = vrot.lane.b32.xlu0 %v22319_v20, %s22490_s13 }
 0x5ee   : > { %13039 = vrot.lane.b32.xlu0 %v24586_v48, %s22487_s29 }
 0x5f2   : > { %13043 = vrot.lane.b32.xlu0 %v24593_v24, %s22487_s29 }
 0x5f6   : > { %13047 = vrot.lane.b32.xlu0 %v24600_v28, %s22487_s29 }
 0x5fa   : > { %13051 = vrot.lane.b32.xlu0 %v24607_v32, %s22487_s29 }
 0x5fe   : > { %13055 = vrot.lane.b32.xlu0 %v24614_v1, %s22487_s29 }
 0x602   : > { %13059 = vrot.lane.b32.xlu0 %v24621_v41, %s22487_s29 }
 0x606   : > { %13063 = vrot.lane.b32.xlu0 %v24628_v6, %s22487_s29 }
 0x60a   : > { %13067 = vrot.lane.b32.xlu0 %v24635_v13, %s22487_s29 }
 0x60e   : > { %13418 = vrot.lane.b32.xlu0 %v24586_v48, %s22490_s13 }
 0x612   : > { %13422 = vrot.lane.b32.xlu0 %v24593_v24, %s22490_s13 }
 0x616   : > { %13426 = vrot.lane.b32.xlu0 %v24600_v28, %s22490_s13 }
 0x61a   : > { %13430 = vrot.lane.b32.xlu0 %v24607_v32, %s22490_s13 }
 0x61e   : > { %13434 = vrot.lane.b32.xlu0 %v24614_v1, %s22490_s13 }
 0x622   : > { %13438 = vrot.lane.b32.xlu0 %v24621_v41, %s22490_s13 }
 0x626   : > { %13442 = vrot.lane.b32.xlu0 %v24628_v6, %s22490_s13 }
 0x62a   : > { %13446 = vrot.lane.b32.xlu0 %v24635_v13, %s22490_s13 }
 0x62e   : > { %13860 = vrot.lane.b32.xlu0 %v24586_v48, %s22496_s19 }
 0x65b   : > { %v24659_v14 = vpop.permute.xlu1 %22315 }
 0x65c   : > { %v28759_v15 = vunpack.i.h.bf16 %v24659_v14  ;;  %v22317_v44 = vunpack.i.l.bf16 %v24659_v14  ;;  %v24663_v51 = vpop.permute.xlu0 %22320 }
 0x65d   : > { %v28760_v18 = vunpack.i.h.bf16 %v24663_v51  ;;  %v22322_v29 = vunpack.i.l.bf16 %v24663_v51 }
 0x65e   : > { %v12993_v52 = vsel %vm2086_vm7, %v22317_v44, %v28759_v15 }
 0x65f   : > { %v24674_v60 = vmax.f32 %v12969_v58, %v12993_v52  ;;  %v12995_v56 = vsel %vm2086_vm7, %v22322_v29, %v28760_v18 }
 0x660   : > { %v24679_v17 = vmax.f32 %v12972_v10, %v12995_v56  ;;  %v24718_v37 = vpop.permute.xlu0 %13039 }
 0x662   : > { %v24683_v9 = vpack.i.bf16 %v24679_v17, %v24674_v60  ;;  %v21806_v12 = vpack.c.bf16 %v24679_v17, %v24674_v60 }
 0x664   : > { %22335 = vrot.lane.b32.xlu0 %v24683_v9, %s28769_s23  ;;  %22325 = vrot.lane.b32.xlu1 %v24683_v9, %s22486_s28  ;;  %v24734_v59 = vpop.permute.xlu0 %13043 }
 0x668   : > { %13862 = vrot.lane.b32.xlu0 %v24694_v45, %s22496_s19  ;;  %13041 = vrot.lane.b32.xlu1 %v24694_v45, %s22487_s29  ;;  %v24749_v4 = vpop.permute.xlu0 %13047 }
 0x66c   : > { %13864 = vrot.lane.b32.xlu0 %v24593_v24, %s22496_s19  ;;  %13045 = vrot.lane.b32.xlu1 %v24703_v46, %s22487_s29  ;;  %v24760_v7 = vpop.permute.xlu0 %13051 }
 0x670   : > { %13866 = vrot.lane.b32.xlu0 %v24703_v46, %s22496_s19  ;;  %13049 = vrot.lane.b32.xlu1 %v24712_v27, %s22487_s29  ;;  %v24770_v40 = vpop.permute.xlu0 %13055 }
 0x674   : > { %13868 = vrot.lane.b32.xlu0 %v24600_v28, %s22496_s19  ;;  %13053 = vrot.lane.b32.xlu1 %v24723_v5, %s22487_s29  ;;  %v24776_v8 = vpop.permute.xlu0 %13059 }
 0x678   : > { %13870 = vrot.lane.b32.xlu0 %v24712_v27, %s22496_s19  ;;  %13057 = vrot.lane.b32.xlu1 %v24732_v39, %s22487_s29  ;;  %v24786_v21 = vpop.permute.xlu0 %13063 }
 0x67c   : > { %13872 = vrot.lane.b32.xlu0 %v24607_v32, %s22496_s19  ;;  %13061 = vrot.lane.b32.xlu1 %v24743_v55, %s22487_s29  ;;  %v24792_v22 = vpop.permute.xlu0 %13067 }
 0x680   : > { %13874 = vrot.lane.b32.xlu0 %v24723_v5, %s22496_s19  ;;  %13065 = vrot.lane.b32.xlu1 %v24754_v16, %s22487_s29  ;;  %v24802_v25 = vpop.permute.xlu0 %13418 }
 0x684   : > { %13876 = vrot.lane.b32.xlu0 %v24614_v1, %s22496_s19  ;;  %22330 = vrot.lane.b32.xlu1 %v24683_v9, %s22501_s20  ;;  %v24808_v30 = vpop.permute.xlu0 %13422 }
 0x688   : > { %13878 = vrot.lane.b32.xlu0 %v24732_v39, %s22496_s19  ;;  %13420 = vrot.lane.b32.xlu1 %v24694_v45, %s22490_s13  ;;  %v24818_v31 = vpop.permute.xlu0 %13426 }
 0x68c   : > { %13880 = vrot.lane.b32.xlu0 %v24621_v41, %s22496_s19  ;;  %13424 = vrot.lane.b32.xlu1 %v24703_v46, %s22490_s13  ;;  %v24824_v33 = vpop.permute.xlu0 %13430 }
 0x690   : > { %13882 = vrot.lane.b32.xlu0 %v24743_v55, %s22496_s19  ;;  %13428 = vrot.lane.b32.xlu1 %v24712_v27, %s22490_s13  ;;  %v24834_v2 = vpop.permute.xlu0 %13434 }
 0x694   : > { %13884 = vrot.lane.b32.xlu0 %v24628_v6, %s22496_s19  ;;  %13432 = vrot.lane.b32.xlu1 %v24723_v5, %s22490_s13  ;;  %v24840_v34 = vpop.permute.xlu0 %13438 }
 0x698   : > { %13886 = vrot.lane.b32.xlu0 %v24754_v16, %s22496_s19  ;;  %13436 = vrot.lane.b32.xlu1 %v24732_v39, %s22490_s13  ;;  %v24850_v42 = vpop.permute.xlu0 %13442 }
 0x69c   : > { %13667 = vrot.lane.b32.xlu0 %v24635_v13, %s22493_s16  ;;  %13440 = vrot.lane.b32.xlu1 %v24743_v55, %s22490_s13  ;;  %v24856_v35 = vpop.permute.xlu0 %13446 }
 0x6a0   : > { %13888 = vrot.lane.b32.xlu0 %v24635_v13, %s22496_s19  ;;  %13444 = vrot.lane.b32.xlu1 %v24754_v16, %s22490_s13  ;;  %v24866_v47 = vpop.permute.xlu0 %13860 }
 0x6a4   : > { %14302 = vrot.lane.b32.xlu0 %v24586_v48, %s22506_s27  ;;  %13639 = vrot.lane.b32.xlu1 %v24586_v48, %s22493_s16 }
 0x6a8   : > { %14304 = vrot.lane.b32.xlu0 %v24694_v45, %s22506_s27  ;;  %13641 = vrot.lane.b32.xlu1 %v24694_v45, %s22493_s16 }
 0x6ac   : > { %14306 = vrot.lane.b32.xlu0 %v24593_v24, %s22506_s27  ;;  %22340 = vrot.lane.b32.xlu1 %v24683_v9, %s28768_s21 }
 0x6b0   : > { %14308 = vrot.lane.b32.xlu0 %v24703_v46, %s22506_s27  ;;  %13643 = vrot.lane.b32.xlu1 %v24593_v24, %s22493_s16 }
 0x6b4   : > { %14310 = vrot.lane.b32.xlu0 %v24600_v28, %s22506_s27  ;;  %13645 = vrot.lane.b32.xlu1 %v24703_v46, %s22493_s16 }
 0x6b8   : > { %14312 = vrot.lane.b32.xlu0 %v24712_v27, %s22506_s27  ;;  %13647 = vrot.lane.b32.xlu1 %v24600_v28, %s22493_s16 }
 0x6bc   : > { %14314 = vrot.lane.b32.xlu0 %v24607_v32, %s22506_s27  ;;  %13649 = vrot.lane.b32.xlu1 %v24712_v27, %s22493_s16 }
 0x6c0   : > { %14316 = vrot.lane.b32.xlu0 %v24723_v5, %s22506_s27  ;;  %13651 = vrot.lane.b32.xlu1 %v24607_v32, %s22493_s16 }
 0x6c4   : > { %14318 = vrot.lane.b32.xlu0 %v24614_v1, %s22506_s27  ;;  %13653 = vrot.lane.b32.xlu1 %v24723_v5, %s22493_s16 }
 0x6c8   : > { %14320 = vrot.lane.b32.xlu0 %v24732_v39, %s22506_s27  ;;  %13655 = vrot.lane.b32.xlu1 %v24614_v1, %s22493_s16 }
 0x6cc   : > { %14322 = vrot.lane.b32.xlu0 %v24621_v41, %s22506_s27  ;;  %13657 = vrot.lane.b32.xlu1 %v24732_v39, %s22493_s16 }
 0x6d0   : > { %14324 = vrot.lane.b32.xlu0 %v24743_v55, %s22506_s27  ;;  %13659 = vrot.lane.b32.xlu1 %v24621_v41, %s22493_s16 }
 0x6d4   : > { %14326 = vrot.lane.b32.xlu0 %v24628_v6, %s22506_s27  ;;  %13661 = vrot.lane.b32.xlu1 %v24743_v55, %s22493_s16 }
 0x6d6   : > { %v24872_v54 = vpop.permute.xlu0 %22335  ;;  %v22326_v57 = vpop.permute.xlu1 %22325 }
 0x6d7   : > { %v22328_v58 = vunpack.i.h.bf16 %v22326_v57  ;;  %v22327_v62 = vunpack.i.l.bf16 %v22326_v57 }
 0x6d8   : > { %14328 = vrot.lane.b32.xlu0 %v24754_v16, %s22506_s27  ;;  %13663 = vrot.lane.b32.xlu1 %v24628_v6, %s22493_s16 }
 0x6d9   : > { %v21803_v63 = vpack.c.bf16 %v22328_v58, %v22327_v62 }
 0x6da   : > { %v24878_v10 = vpop.permute.xlu0 %13862  ;;  %v13042_v19 = vpop.permute.xlu1 %13041 }
 0x6db   : > { %21804 = vmatpush3.bf16.msra.mxu1 %v21803_v63 }
 0x6dc   : > { %14109 = vrot.lane.b32.xlu0 %v24635_v13, %s22515_s26  ;;  %13665 = vrot.lane.b32.xlu1 %v24754_v16, %s22493_s16 }
 0x6dd   : > { %21805 = vmatprep.subr.bf16.mxu1 %v28762_v43 }
 0x6de   : > { %v24885_v20 = vpop.permute.xlu0 %13864  ;;  %v13046_v44 = vpop.permute.xlu1 %13045  ;;  %20494 = vmatmul.mubr.msk.f32.vlgmr.msra.gmra.mrb[6].mxu1 %vm13077_vm3, %v24718_v37 }
 0x6df   : > { %21807 = vmatpush3.bf16.msra.mxu1 %v21806_v12  ;;  %20496 = vmatprep.mubr.msk.f32.mxu1 %vm22512_vm2, %v28776_v36 }
 0x6e0   : > { %14330 = vrot.lane.b32.xlu0 %v24635_v13, %s22506_s27  ;;  %14081 = vrot.lane.b32.xlu1 %v24586_v48, %s22515_s26 }
 0x6e1   : > { %21811 = vmatprep.subr.bf16.mxu1 %v28762_v43 }
 0x6e2   : > { %v24899_v29 = vpop.permute.xlu0 %13866  ;;  %v13050_v52 = vpop.permute.xlu1 %13049  ;;  %20497 = vmatmul.mubr.msk.f32.gmra.mrb[8].mxu1 %vm13077_vm3, %v13042_v19 }
 0x6e3   : > { %20499 = vmatprep.mubr.msk.f32.mxu1 %vm22512_vm2, %v28776_v36 }
 0x6e4   : > { %14525 = vrot.lane.b32.xlu0 %v24694_v45, %s22516_s14  ;;  %22345 = vrot.lane.b32.xlu1 %v24683_v9, %s22496_s19 }
 0x6e6   : > { %v24908_v60 = vpop.permute.xlu0 %13868  ;;  %v13054_v56 = vpop.permute.xlu1 %13053  ;;  %20500 = vmatmul.mubr.msk.f32.gmra.mrb[10].mxu1 %vm13077_vm3, %v24734_v59 }
 0x6e7   : > { %20502 = vmatprep.mubr.msk.f32.mxu1 %vm22512_vm2, %v28776_v36 }
 0x6e8   : > { %14529 = vrot.lane.b32.xlu0 %v24703_v46, %s22516_s14  ;;  %22350 = vrot.lane.b32.xlu1 %v24683_v9, %s22498_s25 }
 0x6ea   : > { %v24918_v17 = vpop.permute.xlu0 %13870  ;;  %v13058_v12 = vpop.permute.xlu1 %13057  ;;  %20503 = vmatmul.mubr.msk.f32.gmra.mrb[12].mxu1 %vm13077_vm3, %v13046_v44 }
 0x6eb   : > { %20505 = vmatprep.mubr.msk.f32.mxu1 %vm22512_vm2, %v28776_v36 }
 0x6ec   : > { %14533 = vrot.lane.b32.xlu0 %v24712_v27, %s22516_s14  ;;  %14083 = vrot.lane.b32.xlu1 %v24694_v45, %s22515_s26 }
 0x6ee   : > { %v24927_v37 = vpop.permute.xlu0 %13872  ;;  %v13062_v59 = vpop.permute.xlu1 %13061  ;;  %20506 = vmatmul.mubr.msk.f32.gmra.mrb[14].mxu1 %vm13077_vm3, %v24749_v4 }
 0x6ef   : > { %20508 = vmatprep.mubr.msk.f32.mxu1 %vm22512_vm2, %v28776_v36 }
 0x6f0   : > { %14537 = vrot.lane.b32.xlu0 %v24723_v5, %s22516_s14  ;;  %14085 = vrot.lane.b32.xlu1 %v24593_v24, %s22515_s26 }
 0x6f2   : > { %v24937_v57 = vpop.permute.xlu1 %13065  ;;  %20509 = vmatmul.mubr.msk.f32.gmra.mrb[16].mxu1 %vm13077_vm3, %v13050_v52  ;;  %v24940_v58 = vpop.permute.xlu0 %13874 }
 0x6f3   : > { %20511 = vmatprep.mubr.msk.f32.mxu1 %vm22512_vm2, %v28776_v36 }
 0x6f4   : > { %14541 = vrot.lane.b32.xlu0 %v24732_v39, %s22516_s14  ;;  %14087 = vrot.lane.b32.xlu1 %v24703_v46, %s22515_s26 }
 0x6f6   : > { %v22331_v4 = vpop.permute.xlu1 %22330  ;;  %20512 = vmatmul.mubr.msk.f32.gmra.mrb[18].mxu1 %vm13077_vm3, %v24760_v7  ;;  %v24956_v19 = vpop.permute.xlu0 %13876  ;;  %v24968_v7 = vld [vmem:[%s28697_s5 + $0x8] sm:$0xff] }
 0x6f7   : > { %v22333_v62 = vunpack.i.h.bf16 %v22331_v4  ;;  %v22332_v63 = vunpack.i.l.bf16 %v22331_v4  ;;  %20514 = vmatprep.mubr.msk.f32.mxu1 %vm22512_vm2, %v28776_v36 }
 0x6f8   : > { %14545 = vrot.lane.b32.xlu0 %v24743_v55, %s22516_s14  ;;  %14089 = vrot.lane.b32.xlu1 %v24600_v28, %s22515_s26 }
 0x6f9   : > { %v21809_v44 = vpack.c.bf16 %v22333_v62, %v22332_v63 }
 0x6fa   : > { %v13421_v52 = vpop.permute.xlu1 %13420  ;;  %20515 = vmatmul.mubr.msk.f32.gmra.mrb[20].mxu1 %vm13077_vm3, %v13054_v56  ;;  %v24975_v56 = vpop.permute.xlu0 %13878 }
 0x6fb   : > { %21810 = vmatpush3.bf16.msra.mxu0 %v21809_v44  ;;  %20517 = vmatprep.mubr.msk.f32.mxu1 %vm22512_vm2, %v28776_v36  ;;  %v25044_v44 = vld [vmem:[%s28697_s5 + $0x68] sm:$0xff] }
 0x6fc   : > { %14549 = vrot.lane.b32.xlu0 %v24754_v16, %s22516_s14  ;;  %14091 = vrot.lane.b32.xlu1 %v24712_v27, %s22515_s26 }
 0x6fd   : > { %21814 = vmatprep.subr.bf16.mxu0 %v28762_v43 }
 0x6fe   : > { %v13425_v4 = vpop.permute.xlu1 %13424  ;;  %20518 = vmatmul.mubr.msk.f32.gmra.mrb[22].mxu1 %vm13077_vm3, %v24770_v40  ;;  %20592 = vmatmul.mubr.msk.f32.vlgmr.msra.gmra.mrb[8].mxu0 %vm13077_vm3, %v24802_v25  ;;  %v24988_v40 = vld [vmem:[%s28697_s5 + $0x28] sm:$0xff]  ;;  %v25000_v62 = vpop.permute.xlu0 %13880 }
 0x6ff   : > { %20520 = vmatprep.mubr.msk.f32.mxu1 %vm22512_vm2, %v28776_v36  ;;  %20594 = vmatprep.mubr.msk.f32.mxu0 %vm22512_vm2, %v28776_v36 }
 0x700   : > { %14965 = vrot.lane.b32.xlu0 %v24968_v7, %s22487_s29  ;;  %14093 = vrot.lane.b32.xlu1 %v24607_v32, %s22515_s26 }
 0x702   : > { %v13429_v25 = vpop.permute.xlu1 %13428  ;;  %20521 = vmatmul.mubr.msk.f32.gmra.mrb[24].mxu1 %vm13077_vm3, %v13058_v12  ;;  %20595 = vmatmul.mubr.msk.f32.gmra.mrb[10].mxu0 %vm13077_vm3, %v13421_v52  ;;  %v25064_v52 = vld [vmem:[%s28697_s5 + $0x88] sm:$0xff] }
 0x703   : > { %20523 = vmatprep.mubr.msk.f32.mxu1 %vm22512_vm2, %v28776_v36  ;;  %20597 = vmatprep.mubr.msk.f32.mxu0 %vm22512_vm2, %v28776_v36 }
 0x704   : > { %14967 = vrot.lane.b32.xlu0 %v24988_v40, %s22487_s29  ;;  %14095 = vrot.lane.b32.xlu1 %v24723_v5, %s22515_s26 }
 0x706   : > { %v13433_v63 = vpop.permute.xlu1 %13432  ;;  %20524 = vmatmul.mubr.msk.f32.gmra.mrb[26].mxu1 %vm13077_vm3, %v24776_v8  ;;  %20598 = vmatmul.mubr.msk.f32.gmra.mrb[12].mxu0 %vm13077_vm3, %v24808_v30  ;;  %v25016_v8 = vpop.permute.xlu0 %13882  ;;  %v25025_v30 = vld [vmem:[%s28697_s5 + $0x48] sm:$0xff] }
 0x707   : > { %20526 = vmatprep.mubr.msk.f32.mxu1 %vm22512_vm2, %v28776_v36  ;;  %20600 = vmatprep.mubr.msk.f32.mxu0 %vm22512_vm2, %v28776_v36 }
 0x708   : > { %22370 = vrot.lane.b32.xlu0 %v24683_v9, %s22517_s30  ;;  %14097 = vrot.lane.b32.xlu1 %v24614_v1, %s22515_s26 }
 0x70a   : > { %v13437_v12 = vpop.permute.xlu1 %13436  ;;  %20527 = vmatmul.mubr.msk.f32.gmra.mrb[28].mxu1 %vm13077_vm3, %v13062_v59  ;;  %20601 = vmatmul.mubr.msk.f32.gmra.mrb[14].mxu0 %vm13077_vm3, %v13425_v4  ;;  %v22337_v4 = vunpack.i.l.bf16 %v24872_v54 }
 0x70b   : > { %20529 = vmatprep.mubr.msk.f32.mxu1 %vm22512_vm2, %v28776_v36  ;;  %20603 = vmatprep.mubr.msk.f32.mxu0 %vm22512_vm2, %v28776_v36 }
 0x70c   : > { %14099 = vrot.lane.b32.xlu1 %v24732_v39, %s22515_s26  ;;  %14969 = vrot.lane.b32.xlu0 %v25025_v30, %s22487_s29 }
 0x70e   : > { %v25031_v59 = vpop.permute.xlu1 %13440  ;;  %20530 = vmatmul.mubr.msk.f32.gmra.mrb[30].mxu1 %vm13077_vm3, %v24786_v21  ;;  %20604 = vmatmul.mubr.msk.f32.gmra.mrb[16].mxu0 %vm13077_vm3, %v24818_v31  ;;  %v25050_v21 = vpop.permute.xlu0 %13884 }
 0x70f   : > { %20532 = vmatprep.mubr.msk.f32.mxu1 %vm22512_vm2, %v28776_v36  ;;  %20606 = vmatprep.mubr.msk.f32.mxu0 %vm22512_vm2, %v28776_v36 }
 0x710   : > { %14101 = vrot.lane.b32.xlu1 %v24621_v41, %s22515_s26  ;;  %14971 = vrot.lane.b32.xlu0 %v25044_v44, %s22487_s29 }
 0x712   : > { %v25052_v31 = vpop.permute.xlu1 %13444  ;;  %20533 = vmatmul.mubr.msk.f32.gmra.mrb[32].mxu1 %vm13077_vm3, %v24937_v57  ;;  %20607 = vmatmul.mubr.msk.f32.gmra.mrb[18].mxu0 %vm13077_vm3, %v13429_v25  ;;  %v22338_v57 = vunpack.i.h.bf16 %v24872_v54  ;;  %v25078_v15 = vpop.permute.xlu0 %13886  ;;  %v25087_v54 = vld [vmem:[%s28697_s5 + $0xa8] sm:$0xff] }
 0x713   : > { %20535 = vmatprep.mubr.msk.f32.mxu1 %vm22512_vm2, %v28776_v36  ;;  %20609 = vmatprep.mubr.msk.f32.mxu0 %vm22512_vm2, %v28776_v36 }
 0x714   : > { %14103 = vrot.lane.b32.xlu1 %v24743_v55, %s22515_s26  ;;  %14973 = vrot.lane.b32.xlu0 %v25064_v52, %s22487_s29 }
 0x716   : > { %v25072_v25 = vpop.permute.xlu1 %13639  ;;  %20536 = vmatmul.mubr.msk.f32.gmra.mrb[34].mxu1 %vm13077_vm3, %v24792_v22  ;;  %20610 = vmatmul.mubr.msk.f32.gmra.mrb[20].mxu0 %vm13077_vm3, %v24824_v33  ;;  %v21812_v22 = vpack.c.bf16 %v22338_v57, %v22337_v4  ;;  %v25107_v57 = vld [vmem:[%s28697_s5 + $0xc8] sm:$0xff]  ;;  %v25109_v4 = vpop.permute.xlu0 %13667 }
 0x717   : > { %20542 = vmatprep.mubr.msk.f32.mxu1 %vm22512_vm2, %v28776_v36  ;;  %20612 = vmatprep.mubr.msk.f32.mxu0 %vm22512_vm2, %v28776_v36 }
 0x718   : > { %14105 = vrot.lane.b32.xlu1 %v24628_v6, %s22515_s26  ;;  %14975 = vrot.lane.b32.xlu0 %v25087_v54, %s22487_s29 }
 0x71a   : > { %v25093_v33 = vpop.permute.xlu1 %13641  ;;  %20543 = vmatmul.mubr.msk.f32.vlgmr.msra.gmra.mrb[36].mxu1 %vm13077_vm3, %v24586_v48  ;;  %20613 = vmatmul.mubr.msk.f32.gmra.mrb[22].mxu0 %vm13077_vm3, %v13433_v63 }
 0x71b   : > { %21813 = vmatpush3.bf16.msra.mxu1 %v21812_v22  ;;  %20545 = vmatprep.mubr.msk.f32.mxu1 %vm22512_vm2, %v28776_v36 }
 0x71c   : > { %14107 = vrot.lane.b32.xlu1 %v24754_v16, %s22515_s26  ;;  %20615 = vmatprep.mubr.msk.f32.mxu0 %vm22512_vm2, %v28776_v36 }
 0x71d   : > { %21817 = vmatprep.subr.bf16.mxu1 %v28762_v43  ;;  %14977 = vrot.lane.b32.xlu0 %v25107_v57, %s22487_s29 }
 0x71e   : > { %v22341_v63 = vpop.permute.xlu1 %22340  ;;  %20546 = vmatmul.mubr.msk.f32.gmra.mrb[38].mxu1 %vm13077_vm3, %v24694_v45  ;;  %20616 = vmatmul.mubr.msk.f32.gmra.mrb[24].mxu0 %vm13077_vm3, %v24834_v2 }
 0x71f   : > { %v22343_v22 = vunpack.i.h.bf16 %v22341_v63  ;;  %v22342_v18 = vunpack.i.l.bf16 %v22341_v63  ;;  %20548 = vmatprep.mubr.msk.f32.mxu1 %vm22512_vm2, %v28776_v36  ;;  %20618 = vmatprep.mubr.msk.f32.mxu0 %vm22512_vm2, %v28776_v36  ;;  %v25136_v63 = vpop.permute.xlu0 %13888 }
 0x720   : > { %22355 = vrot.lane.b32.xlu1 %v24683_v9, %s22505_s15 }
 0x721   : > { %v21815_v45 = vpack.c.bf16 %v22343_v22, %v22342_v18  ;;  %14979 = vrot.lane.b32.xlu0 %v25127_v26, %s22487_s29  ;;  %v25147_v18 = vld [vmem:[%s28697_s5 + $0x108] sm:$0xff] }
 0x722   : > { %v25131_v2 = vpop.permute.xlu1 %13643  ;;  %20549 = vmatmul.mubr.msk.f32.gmra.mrb[40].mxu1 %vm13077_vm3, %v24593_v24  ;;  %20619 = vmatmul.mubr.msk.f32.gmra.mrb[26].mxu0 %vm13077_vm3, %v13437_v12 }
 0x723   : > { %21816 = vmatpush3.bf16.msra.mxu0 %v21815_v45  ;;  %20551 = vmatprep.mubr.msk.f32.mxu1 %vm22512_vm2, %v28776_v36  ;;  %v25169_v22 = vpop.permute.xlu0 %14302 }
 0x724   : > { %22360 = vrot.lane.b32.xlu1 %v24683_v9, %s22518_s24  ;;  %20621 = vmatprep.mubr.msk.f32.mxu0 %vm22512_vm2, %v28776_v36  ;;  %v25167_v9 = vld [vmem:[%s28697_s5 + $0x128] sm:$0xff] }
 0x725   : > { %21820 = vmatprep.subr.bf16.mxu0 %v28762_v43  ;;  %14981 = vrot.lane.b32.xlu0 %v25147_v18, %s22487_s29 }
 0x726   : > { %v25152_v12 = vpop.permute.xlu1 %13645  ;;  %20552 = vmatmul.mubr.msk.f32.gmra.mrb[42].mxu1 %vm13077_vm3, %v24703_v46  ;;  %20622 = vmatmul.mubr.msk.f32.gmra.mrb[28].mxu0 %vm13077_vm3, %v24840_v34 }
 0x727   : > { %20554 = vmatprep.mubr.msk.f32.mxu1 %vm22512_vm2, %v28776_v36  ;;  %20624 = vmatprep.mubr.msk.f32.mxu0 %vm22512_vm2, %v28776_v36 }
 0x728   : > { %14523 = vrot.lane.b32.xlu1 %v24586_v48, %s22516_s14  ;;  %v25188_v48 = vld [vmem:[%s28697_s5 + $0x148] sm:$0xff] }
 0x729   : > { %14983 = vrot.lane.b32.xlu0 %v25167_v9, %s22487_s29 }
 0x72a   : > { %v25173_v46 = vpop.permute.xlu1 %13647  ;;  %20555 = vmatmul.mubr.msk.f32.gmra.mrb[44].mxu1 %vm13077_vm3, %v24600_v28  ;;  %20625 = vmatmul.mubr.msk.f32.gmra.mrb[30].mxu0 %vm13077_vm3, %v25031_v59  ;;  %v25198_v59 = vpop.permute.xlu0 %14304 }
 0x72b   : > { %20557 = vmatprep.mubr.msk.f32.mxu1 %vm22512_vm2, %v28776_v36  ;;  %20627 = vmatprep.mubr.msk.f32.mxu0 %vm22512_vm2, %v28776_v36 }
 0x72c   : > { %14527 = vrot.lane.b32.xlu1 %v24593_v24, %s22516_s14  ;;  %v25209_v24 = vld [vmem:[%s28697_s5 + $0x168] sm:$0xff] }
 0x72d   : > { %14985 = vrot.lane.b32.xlu0 %v25188_v48, %s22487_s29 }
 0x72e   : > { %v25192_v34 = vpop.permute.xlu1 %13649  ;;  %20558 = vmatmul.mubr.msk.f32.gmra.mrb[46].mxu1 %vm13077_vm3, %v24712_v27  ;;  %20628 = vmatmul.mubr.msk.f32.gmra.mrb[32].mxu0 %vm13077_vm3, %v24850_v42  ;;  %v25230_v42 = vpop.permute.xlu0 %14306 }
 0x72f   : > { %20560 = vmatprep.mubr.msk.f32.mxu1 %vm22512_vm2, %v28776_v36  ;;  %20630 = vmatprep.mubr.msk.f32.mxu0 %vm22512_vm2, %v28776_v36 }
 0x730   : > { %14531 = vrot.lane.b32.xlu1 %v24600_v28, %s22516_s14  ;;  %v25228_v28 = vld [vmem:[%s28697_s5 + $0x188] sm:$0xff] }
 0x731   : > { %14987 = vrot.lane.b32.xlu0 %v25209_v24, %s22487_s29 }
 0x732   : > { %v25213_v27 = vpop.permute.xlu1 %13651  ;;  %20561 = vmatmul.mubr.msk.f32.gmra.mrb[48].mxu1 %vm13077_vm3, %v24607_v32  ;;  %20631 = vmatmul.mubr.msk.f32.gmra.mrb[34].mxu0 %vm13077_vm3, %v25052_v31 }
 0x733   : > { %20563 = vmatprep.mubr.msk.f32.mxu1 %vm22512_vm2, %v28776_v36  ;;  %20633 = vmatprep.mubr.msk.f32.mxu0 %vm22512_vm2, %v28776_v36 }
 0x734   : > { %14535 = vrot.lane.b32.xlu1 %v24607_v32, %s22516_s14  ;;  %v25249_v32 = vld [vmem:[%s28697_s5 + $0x1a8] sm:$0xff] }
 0x735   : > { %14989 = vrot.lane.b32.xlu0 %v25228_v28, %s22487_s29 }
 0x736   : > { %v25234_v31 = vpop.permute.xlu1 %13653  ;;  %20564 = vmatmul.mubr.msk.f32.gmra.mrb[50].mxu1 %vm13077_vm3, %v24723_v5  ;;  %20634 = vmatmul.mubr.msk.f32.gmra.mrb[36].mxu0 %vm13077_vm3, %v24856_v35  ;;  %v25259_v35 = vpop.permute.xlu0 %14308 }
 0x737   : > { %20566 = vmatprep.mubr.msk.f32.mxu1 %vm22512_vm2, %v28776_v36  ;;  %20689 = vmatprep.mubr.msk.f32.mxu0 %vm22512_vm2, %v28776_v36 }
 0x738   : > { %14539 = vrot.lane.b32.xlu1 %v24614_v1, %s22516_s14 }
 0x739   : > { %14991 = vrot.lane.b32.xlu0 %v25249_v32, %s22487_s29 }
 0x73a   : > { %v25253_v5 = vpop.permute.xlu1 %13655  ;;  %20567 = vmatmul.mubr.msk.f32.gmra.mrb[52].mxu1 %vm13077_vm3, %v24614_v1  ;;  %20690 = vmatmul.mubr.msk.f32.vlgmr.msra.gmra.mrb[38].mxu0 %vm13077_vm3, %v24866_v47  ;;  %v25273_v1 = vmax.f32 %v12937_v23, %v22307_v49  ;;  %v28854_v47 = vmax.f32 %v24548_v38, 0.0  ;;  %v25293_v3 = vpop.permute.xlu0 %14310 }
 0x73b   : > { %20569 = vmatprep.mubr.msk.f32.mxu1 %vm22512_vm2, %v28776_v36  ;;  %20692 = vmatprep.mubr.msk.f32.mxu0 %vm22512_vm2, %v28776_v36 }
 0x73c   : > { %14543 = vrot.lane.b32.xlu1 %v24621_v41, %s22516_s14  ;;  %v25279_v45 = vmax.f32 %v28854_v47, %v22313_v53 }
 0x73d   : > { %15401 = vrot.lane.b32.xlu0 %v24968_v7, %s22493_s16 }
 0x73e   : > { %v25281_v43 = vpop.permute.xlu1 %13657  ;;  %20570 = vmatmul.mubr.msk.f32.gmra.mrb[54].mxu1 %vm13077_vm3, %v24732_v39  ;;  %20693 = vmatmul.mubr.msk.f32.gmra.mrb[40].mxu0 %vm13077_vm3, %v24878_v10  ;;  %v22364_v23 = vpack.i.bf16 %v25279_v45, %v25273_v1  ;;  %v25316_v49 = vpop.permute.xlu0 %14312 }
 0x73f   : > { %20572 = vmatprep.mubr.msk.f32.mxu1 %vm22512_vm2, %v28776_v36  ;;  %20695 = vmatprep.mubr.msk.f32.mxu0 %vm22512_vm2, %v28776_v36 }
 0x740   : > { %14547 = vrot.lane.b32.xlu1 %v24628_v6, %s22516_s14 }
 0x741   : > { %15403 = vrot.lane.b32.xlu0 %v24988_v40, %s22493_s16 }
 0x742   : > { %v25297_v38 = vpop.permute.xlu1 %13659  ;;  %20573 = vmatmul.mubr.msk.f32.gmra.mrb[56].mxu1 %vm13077_vm3, %v24621_v41  ;;  %20696 = vmatmul.mubr.msk.f32.gmra.mrb[42].mxu0 %vm13077_vm3, %v24885_v20  ;;  %v25336_v53 = vpop.permute.xlu0 %14314 }
 0x743   : > { %20575 = vmatprep.mubr.msk.f32.mxu1 %vm22512_vm2, %v28776_v36  ;;  %20698 = vmatprep.mubr.msk.f32.mxu0 %vm22512_vm2, %v28776_v36 }
 0x744   : > { %22365 = vrot.lane.b32.xlu1 %v22364_v23, %s22490_s13 }
 0x746   : > { %v25310_v0 = vpop.permute.xlu1 %13661  ;;  %20576 = vmatmul.mubr.msk.f32.gmra.mrb[58].mxu1 %vm13077_vm3, %v24743_v55  ;;  %20699 = vmatmul.mubr.msk.f32.gmra.mrb[44].mxu0 %vm13077_vm3, %v24899_v29  ;;  %v25356_v39 = vpop.permute.xlu0 %14316 }
 0x747   : > { %20578 = vmatprep.mubr.msk.f32.mxu1 %vm22512_vm2, %v28776_v36  ;;  %20701 = vmatprep.mubr.msk.f32.mxu0 %vm22512_vm2, %v28776_v36 }
 0x748   : > { %14551 = vrot.lane.b32.xlu1 %v24635_v13, %s22516_s14 }
 0x74a   : > { %v25324_v50 = vpop.permute.xlu1 %13663  ;;  %20579 = vmatmul.mubr.msk.f32.gmra.mrb[60].mxu1 %vm13077_vm3, %v24628_v6  ;;  %20702 = vmatmul.mubr.msk.f32.gmra.mrb[46].mxu0 %vm13077_vm3, %v24908_v60  ;;  %v25374_v10 = vpop.permute.xlu0 %14318 }
 0x74b   : > { %20581 = vmatprep.mubr.msk.f32.mxu1 %vm22512_vm2, %v28776_v36  ;;  %20704 = vmatprep.mubr.msk.f32.mxu0 %vm22512_vm2, %v28776_v36 }
 0x74c   : > { %15186 = vrot.lane.b32.xlu1 %v24968_v7, %s22490_s13 }
 0x74e   : > { %v25338_v41 = vpop.permute.xlu1 %13665  ;;  %20582 = vmatmul.mubr.msk.f32.gmra.mrb[62].mxu1 %vm13077_vm3, %v24754_v16  ;;  %20705 = vmatmul.mubr.msk.f32.gmra.mrb[48].mxu0 %vm13077_vm3, %v24918_v17 }
 0x74f   : > { %20584 = vmatprep.mubr.msk.f32.mxu1 %vm22512_vm2, %v28776_v36  ;;  %20707 = vmatprep.mubr.msk.f32.mxu0 %vm22512_vm2, %v28776_v36 }
 0x750   : > { %15188 = vrot.lane.b32.xlu1 %v24988_v40, %s22490_s13 }
 0x752   : > { %v25350_v6 = vpop.permute.xlu1 %14081  ;;  %20585 = vmatmul.mubr.msk.f32.gmra.mrb[64].mxu1 %vm13077_vm3, %v24635_v13  ;;  %20708 = vmatmul.mubr.msk.f32.gmra.mrb[50].mxu0 %vm13077_vm3, %v24927_v37 }
 0x753   : > { %20640 = vmatprep.mubr.msk.f32.mxu1 %vm22512_vm2, %v28776_v36  ;;  %20710 = vmatprep.mubr.msk.f32.mxu0 %vm22512_vm2, %v28776_v36 }
 0x754   : > { %15190 = vrot.lane.b32.xlu1 %v25025_v30, %s22490_s13 }
 0x756   : > { %v22346_v55 = vpop.permute.xlu1 %22345  ;;  %20641 = vmatmul.mubr.msk.f32.vlgmr.msra.gmra.mrb[66].mxu1 %vm13077_vm3, %v25072_v25  ;;  %20711 = vmatmul.mubr.msk.f32.gmra.mrb[52].mxu0 %vm13077_vm3, %v24940_v58  ;;  %v28855_v58 = vmov 0.0|0.0  }
 0x757   : > { %v22348_v13 = vunpack.i.h.bf16 %v22346_v55  ;;  %v22347_v16 = vunpack.i.l.bf16 %v22346_v55  ;;  %20643 = vmatprep.mubr.msk.f32.mxu1 %vm22512_vm2, %v28776_v36  ;;  %20713 = vmatprep.mubr.msk.f32.mxu0 %vm22512_vm2, %v28776_v36 }
 0x758   : > { %15192 = vrot.lane.b32.xlu1 %v25044_v44, %s22490_s13 }
 0x759   : > { %v21818_v20 = vpack.c.bf16 %v22348_v13, %v22347_v16 }
 0x75a   : > { %v22351_v29 = vpop.permute.xlu1 %22350  ;;  %20644 = vmatmul.mubr.msk.f32.gmra.mrb[68].mxu1 %vm13077_vm3, %v25093_v33  ;;  %20714 = vmatmul.mubr.msk.f32.gmra.mrb[54].mxu0 %vm13077_vm3, %v24956_v19  ;;  %v25393_v19 = vpop.permute.xlu0 %14320 }
 0x75b   : > { %v22353_v60 = vunpack.i.h.bf16 %v22351_v29  ;;  %v22352_v17 = vunpack.i.l.bf16 %v22351_v29  ;;  %21819 = vmatpush3.bf16.msra.mxu1 %v21818_v20  ;;  %20646 = vmatprep.mubr.msk.f32.mxu1 %vm22512_vm2, %v28776_v36 }
 0x75c   : > { %15194 = vrot.lane.b32.xlu1 %v25064_v52, %s22490_s13  ;;  %20716 = vmatprep.mubr.msk.f32.mxu0 %vm22512_vm2, %v28776_v36 }
 0x75d   : > { %v21821_v37 = vpack.c.bf16 %v22353_v60, %v22352_v17  ;;  %21823 = vmatprep.subr.bf16.mxu1 %v28855_v58 }
 0x75e   : > { %v25387_v25 = vpop.permute.xlu1 %14083  ;;  %20647 = vmatmul.mubr.msk.f32.gmra.mrb[70].mxu1 %vm13077_vm3, %v25131_v2  ;;  %20717 = vmatmul.mubr.msk.f32.gmra.mrb[56].mxu0 %vm13077_vm3, %v24975_v56  ;;  %v25414_v56 = vpop.permute.xlu0 %14322 }
 0x75f   : > { %21822 = vmatpush3.bf16.msra.mxu0 %v21821_v37  ;;  %20649 = vmatprep.mubr.msk.f32.mxu1 %vm22512_vm2, %v28776_v36 }
 0x760   : > { %15196 = vrot.lane.b32.xlu1 %v25087_v54, %s22490_s13  ;;  %20719 = vmatprep.mubr.msk.f32.mxu0 %vm22512_vm2, %v28776_v36 }
 0x761   : > { %21826 = vmatprep.subr.bf16.mxu0 %v28855_v58 }
 0x762   : > { %v25402_v33 = vpop.permute.xlu1 %14085  ;;  %20650 = vmatmul.mubr.msk.f32.gmra.mrb[72].mxu1 %vm13077_vm3, %v25152_v12  ;;  %20720 = vmatmul.mubr.msk.f32.gmra.mrb[58].mxu0 %vm13077_vm3, %v25000_v62  ;;  %v25434_v12 = vpop.permute.xlu0 %14324 }
 0x763   : > { %20652 = vmatprep.mubr.msk.f32.mxu1 %vm22512_vm2, %v28776_v36  ;;  %20722 = vmatprep.mubr.msk.f32.mxu0 %vm22512_vm2, %v28776_v36 }
 0x764   : > { %15198 = vrot.lane.b32.xlu1 %v25107_v57, %s22490_s13 }
 0x766   : > { %v25416_v2 = vpop.permute.xlu1 %14087  ;;  %20653 = vmatmul.mubr.msk.f32.gmra.mrb[74].mxu1 %vm13077_vm3, %v25173_v46  ;;  %20723 = vmatmul.mubr.msk.f32.gmra.mrb[60].mxu0 %vm13077_vm3, %v25016_v8 }
 0x767   : > { %20655 = vmatprep.mubr.msk.f32.mxu1 %vm22512_vm2, %v28776_v36  ;;  %20725 = vmatprep.mubr.msk.f32.mxu0 %vm22512_vm2, %v28776_v36 }
 0x768   : > { %15200 = vrot.lane.b32.xlu1 %v25127_v26, %s22490_s13 }
 0x76a   : > { %v25428_v62 = vpop.permute.xlu1 %14089  ;;  %20656 = vmatmul.mubr.msk.f32.gmra.mrb[76].mxu1 %vm13077_vm3, %v25192_v34  ;;  %20726 = vmatmul.mubr.msk.f32.gmra.mrb[62].mxu0 %vm13077_vm3, %v25050_v21  ;;  %v25454_v21 = vpop.permute.xlu0 %14326 }
 0x76b   : > { %20658 = vmatprep.mubr.msk.f32.mxu1 %vm22512_vm2, %v28776_v36  ;;  %20728 = vmatprep.mubr.msk.f32.mxu0 %vm22512_vm2, %v28776_v36 }
 0x76c   : > { %15202 = vrot.lane.b32.xlu1 %v25147_v18, %s22490_s13 }
 0x76e   : > { %v25442_v8 = vpop.permute.xlu1 %14091  ;;  %20659 = vmatmul.mubr.msk.f32.gmra.mrb[78].mxu1 %vm13077_vm3, %v25213_v27  ;;  %20729 = vmatmul.mubr.msk.f32.gmra.mrb[64].mxu0 %vm13077_vm3, %v25078_v15  ;;  %v25474_v34 = vpop.permute.xlu0 %14328 }
 0x76f   : > { %20661 = vmatprep.mubr.msk.f32.mxu1 %vm22512_vm2, %v28776_v36  ;;  %20731 = vmatprep.mubr.msk.f32.mxu0 %vm22512_vm2, %v28776_v36 }
 0x770   : > { %15204 = vrot.lane.b32.xlu1 %v25167_v9, %s22490_s13 }
 0x772   : > { %v25456_v46 = vpop.permute.xlu1 %14093  ;;  %20662 = vmatmul.mubr.msk.f32.gmra.mrb[80].mxu1 %vm13077_vm3, %v25234_v31  ;;  %20732 = vmatmul.mubr.msk.f32.gmra.mrb[66].mxu0 %vm13077_vm3, %v25136_v63 }
 0x773   : > { %20664 = vmatprep.mubr.msk.f32.mxu1 %vm22512_vm2, %v28776_v36  ;;  %20787 = vmatprep.mubr.msk.f32.mxu0 %vm22512_vm2, %v28776_v36 }
 0x774   : > { %15206 = vrot.lane.b32.xlu1 %v25188_v48, %s22490_s13 }
 0x776   : > { %v25468_v15 = vpop.permute.xlu1 %14095  ;;  %20665 = vmatmul.mubr.msk.f32.gmra.mrb[82].mxu1 %vm13077_vm3, %v25253_v5  ;;  %20788 = vmatmul.mubr.msk.f32.vlgmr.msra.gmra.mrb[68].mxu0 %vm13077_vm3, %v25169_v22  ;;  %v25494_v22 = vpop.permute.xlu0 %14109 }
 0x777   : > { %20667 = vmatprep.mubr.msk.f32.mxu1 %vm22512_vm2, %v28776_v36  ;;  %20790 = vmatprep.mubr.msk.f32.mxu0 %vm22512_vm2, %v28776_v36 }
 0x778   : > { %15208 = vrot.lane.b32.xlu1 %v25209_v24, %s22490_s13 }
 0x77a   : > { %v25482_v63 = vpop.permute.xlu1 %14097  ;;  %20668 = vmatmul.mubr.msk.f32.gmra.mrb[84].mxu1 %vm13077_vm3, %v25281_v43  ;;  %20791 = vmatmul.mubr.msk.f32.gmra.mrb[70].mxu0 %vm13077_vm3, %v25198_v59  ;;  %v25511_v43 = vld [vmem:[%s28697_s5 + $0x1c8] sm:$0xff] }
 0x77b   : > { %20670 = vmatprep.mubr.msk.f32.mxu1 %vm22512_vm2, %v28776_v36  ;;  %20793 = vmatprep.mubr.msk.f32.mxu0 %vm22512_vm2, %v28776_v36 }
 0x77c   : > { %15210 = vrot.lane.b32.xlu1 %v25228_v28, %s22490_s13 }
 0x77e   : > { %v25496_v27 = vpop.permute.xlu1 %14099  ;;  %20671 = vmatmul.mubr.msk.f32.gmra.mrb[86].mxu1 %vm13077_vm3, %v25297_v38  ;;  %20794 = vmatmul.mubr.msk.f32.gmra.mrb[72].mxu0 %vm13077_vm3, %v25230_v42  ;;  %v25519_v42 = vpop.permute.xlu0 %14330 }
 0x77f   : > { %20673 = vmatprep.mubr.msk.f32.mxu1 %vm22512_vm2, %v28776_v36  ;;  %20796 = vmatprep.mubr.msk.f32.mxu0 %vm22512_vm2, %v28776_v36 }
 0x780   : > { %15212 = vrot.lane.b32.xlu1 %v25249_v32, %s22490_s13 }
 0x782   : > { %v25513_v59 = vpop.permute.xlu1 %14101  ;;  %20674 = vmatmul.mubr.msk.f32.gmra.mrb[88].mxu1 %vm13077_vm3, %v25310_v0  ;;  %20797 = vmatmul.mubr.msk.f32.gmra.mrb[74].mxu0 %vm13077_vm3, %v25259_v35  ;;  %v25539_v5 = vpop.permute.xlu0 %14525 }
 0x783   : > { %20676 = vmatprep.mubr.msk.f32.mxu1 %vm22512_vm2, %v28776_v36  ;;  %20799 = vmatprep.mubr.msk.f32.mxu0 %vm22512_vm2, %v28776_v36 }
 0x784   : > { %14993 = vrot.lane.b32.xlu1 %v25511_v43, %s22487_s29 }
 0x786   : > { %v25527_v31 = vpop.permute.xlu1 %14103  ;;  %20677 = vmatmul.mubr.msk.f32.gmra.mrb[90].mxu1 %vm13077_vm3, %v25324_v50  ;;  %20800 = vmatmul.mubr.msk.f32.gmra.mrb[76].mxu0 %vm13077_vm3, %v25293_v3  ;;  %v25559_v3 = vpop.permute.xlu0 %14529 }
 0x787   : > { %20679 = vmatprep.mubr.msk.f32.mxu1 %vm22512_vm2, %v28776_v36  ;;  %20802 = vmatprep.mubr.msk.f32.mxu0 %vm22512_vm2, %v28776_v36 }
 0x788   : > { %15214 = vrot.lane.b32.xlu1 %v25511_v43, %s22490_s13 }
 0x78a   : > { %v25541_v35 = vpop.permute.xlu1 %14105  ;;  %20680 = vmatmul.mubr.msk.f32.gmra.mrb[92].mxu1 %vm13077_vm3, %v25338_v41  ;;  %20803 = vmatmul.mubr.msk.f32.gmra.mrb[78].mxu0 %vm13077_vm3, %v25316_v49  ;;  %v25577_v0 = vpop.permute.xlu0 %14533 }
 0x78b   : > { %20682 = vmatprep.mubr.msk.f32.mxu1 %vm22512_vm2, %v28776_v36  ;;  %20805 = vmatprep.mubr.msk.f32.mxu0 %vm22512_vm2, %v28776_v36 }
 0x78c   : > { %15624 = vrot.lane.b32.xlu1 %v24968_v7, %s22496_s19 }
 0x78e   : > { %v25553_v47 = vpop.permute.xlu1 %14107  ;;  %20683 = vmatmul.mubr.msk.f32.gmra.mrb[94].mxu1 %vm13077_vm3, %v25109_v4  ;;  %20806 = vmatmul.mubr.msk.f32.gmra.mrb[80].mxu0 %vm13077_vm3, %v25336_v53  ;;  %v25596_v55 = vpop.permute.xlu0 %14537 }
 0x78f   : > { %20738 = vmatprep.mubr.msk.f32.mxu1 %vm22512_vm2, %v28776_v36  ;;  %20808 = vmatprep.mubr.msk.f32.mxu0 %vm22512_vm2, %v28776_v36 }
 0x790   : > { %15626 = vrot.lane.b32.xlu1 %v24988_v40, %s22496_s19 }
 0x792   : > { %v22356_v38 = vpop.permute.xlu1 %22355  ;;  %20739 = vmatmul.mubr.msk.f32.vlgmr.msra.gmra.mrb[96].mxu1 %vm13077_vm3, %v25350_v6  ;;  %20809 = vmatmul.mubr.msk.f32.gmra.mrb[82].mxu0 %vm13077_vm3, %v25356_v39  ;;  %v25617_v16 = vpop.permute.xlu0 %14541 }
 0x793   : > { %v22358_v4 = vunpack.i.h.bf16 %v22356_v38  ;;  %v22357_v23 = vunpack.i.l.bf16 %v22356_v38  ;;  %20741 = vmatprep.mubr.msk.f32.mxu1 %vm22512_vm2, %v28776_v36  ;;  %20811 = vmatprep.mubr.msk.f32.mxu0 %vm22512_vm2, %v28776_v36 }
 0x794   : > { %15628 = vrot.lane.b32.xlu1 %v25025_v30, %s22496_s19 }
 0x795   : > { %v21824_v49 = vpack.c.bf16 %v22358_v4, %v22357_v23 }
 0x796   : > { %v22361_v50 = vpop.permute.xlu1 %22360  ;;  %20742 = vmatmul.mubr.msk.f32.gmra.mrb[98].mxu1 %vm13077_vm3, %v25387_v25  ;;  %20812 = vmatmul.mubr.msk.f32.gmra.mrb[84].mxu0 %vm13077_vm3, %v25374_v10  ;;  %v25637_v29 = vpop.permute.xlu0 %14545 }
 0x797   : > { %v22363_v53 = vunpack.i.h.bf16 %v22361_v50  ;;  %v22362_v41 = vunpack.i.l.bf16 %v22361_v50  ;;  %21825 = vmatpush3.bf16.msra.mxu1 %v21824_v49  ;;  %20744 = vmatprep.mubr.msk.f32.mxu1 %vm22512_vm2, %v28776_v36 }
 0x798   : > { %15630 = vrot.lane.b32.xlu1 %v25044_v44, %s22496_s19  ;;  %20814 = vmatprep.mubr.msk.f32.mxu0 %vm22512_vm2, %v28776_v36 }
 0x799   : > { %v21827_v6 = vpack.c.bf16 %v22363_v53, %v22362_v41  ;;  %21829 = vmatprep.subr.bf16.mxu1 %v28855_v58 }
 0x79a   : > { %v25590_v39 = vpop.permute.xlu1 %14523  ;;  %20745 = vmatmul.mubr.msk.f32.gmra.mrb[100].mxu1 %vm13077_vm3, %v25402_v33  ;;  %20815 = vmatmul.mubr.msk.f32.gmra.mrb[86].mxu0 %vm13077_vm3, %v25393_v19  ;;  %v25657_v17 = vpop.permute.xlu0 %14549 }
 0x79b   : > { %21828 = vmatpush3.bf16.msra.mxu0 %v21827_v6  ;;  %20747 = vmatprep.mubr.msk.f32.mxu1 %vm22512_vm2, %v28776_v36 }
 0x79c   : > { %15632 = vrot.lane.b32.xlu1 %v25064_v52, %s22496_s19  ;;  %20817 = vmatprep.mubr.msk.f32.mxu0 %vm22512_vm2, %v28776_v36 }
 0x79d   : > { %21832 = vmatprep.subr.bf16.mxu0 %v28855_v58 }
 0x79e   : > { %v25605_v13 = vpop.permute.xlu1 %14527  ;;  %20748 = vmatmul.mubr.msk.f32.gmra.mrb[102].mxu1 %vm13077_vm3, %v25416_v2  ;;  %20818 = vmatmul.mubr.msk.f32.gmra.mrb[88].mxu0 %vm13077_vm3, %v25414_v56  ;;  %v25679_v56 = vpop.permute.xlu0 %14965 }
 0x79f   : > { %20750 = vmatprep.mubr.msk.f32.mxu1 %vm22512_vm2, %v28776_v36  ;;  %20820 = vmatprep.mubr.msk.f32.mxu0 %vm22512_vm2, %v28776_v36 }
 0x7a0   : > { %15634 = vrot.lane.b32.xlu1 %v25087_v54, %s22496_s19 }
 0x7a2   : > { %v25619_v10 = vpop.permute.xlu1 %14531  ;;  %20751 = vmatmul.mubr.msk.f32.gmra.mrb[104].mxu1 %vm13077_vm3, %v25428_v62  ;;  %20821 = vmatmul.mubr.msk.f32.gmra.mrb[90].mxu0 %vm13077_vm3, %v25434_v12 }
 0x7a3   : > { %20753 = vmatprep.mubr.msk.f32.mxu1 %vm22512_vm2, %v28776_v36  ;;  %20823 = vmatprep.mubr.msk.f32.mxu0 %vm22512_vm2, %v28776_v36 }
 0x7a4   : > { %15636 = vrot.lane.b32.xlu1 %v25107_v57, %s22496_s19 }
 0x7a6   : > { %v25631_v20 = vpop.permute.xlu1 %14535  ;;  %20754 = vmatmul.mubr.msk.f32.gmra.mrb[106].mxu1 %vm13077_vm3, %v25442_v8  ;;  %20824 = vmatmul.mubr.msk.f32.gmra.mrb[92].mxu0 %vm13077_vm3, %v25454_v21 }
 0x7a7   : > { %20756 = vmatprep.mubr.msk.f32.mxu1 %vm22512_vm2, %v28776_v36  ;;  %20826 = vmatprep.mubr.msk.f32.mxu0 %vm22512_vm2, %v28776_v36 }
 0x7a8   : > { %15638 = vrot.lane.b32.xlu1 %v25127_v26, %s22496_s19 }
 0x7aa   : > { %v25645_v60 = vpop.permute.xlu1 %14539  ;;  %20757 = vmatmul.mubr.msk.f32.gmra.mrb[108].mxu1 %vm13077_vm3, %v25456_v46  ;;  %20827 = vmatmul.mubr.msk.f32.gmra.mrb[94].mxu0 %vm13077_vm3, %v25474_v34  ;;  %v25699_v46 = vpop.permute.xlu0 %14967 }
 0x7ab   : > { %20759 = vmatprep.mubr.msk.f32.mxu1 %vm22512_vm2, %v28776_v36  ;;  %20829 = vmatprep.mubr.msk.f32.mxu0 %vm22512_vm2, %v28776_v36 }
 0x7ac   : > { %15640 = vrot.lane.b32.xlu1 %v25147_v18, %s22496_s19 }
 0x7ae   : > { %v25659_v37 = vpop.permute.xlu1 %14543  ;;  %20760 = vmatmul.mubr.msk.f32.gmra.mrb[110].mxu1 %vm13077_vm3, %v25468_v15  ;;  %20830 = vmatmul.mubr.msk.f32.gmra.mrb[96].mxu0 %vm13077_vm3, %v25519_v42  ;;  %v28856_v15 = vunpack.i.h.bf16 %v24663_v51  ;;  %v22371_v41 = vpop.permute.xlu0 %22370 }
 0x7af   : > { %20762 = vmatprep.mubr.msk.f32.mxu1 %vm22512_vm2, %v28776_v36  ;;  %20885 = vmatprep.mubr.msk.f32.mxu0 %vm22512_vm2, %v28776_v36 }
 0x7b0   : > { %15642 = vrot.lane.b32.xlu1 %v25167_v9, %s22496_s19 }
 0x7b1   : > { %v25671_v25 = vpop.f32.mrb[6].mxu1 }
 0x7b2   : > { %v25673_v19 = vpop.permute.xlu1 %14547  ;;  %20763 = vmatmul.mubr.msk.f32.gmra.mrb[112].mxu1 %vm13077_vm3, %v25482_v63  ;;  %v20495_v33 = vpop.f32.mrb[7].mxu1  ;;  %20886 = vmatmul.mubr.msk.f32.vlgmr.msra.gmra.mrb[98].mxu0 %vm13077_vm3, %v24968_v7 }
 0x7b3   : > { %20765 = vmatprep.mubr.msk.f32.mxu1 %vm22512_vm2, %v28776_v36  ;;  %20888 = vmatprep.mubr.msk.f32.mxu0 %vm22512_vm2, %v28776_v36 }
 0x7b4   : > { %15644 = vrot.lane.b32.xlu1 %v25188_v48, %s22496_s19 }
 0x7b5   : > { %v25687_v2 = vpop.f32.mrb[8].mxu1 }
 0x7b6   : > { %v22366_v62 = vpop.permute.xlu1 %22365  ;;  %v20498_v12 = vpop.f32.mrb[9].mxu1  ;;  %20766 = vmatmul.mubr.msk.f32.gmra.mrb[114].mxu1 %vm13077_vm3, %v25496_v27  ;;  %20889 = vmatmul.mubr.msk.f32.gmra.mrb[100].mxu0 %vm13077_vm3, %v24988_v40  ;;  %v28858_v27 = vunpack.i.h.bf16 %v24659_v14 }
 0x7b7   : > { %v22368_v8 = vunpack.i.h.bf16 %v22366_v62  ;;  %v22367_v21 = vunpack.i.l.bf16 %v22366_v62  ;;  %20768 = vmatprep.mubr.msk.f32.mxu1 %vm22512_vm2, %v28776_v36  ;;  %20891 = vmatprep.mubr.msk.f32.mxu0 %vm22512_vm2, %v28776_v36  ;;  %v25764_v62 = vpop.permute.xlu0 %14969 }
 0x7b8   : > { %15646 = vrot.lane.b32.xlu1 %v25209_v24, %s22496_s19 }
 0x7b9   : > { %v12996_v34 = vsel %vm2086_vm7, %v28856_v15, %v22368_v8  ;;  %v25705_v63 = vmax.f32 %v25279_v45, %v22368_v8  ;;  %v12994_v42 = vsel %vm2086_vm7, %v28858_v27, %v22367_v21  ;;  %v25711_v38 = vmax.f32 %v25273_v1, %v22367_v21  ;;  %v25713_v4 = vpop.f32.mrb[10].mxu1 }
 0x7ba   : > { %v13007_v23 = vmax.f32 %v24577_v11, %v12996_v34  ;;  %v13004_v49 = vmax.f32 %v24571_v61, %v12994_v42  ;;  %v25717_v50 = vpop.permute.xlu1 %14551  ;;  %20769 = vmatmul.mubr.msk.f32.gmra.mrb[116].mxu1 %vm13077_vm3, %v25513_v59  ;;  %v20501_v51 = vpop.f32.mrb[11].mxu1  ;;  %20892 = vmatmul.mubr.msk.f32.gmra.mrb[102].mxu0 %vm13077_vm3, %v25025_v30  ;;  %v22373_v21 = vunpack.i.h.bf16 %v22371_v41  ;;  %v22372_v15 = vunpack.i.l.bf16 %v22371_v41 }
 0x7bb   : > { %28857 = vst [vmem:[#allocation2_spill] sm:$0xff] %v25705_v63  ;;  %28859 = vst [vmem:[#allocation4_spill] sm:$0xff] %v25711_v38  ;;  %20771 = vmatprep.mubr.msk.f32.mxu1 %vm22512_vm2, %v28776_v36  ;;  %20894 = vmatprep.mubr.msk.f32.mxu0 %vm22512_vm2, %v28776_v36  ;;  %v25729_v11 = vpack.i.bf16 %v25705_v63, %v25711_v38  ;;  %v25790_v27 = vpop.permute.xlu0 %14971  ;;  %vm18560_vm7 = vcmask 982016  }
 0x7bc   : > { %15648 = vrot.lane.b32.xlu1 %v25228_v28, %s22496_s19  ;;  %v25735_v14 = vpack.i.bf16 %v13007_v23, %v13004_v49  ;;  %v21833_v1 = vpack.c.bf16 %v13007_v23, %v13004_v49  ;;  %v21830_v23 = vpack.c.bf16 %v22373_v21, %v22372_v15 }
 0x7bd   : > { %28860 = vst [vmem:[#allocation5_spill] sm:$0xff] %v25729_v11  ;;  %v25737_v45 = vpop.f32.mrb[12].mxu1 }
 0x7be   : > { %v25739_v59 = vpop.permute.xlu1 %15186  ;;  %22375 = vrot.lane.b32.xlu0 %v25735_v14, %s22486_s28  ;;  %v20504_v53 = vpop.f32.mrb[13].mxu1  ;;  %20772 = vmatmul.mubr.msk.f32.gmra.mrb[118].mxu1 %vm13077_vm3, %v25527_v31 }
 0x7bf   : > { %21834 = vmatpush3.bf16.msra.mxu0 %v21833_v1  ;;  %20774 = vmatprep.mubr.msk.f32.mxu1 %vm22512_vm2, %v28776_v36 }
 0x7c0   : > { %15650 = vrot.lane.b32.xlu1 %v25249_v32, %s22496_s19  ;;  %20895 = vmatmul.mubr.msk.f32.gmra.mrb[104].mxu0 %vm13077_vm3, %v25044_v44 }
 0x7c1   : > { %v25751_v6 = vpop.f32.mrb[14].mxu1  ;;  %20897 = vmatprep.mubr.msk.f32.mxu0 %vm22512_vm2, %v28776_v36  ;;  %21838 = vmatprep.subr.bf16.mxu0 %v28855_v58 }
 0x7c2   : > { %v25756_v33 = vpop.permute.xlu1 %15188  ;;  %22380 = vrot.lane.b32.xlu0 %v25735_v14, %s22501_s20  ;;  %20775 = vmatmul.mubr.msk.f32.gmra.mrb[120].mxu1 %vm13077_vm3, %v25541_v35  ;;  %v20507_v31 = vpop.f32.mrb[15].mxu1 }
 0x7c3   : > { %20777 = vmatprep.mubr.msk.f32.mxu1 %vm22512_vm2, %v28776_v36 }
 0x7c4   : > { %15429 = vrot.lane.b32.xlu1 %v25511_v43, %s22493_s16  ;;  %20898 = vmatmul.mubr.msk.f32.gmra.mrb[106].mxu0 %vm13077_vm3, %v25064_v52 }
 0x7c5   : > { %v25770_v12 = vpop.f32.mrb[16].mxu1  ;;  %20900 = vmatprep.mubr.msk.f32.mxu0 %vm22512_vm2, %v28776_v36 }
 0x7c6   : > { %v25774_v8 = vpop.permute.xlu1 %15190  ;;  %15405 = vrot.lane.b32.xlu0 %v25025_v30, %s22493_s16  ;;  %v20510_v35 = vpop.f32.mrb[17].mxu1  ;;  %20778 = vmatmul.mubr.msk.f32.gmra.mrb[122].mxu1 %vm13077_vm3, %v25553_v47 }
 0x7c7   : > { %20780 = vmatprep.mubr.msk.f32.mxu1 %vm22512_vm2, %v28776_v36 }
 0x7c8   : > { %15652 = vrot.lane.b32.xlu1 %v25511_v43, %s22496_s19  ;;  %20901 = vmatmul.mubr.msk.f32.gmra.mrb[108].mxu0 %vm13077_vm3, %v25087_v54 }
 0x7c9   : > { %v25786_v34 = vpop.f32.mrb[18].mxu1  ;;  %20903 = vmatprep.mubr.msk.f32.mxu0 %vm22512_vm2, %v28776_v36 }
 0x7ca   : > { %v25792_v42 = vpop.permute.xlu1 %15192  ;;  %15407 = vrot.lane.b32.xlu0 %v25044_v44, %s22493_s16  ;;  %20781 = vmatmul.mubr.msk.f32.gmra.mrb[124].mxu1 %vm13077_vm3, %v25494_v22  ;;  %v20513_v47 = vpop.f32.mrb[19].mxu1 }
 0x7cb   : > { %20836 = vmatprep.mubr.msk.f32.mxu1 %vm22512_vm2, %v28776_v36 }
 0x7cc   : > { %16066 = vrot.lane.b32.xlu1 %v24968_v7, %s22506_s27  ;;  %20904 = vmatmul.mubr.msk.f32.gmra.mrb[110].mxu0 %vm13077_vm3, %v25107_v57  ;;  %v25820_v7 = vpop.permute.xlu0 %14973 }
 0x7cd   : > { %v25804_v49 = vpop.f32.mrb[20].mxu1  ;;  %20906 = vmatprep.mubr.msk.f32.mxu0 %vm22512_vm2, %v28776_v36 }
 0x7ce   : > { %v25808_v51 = vpop.permute.xlu1 %15194  ;;  %15409 = vrot.lane.b32.xlu0 %v25064_v52, %s22493_s16  ;;  %v20516_v22 = vpop.f32.mrb[21].mxu1  ;;  %20837 = vmatmul.mubr.msk.f32.vlgmr.msra.gmra.mrb[126].mxu1 %vm13077_vm3, %v25590_v39 }
 0x7cf   : > { %21831 = vmatpush3.bf16.msra.mxu1 %v21830_v23  ;;  %20839 = vmatprep.mubr.msk.f32.mxu1 %vm22512_vm2, %v28776_v36 }
 0x7d0   : > { %16068 = vrot.lane.b32.xlu1 %v24988_v40, %s22506_s27  ;;  %20907 = vmatmul.mubr.msk.f32.gmra.mrb[112].mxu0 %vm13077_vm3, %v25127_v26  ;;  %v25859_v15 = vpop.permute.xlu0 %14975 }
 0x7d1   : > { %v25822_v1 = vpop.f32.mrb[22].mxu1  ;;  %v25824_v53 = vpop.f32.mrb[8].mxu0  ;;  %20909 = vmatprep.mubr.msk.f32.mxu0 %vm22512_vm2, %v28776_v36  ;;  %21835 = vmatprep.subr.bf16.mxu1 %v28855_v58 }
 0x7d2   : > { %v25829_v39 = vpop.permute.xlu1 %15196  ;;  %15411 = vrot.lane.b32.xlu0 %v25087_v54, %s22493_s16  ;;  %20840 = vmatmul.mubr.msk.f32.gmra.mrb[128].mxu1 %vm13077_vm3, %v25539_v5  ;;  %v20519_v40 = vpop.f32.mrb[23].mxu1 }
 0x7d3   : > { %v20593_v41 = vpop.f32.mrb[9].mxu0  ;;  %20842 = vmatprep.mubr.msk.f32.mxu1 %vm22512_vm2, %v28776_v36 }
 0x7d4   : > { %16070 = vrot.lane.b32.xlu1 %v25025_v30, %s22506_s27  ;;  %20910 = vmatmul.mubr.msk.f32.gmra.mrb[114].mxu0 %vm13077_vm3, %v25147_v18 }
 0x7d5   : > { %v25841_v31 = vpop.f32.mrb[24].mxu1  ;;  %v25843_v35 = vpop.f32.mrb[10].mxu0  ;;  %20912 = vmatprep.mubr.msk.f32.mxu0 %vm22512_vm2, %v28776_v36 }
 0x7d6   : > { %v25847_v21 = vpop.permute.xlu1 %15198  ;;  %15413 = vrot.lane.b32.xlu0 %v25107_v57, %s22493_s16  ;;  %v20522_v5 = vpop.f32.mrb[25].mxu1  ;;  %20843 = vmatmul.mubr.msk.f32.gmra.mrb[130].mxu1 %vm13077_vm3, %v25605_v13 }
 0x7d7   : > { %v20596_v30 = vpop.f32.mrb[11].mxu0  ;;  %20845 = vmatprep.mubr.msk.f32.mxu1 %vm22512_vm2, %v28776_v36 }
 0x7d8   : > { %16072 = vrot.lane.b32.xlu1 %v25044_v44, %s22506_s27  ;;  %20913 = vmatmul.mubr.msk.f32.gmra.mrb[116].mxu0 %vm13077_vm3, %v25167_v9  ;;  %v25897_v30 = vpop.permute.xlu0 %14977 }
 0x7d9   : > { %v25861_v47 = vpop.f32.mrb[26].mxu1  ;;  %v25863_v23 = vpop.f32.mrb[12].mxu0  ;;  %20915 = vmatprep.mubr.msk.f32.mxu0 %vm22512_vm2, %v28776_v36 }
 0x7da   : > { %v25867_v13 = vpop.permute.xlu1 %15200  ;;  %15415 = vrot.lane.b32.xlu0 %v25127_v26, %s22493_s16  ;;  %20846 = vmatmul.mubr.msk.f32.gmra.mrb[132].mxu1 %vm13077_vm3, %v25559_v3  ;;  %v20525_v44 = vpop.f32.mrb[27].mxu1 }
 0x7db   : > { %v20599_v22 = vpop.f32.mrb[13].mxu0  ;;  %20848 = vmatprep.mubr.msk.f32.mxu1 %vm22512_vm2, %v28776_v36 }
 0x7dc   : > { %16074 = vrot.lane.b32.xlu1 %v25064_v52, %s22506_s27  ;;  %20916 = vmatmul.mubr.msk.f32.gmra.mrb[118].mxu0 %vm13077_vm3, %v25188_v48 }
 0x7dd   : > { %v25879_v40 = vpop.f32.mrb[28].mxu1  ;;  %v25881_v41 = vpop.f32.mrb[14].mxu0  ;;  %20918 = vmatprep.mubr.msk.f32.mxu0 %vm22512_vm2, %v28776_v36 }
 0x7de   : > { %v25885_v5 = vpop.permute.xlu1 %15202  ;;  %15417 = vrot.lane.b32.xlu0 %v25147_v18, %s22493_s16  ;;  %v20528_v3 = vpop.f32.mrb[29].mxu1  ;;  %20849 = vmatmul.mubr.msk.f32.gmra.mrb[134].mxu1 %vm13077_vm3, %v25619_v10 }
 0x7df   : > { %v20602_v52 = vpop.f32.mrb[15].mxu0  ;;  %20851 = vmatprep.mubr.msk.f32.mxu1 %vm22512_vm2, %v28776_v36 }
 0x7e0   : > { %16076 = vrot.lane.b32.xlu1 %v25087_v54, %s22506_s27  ;;  %20919 = vmatmul.mubr.msk.f32.gmra.mrb[120].mxu0 %vm13077_vm3, %v25209_v24 }
 0x7e1   : > { %v25899_v44 = vpop.f32.mrb[30].mxu1  ;;  %v25901_v22 = vpop.f32.mrb[16].mxu0  ;;  %20921 = vmatprep.mubr.msk.f32.mxu0 %vm22512_vm2, %v28776_v36 }
 0x7e2   : > { %v25905_v10 = vpop.permute.xlu1 %15204  ;;  %15419 = vrot.lane.b32.xlu0 %v25167_v9, %s22493_s16  ;;  %20852 = vmatmul.mubr.msk.f32.gmra.mrb[136].mxu1 %vm13077_vm3, %v25577_v0  ;;  %v20531_v54 = vpop.f32.mrb[31].mxu1 }
 0x7e3   : > { %v20605_v3 = vpop.f32.mrb[17].mxu0  ;;  %20854 = vmatprep.mubr.msk.f32.mxu1 %vm22512_vm2, %v28776_v36  ;;  %v25935_v54 = vpop.permute.xlu0 %14979 }
 0x7e4   : > { %16078 = vrot.lane.b32.xlu1 %v25107_v57, %s22506_s27  ;;  %20922 = vmatmul.mubr.msk.f32.gmra.mrb[122].mxu0 %vm13077_vm3, %v25228_v28 }
 0x7e5   : > { %v25917_v52 = vpop.f32.mrb[32].mxu1  ;;  %v25919_v61 = vpop.f32.mrb[18].mxu0  ;;  %20924 = vmatprep.mubr.msk.f32.mxu0 %vm22512_vm2, %v28776_v36 }
 0x7e6   : > { %v25923_v38 = vpop.permute.xlu1 %15206  ;;  %15421 = vrot.lane.b32.xlu0 %v25188_v48, %s22493_s16  ;;  %v20534_v0 = vpop.f32.mrb[33].mxu1  ;;  %20855 = vmatmul.mubr.msk.f32.gmra.mrb[138].mxu1 %vm13077_vm3, %v25631_v20 }
 0x7e7   : > { %v20608_v57 = vpop.f32.mrb[19].mxu0  ;;  %20857 = vmatprep.mubr.msk.f32.mxu1 %vm22512_vm2, %v28776_v36 }
 0x7e8   : > { %16080 = vrot.lane.b32.xlu1 %v25127_v26, %s22506_s27  ;;  %20925 = vmatmul.mubr.msk.f32.gmra.mrb[124].mxu0 %vm13077_vm3, %v25249_v32 }
 0x7e9   : > { %v25937_v3 = vpop.f32.mrb[34].mxu1  ;;  %v25939_v63 = vpop.f32.mrb[20].mxu0  ;;  %20927 = vmatprep.mubr.msk.f32.mxu0 %vm22512_vm2, %v28776_v36 }
 0x7ea   : > { %v25943_v20 = vpop.permute.xlu1 %15208  ;;  %15423 = vrot.lane.b32.xlu0 %v25209_v24, %s22493_s16  ;;  %20858 = vmatmul.mubr.msk.f32.gmra.mrb[140].mxu1 %vm13077_vm3, %v25596_v55  ;;  %v20537_v26 = vpop.f32.mrb[35].mxu1 }
 0x7eb   : > { %v20611_v0 = vpop.f32.mrb[21].mxu0  ;;  %20860 = vmatprep.mubr.msk.f32.mxu1 %vm22512_vm2, %v28776_v36 }
 0x7ec   : > { %16082 = vrot.lane.b32.xlu1 %v25147_v18, %s22506_s27  ;;  %20928 = vmatmul.mubr.msk.f32.gmra.mrb[126].mxu0 %vm13077_vm3, %v25511_v43 }
 0x7ed   : > { %v13344_v57 = vpop.f32.mrb[36].mxu1  ;;  %v25955_v11 = vpop.f32.mrb[22].mxu0  ;;  %20983 = vmatprep.mubr.msk.f32.mxu0 %vm22512_vm2, %v28776_v36 }
 0x7ee   : > { %v13345_v58 = vadd.f32 %v13344_v57, %v25671_v25  ;;  %v25960_v55 = vpop.permute.xlu1 %15210  ;;  %15425 = vrot.lane.b32.xlu0 %v25228_v28, %s22493_s16  ;;  %v20614_v26 = vpop.f32.mrb[23].mxu0  ;;  %20861 = vmatmul.mubr.msk.f32.gmra.mrb[142].mxu1 %vm13077_vm3, %v25645_v60 }
 0x7ef   : > { %v20544_v18 = vpop.f32.mrb[37].mxu1  ;;  %20863 = vmatprep.mubr.msk.f32.mxu1 %vm22512_vm2, %v28776_v36  ;;  %v25972_v25 = vpop.permute.xlu0 %14981 }
 0x7f0   : > { %16084 = vrot.lane.b32.xlu1 %v25167_v9, %s22506_s27  ;;  %20984 = vmatmul.mubr.msk.f32.vlgmr.msra.gmra.mrb[128].mxu0 %vm13077_vm3, %v25739_v59  ;;  %v25975_v0 = vadd.f32 %v25824_v53, %v13345_v58 }
 0x7f1   : > { %v13349_v57 = vpop.f32.mrb[38].mxu1  ;;  %v25977_v26 = vpop.f32.mrb[24].mxu0  ;;  %20986 = vmatprep.mubr.msk.f32.mxu0 %vm22512_vm2, %v28776_v36 }
 0x7f2   : > { %v13350_v60 = vadd.f32 %v13349_v57, %v25687_v2  ;;  %v25982_v18 = vpop.permute.xlu1 %15212  ;;  %15427 = vrot.lane.b32.xlu0 %v25249_v32, %s22493_s16  ;;  %20864 = vmatmul.mubr.msk.f32.gmra.mrb[144].mxu1 %vm13077_vm3, %v25617_v16  ;;  %v20547_v9 = vpop.f32.mrb[39].mxu1 }
 0x7f3   : > { %v20617_v59 = vpop.f32.mrb[25].mxu0  ;;  %20866 = vmatprep.mubr.msk.f32.mxu1 %vm22512_vm2, %v28776_v36 }
 0x7f4   : > { %16086 = vrot.lane.b32.xlu1 %v25188_v48, %s22506_s27  ;;  %20987 = vmatmul.mubr.msk.f32.gmra.mrb[130].mxu0 %vm13077_vm3, %v25756_v33  ;;  %v25995_v58 = vadd.f32 %v25843_v35, %v13350_v60  ;;  %v26007_v48 = vld [vmem:[%s28697_s5 + $0x8] sm:$0xff] }
 0x7f5   : > { %v13354_v2 = vpop.f32.mrb[40].mxu1  ;;  %v25997_v53 = vpop.f32.mrb[26].mxu0  ;;  %20989 = vmatprep.mubr.msk.f32.mxu0 %vm22512_vm2, %v28776_v36 }
 0x7f6   : > { %v13355_v16 = vadd.f32 %v13354_v2, %v25713_v4  ;;  %v26002_v57 = vpop.permute.xlu1 %14993  ;;  %15845 = vrot.lane.b32.xlu0 %v26007_v48, %s22515_s26  ;;  %v20620_v33 = vpop.f32.mrb[27].mxu0  ;;  %20867 = vmatmul.mubr.msk.f32.gmra.mrb[146].mxu1 %vm13077_vm3, %v25659_v37 }
 0x7f7   : > { %v20550_v35 = vpop.f32.mrb[41].mxu1  ;;  %20869 = vmatprep.mubr.msk.f32.mxu1 %vm22512_vm2, %v28776_v36  ;;  %v26019_v4 = vpop.permute.xlu0 %14983 }
 0x7f8   : > { %16088 = vrot.lane.b32.xlu1 %v25209_v24, %s22506_s27  ;;  %20990 = vmatmul.mubr.msk.f32.gmra.mrb[132].mxu0 %vm13077_vm3, %v25774_v8  ;;  %v26022_v60 = vadd.f32 %v25863_v23, %v13355_v16 }
 0x7f9   : > { %v13359_v9 = vpop.f32.mrb[42].mxu1  ;;  %v26024_v59 = vpop.f32.mrb[28].mxu0  ;;  %20992 = vmatprep.mubr.msk.f32.mxu0 %vm22512_vm2, %v28776_v36 }
 0x7fa   : > { %v13360_v37 = vadd.f32 %v13359_v9, %v25737_v45  ;;  %v26029_v2 = vpop.permute.xlu1 %15214  ;;  %22385 = vrot.lane.b32.xlu0 %v25735_v14, %s28769_s23  ;;  %20870 = vmatmul.mubr.msk.f32.gmra.mrb[148].mxu1 %vm13077_vm3, %v25637_v29  ;;  %v20553_v24 = vpop.f32.mrb[43].mxu1 }
 0x7fb   : > { %v20623_v8 = vpop.f32.mrb[29].mxu0  ;;  %20872 = vmatprep.mubr.msk.f32.mxu1 %vm22512_vm2, %v28776_v36 }
 0x7fc   : > { %16090 = vrot.lane.b32.xlu1 %v25228_v28, %s22506_s27  ;;  %20993 = vmatmul.mubr.msk.f32.gmra.mrb[134].mxu0 %vm13077_vm3, %v25792_v42  ;;  %v26042_v45 = vadd.f32 %v25881_v41, %v13360_v37 }
 0x7fd   : > { %v13364_v23 = vpop.f32.mrb[44].mxu1  ;;  %v26044_v16 = vpop.f32.mrb[30].mxu0  ;;  %20995 = vmatprep.mubr.msk.f32.mxu0 %vm22512_vm2, %v28776_v36 }
 0x7fe   : > { %v13365_v29 = vadd.f32 %v13364_v23, %v25751_v6  ;;  %v26049_v33 = vpop.permute.xlu1 %15624  ;;  %22390 = vrot.lane.b32.xlu0 %v25735_v14, %s28768_s21  ;;  %v20626_v28 = vpop.f32.mrb[31].mxu0  ;;  %20873 = vmatmul.mubr.msk.f32.gmra.mrb[150].mxu1 %vm13077_vm3, %v25673_v19 }
 0x7ff   : > { %v20556_v42 = vpop.f32.mrb[45].mxu1  ;;  %20875 = vmatprep.mubr.msk.f32.mxu1 %vm22512_vm2, %v28776_v36  ;;  %v26061_v6 = vpop.permute.xlu0 %14985 }
 0x800   : > { %16092 = vrot.lane.b32.xlu1 %v25249_v32, %s22506_s27  ;;  %20996 = vmatmul.mubr.msk.f32.gmra.mrb[136].mxu0 %vm13077_vm3, %v25808_v51  ;;  %v26064_v41 = vadd.f32 %v25901_v22, %v13365_v29  ;;  %v22448_v32 = vld [vmem:[%s28697_s5 + $0x28] sm:$0xff] }
 0x801   : > { %v13369_v35 = vpop.f32.mrb[46].mxu1  ;;  %v26066_v9 = vpop.f32.mrb[32].mxu0  ;;  %20998 = vmatprep.mubr.msk.f32.mxu0 %vm22512_vm2, %v28776_v36  ;;  %v26098_v29 = vld [vmem:[%s28697_s5 + $0x48] sm:$0xff] }
 0x802   : > { %v13370_v19 = vadd.f32 %v13369_v35, %v25770_v12  ;;  %v26071_v37 = vpop.permute.xlu1 %15626  ;;  %15847 = vrot.lane.b32.xlu0 %v22448_v32, %s22515_s26  ;;  %20876 = vmatmul.mubr.msk.f32.gmra.mrb[152].mxu1 %vm13077_vm3, %v25657_v17  ;;  %v20559_v51 = vpop.f32.mrb[47].mxu1 }
 0x803   : > { %v20629_v22 = vpop.f32.mrb[33].mxu0  ;;  %20878 = vmatprep.mubr.msk.f32.mxu1 %vm22512_vm2, %v28776_v36  ;;  %v22450_v51 = vld [vmem:[%s28697_s5 + $0x68] sm:$0xff] }
 0x804   : > { %15873 = vrot.lane.b32.xlu1 %v25511_v43, %s22515_s26  ;;  %20999 = vmatmul.mubr.msk.f32.gmra.mrb[138].mxu0 %vm13077_vm3, %v25829_v39  ;;  %v26086_v12 = vadd.f32 %v25919_v61, %v13370_v19 }
 0x805   : > { %v13374_v24 = vpop.f32.mrb[48].mxu1  ;;  %v26088_v8 = vpop.f32.mrb[34].mxu0  ;;  %21001 = vmatprep.mubr.msk.f32.mxu0 %vm22512_vm2, %v28776_v36 }
 0x806   : > { %v13375_v17 = vadd.f32 %v13374_v24, %v25786_v34  ;;  %v26093_v23 = vpop.permute.xlu1 %15628  ;;  %15849 = vrot.lane.b32.xlu0 %v26098_v29, %s22515_s26  ;;  %v20632_v61 = vpop.f32.mrb[35].mxu0  ;;  %20879 = vmatmul.mubr.msk.f32.gmra.mrb[154].mxu1 %vm13077_vm3, %v25717_v50 }
 0x807   : > { %v20562_v39 = vpop.f32.mrb[49].mxu1  ;;  %20934 = vmatprep.mubr.msk.f32.mxu1 %vm22512_vm2, %v28776_v36  ;;  %v26110_v34 = vpop.permute.xlu0 %14987 }
 0x808   : > { %16094 = vrot.lane.b32.xlu1 %v25511_v43, %s22506_s27  ;;  %21002 = vmatmul.mubr.msk.f32.gmra.mrb[140].mxu0 %vm13077_vm3, %v25847_v21  ;;  %v26113_v28 = vadd.f32 %v25939_v63, %v13375_v17 }
 0x809   : > { %v13379_v42 = vpop.f32.mrb[50].mxu1  ;;  %v26115_v35 = vpop.f32.mrb[36].mxu0  ;;  %21004 = vmatprep.mubr.msk.f32.mxu0 %vm22512_vm2, %v28776_v36 }
 0x80a   : > { %v13380_v50 = vadd.f32 %v13379_v42, %v25804_v49  ;;  %v26120_v19 = vpop.permute.xlu1 %15630  ;;  %15851 = vrot.lane.b32.xlu0 %v22450_v51, %s22515_s26  ;;  %20935 = vmatmul.mubr.msk.f32.vlgmr.msra.gmra.mrb[156].mxu1 %vm13077_vm3, %v25679_v56  ;;  %v20565_v63 = vpop.f32.mrb[51].mxu1 }
 0x80b   : > { %20937 = vmatprep.mubr.msk.f32.mxu1 %vm22512_vm2, %v28776_v36  ;;  %v20635_v21 = vpop.f32.mrb[37].mxu0 }
 0x80c   : > { %16289 = vrot.lane.b32.xlu1 %v22448_v32, %s22516_s14  ;;  %21005 = vmatmul.mubr.msk.f32.gmra.mrb[142].mxu0 %vm13077_vm3, %v25867_v13  ;;  %v26134_v49 = vadd.f32 %v25955_v11, %v13380_v50  ;;  %v26146_v32 = vld [vmem:[%s28697_s5 + $0x88] sm:$0xff] }
 0x80d   : > { %v13384_v22 = vpop.f32.mrb[52].mxu1  ;;  %v26136_v24 = vpop.f32.mrb[38].mxu0  ;;  %21007 = vmatprep.mubr.msk.f32.mxu0 %vm22512_vm2, %v28776_v36 }
 0x80e   : > { %v13385_v56 = vadd.f32 %v13384_v22, %v25822_v1  ;;  %v26141_v17 = vpop.permute.xlu1 %15632  ;;  %15853 = vrot.lane.b32.xlu0 %v26146_v32, %s22515_s26  ;;  %20938 = vmatmul.mubr.msk.f32.gmra.mrb[158].mxu1 %vm13077_vm3, %v25699_v46  ;;  %v20568_v11 = vpop.f32.mrb[53].mxu1 }
 0x80f   : > { %20940 = vmatprep.mubr.msk.f32.mxu1 %vm22512_vm2, %v28776_v36  ;;  %v20691_v13 = vpop.f32.mrb[39].mxu0  ;;  %v26155_v1 = vpop.permute.xlu0 %14989 }
 0x810   : > { %16293 = vrot.lane.b32.xlu1 %v22450_v51, %s22516_s14  ;;  %21008 = vmatmul.mubr.msk.f32.gmra.mrb[144].mxu0 %vm13077_vm3, %v25885_v5  ;;  %v26160_v61 = vadd.f32 %v25977_v26, %v13385_v56  ;;  %v22452_v51 = vld [vmem:[%s28697_s5 + $0xa8] sm:$0xff] }
 0x811   : > { %v13389_v39 = vpop.f32.mrb[54].mxu1  ;;  %21010 = vmatprep.mubr.msk.f32.mxu0 %vm22512_vm2, %v28776_v36  ;;  %v26164_v46 = vpop.f32.mrb[40].mxu0  ;;  %v26193_v56 = vld [vmem:[%s28697_s5 + $0xc8] sm:$0xff] }
 0x812   : > { %v13390_v42 = vadd.f32 %v13389_v39, %v25841_v31  ;;  %v26167_v50 = vpop.permute.xlu1 %15634  ;;  %15855 = vrot.lane.b32.xlu0 %v22452_v51, %s22515_s26  ;;  %20941 = vmatmul.mubr.msk.f32.gmra.mrb[160].mxu1 %vm13077_vm3, %v25764_v62  ;;  %v20571_v5 = vpop.f32.mrb[55].mxu1 }
 0x813   : > { %20943 = vmatprep.mubr.msk.f32.mxu1 %vm22512_vm2, %v28776_v36  ;;  %v20694_v26 = vpop.f32.mrb[41].mxu0  ;;  %v26205_v11 = vpop.permute.xlu0 %14991 }
 0x814   : > { %16297 = vrot.lane.b32.xlu1 %v22452_v51, %s22516_s14  ;;  %21011 = vmatmul.mubr.msk.f32.gmra.mrb[146].mxu0 %vm13077_vm3, %v25905_v10  ;;  %v26181_v31 = vadd.f32 %v25997_v53, %v13390_v42 }
 0x815   : > { %v13394_v63 = vpop.f32.mrb[56].mxu1  ;;  %21013 = vmatprep.mubr.msk.f32.mxu0 %vm22512_vm2, %v28776_v36  ;;  %v26185_v21 = vpop.f32.mrb[42].mxu0 }
 0x816   : > { %v13395_v62 = vadd.f32 %v13394_v63, %v25861_v47  ;;  %v26188_v22 = vpop.permute.xlu1 %15636  ;;  %15857 = vrot.lane.b32.xlu0 %v26193_v56, %s22515_s26  ;;  %20944 = vmatmul.mubr.msk.f32.gmra.mrb[162].mxu1 %vm13077_vm3, %v25790_v27  ;;  %v20574_v10 = vpop.f32.mrb[57].mxu1  ;;  %v22454_v47 = vld [vmem:[%s28697_s5 + $0xe8] sm:$0xff] }
 0x817   : > { %20946 = vmatprep.mubr.msk.f32.mxu1 %vm22512_vm2, %v28776_v36  ;;  %v20697_v53 = vpop.f32.mrb[43].mxu0  ;;  %v26243_v10 = vld [vmem:[%s28697_s5 + $0x108] sm:$0xff] }
 0x818   : > { %16301 = vrot.lane.b32.xlu1 %v22454_v47, %s22516_s14  ;;  %21014 = vmatmul.mubr.msk.f32.gmra.mrb[148].mxu0 %vm13077_vm3, %v25923_v38  ;;  %v26210_v13 = vadd.f32 %v26024_v59, %v13395_v62  ;;  %v22455_v59 = vld [vmem:[%s28697_s5 + $0x128] sm:$0xff]  ;;  %v26255_v53 = vpop.permute.xlu0 %15401 }
 0x819   : > { %v13399_v27 = vpop.f32.mrb[58].mxu1  ;;  %21016 = vmatprep.mubr.msk.f32.mxu0 %vm22512_vm2, %v28776_v36  ;;  %v26214_v39 = vpop.f32.mrb[44].mxu0 }
 0x81a   : > { %v13400_v42 = vadd.f32 %v13399_v27, %v25879_v40  ;;  %v26217_v51 = vpop.permute.xlu1 %15638  ;;  %15859 = vrot.lane.b32.xlu0 %v22454_v47, %s22515_s26  ;;  %20947 = vmatmul.mubr.msk.f32.gmra.mrb[164].mxu1 %vm13077_vm3, %v25820_v7  ;;  %v20577_v5 = vpop.f32.mrb[59].mxu1 }
 0x81b   : > { %20949 = vmatprep.mubr.msk.f32.mxu1 %vm22512_vm2, %v28776_v36  ;;  %v20700_v38 = vpop.f32.mrb[45].mxu0 }
 0x81c   : > { %16305 = vrot.lane.b32.xlu1 %v22455_v59, %s22516_s14  ;;  %21017 = vmatmul.mubr.msk.f32.gmra.mrb[150].mxu0 %vm13077_vm3, %v25943_v20  ;;  %v26231_v40 = vadd.f32 %v26044_v16, %v13400_v42 }
 0x81d   : > { %v13404_v26 = vpop.f32.mrb[60].mxu1  ;;  %21019 = vmatprep.mubr.msk.f32.mxu0 %vm22512_vm2, %v28776_v36  ;;  %v26235_v7 = vpop.f32.mrb[46].mxu0 }
 0x81e   : > { %v13405_v63 = vadd.f32 %v13404_v26, %v25899_v44  ;;  %v26238_v62 = vpop.permute.xlu1 %15640  ;;  %15861 = vrot.lane.b32.xlu0 %v26243_v10, %s22515_s26  ;;  %20950 = vmatmul.mubr.msk.f32.gmra.mrb[166].mxu1 %vm13077_vm3, %v25859_v15  ;;  %v20580_v20 = vpop.f32.mrb[61].mxu1  ;;  %v22457_v44 = vld [vmem:[%s28697_s5 + $0x168] sm:$0xff] }
 0x81f   : > { %20952 = vmatprep.mubr.msk.f32.mxu1 %vm22512_vm2, %v28776_v36  ;;  %v20703_v16 = vpop.f32.mrb[47].mxu0  ;;  %v26293_v20 = vld [vmem:[%s28697_s5 + $0x148] sm:$0xff] }
 0x820   : > { %16309 = vrot.lane.b32.xlu1 %v22457_v44, %s22516_s14  ;;  %21020 = vmatmul.mubr.msk.f32.gmra.mrb[152].mxu0 %vm13077_vm3, %v25960_v55  ;;  %v26260_v47 = vadd.f32 %v26066_v9, %v13405_v63  ;;  %v22458_v9 = vld [vmem:[%s28697_s5 + $0x1a8] sm:$0xff] }
 0x821   : > { %v13409_v15 = vpop.f32.mrb[62].mxu1  ;;  %21022 = vmatprep.mubr.msk.f32.mxu0 %vm22512_vm2, %v28776_v36  ;;  %v26264_v27 = vpop.f32.mrb[48].mxu0 }
 0x822   : > { %v13410_v42 = vadd.f32 %v13409_v15, %v25917_v52  ;;  %v26267_v5 = vpop.permute.xlu1 %15642  ;;  %15863 = vrot.lane.b32.xlu0 %v22455_v59, %s22515_s26  ;;  %20953 = vmatmul.mubr.msk.f32.gmra.mrb[168].mxu1 %vm13077_vm3, %v25897_v30  ;;  %v20583_v38 = vpop.f32.mrb[63].mxu1 }
 0x823   : > { %20955 = vmatprep.mubr.msk.f32.mxu1 %vm22512_vm2, %v28776_v36  ;;  %v20706_v55 = vpop.f32.mrb[49].mxu0 }
 0x824   : > { %16313 = vrot.lane.b32.xlu1 %v22458_v9, %s22516_s14  ;;  %21023 = vmatmul.mubr.msk.f32.gmra.mrb[154].mxu0 %vm13077_vm3, %v25982_v18  ;;  %v26281_v52 = vadd.f32 %v26088_v8, %v13410_v42 }
 0x825   : > { %v13414_v59 = vpop.f32.mrb[64].mxu1  ;;  %21025 = vmatprep.mubr.msk.f32.mxu0 %vm22512_vm2, %v28776_v36  ;;  %v26285_v30 = vpop.f32.mrb[50].mxu0 }
 0x826   : > { %v13415_v26 = vadd.f32 %v13414_v59, %v25937_v3  ;;  %v26288_v63 = vpop.permute.xlu1 %15644  ;;  %15865 = vrot.lane.b32.xlu0 %v26293_v20, %s22515_s26  ;;  %20956 = vmatmul.mubr.msk.f32.gmra.mrb[170].mxu1 %vm13077_vm3, %v25935_v54  ;;  %v20586_v18 = vpop.f32.mrb[65].mxu1  ;;  %v26313_v54 = vld [vmem:[%s28697_s5 + $0x10] sm:$0xff] }
 0x827   : > { %20958 = vmatprep.mubr.msk.f32.mxu1 %vm22512_vm2, %v28776_v36  ;;  %v20709_v8 = vpop.f32.mrb[51].mxu0  ;;  %v26303_v3 = vpop.permute.xlu0 %15403  ;;  %v26345_v18 = vld [vmem:[%s28697_s5 + $0x188] sm:$0xff] }
 0x828   : > { %16315 = vrot.lane.b32.xlu1 %v25511_v43, %s22516_s14  ;;  %21026 = vmatmul.mubr.msk.f32.gmra.mrb[156].mxu0 %vm13077_vm3, %v26029_v2  ;;  %v26308_v16 = vadd.f32 %v26115_v35, %v13415_v26 }
 0x829   : > { %v13771_v15 = vpop.f32.mrb[66].mxu1  ;;  %21081 = vmatprep.mubr.msk.f32.mxu0 %vm22512_vm2, %v28776_v36  ;;  %v26317_v42 = vpop.f32.mrb[52].mxu0 }
 0x82a   : > { %v13845_v43 = vadd.f32 %v13771_v15, %v25975_v0  ;;  %v26320_v38 = vpop.permute.xlu1 %15646  ;;  %15867 = vrot.lane.b32.xlu0 %v22457_v44, %s22515_s26  ;;  %v20642_v2 = vpop.f32.mrb[67].mxu1  ;;  %20959 = vmatmul.mubr.msk.f32.gmra.mrb[172].mxu1 %vm13077_vm3, %v25972_v25  ;;  %v26335_v0 = vld [vmem:[%s28697_s5 + $0x30] sm:$0xff] }
 0x82b   : > { %20961 = vmatprep.mubr.msk.f32.mxu1 %vm22512_vm2, %v28776_v36  ;;  %v20712_v35 = vpop.f32.mrb[53].mxu0 }
 0x82c   : > { %16729 = vrot.lane.b32.xlu1 %v26313_v54, %s22487_s29  ;;  %v26330_v55 = vadd.f32 %v26136_v24, %v13845_v43 }
 0x82d   : > { %v13776_v59 = vpop.f32.mrb[68].mxu1  ;;  %v26337_v44 = vpop.f32.mrb[54].mxu0 }
 0x82e   : > { %v13846_v25 = vadd.f32 %v13776_v59, %v25995_v58  ;;  %v26340_v26 = vpop.permute.xlu1 %15648  ;;  %15869 = vrot.lane.b32.xlu0 %v26345_v18, %s22515_s26  ;;  %v20645_v24 = vpop.f32.mrb[69].mxu1  ;;  %20962 = vmatmul.mubr.msk.f32.gmra.mrb[174].mxu1 %vm13077_vm3, %v26019_v4  ;;  %v26361_v59 = vld [vmem:[%s28697_s5 + $0x50] sm:$0xff] }
 0x82f   : > { %28861 = vst [vmem:[#allocation3_spill] sm:$0xff] %v26340_v26  ;;  %20964 = vmatprep.mubr.msk.f32.mxu1 %vm22512_vm2, %v28776_v36  ;;  %v20715_v8 = vpop.f32.mrb[55].mxu0 }
 0x830   : > { %16731 = vrot.lane.b32.xlu1 %v26335_v0, %s22487_s29  ;;  %v22376_v58 = vpop.permute.xlu0 %22375  ;;  %v26356_v15 = vadd.f32 %v26164_v46, %v13846_v25 }
 0x831   : > { %v22378_v43 = vunpack.i.h.bf16 %v22376_v58  ;;  %v22377_v2 = vunpack.i.l.bf16 %v22376_v58  ;;  %v13781_v35 = vpop.f32.mrb[70].mxu1  ;;  %v26363_v4 = vpop.f32.mrb[56].mxu0 }
 0x832   : > { %28862 = vst [vmem:[#allocation9_spill] sm:$0xff] %v26356_v15  ;;  %v13847_v24 = vadd.f32 %v13781_v35, %v26022_v60  ;;  %v26366_v8 = vpop.permute.xlu1 %15650  ;;  %15871 = vrot.lane.b32.xlu0 %v22458_v9, %s22515_s26  ;;  %v20648_v26 = vpop.f32.mrb[71].mxu1  ;;  %20965 = vmatmul.mubr.msk.f32.gmra.mrb[176].mxu1 %vm13077_vm3, %v26061_v6  ;;  %v26381_v6 = vld [vmem:[%s28697_s5 + $0x70] sm:$0xff] }
 0x833   : > { %28863 = vst [vmem:[#allocation8_spill] sm:$0xff] %v26366_v8  ;;  %v21836_v46 = vpack.c.bf16 %v22378_v43, %v22377_v2  ;;  %20967 = vmatprep.mubr.msk.f32.mxu1 %vm22512_vm2, %v28776_v36  ;;  %v20718_v25 = vpop.f32.mrb[57].mxu0 }
 0x834   : > { %16733 = vrot.lane.b32.xlu1 %v26361_v59, %s22487_s29  ;;  %v22381_v58 = vpop.permute.xlu0 %22380  ;;  %v26376_v15 = vadd.f32 %v26185_v21, %v13847_v24 }
 0x835   : > { %v22383_v60 = vunpack.i.h.bf16 %v22381_v58  ;;  %v22382_v35 = vunpack.i.l.bf16 %v22381_v58  ;;  %v13786_v8 = vpop.f32.mrb[72].mxu1  ;;  %21837 = vmatpush3.bf16.msra.mxu1 %v21836_v46  ;;  %v26383_v9 = vpop.f32.mrb[58].mxu0  ;;  %v28864_v46 = vmov 0.0|0.0  }
 0x836   : > { %v13848_v26 = vadd.f32 %v13786_v8, %v26042_v45  ;;  %v26386_v43 = vpop.permute.xlu1 %15429  ;;  %22395 = vrot.lane.b32.xlu0 %v25735_v14, %s22496_s19  ;;  %v20651_v21 = vpop.f32.mrb[73].mxu1  ;;  %20968 = vmatmul.mubr.msk.f32.gmra.mrb[178].mxu1 %vm13077_vm3, %v26110_v34  ;;  %v26405_v34 = vld [vmem:[%s28697_s5 + $0x90] sm:$0xff] }
 0x837   : > { %v21839_v2 = vpack.c.bf16 %v22383_v60, %v22382_v35  ;;  %20970 = vmatprep.mubr.msk.f32.mxu1 %vm22512_vm2, %v28776_v36  ;;  %v20721_v24 = vpop.f32.mrb[59].mxu0  ;;  %21841 = vmatprep.subr.bf16.mxu1 %v28864_v46 }
 0x838   : > { %16735 = vrot.lane.b32.xlu1 %v26381_v6, %s22487_s29  ;;  %v26397_v45 = vpop.permute.xlu0 %15405  ;;  %v26400_v8 = vadd.f32 %v26214_v39, %v13848_v26 }
 0x839   : > { %v13791_v25 = vpop.f32.mrb[74].mxu1  ;;  %21840 = vmatpush3.bf16.msra.mxu0 %v21839_v2  ;;  %v26407_v58 = vpop.f32.mrb[60].mxu0 }
 0x83a   : > { %v13849_v60 = vadd.f32 %v13791_v25, %v26064_v41  ;;  %v26410_v35 = vpop.permute.xlu1 %15652  ;;  %22400 = vrot.lane.b32.xlu0 %v25735_v14, %s22498_s25  ;;  %v20654_v21 = vpop.f32.mrb[75].mxu1  ;;  %20971 = vmatmul.mubr.msk.f32.gmra.mrb[180].mxu1 %vm13077_vm3, %v26155_v1  ;;  %v26433_v1 = vld [vmem:[%s28697_s5 + $0xb0] sm:$0xff] }
 0x83b   : > { %20973 = vmatprep.mubr.msk.f32.mxu1 %vm22512_vm2, %v28776_v36  ;;  %v20724_v39 = vpop.f32.mrb[61].mxu0  ;;  %21844 = vmatprep.subr.bf16.mxu0 %v28864_v46 }
 0x83c   : > { %16737 = vrot.lane.b32.xlu1 %v26405_v34, %s22487_s29  ;;  %v26421_v26 = vpop.permute.xlu0 %15407  ;;  %21082 = vmatmul.mubr.msk.f32.vlgmr.msra.gmra.mrb[158].mxu0 %vm13077_vm3, %v26049_v33  ;;  %v26426_v41 = vadd.f32 %v26235_v7, %v13849_v60 }
 0x83d   : > { %v13796_v2 = vpop.f32.mrb[76].mxu1  ;;  %21084 = vmatprep.mubr.msk.f32.mxu0 %vm22512_vm2, %v28776_v36  ;;  %v26435_v24 = vpop.f32.mrb[62].mxu0 }
 0x83e   : > { %v13850_v25 = vadd.f32 %v13796_v2, %v26086_v12  ;;  %v26438_v21 = vpop.permute.xlu1 %16066  ;;  %16287 = vrot.lane.b32.xlu0 %v26007_v48, %s22516_s14  ;;  %v20657_v33 = vpop.f32.mrb[77].mxu1  ;;  %20974 = vmatmul.mubr.msk.f32.gmra.mrb[182].mxu1 %vm13077_vm3, %v26205_v11  ;;  %v26460_v11 = vld [vmem:[%s28697_s5 + $0xd0] sm:$0xff] }
 0x83f   : > { %20976 = vmatprep.mubr.msk.f32.mxu1 %vm22512_vm2, %v28776_v36  ;;  %v20727_v7 = vpop.f32.mrb[63].mxu0 }
 0x840   : > { %16739 = vrot.lane.b32.xlu1 %v26433_v1, %s22487_s29  ;;  %v26448_v60 = vpop.permute.xlu0 %15409  ;;  %21085 = vmatmul.mubr.msk.f32.gmra.mrb[160].mxu0 %vm13077_vm3, %v26071_v37  ;;  %v26453_v12 = vadd.f32 %v26264_v27, %v13850_v25 }
 0x841   : > { %v13801_v48 = vpop.f32.mrb[78].mxu1  ;;  %21087 = vmatprep.mubr.msk.f32.mxu0 %vm22512_vm2, %v28776_v36  ;;  %v26462_v39 = vpop.f32.mrb[64].mxu0 }
 0x842   : > { %v13851_v2 = vadd.f32 %v13801_v48, %v26113_v28  ;;  %v26465_v33 = vpop.permute.xlu1 %16068  ;;  %16291 = vrot.lane.b32.xlu0 %v26098_v29, %s22516_s14  ;;  %v20660_v37 = vpop.f32.mrb[79].mxu1  ;;  %20977 = vmatmul.mubr.msk.f32.gmra.mrb[184].mxu1 %vm13077_vm3, %v26002_v57  ;;  %v26487_v57 = vld [vmem:[%s28697_s5 + $0xf0] sm:$0xff] }
 0x843   : > { %21032 = vmatprep.mubr.msk.f32.mxu1 %vm22512_vm2, %v28776_v36  ;;  %v20730_v27 = vpop.f32.mrb[65].mxu0 }
 0x844   : > { %16741 = vrot.lane.b32.xlu1 %v26460_v11, %s22487_s29  ;;  %v26475_v25 = vpop.permute.xlu0 %15411  ;;  %21088 = vmatmul.mubr.msk.f32.gmra.mrb[162].mxu0 %vm13077_vm3, %v26093_v23  ;;  %v26480_v28 = vadd.f32 %v26285_v30, %v13851_v2 }
 0x845   : > { %v13806_v29 = vpop.f32.mrb[80].mxu1  ;;  %21090 = vmatprep.mubr.msk.f32.mxu0 %vm22512_vm2, %v28776_v36  ;;  %v26489_v7 = vpop.f32.mrb[66].mxu0 }
 0x846   : > { %v13852_v48 = vadd.f32 %v13806_v29, %v26134_v49  ;;  %v26492_v37 = vpop.permute.xlu1 %16070  ;;  %16295 = vrot.lane.b32.xlu0 %v26146_v32, %s22516_s14  ;;  %v20663_v23 = vpop.f32.mrb[81].mxu1  ;;  %21033 = vmatmul.mubr.msk.f32.vlgmr.msra.gmra.mrb[186].mxu1 %vm13077_vm3, %v26255_v53  ;;  %v26514_v53 = vld [vmem:[%s28697_s5 + $0x110] sm:$0xff] }
 0x847   : > { %21035 = vmatprep.mubr.msk.f32.mxu1 %vm22512_vm2, %v28776_v36  ;;  %v20733_v30 = vpop.f32.mrb[67].mxu0 }
 0x848   : > { %16743 = vrot.lane.b32.xlu1 %v26487_v57, %s22487_s29  ;;  %v26502_v2 = vpop.permute.xlu0 %15413  ;;  %21091 = vmatmul.mubr.msk.f32.gmra.mrb[164].mxu0 %vm13077_vm3, %v26120_v19  ;;  %v26507_v49 = vadd.f32 %v26317_v42, %v13852_v48 }
 0x849   : > { %v13811_v32 = vpop.f32.mrb[82].mxu1  ;;  %21093 = vmatprep.mubr.msk.f32.mxu0 %vm22512_vm2, %v28776_v36  ;;  %v26516_v27 = vpop.f32.mrb[68].mxu0 }
 0x84a   : > { %v13853_v29 = vadd.f32 %v13811_v32, %v26160_v61  ;;  %v26519_v23 = vpop.permute.xlu1 %16072  ;;  %16299 = vrot.lane.b32.xlu0 %v26193_v56, %s22516_s14  ;;  %v20666_v19 = vpop.f32.mrb[83].mxu1  ;;  %21036 = vmatmul.mubr.msk.f32.gmra.mrb[188].mxu1 %vm13077_vm3, %v26303_v3  ;;  %v26541_v3 = vld [vmem:[%s28697_s5 + $0x130] sm:$0xff] }
 0x84b   : > { %21038 = vmatprep.mubr.msk.f32.mxu1 %vm22512_vm2, %v28776_v36  ;;  %v20789_v42 = vpop.f32.mrb[69].mxu0 }
 0x84c   : > { %16745 = vrot.lane.b32.xlu1 %v26514_v53, %s22487_s29  ;;  %v26529_v48 = vpop.permute.xlu0 %15415  ;;  %21094 = vmatmul.mubr.msk.f32.gmra.mrb[166].mxu0 %vm13077_vm3, %v26141_v17  ;;  %v26534_v61 = vadd.f32 %v26337_v44, %v13853_v29 }
 0x84d   : > { %v13816_v56 = vpop.f32.mrb[84].mxu1  ;;  %21096 = vmatprep.mubr.msk.f32.mxu0 %vm22512_vm2, %v28776_v36  ;;  %v26543_v30 = vpop.f32.mrb[70].mxu0 }
 0x84e   : > { %v13854_v32 = vadd.f32 %v13816_v56, %v26181_v31  ;;  %v26546_v19 = vpop.permute.xlu1 %16074  ;;  %16303 = vrot.lane.b32.xlu0 %v26243_v10, %s22516_s14  ;;  %v20669_v17 = vpop.f32.mrb[85].mxu1  ;;  %21039 = vmatmul.mubr.msk.f32.gmra.mrb[190].mxu1 %vm13077_vm3, %v26397_v45  ;;  %v26568_v45 = vld [vmem:[%s28697_s5 + $0x150] sm:$0xff] }
 0x84f   : > { %21041 = vmatprep.mubr.msk.f32.mxu1 %vm22512_vm2, %v28776_v36  ;;  %v20792_v44 = vpop.f32.mrb[71].mxu0 }
 0x850   : > { %16747 = vrot.lane.b32.xlu1 %v26541_v3, %s22487_s29  ;;  %v26556_v29 = vpop.permute.xlu0 %15417  ;;  %21097 = vmatmul.mubr.msk.f32.gmra.mrb[168].mxu0 %vm13077_vm3, %v26167_v50  ;;  %v26561_v31 = vadd.f32 %v26363_v4, %v13854_v32 }
 0x851   : > { %v13821_v10 = vpop.f32.mrb[86].mxu1  ;;  %21099 = vmatprep.mubr.msk.f32.mxu0 %vm22512_vm2, %v28776_v36  ;;  %v26570_v42 = vpop.f32.mrb[72].mxu0 }
 0x852   : > { %v13855_v56 = vadd.f32 %v13821_v10, %v26210_v13  ;;  %v26573_v17 = vpop.permute.xlu1 %16076  ;;  %16307 = vrot.lane.b32.xlu0 %v26293_v20, %s22516_s14  ;;  %v20672_v50 = vpop.f32.mrb[87].mxu1  ;;  %21042 = vmatmul.mubr.msk.f32.gmra.mrb[192].mxu1 %vm13077_vm3, %v26421_v26  ;;  %v26595_v26 = vld [vmem:[%s28697_s5 + $0x170] sm:$0xff] }
 0x853   : > { %21044 = vmatprep.mubr.msk.f32.mxu1 %vm22512_vm2, %v28776_v36  ;;  %v20795_v4 = vpop.f32.mrb[73].mxu0 }
 0x854   : > { %16749 = vrot.lane.b32.xlu1 %v26568_v45, %s22487_s29  ;;  %v26583_v32 = vpop.permute.xlu0 %15419  ;;  %21100 = vmatmul.mubr.msk.f32.gmra.mrb[170].mxu0 %vm13077_vm3, %v26188_v22  ;;  %v26588_v13 = vadd.f32 %v26383_v9, %v13855_v56 }
 0x855   : > { %v13826_v20 = vpop.f32.mrb[88].mxu1  ;;  %21102 = vmatprep.mubr.msk.f32.mxu0 %vm22512_vm2, %v28776_v36  ;;  %v26597_v44 = vpop.f32.mrb[74].mxu0 }
 0x856   : > { %v13856_v10 = vadd.f32 %v13826_v20, %v26231_v40  ;;  %v26600_v50 = vpop.permute.xlu1 %16078  ;;  %16311 = vrot.lane.b32.xlu0 %v26345_v18, %s22516_s14  ;;  %v20675_v22 = vpop.f32.mrb[89].mxu1  ;;  %21045 = vmatmul.mubr.msk.f32.gmra.mrb[194].mxu1 %vm13077_vm3, %v26448_v60  ;;  %v26622_v60 = vld [vmem:[%s28697_s5 + $0x190] sm:$0xff] }
 0x857   : > { %21047 = vmatprep.mubr.msk.f32.mxu1 %vm22512_vm2, %v28776_v36  ;;  %v20798_v9 = vpop.f32.mrb[75].mxu0 }
 0x858   : > { %16751 = vrot.lane.b32.xlu1 %v26595_v26, %s22487_s29  ;;  %v26610_v56 = vpop.permute.xlu0 %15421  ;;  %21103 = vmatmul.mubr.msk.f32.gmra.mrb[172].mxu0 %vm13077_vm3, %v26217_v51  ;;  %v26615_v40 = vadd.f32 %v26407_v58, %v13856_v10 }
 0x859   : > { %v13831_v18 = vpop.f32.mrb[90].mxu1  ;;  %21105 = vmatprep.mubr.msk.f32.mxu0 %vm22512_vm2, %v28776_v36  ;;  %v26624_v4 = vpop.f32.mrb[76].mxu0 }
 0x85a   : > { %v13857_v20 = vadd.f32 %v13831_v18, %v26260_v47  ;;  %v26627_v22 = vpop.permute.xlu1 %16080  ;;  %16950 = vrot.lane.b32.xlu0 %v26313_v54, %s22490_s13  ;;  %v20678_v51 = vpop.f32.mrb[91].mxu1  ;;  %21048 = vmatmul.mubr.msk.f32.gmra.mrb[196].mxu1 %vm13077_vm3, %v26475_v25  ;;  %v26649_v25 = vld [vmem:[%s28697_s5 + $0x1b0] sm:$0xff] }
 0x85b   : > { %21050 = vmatprep.mubr.msk.f32.mxu1 %vm22512_vm2, %v28776_v36  ;;  %v20801_v58 = vpop.f32.mrb[77].mxu0 }
 0x85c   : > { %16753 = vrot.lane.b32.xlu1 %v26622_v60, %s22487_s29  ;;  %v26637_v10 = vpop.permute.xlu0 %15423  ;;  %21106 = vmatmul.mubr.msk.f32.gmra.mrb[174].mxu0 %vm13077_vm3, %v26238_v62  ;;  %v26642_v47 = vadd.f32 %v26435_v24, %v13857_v20 }
 0x85d   : > { %v13836_v9 = vpop.f32.mrb[92].mxu1  ;;  %21108 = vmatprep.mubr.msk.f32.mxu0 %vm22512_vm2, %v28776_v36  ;;  %v26651_v18 = vpop.f32.mrb[78].mxu0 }
 0x85e   : > { %v13858_v51 = vadd.f32 %v13836_v9, %v26281_v52  ;;  %v26654_v58 = vpop.permute.xlu1 %16082  ;;  %16952 = vrot.lane.b32.xlu0 %v26335_v0, %s22490_s13  ;;  %v20681_v62 = vpop.f32.mrb[93].mxu1  ;;  %21051 = vmatmul.mubr.msk.f32.gmra.mrb[198].mxu1 %vm13077_vm3, %v26502_v2  ;;  %v26676_v2 = vld [vmem:[%s28697_s5 + $0x1d0] sm:$0xff] }
 0x85f   : > { %28865 = vst [vmem:[#allocation6_spill] sm:$0xff] %v26654_v58  ;;  %21053 = vmatprep.mubr.msk.f32.mxu1 %vm22512_vm2, %v28776_v36  ;;  %v20804_v24 = vpop.f32.mrb[79].mxu0 }
 0x860   : > { %16755 = vrot.lane.b32.xlu1 %v26649_v25, %s22487_s29  ;;  %v26664_v20 = vpop.permute.xlu0 %15425  ;;  %21109 = vmatmul.mubr.msk.f32.gmra.mrb[176].mxu0 %vm13077_vm3, %v26267_v5  ;;  %v26669_v52 = vadd.f32 %v26462_v39, %v13858_v51 }
 0x861   : > { %v13841_v9 = vpop.f32.mrb[94].mxu1  ;;  %21111 = vmatprep.mubr.msk.f32.mxu0 %vm22512_vm2, %v28776_v36  ;;  %v26678_v62 = vpop.f32.mrb[80].mxu0 }
 0x862   : > { %v13859_v24 = vadd.f32 %v13841_v9, %v26308_v16  ;;  %v26681_v58 = vpop.permute.xlu1 %16084  ;;  %22405 = vrot.lane.b32.xlu0 %v25735_v14, %s22505_s15  ;;  %v20684_v5 = vpop.f32.mrb[95].mxu1  ;;  %21054 = vmatmul.mubr.msk.f32.gmra.mrb[200].mxu1 %vm13077_vm3, %v26529_v48 }
 0x863   : > { %28866 = vst [vmem:[#allocation10_spill] sm:$0xff] %v26681_v58  ;;  %21056 = vmatprep.mubr.msk.f32.mxu1 %vm22512_vm2, %v28776_v36  ;;  %v20807_v39 = vpop.f32.mrb[81].mxu0 }
 0x864   : > { %16978 = vrot.lane.b32.xlu1 %v26676_v2, %s22490_s13  ;;  %v26691_v51 = vpop.permute.xlu0 %15427  ;;  %21112 = vmatmul.mubr.msk.f32.gmra.mrb[178].mxu0 %vm13077_vm3, %v26288_v63  ;;  %v26696_v16 = vadd.f32 %v26489_v7, %v13859_v24 }
 0x865   : > { %v14213_v9 = vpop.f32.mrb[96].mxu1  ;;  %21114 = vmatprep.mubr.msk.f32.mxu0 %vm22512_vm2, %v28776_v36  ;;  %v26700_v48 = vpop.f32.mrb[82].mxu0 }
 0x866   : > { %v14287_v5 = vadd.f32 %v14213_v9, %v26330_v55  ;;  %v26703_v39 = vpop.permute.xlu1 %16086  ;;  %22410 = vrot.lane.b32.xlu0 %v25735_v14, %s22518_s24  ;;  %v20740_v58 = vpop.f32.mrb[97].mxu1  ;;  %21057 = vmatmul.mubr.msk.f32.gmra.mrb[202].mxu1 %vm13077_vm3, %v26556_v29 }
 0x867   : > { %28867 = vst [vmem:[#allocation11_spill] sm:$0xff] %v26703_v39  ;;  %21059 = vmatprep.mubr.msk.f32.mxu1 %vm22512_vm2, %v28776_v36  ;;  %v20810_v63 = vpop.f32.mrb[83].mxu0  ;;  %v28869_v58 = vld [vmem:[#allocation9_spill] sm:$0xff] }
 0x868   : > { %17392 = vrot.lane.b32.xlu1 %v26313_v54, %s22496_s19  ;;  %v26713_v7 = vpop.permute.xlu0 %15845  ;;  %21115 = vmatmul.mubr.msk.f32.gmra.mrb[180].mxu0 %vm13077_vm3, %v26320_v38  ;;  %v26718_v55 = vadd.f32 %v26516_v27, %v14287_v5  ;;  %v28871_v5 = vld [vmem:[#allocation3_spill] sm:$0xff] }
 0x869   : > { %v14218_v24 = vpop.f32.mrb[98].mxu1  ;;  %21117 = vmatprep.mubr.msk.f32.mxu0 %vm22512_vm2, %v28776_v36  ;;  %v26722_v29 = vpop.f32.mrb[84].mxu0 }
 0x86a   : > { %28868 = vst [vmem:[#allocation14_spill] sm:$0xff] %v26718_v55  ;;  %v14288_v9 = vadd.f32 %v14218_v24, %v28869_v58  ;;  %v26725_v63 = vpop.permute.xlu1 %16088  ;;  %16954 = vrot.lane.b32.xlu0 %v26361_v59, %s22490_s13  ;;  %v20743_v39 = vpop.f32.mrb[99].mxu1  ;;  %21060 = vmatmul.mubr.msk.f32.gmra.mrb[204].mxu1 %vm13077_vm3, %v26583_v32 }
 0x86b   : > { %28870 = vst [vmem:[#allocation13_spill] sm:$0xff] %v26725_v63  ;;  %21062 = vmatprep.mubr.msk.f32.mxu1 %vm22512_vm2, %v28776_v36  ;;  %v20813_v38 = vpop.f32.mrb[85].mxu0 }
 0x86c   : > { %22415 = vrot.lane.b32.xlu1 %v25735_v14, %s22517_s30  ;;  %v22386_v27 = vpop.permute.xlu0 %22385  ;;  %21118 = vmatmul.mubr.msk.f32.gmra.mrb[182].mxu0 %vm13077_vm3, %v28871_v5  ;;  %v26738_v24 = vadd.f32 %v26543_v30, %v14288_v9  ;;  %v28873_v5 = vld [vmem:[#allocation8_spill] sm:$0xff]  ;;  %s28899_s30 = smov 120  }
 0x86d   : > { %v22388_v58 = vunpack.i.h.bf16 %v22386_v27  ;;  %v22387_v63 = vunpack.i.l.bf16 %v22386_v27  ;;  %v14223_v39 = vpop.f32.mrb[100].mxu1  ;;  %21120 = vmatprep.mubr.msk.f32.mxu0 %vm22512_vm2, %v28776_v36  ;;  %v26742_v32 = vpop.f32.mrb[86].mxu0 }
 0x86e   : > { %v14289_v38 = vadd.f32 %v14223_v39, %v26376_v15  ;;  %v26745_v55 = vpop.permute.xlu1 %16090  ;;  %16956 = vrot.lane.b32.xlu0 %v26381_v6, %s22490_s13  ;;  %v20746_v14 = vpop.f32.mrb[101].mxu1  ;;  %21063 = vmatmul.mubr.msk.f32.gmra.mrb[206].mxu1 %vm13077_vm3, %v26610_v56 }
 0x86f   : > { %28872 = vst [vmem:[#allocation7_spill] sm:$0xff] %v26745_v55  ;;  %v21842_v30 = vpack.c.bf16 %v22388_v58, %v22387_v63  ;;  %21065 = vmatprep.mubr.msk.f32.mxu1 %vm22512_vm2, %v28776_v36  ;;  %v20816_v9 = vpop.f32.mrb[87].mxu0 }
 0x870   : > { %v22391_v27 = vpop.permute.xlu0 %22390  ;;  %21121 = vmatmul.mubr.msk.f32.gmra.mrb[184].mxu0 %vm13077_vm3, %v28873_v5  ;;  %v26756_v15 = vadd.f32 %v26570_v42, %v14289_v38  ;;  %17394 = vrot.lane.b32.xlu1 %v26335_v0, %s22496_s19 }
 0x871   : > { %v22393_v39 = vunpack.i.h.bf16 %v22391_v27  ;;  %v22392_v14 = vunpack.i.l.bf16 %v22391_v27  ;;  %v14228_v55 = vpop.f32.mrb[102].mxu1  ;;  %21843 = vmatpush3.bf16.msra.mxu1 %v21842_v30  ;;  %21123 = vmatprep.mubr.msk.f32.mxu0 %vm22512_vm2, %v28776_v36  ;;  %v26762_v56 = vpop.f32.mrb[88].mxu0 }
 0x872   : > { %v14290_v63 = vadd.f32 %v14228_v55, %v26400_v8  ;;  %v26765_v58 = vpop.permute.xlu1 %16092  ;;  %16958 = vrot.lane.b32.xlu0 %v26405_v34, %s22490_s13  ;;  %v20749_v42 = vpop.f32.mrb[103].mxu1  ;;  %21066 = vmatmul.mubr.msk.f32.gmra.mrb[208].mxu1 %vm13077_vm3, %v26637_v10 }
 0x873   : > { %v21845_v38 = vpack.c.bf16 %v22393_v39, %v22392_v14  ;;  %21068 = vmatprep.mubr.msk.f32.mxu1 %vm22512_vm2, %v28776_v36  ;;  %v20819_v30 = vpop.f32.mrb[89].mxu0  ;;  %21847 = vmatprep.subr.bf16.mxu1 %v28864_v46 }
 0x874   : > { %v26774_v9 = vpop.permute.xlu0 %15847  ;;  %21124 = vmatmul.mubr.msk.f32.gmra.mrb[186].mxu0 %vm13077_vm3, %v26410_v35  ;;  %v26779_v8 = vadd.f32 %v26597_v44, %v14290_v63  ;;  %17396 = vrot.lane.b32.xlu1 %v26361_v59, %s22496_s19 }
 0x875   : > { %v14233_v55 = vpop.f32.mrb[104].mxu1  ;;  %21846 = vmatpush3.bf16.msra.mxu0 %v21845_v38  ;;  %21179 = vmatprep.mubr.msk.f32.mxu0 %vm22512_vm2, %v28776_v36  ;;  %v26785_v10 = vpop.f32.mrb[90].mxu0 }
 0x876   : > { %v14291_v27 = vadd.f32 %v14233_v55, %v26426_v41  ;;  %v26788_v5 = vpop.permute.xlu1 %15873  ;;  %16960 = vrot.lane.b32.xlu0 %v26433_v1, %s22490_s13  ;;  %v20752_v35 = vpop.f32.mrb[105].mxu1  ;;  %21069 = vmatmul.mubr.msk.f32.gmra.mrb[210].mxu1 %vm13077_vm3, %v26664_v20 }
 0x877   : > { %21071 = vmatprep.mubr.msk.f32.mxu1 %vm22512_vm2, %v28776_v36  ;;  %v20822_v44 = vpop.f32.mrb[91].mxu0  ;;  %21850 = vmatprep.subr.bf16.mxu0 %v28864_v46 }
 0x878   : > { %v26797_v39 = vpop.permute.xlu0 %15849  ;;  %21180 = vmatmul.mubr.msk.f32.vlgmr.msra.gmra.mrb[188].mxu0 %vm13077_vm3, %v26438_v21  ;;  %v26802_v41 = vadd.f32 %v26624_v4, %v14291_v27  ;;  %17398 = vrot.lane.b32.xlu1 %v26381_v6, %s22496_s19 }
 0x879   : > { %v14238_v14 = vpop.f32.mrb[106].mxu1  ;;  %21182 = vmatprep.mubr.msk.f32.mxu0 %vm22512_vm2, %v28776_v36  ;;  %v26808_v20 = vpop.f32.mrb[92].mxu0 }
 0x87a   : > { %v14292_v63 = vadd.f32 %v14238_v14, %v26453_v12  ;;  %v26811_v42 = vpop.permute.xlu1 %16094  ;;  %16962 = vrot.lane.b32.xlu0 %v26460_v11, %s22490_s13  ;;  %v20755_v21 = vpop.f32.mrb[107].mxu1  ;;  %21072 = vmatmul.mubr.msk.f32.gmra.mrb[212].mxu1 %vm13077_vm3, %v26691_v51 }
 0x87b   : > { %21074 = vmatprep.mubr.msk.f32.mxu1 %vm22512_vm2, %v28776_v36  ;;  %v20825_v4 = vpop.f32.mrb[93].mxu0 }
 0x87c   : > { %v26819_v38 = vpop.permute.xlu0 %15851  ;;  %21183 = vmatmul.mubr.msk.f32.gmra.mrb[190].mxu0 %vm13077_vm3, %v26465_v33  ;;  %v26824_v12 = vadd.f32 %v26651_v18, %v14292_v63  ;;  %17400 = vrot.lane.b32.xlu1 %v26405_v34, %s22496_s19 }
 0x87d   : > { %v14243_v30 = vpop.f32.mrb[108].mxu1  ;;  %21185 = vmatprep.mubr.msk.f32.mxu0 %vm22512_vm2, %v28776_v36  ;;  %v26830_v51 = vpop.f32.mrb[94].mxu0 }
 0x87e   : > { %v14293_v55 = vadd.f32 %v14243_v30, %v26480_v28  ;;  %v26833_v27 = vpop.permute.xlu1 %16289  ;;  %16964 = vrot.lane.b32.xlu0 %v26487_v57, %s22490_s13  ;;  %v20758_v33 = vpop.f32.mrb[109].mxu1  ;;  %21075 = vmatmul.mubr.msk.f32.gmra.mrb[214].mxu1 %vm13077_vm3, %v26386_v43 }
 0x87f   : > { %21130 = vmatprep.mubr.msk.f32.mxu1 %vm22512_vm2, %v28776_v36  ;;  %v20828_v18 = vpop.f32.mrb[95].mxu0 }
 0x880   : > { %v26841_v35 = vpop.permute.xlu0 %15853  ;;  %21186 = vmatmul.mubr.msk.f32.gmra.mrb[192].mxu0 %vm13077_vm3, %v26492_v37  ;;  %v26846_v28 = vadd.f32 %v26678_v62, %v14293_v55  ;;  %17402 = vrot.lane.b32.xlu1 %v26433_v1, %s22496_s19 }
 0x881   : > { %v14248_v44 = vpop.f32.mrb[110].mxu1  ;;  %21188 = vmatprep.mubr.msk.f32.mxu0 %vm22512_vm2, %v28776_v36  ;;  %v26852_v43 = vpop.f32.mrb[96].mxu0 }
 0x882   : > { %v14294_v14 = vadd.f32 %v14248_v44, %v26507_v49  ;;  %v26855_v63 = vpop.permute.xlu1 %16293  ;;  %16966 = vrot.lane.b32.xlu0 %v26514_v53, %s22490_s13  ;;  %v20761_v37 = vpop.f32.mrb[111].mxu1  ;;  %21131 = vmatmul.mubr.msk.f32.vlgmr.msra.gmra.mrb[216].mxu1 %vm13077_vm3, %v26713_v7 }
 0x883   : > { %21133 = vmatprep.mubr.msk.f32.mxu1 %vm22512_vm2, %v28776_v36  ;;  %v20831_v62 = vpop.f32.mrb[97].mxu0 }
 0x884   : > { %v26863_v21 = vpop.permute.xlu0 %15855  ;;  %21189 = vmatmul.mubr.msk.f32.gmra.mrb[194].mxu0 %vm13077_vm3, %v26519_v23  ;;  %v26868_v49 = vadd.f32 %v26700_v48, %v14294_v14  ;;  %17404 = vrot.lane.b32.xlu1 %v26460_v11, %s22496_s19 }
 0x885   : > { %v14253_v4 = vpop.f32.mrb[112].mxu1  ;;  %21191 = vmatprep.mubr.msk.f32.mxu0 %vm22512_vm2, %v28776_v36  ;;  %v26874_v7 = vpop.f32.mrb[98].mxu0 }
 0x886   : > { %v14295_v30 = vadd.f32 %v14253_v4, %v26534_v61  ;;  %v26877_v55 = vpop.permute.xlu1 %16297  ;;  %16968 = vrot.lane.b32.xlu0 %v26541_v3, %s22490_s13  ;;  %v20764_v23 = vpop.f32.mrb[113].mxu1  ;;  %21134 = vmatmul.mubr.msk.f32.gmra.mrb[218].mxu1 %vm13077_vm3, %v26774_v9 }
 0x887   : > { %21136 = vmatprep.mubr.msk.f32.mxu1 %vm22512_vm2, %v28776_v36  ;;  %v20887_v48 = vpop.f32.mrb[99].mxu0 }
 0x888   : > { %v26885_v33 = vpop.permute.xlu0 %15857  ;;  %21192 = vmatmul.mubr.msk.f32.gmra.mrb[196].mxu0 %vm13077_vm3, %v26546_v19  ;;  %v26890_v61 = vadd.f32 %v26722_v29, %v14295_v30  ;;  %17406 = vrot.lane.b32.xlu1 %v26487_v57, %s22496_s19 }
 0x889   : > { %v14258_v18 = vpop.f32.mrb[114].mxu1  ;;  %21194 = vmatprep.mubr.msk.f32.mxu0 %vm22512_vm2, %v28776_v36  ;;  %v26896_v9 = vpop.f32.mrb[100].mxu0 }
 0x88a   : > { %v14296_v44 = vadd.f32 %v14258_v18, %v26561_v31  ;;  %v26899_v14 = vpop.permute.xlu1 %16301  ;;  %16970 = vrot.lane.b32.xlu0 %v26568_v45, %s22490_s13  ;;  %v20767_v19 = vpop.f32.mrb[115].mxu1  ;;  %21137 = vmatmul.mubr.msk.f32.gmra.mrb[220].mxu1 %vm13077_vm3, %v26797_v39 }
 0x88b   : > { %21139 = vmatprep.mubr.msk.f32.mxu1 %vm22512_vm2, %v28776_v36  ;;  %v20890_v29 = vpop.f32.mrb[101].mxu0 }
 0x88c   : > { %v26907_v37 = vpop.permute.xlu0 %15859  ;;  %21195 = vmatmul.mubr.msk.f32.gmra.mrb[198].mxu0 %vm13077_vm3, %v26573_v17  ;;  %v26912_v31 = vadd.f32 %v26742_v32, %v14296_v44  ;;  %17408 = vrot.lane.b32.xlu1 %v26514_v53, %s22496_s19 }
 0x88d   : > { %v14263_v62 = vpop.f32.mrb[116].mxu1  ;;  %21197 = vmatprep.mubr.msk.f32.mxu0 %vm22512_vm2, %v28776_v36  ;;  %v26918_v39 = vpop.f32.mrb[102].mxu0 }
 0x88e   : > { %v14297_v4 = vadd.f32 %v14263_v62, %v26588_v13  ;;  %v26921_v30 = vpop.permute.xlu1 %16305  ;;  %16972 = vrot.lane.b32.xlu0 %v26595_v26, %s22490_s13  ;;  %v20770_v17 = vpop.f32.mrb[117].mxu1  ;;  %21140 = vmatmul.mubr.msk.f32.gmra.mrb[222].mxu1 %vm13077_vm3, %v26819_v38 }
 0x88f   : > { %21142 = vmatprep.mubr.msk.f32.mxu1 %vm22512_vm2, %v28776_v36  ;;  %v20893_v32 = vpop.f32.mrb[103].mxu0  ;;  %v28874_v17 = vld [vmem:[#allocation6_spill] sm:$0xff] }
 0x890   : > { %v26929_v23 = vpop.permute.xlu0 %15861  ;;  %21198 = vmatmul.mubr.msk.f32.gmra.mrb[200].mxu0 %vm13077_vm3, %v26600_v50  ;;  %v26934_v13 = vadd.f32 %v26762_v56, %v14297_v4  ;;  %17410 = vrot.lane.b32.xlu1 %v26541_v3, %s22496_s19 }
 0x891   : > { %v14268_v48 = vpop.f32.mrb[118].mxu1  ;;  %21200 = vmatprep.mubr.msk.f32.mxu0 %vm22512_vm2, %v28776_v36 }
 0x892   : > { %v14298_v38 = vadd.f32 %v14268_v48, %v26615_v40  ;;  %v26941_v18 = vpop.permute.xlu1 %16309  ;;  %16974 = vrot.lane.b32.xlu0 %v26622_v60, %s22490_s13  ;;  %v20773_v44 = vpop.f32.mrb[119].mxu1  ;;  %21143 = vmatmul.mubr.msk.f32.gmra.mrb[224].mxu1 %vm13077_vm3, %v26841_v35 }
 0x893   : > { %21145 = vmatprep.mubr.msk.f32.mxu1 %vm22512_vm2, %v28776_v36  ;;  %v26949_v50 = vpop.f32.mrb[104].mxu0 }
 0x894   : > { %v26951_v56 = vpop.permute.xlu0 %15863  ;;  %21201 = vmatmul.mubr.msk.f32.gmra.mrb[202].mxu0 %vm13077_vm3, %v26627_v22  ;;  %v20896_v40 = vpop.f32.mrb[105].mxu0  ;;  %v26956_v19 = vadd.f32 %v26785_v10, %v14298_v38  ;;  %17412 = vrot.lane.b32.xlu1 %v26568_v45, %s22496_s19 }
 0x895   : > { %v14273_v29 = vpop.f32.mrb[120].mxu1  ;;  %21203 = vmatprep.mubr.msk.f32.mxu0 %vm22512_vm2, %v28776_v36 }
 0x896   : > { %v14299_v35 = vadd.f32 %v14273_v29, %v26642_v47  ;;  %v26963_v62 = vpop.permute.xlu1 %16313  ;;  %16976 = vrot.lane.b32.xlu0 %v26649_v25, %s22490_s13  ;;  %v20776_v4 = vpop.f32.mrb[121].mxu1  ;;  %21146 = vmatmul.mubr.msk.f32.gmra.mrb[226].mxu1 %vm13077_vm3, %v26863_v21  ;;  %v28875_v29 = vld [vmem:[#allocation10_spill] sm:$0xff] }
 0x897   : > { %21148 = vmatprep.mubr.msk.f32.mxu1 %vm22512_vm2, %v28776_v36  ;;  %v26971_v22 = vpop.f32.mrb[106].mxu0 }
 0x898   : > { %v26973_v10 = vpop.permute.xlu0 %15865  ;;  %21204 = vmatmul.mubr.msk.f32.gmra.mrb[204].mxu0 %vm13077_vm3, %v28874_v17  ;;  %v20899_v47 = vpop.f32.mrb[107].mxu0  ;;  %v26978_v32 = vadd.f32 %v26808_v20, %v14299_v35  ;;  %17414 = vrot.lane.b32.xlu1 %v26595_v26, %s22496_s19 }
 0x899   : > { %v14278_v48 = vpop.f32.mrb[122].mxu1  ;;  %21206 = vmatprep.mubr.msk.f32.mxu0 %vm22512_vm2, %v28776_v36 }
 0x89a   : > { %v14300_v21 = vadd.f32 %v14278_v48, %v26669_v52  ;;  %v26985_v38 = vpop.permute.xlu1 %16315  ;;  %16757 = vrot.lane.b32.xlu0 %v26676_v2, %s22487_s29  ;;  %v20779_v44 = vpop.f32.mrb[123].mxu1  ;;  %21149 = vmatmul.mubr.msk.f32.gmra.mrb[228].mxu1 %vm13077_vm3, %v26885_v33 }
 0x89b   : > { %21151 = vmatprep.mubr.msk.f32.mxu1 %vm22512_vm2, %v28776_v36  ;;  %v26993_v20 = vpop.f32.mrb[108].mxu0 }
 0x89c   : > { %v26995_v40 = vpop.permute.xlu0 %15867  ;;  %21207 = vmatmul.mubr.msk.f32.gmra.mrb[206].mxu0 %vm13077_vm3, %v28875_v29  ;;  %v20902_v52 = vpop.f32.mrb[109].mxu0  ;;  %v27000_v35 = vadd.f32 %v26830_v51, %v14300_v21  ;;  %17416 = vrot.lane.b32.xlu1 %v26622_v60, %s22496_s19 }
 0x89d   : > { %v14283_v4 = vpop.f32.mrb[124].mxu1  ;;  %21209 = vmatprep.mubr.msk.f32.mxu0 %vm22512_vm2, %v28776_v36 }
 0x89e   : > { %v14301_v33 = vadd.f32 %v14283_v4, %v26696_v16  ;;  %v27007_v17 = vpop.permute.xlu1 %16729  ;;  %17171 = vrot.lane.b32.xlu0 %v26313_v54, %s22493_s16  ;;  %v20782_v47 = vpop.f32.mrb[125].mxu1  ;;  %21152 = vmatmul.mubr.msk.f32.gmra.mrb[230].mxu1 %vm13077_vm3, %v26907_v37  ;;  %v28877_v16 = vld [vmem:[#allocation11_spill] sm:$0xff]  ;;  %v28878_v37 = vld [vmem:[#allocation14_spill] sm:$0xff] }
 0x89f   : > { %28876 = vst [vmem:[#allocation15_spill] sm:$0xff] %v27007_v17  ;;  %21154 = vmatprep.mubr.msk.f32.mxu1 %vm22512_vm2, %v28776_v36  ;;  %v27015_v51 = vpop.f32.mrb[110].mxu0 }
 0x8a0   : > { %v27018_v48 = vadd.f32 %v26852_v43, %v14301_v33  ;;  %v27020_v21 = vpop.permute.xlu0 %15869  ;;  %21210 = vmatmul.mubr.msk.f32.gmra.mrb[208].mxu0 %vm13077_vm3, %v28877_v16  ;;  %v20905_v44 = vpop.f32.mrb[111].mxu0  ;;  %17418 = vrot.lane.b32.xlu1 %v26649_v25, %s22496_s19 }
 0x8a1   : > { %v14655_v29 = vpop.f32.mrb[126].mxu1  ;;  %21212 = vmatprep.mubr.msk.f32.mxu0 %vm22512_vm2, %v28776_v36  ;;  %v28880_v44 = vld [vmem:[#allocation13_spill] sm:$0xff] }
 0x8a2   : > { %v14729_v52 = vadd.f32 %v14655_v29, %v28878_v37  ;;  %v27029_v4 = vpop.permute.xlu1 %16731  ;;  %17173 = vrot.lane.b32.xlu0 %v26335_v0, %s22493_s16  ;;  %v20838_v43 = vpop.f32.mrb[127].mxu1  ;;  %21155 = vmatmul.mubr.msk.f32.gmra.mrb[232].mxu1 %vm13077_vm3, %v26929_v23 }
 0x8a3   : > { %28879 = vst [vmem:[#allocation16_spill] sm:$0xff] %v27029_v4  ;;  %21157 = vmatprep.mubr.msk.f32.mxu1 %vm22512_vm2, %v28776_v36  ;;  %v27037_v33 = vpop.f32.mrb[112].mxu0  ;;  %v28882_v4 = vld [vmem:[#allocation7_spill] sm:$0xff] }
 0x8a4   : > { %v27040_v47 = vadd.f32 %v26874_v7, %v14729_v52  ;;  %v27042_v16 = vpop.permute.xlu0 %15871  ;;  %21213 = vmatmul.mubr.msk.f32.gmra.mrb[210].mxu0 %vm13077_vm3, %v28880_v44  ;;  %v20908_v29 = vpop.f32.mrb[113].mxu0  ;;  %17199 = vrot.lane.b32.xlu1 %v26676_v2, %s22493_s16 }
 0x8a5   : > { %v14660_v37 = vpop.f32.mrb[128].mxu1  ;;  %21215 = vmatprep.mubr.msk.f32.mxu0 %vm22512_vm2, %v28776_v36 }
 0x8a6   : > { %v14730_v23 = vadd.f32 %v14660_v37, %v26738_v24  ;;  %v27051_v43 = vpop.permute.xlu1 %16733  ;;  %17175 = vrot.lane.b32.xlu0 %v26361_v59, %s22493_s16  ;;  %v20841_v7 = vpop.f32.mrb[129].mxu1  ;;  %21158 = vmatmul.mubr.msk.f32.gmra.mrb[234].mxu1 %vm13077_vm3, %v26951_v56 }
 0x8a7   : > { %28881 = vst [vmem:[#allocation19_spill] sm:$0xff] %v27051_v43  ;;  %21160 = vmatprep.mubr.msk.f32.mxu1 %vm22512_vm2, %v28776_v36  ;;  %v27059_v52 = vpop.f32.mrb[114].mxu0 }
 0x8a8   : > { %v27062_v44 = vadd.f32 %v26896_v9, %v14730_v23  ;;  %v22396_v29 = vpop.permute.xlu0 %22395  ;;  %21216 = vmatmul.mubr.msk.f32.gmra.mrb[212].mxu0 %vm13077_vm3, %v28882_v4  ;;  %v20911_v24 = vpop.f32.mrb[115].mxu0  ;;  %17420 = vrot.lane.b32.xlu1 %v26676_v2, %s22496_s19  ;;  %s386_s19 = scalar_lea.vmem %s28703_s11, %s19824_s22 }
 0x8a9   : > { %v22398_v37 = vunpack.i.h.bf16 %v22396_v29  ;;  %v22397_v7 = vunpack.i.l.bf16 %v22396_v29  ;;  %v14665_v43 = vpop.f32.mrb[130].mxu1  ;;  %21218 = vmatprep.mubr.msk.f32.mxu0 %vm22512_vm2, %v28776_v36 }
 0x8aa   : > { %v14731_v56 = vadd.f32 %v14665_v43, %v26756_v15  ;;  %v27071_v17 = vpop.permute.xlu1 %16735  ;;  %17177 = vrot.lane.b32.xlu0 %v26381_v6, %s22493_s16  ;;  %v20844_v9 = vpop.f32.mrb[131].mxu1  ;;  %21161 = vmatmul.mubr.msk.f32.gmra.mrb[236].mxu1 %vm13077_vm3, %v26973_v10 }
 0x8ab   : > { %v21848_v4 = vpack.c.bf16 %v22398_v37, %v22397_v7  ;;  %21163 = vmatprep.mubr.msk.f32.mxu1 %vm22512_vm2, %v28776_v36  ;;  %v27079_v23 = vpop.f32.mrb[116].mxu0 }
 0x8ac   : > { %v27082_v29 = vadd.f32 %v26918_v39, %v14731_v56  ;;  %v22401_v24 = vpop.permute.xlu0 %22400  ;;  %21219 = vmatmul.mubr.msk.f32.gmra.mrb[214].mxu0 %vm13077_vm3, %v26765_v58  ;;  %v20914_v15 = vpop.f32.mrb[117].mxu0  ;;  %17830 = vrot.lane.b32.xlu1 %v26313_v54, %s22506_s27 }
 0x8ad   : > { %v22403_v43 = vunpack.i.h.bf16 %v22401_v24  ;;  %v22402_v9 = vunpack.i.l.bf16 %v22401_v24  ;;  %v14670_v10 = vpop.f32.mrb[132].mxu1  ;;  %21849 = vmatpush3.bf16.msra.mxu1 %v21848_v4  ;;  %21221 = vmatprep.mubr.msk.f32.mxu0 %vm22512_vm2, %v28776_v36 }
 0x8ae   : > { %v14732_v37 = vadd.f32 %v14670_v10, %v26779_v8  ;;  %v27091_v7 = vpop.permute.xlu1 %16737  ;;  %17179 = vrot.lane.b32.xlu0 %v26405_v34, %s22493_s16  ;;  %v20847_v39 = vpop.f32.mrb[133].mxu1  ;;  %21164 = vmatmul.mubr.msk.f32.gmra.mrb[238].mxu1 %vm13077_vm3, %v26995_v40 }
 0x8af   : > { %v21851_v58 = vpack.c.bf16 %v22403_v43, %v22402_v9  ;;  %21166 = vmatprep.mubr.msk.f32.mxu1 %vm22512_vm2, %v28776_v36  ;;  %v27099_v54 = vpop.f32.mrb[118].mxu0  ;;  %21853 = vmatprep.subr.bf16.mxu1 %v28864_v46 }
 0x8b0   : > { %v16288_v56 = vpop.permute.xlu0 %16287  ;;  %21222 = vmatmul.mubr.msk.f32.gmra.mrb[216].mxu0 %vm13077_vm3, %v26811_v42  ;;  %v20917_v8 = vpop.f32.mrb[119].mxu0  ;;  %v27105_v4 = vadd.f32 %v26949_v50, %v14732_v37  ;;  %17832 = vrot.lane.b32.xlu1 %v26335_v0, %s22506_s27 }
 0x8b1   : > { %v14675_v40 = vpop.f32.mrb[134].mxu1  ;;  %21852 = vmatpush3.bf16.msra.mxu0 %v21851_v58  ;;  %21277 = vmatprep.mubr.msk.f32.mxu0 %vm22512_vm2, %v28776_v36 }
 0x8b2   : > { %v14733_v24 = vadd.f32 %v14675_v40, %v26802_v41  ;;  %v27112_v15 = vpop.permute.xlu1 %16739  ;;  %17181 = vrot.lane.b32.xlu0 %v26433_v1, %s22493_s16  ;;  %v20850_v42 = vpop.f32.mrb[135].mxu1  ;;  %21167 = vmatmul.mubr.msk.f32.gmra.mrb[240].mxu1 %vm13077_vm3, %v27020_v21  ;;  %v27128_v41 = vld [vmem:[%s28697_s5 + $0x10] sm:$0xff] }
 0x8b3   : > { %21169 = vmatprep.mubr.msk.f32.mxu1 %vm22512_vm2, %v28776_v36  ;;  %v27120_v0 = vpop.f32.mrb[120].mxu0  ;;  %21856 = vmatprep.subr.bf16.mxu0 %v28864_v46 }
 0x8b4   : > { %v27123_v50 = vpop.permute.xlu0 %16291  ;;  %21278 = vmatmul.mubr.msk.f32.vlgmr.msra.gmra.mrb[218].mxu0 %vm13077_vm3, %v27128_v41  ;;  %v20920_v43 = vpop.f32.mrb[121].mxu0  ;;  %v27133_v21 = vadd.f32 %v26971_v22, %v14733_v24  ;;  %17834 = vrot.lane.b32.xlu1 %v26361_v59, %s22506_s27 }
 0x8b5   : > { %v14680_v9 = vpop.f32.mrb[136].mxu1  ;;  %21280 = vmatprep.mubr.msk.f32.mxu0 %vm22512_vm2, %v28776_v36 }
 0x8b6   : > { %v14734_v10 = vadd.f32 %v14680_v9, %v26824_v12  ;;  %v27140_v37 = vpop.permute.xlu1 %16741  ;;  %17183 = vrot.lane.b32.xlu0 %v26460_v11, %s22493_s16  ;;  %v20853_v39 = vpop.f32.mrb[137].mxu1  ;;  %21170 = vmatmul.mubr.msk.f32.gmra.mrb[242].mxu1 %vm13077_vm3, %v27042_v16  ;;  %v27155_v12 = vld [vmem:[%s28697_s5 + $0x30] sm:$0xff] }
 0x8b7   : > { %21172 = vmatprep.mubr.msk.f32.mxu1 %vm22512_vm2, %v28776_v36  ;;  %v27148_v22 = vpop.f32.mrb[122].mxu0 }
 0x8b8   : > { %v27150_v59 = vpop.permute.xlu0 %16295  ;;  %21281 = vmatmul.mubr.msk.f32.gmra.mrb[220].mxu0 %vm13077_vm3, %v27155_v12  ;;  %v20923_v58 = vpop.f32.mrb[123].mxu0  ;;  %v27160_v8 = vadd.f32 %v26993_v20, %v14734_v10  ;;  %17836 = vrot.lane.b32.xlu1 %v26381_v6, %s22506_s27 }
 0x8b9   : > { %v14685_v16 = vpop.f32.mrb[138].mxu1  ;;  %21283 = vmatprep.mubr.msk.f32.mxu0 %vm22512_vm2, %v28776_v36 }
 0x8ba   : > { %v14735_v40 = vadd.f32 %v14685_v16, %v26846_v28  ;;  %v27167_v24 = vpop.permute.xlu1 %16743  ;;  %17185 = vrot.lane.b32.xlu0 %v26487_v57, %s22493_s16  ;;  %v20856_v42 = vpop.f32.mrb[139].mxu1  ;;  %21173 = vmatmul.mubr.msk.f32.gmra.mrb[244].mxu1 %vm13077_vm3, %v26788_v5  ;;  %v27182_v28 = vld [vmem:[%s28697_s5 + $0x50] sm:$0xff] }
 0x8bb   : > { %21228 = vmatprep.mubr.msk.f32.mxu1 %vm22512_vm2, %v28776_v36  ;;  %v27175_v20 = vpop.f32.mrb[124].mxu0  ;;  %v27208_v16 = vld [vmem:[%s28697_s5 + $0x70] sm:$0xff] }
 0x8bc   : > { %v27177_v6 = vpop.permute.xlu0 %16299  ;;  %21284 = vmatmul.mubr.msk.f32.gmra.mrb[222].mxu0 %vm13077_vm3, %v27182_v28  ;;  %v20926_v43 = vpop.f32.mrb[125].mxu0  ;;  %v27187_v9 = vadd.f32 %v27015_v51, %v14735_v40  ;;  %17838 = vrot.lane.b32.xlu1 %v26405_v34, %s22506_s27 }
 0x8bd   : > { %v14690_v5 = vpop.f32.mrb[140].mxu1  ;;  %21286 = vmatprep.mubr.msk.f32.mxu0 %vm22512_vm2, %v28776_v36 }
 0x8be   : > { %v14736_v10 = vadd.f32 %v14690_v5, %v26868_v49  ;;  %v27194_v39 = vpop.permute.xlu1 %16745  ;;  %17187 = vrot.lane.b32.xlu0 %v26514_v53, %s22493_s16  ;;  %v20859_v58 = vpop.f32.mrb[141].mxu1  ;;  %21229 = vmatmul.mubr.msk.f32.vlgmr.msra.gmra.mrb[246].mxu1 %vm13077_vm3, %v16288_v56 }
 0x8bf   : > { %28883 = vst [vmem:[#allocation18_spill] sm:$0xff] %v27194_v39  ;;  %21231 = vmatprep.mubr.msk.f32.mxu1 %vm22512_vm2, %v28776_v36  ;;  %v27201_v51 = vpop.f32.mrb[126].mxu0  ;;  %v27238_v58 = vld [vmem:[%s28697_s5 + $0x90] sm:$0xff] }
 0x8c0   : > { %v27203_v34 = vpop.permute.xlu0 %16303  ;;  %21287 = vmatmul.mubr.msk.f32.gmra.mrb[224].mxu0 %vm13077_vm3, %v27208_v16  ;;  %v20929_v49 = vpop.f32.mrb[127].mxu0  ;;  %v27213_v40 = vadd.f32 %v27037_v33, %v14736_v10  ;;  %17840 = vrot.lane.b32.xlu1 %v26433_v1, %s22506_s27 }
 0x8c1   : > { %v14695_v56 = vpop.f32.mrb[142].mxu1  ;;  %21289 = vmatprep.mubr.msk.f32.mxu0 %vm22512_vm2, %v28776_v36 }
 0x8c2   : > { %v27219_v42 = vpop.permute.xlu1 %16747  ;;  %17189 = vrot.lane.b32.xlu0 %v26541_v3, %s22493_s16  ;;  %v20862_v43 = vpop.f32.mrb[143].mxu1  ;;  %21232 = vmatmul.mubr.msk.f32.gmra.mrb[248].mxu1 %vm13077_vm3, %v26833_v27  ;;  %v14737_v5 = vadd.f32 %v14695_v56, %v26890_v61 }
 0x8c3   : > { %28884 = vst [vmem:[#allocation12_spill] sm:$0xff] %v27219_v42  ;;  %21234 = vmatprep.mubr.msk.f32.mxu1 %vm22512_vm2, %v28776_v36  ;;  %v27228_v33 = vpop.f32.mrb[128].mxu0  ;;  %v28889_v42 = vld [vmem:[#allocation5_spill] sm:$0xff] }
 0x8c4   : > { %v27231_v1 = vadd.f32 %v27059_v52, %v14737_v5  ;;  %v27233_v10 = vpop.permute.xlu0 %16307  ;;  %21290 = vmatmul.mubr.msk.f32.gmra.mrb[226].mxu0 %vm13077_vm3, %v27238_v58  ;;  %v20985_v27 = vpop.f32.mrb[129].mxu0  ;;  %17842 = vrot.lane.b32.xlu1 %v26460_v11, %s22506_s27 }
 0x8c5   : > { %v14700_v61 = vpop.f32.mrb[144].mxu1  ;;  %21292 = vmatprep.mubr.msk.f32.mxu0 %vm22512_vm2, %v28776_v36  ;;  %v27265_v27 = vld [vmem:[%s28697_s5 + $0xb0] sm:$0xff] }
 0x8c6   : > { %v27246_v52 = vpop.permute.xlu1 %16749  ;;  %17191 = vrot.lane.b32.xlu0 %v26568_v45, %s22493_s16  ;;  %v20865_v49 = vpop.f32.mrb[145].mxu1  ;;  %21235 = vmatmul.mubr.msk.f32.gmra.mrb[250].mxu1 %vm13077_vm3, %v27123_v50  ;;  %v14738_v56 = vadd.f32 %v14700_v61, %v26912_v31 }
 0x8c7   : > { %28885 = vst [vmem:[#allocation20_spill] sm:$0xff] %v27246_v52  ;;  %21237 = vmatprep.mubr.msk.f32.mxu1 %vm22512_vm2, %v28776_v36  ;;  %v27255_v43 = vpop.f32.mrb[130].mxu0 }
 0x8c8   : > { %v27258_v11 = vadd.f32 %v27079_v23, %v14738_v56  ;;  %v27260_v5 = vpop.permute.xlu0 %16311  ;;  %21293 = vmatmul.mubr.msk.f32.gmra.mrb[228].mxu0 %vm13077_vm3, %v27265_v27  ;;  %v20988_v50 = vpop.f32.mrb[131].mxu0  ;;  %17844 = vrot.lane.b32.xlu1 %v26487_v57, %s22506_s27 }
 0x8c9   : > { %v14705_v31 = vpop.f32.mrb[146].mxu1  ;;  %21295 = vmatprep.mubr.msk.f32.mxu0 %vm22512_vm2, %v28776_v36 }
 0x8ca   : > { %v27273_v23 = vpop.permute.xlu1 %16751  ;;  %17193 = vrot.lane.b32.xlu0 %v26595_v26, %s22493_s16  ;;  %v20868_v61 = vpop.f32.mrb[147].mxu1  ;;  %21238 = vmatmul.mubr.msk.f32.gmra.mrb[252].mxu1 %vm13077_vm3, %v26855_v63  ;;  %v14739_v49 = vadd.f32 %v14705_v31, %v26934_v13 }
 0x8cb   : > { %28886 = vst [vmem:[#allocation21_spill] sm:$0xff] %v27273_v23  ;;  %21240 = vmatprep.mubr.msk.f32.mxu1 %vm22512_vm2, %v28776_v36  ;;  %v27282_v56 = vpop.f32.mrb[132].mxu0  ;;  %v27292_v23 = vld [vmem:[%s28697_s5 + $0xd0] sm:$0xff] }
 0x8cc   : > { %v27285_v57 = vadd.f32 %v27099_v54, %v14739_v49  ;;  %v27287_v50 = vpop.permute.xlu0 %16950  ;;  %21296 = vmatmul.mubr.msk.f32.gmra.mrb[230].mxu0 %vm13077_vm3, %v27292_v23  ;;  %v20991_v63 = vpop.f32.mrb[133].mxu0  ;;  %17846 = vrot.lane.b32.xlu1 %v26514_v53, %s22506_s27 }
 0x8cd   : > { %v14710_v13 = vpop.f32.mrb[148].mxu1  ;;  %21298 = vmatprep.mubr.msk.f32.mxu0 %vm22512_vm2, %v28776_v36 }
 0x8ce   : > { %v14740_v54 = vadd.f32 %v14710_v13, %v26956_v19  ;;  %v27301_v31 = vpop.permute.xlu1 %16753  ;;  %17195 = vrot.lane.b32.xlu0 %v26622_v60, %s22493_s16  ;;  %v20871_v61 = vpop.f32.mrb[149].mxu1  ;;  %21241 = vmatmul.mubr.msk.f32.gmra.mrb[254].mxu1 %vm13077_vm3, %v27150_v59  ;;  %v27319_v19 = vld [vmem:[%s28697_s5 + $0xf0] sm:$0xff] }
 0x8cf   : > { %28887 = vst [vmem:[#allocation24_spill] sm:$0xff] %v27301_v31  ;;  %21243 = vmatprep.mubr.msk.f32.mxu1 %vm22512_vm2, %v28776_v36  ;;  %v27309_v49 = vpop.f32.mrb[134].mxu0 }
 0x8d0   : > { %v27312_v63 = vadd.f32 %v27120_v0, %v14740_v54  ;;  %v27314_v52 = vpop.permute.xlu0 %16952  ;;  %21299 = vmatmul.mubr.msk.f32.gmra.mrb[232].mxu0 %vm13077_vm3, %v27319_v19  ;;  %v20994_v13 = vpop.f32.mrb[135].mxu0  ;;  %17848 = vrot.lane.b32.xlu1 %v26541_v3, %s22506_s27 }
 0x8d1   : > { %v14715_v59 = vpop.f32.mrb[150].mxu1  ;;  %21301 = vmatprep.mubr.msk.f32.mxu0 %vm22512_vm2, %v28776_v36 }
 0x8d2   : > { %v14741_v0 = vadd.f32 %v14715_v59, %v26978_v32  ;;  %17197 = vrot.lane.b32.xlu0 %v26649_v25, %s22493_s16  ;;  %v20874_v54 = vpop.f32.mrb[151].mxu1  ;;  %21244 = vmatmul.mubr.msk.f32.gmra.mrb[0].mxu1 %vm13077_vm3, %v26877_v55  ;;  %v27332_v61 = vpop.permute.xlu1 %16755 }
 0x8d3   : > { %28888 = vst [vmem:[#allocation23_spill] sm:$0xff] %v27332_v61  ;;  %21246 = vmatprep.mubr.msk.f32.mxu1 %vm22512_vm2, %v28776_v36  ;;  %v27336_v13 = vpop.f32.mrb[136].mxu0 }
 0x8d4   : > { %v22406_v3 = vpop.permute.xlu0 %22405  ;;  %21302 = vmatmul.mubr.msk.f32.gmra.mrb[234].mxu0 %vm13077_vm3, %v26514_v53  ;;  %v20997_v31 = vpop.f32.mrb[137].mxu0  ;;  %v27341_v32 = vadd.f32 %v27148_v22, %v14741_v0  ;;  %17850 = vrot.lane.b32.xlu1 %v26568_v45, %s22506_s27 }
 0x8d5   : > { %v22408_v59 = vunpack.i.h.bf16 %v22406_v3  ;;  %v22407_v55 = vunpack.i.l.bf16 %v22406_v3  ;;  %v14720_v54 = vpop.f32.mrb[152].mxu1  ;;  %21304 = vmatprep.mubr.msk.f32.mxu0 %vm22512_vm2, %v28776_v36  ;;  %v27359_v31 = vld [vmem:[%s28697_s5 + $0x130] sm:$0xff] }
 0x8d6   : > { %v14742_v61 = vadd.f32 %v14720_v54, %v27000_v35  ;;  %22420 = vrot.lane.b32.xlu0 %v28889_v42, %s22486_s28  ;;  %v20877_v39 = vpop.f32.mrb[153].mxu1  ;;  %21247 = vmatmul.mubr.msk.f32.gmra.mrb[2].mxu1 %vm13077_vm3, %v27177_v6  ;;  %v27368_v6 = vpop.permute.xlu1 %16978 }
 0x8d7   : > { %v21854_v53 = vpack.c.bf16 %v22408_v59, %v22407_v55  ;;  %21249 = vmatprep.mubr.msk.f32.mxu1 %vm22512_vm2, %v28776_v36  ;;  %v27354_v45 = vpop.f32.mrb[138].mxu0 }
 0x8d8   : > { %v22411_v22 = vpop.permute.xlu0 %22410  ;;  %21305 = vmatmul.mubr.msk.f32.gmra.mrb[236].mxu0 %vm13077_vm3, %v27359_v31  ;;  %v21000_v35 = vpop.f32.mrb[139].mxu0  ;;  %v27364_v39 = vadd.f32 %v27175_v20, %v14742_v61  ;;  %17852 = vrot.lane.b32.xlu1 %v26595_v26, %s22506_s27 }
 0x8d9   : > { %v22413_v0 = vunpack.i.h.bf16 %v22411_v22  ;;  %v22412_v3 = vunpack.i.l.bf16 %v22411_v22  ;;  %v14725_v59 = vpop.f32.mrb[154].mxu1  ;;  %21855 = vmatpush3.bf16.msra.mxu1 %v21854_v53  ;;  %21307 = vmatprep.mubr.msk.f32.mxu0 %vm22512_vm2, %v28776_v36 }
 0x8da   : > { %v14743_v55 = vadd.f32 %v14725_v59, %v27018_v48  ;;  %22425 = vrot.lane.b32.xlu0 %v28889_v42, %s22501_s20  ;;  %v20880_v54 = vpop.f32.mrb[155].mxu1  ;;  %21250 = vmatmul.mubr.msk.f32.gmra.mrb[4].mxu1 %vm13077_vm3, %v26899_v14  ;;  %v27387_v48 = vld [vmem:[%s28697_s5 + $0x150] sm:$0xff] }
 0x8db   : > { %v21857_v20 = vpack.c.bf16 %v22413_v0, %v22412_v3  ;;  %21252 = vmatprep.mubr.msk.f32.mxu1 %vm22512_vm2, %v28776_v36  ;;  %v27379_v26 = vpop.f32.mrb[140].mxu0  ;;  %21859 = vmatprep.subr.bf16.mxu1 %v28864_v46  ;;  %v27403_v3 = vpop.permute.xlu1 %17392 }
 0x8dc   : > { %v27382_v61 = vpop.permute.xlu0 %16954  ;;  %21308 = vmatmul.mubr.msk.f32.gmra.mrb[238].mxu0 %vm13077_vm3, %v27387_v48  ;;  %v21003_v53 = vpop.f32.mrb[141].mxu0  ;;  %v27392_v14 = vadd.f32 %v27201_v51, %v14743_v55  ;;  %17854 = vrot.lane.b32.xlu1 %v26622_v60, %s22506_s27 }
 0x8dd   : > { %v15097_v22 = vpop.f32.mrb[156].mxu1  ;;  %21858 = vmatpush3.bf16.msra.mxu0 %v21857_v20  ;;  %21310 = vmatprep.mubr.msk.f32.mxu0 %vm22512_vm2, %v28776_v36 }
 0x8de   : > { %v15171_v35 = vadd.f32 %v15097_v22, %v27040_v47  ;;  %17607 = vrot.lane.b32.xlu0 %v27128_v41, %s22515_s26  ;;  %v20936_v0 = vpop.f32.mrb[157].mxu1  ;;  %21253 = vmatmul.mubr.msk.f32.gmra.mrb[6].mxu1 %vm13077_vm3, %v27203_v34  ;;  %v27415_v47 = vld [vmem:[%s28697_s5 + $0x170] sm:$0xff] }
 0x8df   : > { %21255 = vmatprep.mubr.msk.f32.mxu1 %vm22512_vm2, %v28776_v36  ;;  %21862 = vmatprep.subr.bf16.mxu0 %v28864_v46  ;;  %v27408_v60 = vpop.f32.mrb[142].mxu0 }
 0x8e0   : > { %v27410_v51 = vpop.permute.xlu0 %16956  ;;  %21311 = vmatmul.mubr.msk.f32.gmra.mrb[240].mxu0 %vm13077_vm3, %v27415_v47  ;;  %v21006_v34 = vpop.f32.mrb[143].mxu0  ;;  %v27420_v59 = vadd.f32 %v27228_v33, %v15171_v35  ;;  %17856 = vrot.lane.b32.xlu1 %v26649_v25, %s22506_s27  ;;  %v27440_v25 = vld [vmem:[%s28697_s5 + $0x190] sm:$0xff] }
 0x8e1   : > { %v15102_v55 = vpop.f32.mrb[158].mxu1  ;;  %21313 = vmatprep.mubr.msk.f32.mxu0 %vm22512_vm2, %v28776_v36 }
 0x8e2   : > { %v15172_v54 = vadd.f32 %v15102_v55, %v27062_v44  ;;  %17609 = vrot.lane.b32.xlu0 %v27155_v12, %s22515_s26  ;;  %v20939_v20 = vpop.f32.mrb[159].mxu1  ;;  %21256 = vmatmul.mubr.msk.f32.gmra.mrb[8].mxu1 %vm13077_vm3, %v26921_v30  ;;  %v27449_v30 = vpop.permute.xlu1 %22415 }
 0x8e3   : > { %21258 = vmatprep.mubr.msk.f32.mxu1 %vm22512_vm2, %v28776_v36  ;;  %v27433_v33 = vpop.f32.mrb[144].mxu0 }
 0x8e4   : > { %v27435_v53 = vpop.permute.xlu0 %16958  ;;  %21314 = vmatmul.mubr.msk.f32.gmra.mrb[242].mxu0 %vm13077_vm3, %v27440_v25  ;;  %v21009_v44 = vpop.f32.mrb[145].mxu0  ;;  %v27445_v22 = vadd.f32 %v27255_v43, %v15172_v54  ;;  %17635 = vrot.lane.b32.xlu1 %v26676_v2, %s22515_s26  ;;  %v27467_v54 = vld [vmem:[%s28697_s5 + $0x1b0] sm:$0xff] }
 0x8e5   : > { %v15107_v35 = vpop.f32.mrb[160].mxu1  ;;  %21316 = vmatprep.mubr.msk.f32.mxu0 %vm22512_vm2, %v28776_v36 }
 0x8e6   : > { %v15173_v0 = vadd.f32 %v15107_v35, %v27082_v29  ;;  %17611 = vrot.lane.b32.xlu0 %v27182_v28, %s22515_s26  ;;  %v20942_v34 = vpop.f32.mrb[161].mxu1  ;;  %21259 = vmatmul.mubr.msk.f32.gmra.mrb[10].mxu1 %vm13077_vm3, %v27233_v10  ;;  %v27478_v44 = vpop.permute.xlu1 %17394 }
 0x8e7   : > { %21261 = vmatprep.mubr.msk.f32.mxu1 %vm22512_vm2, %v28776_v36  ;;  %v27460_v43 = vpop.f32.mrb[146].mxu0 }
 0x8e8   : > { %v27462_v55 = vpop.permute.xlu0 %16960  ;;  %21317 = vmatmul.mubr.msk.f32.gmra.mrb[244].mxu0 %vm13077_vm3, %v27467_v54  ;;  %v21012_v29 = vpop.f32.mrb[147].mxu0  ;;  %v27472_v20 = vadd.f32 %v27282_v56, %v15173_v0  ;;  %17858 = vrot.lane.b32.xlu1 %v26676_v2, %s22506_s27  ;;  %v27494_v0 = vld [vmem:[%s28697_s5 + $0x1d0] sm:$0xff] }
 0x8e9   : > { %v15112_v10 = vpop.f32.mrb[162].mxu1  ;;  %21319 = vmatprep.mubr.msk.f32.mxu0 %vm22512_vm2, %v28776_v36  ;;  %28890 = vst [vmem:[#allocation17_spill] sm:$0xff] %v27494_v0 }
 0x8ea   : > { %v15174_v35 = vadd.f32 %v15112_v10, %v27105_v4  ;;  %17613 = vrot.lane.b32.xlu0 %v27208_v16, %s22515_s26  ;;  %v20945_v34 = vpop.f32.mrb[163].mxu1  ;;  %21262 = vmatmul.mubr.msk.f32.gmra.mrb[12].mxu1 %vm13077_vm3, %v26941_v18 }
 0x8eb   : > { %21264 = vmatprep.mubr.msk.f32.mxu1 %vm22512_vm2, %v28776_v36  ;;  %v27487_v56 = vpop.f32.mrb[148].mxu0 }
 0x8ec   : > { %v27489_v2 = vpop.permute.xlu0 %16962  ;;  %21320 = vmatmul.mubr.msk.f32.gmra.mrb[246].mxu0 %vm13077_vm3, %v27494_v0  ;;  %v21015_v4 = vpop.f32.mrb[149].mxu0  ;;  %v27499_v29 = vadd.f32 %v27309_v49, %v15174_v35  ;;  %18053 = vrot.lane.b32.xlu1 %v27155_v12, %s22516_s14 }
 0x8ed   : > { %v15117_v18 = vpop.f32.mrb[164].mxu1  ;;  %21375 = vmatprep.mubr.msk.f32.mxu0 %vm22512_vm2, %v28776_v36  ;;  %v27514_v35 = vpop.permute.xlu1 %17396 }
 0x8ee   : > { %v15175_v10 = vadd.f32 %v15117_v18, %v27133_v21  ;;  %17615 = vrot.lane.b32.xlu0 %v27238_v58, %s22515_s26  ;;  %v20948_v34 = vpop.f32.mrb[165].mxu1  ;;  %21265 = vmatmul.mubr.msk.f32.gmra.mrb[14].mxu1 %vm13077_vm3, %v27260_v5  ;;  %28891 = vst [vmem:[#allocation25_spill] sm:$0xff] %v27514_v35  ;;  %v28892_v5 = vld [vmem:[#allocation2_spill] sm:$0xff]  ;;  %v28893_v18 = vld [vmem:[#allocation4_spill] sm:$0xff] }
 0x8ef   : > { %21267 = vmatprep.mubr.msk.f32.mxu1 %vm22512_vm2, %v28776_v36  ;;  %v27512_v49 = vpop.f32.mrb[150].mxu0  ;;  %v28894_v34 = vpack.c.bf16 %v28892_v5, %v28893_v18 }
 0x8f0   : > { %v27516_v12 = vpop.permute.xlu0 %16964  ;;  %21376 = vmatmul.mubr.msk.f32.vlgmr.msra.gmra.mrb[248].mxu0 %vm13077_vm3, %v27287_v50  ;;  %v21018_v21 = vpop.f32.mrb[151].mxu0  ;;  %v27521_v4 = vadd.f32 %v27336_v13, %v15175_v10  ;;  %18057 = vrot.lane.b32.xlu1 %v27208_v16, %s22516_s14  ;;  %v22417_v10 = vunpack.i.l.bf16 %v27449_v30 }
 0x8f1   : > { %21864 = vmatpush3.bf16.msra.mxu0 %v28894_v34  ;;  %v15122_v0 = vpop.f32.mrb[166].mxu1  ;;  %21378 = vmatprep.mubr.msk.f32.mxu0 %vm22512_vm2, %v28776_v36  ;;  %v27553_v5 = vpop.permute.xlu1 %17398 }
 0x8f2   : > { %v15176_v35 = vadd.f32 %v15122_v0, %v27160_v8  ;;  %17617 = vrot.lane.b32.xlu0 %v27265_v27, %s22515_s26  ;;  %v20951_v50 = vpop.f32.mrb[167].mxu1  ;;  %21268 = vmatmul.mubr.msk.f32.gmra.mrb[16].mxu1 %vm13077_vm3, %v26963_v62  ;;  %v22418_v62 = vunpack.i.h.bf16 %v27449_v30 }
 0x8f3   : > { %21270 = vmatprep.mubr.msk.f32.mxu1 %vm22512_vm2, %v28776_v36  ;;  %v27537_v16 = vpop.f32.mrb[152].mxu0  ;;  %21868 = vmatprep.subr.bf16.mxu0 %v28864_v46 }
 0x8f4   : > { %v27540_v13 = vpop.permute.xlu0 %16966  ;;  %21379 = vmatmul.mubr.msk.f32.gmra.mrb[250].mxu0 %vm13077_vm3, %v27314_v52  ;;  %v21021_v8 = vpop.f32.mrb[153].mxu0  ;;  %v27545_v0 = vadd.f32 %v27354_v45, %v15176_v35  ;;  %18061 = vrot.lane.b32.xlu1 %v27265_v27, %s22516_s14  ;;  %v21860_v35 = vpack.c.bf16 %v22418_v62, %v22417_v10 }
 0x8f5   : > { %v15127_v21 = vpop.f32.mrb[168].mxu1  ;;  %21381 = vmatprep.mubr.msk.f32.mxu0 %vm22512_vm2, %v28776_v36  ;;  %v28895_v8 = vld [vmem:[#allocation15_spill] sm:$0xff] }
 0x8f6   : > { %v15177_v18 = vadd.f32 %v15127_v21, %v27187_v9  ;;  %17619 = vrot.lane.b32.xlu0 %v27292_v23, %s22515_s26  ;;  %v20954_v52 = vpop.f32.mrb[169].mxu1  ;;  %21271 = vmatmul.mubr.msk.f32.gmra.mrb[18].mxu1 %vm13077_vm3, %v26985_v38 }
 0x8f7   : > { %21326 = vmatprep.mubr.msk.f32.mxu1 %vm22512_vm2, %v28776_v36  ;;  %v27562_v27 = vpop.f32.mrb[154].mxu0 }
 0x8f8   : > { %v27564_v45 = vpop.permute.xlu0 %16968  ;;  %21382 = vmatmul.mubr.msk.f32.gmra.mrb[252].mxu0 %vm13077_vm3, %v27382_v61  ;;  %v21024_v30 = vpop.f32.mrb[155].mxu0  ;;  %v27569_v9 = vadd.f32 %v27379_v26, %v15177_v18  ;;  %18065 = vrot.lane.b32.xlu1 %v27319_v19, %s22516_s14  ;;  %v27602_v18 = vld [vmem:[%s28697_s5 + $0x110] sm:$0xff] }
 0x8f9   : > { %v15132_v34 = vpop.f32.mrb[170].mxu1  ;;  %21384 = vmatprep.mubr.msk.f32.mxu0 %vm22512_vm2, %v28776_v36  ;;  %v27584_v61 = vpop.permute.xlu1 %17400 }
 0x8fa   : > { %v15178_v38 = vadd.f32 %v15132_v34, %v27213_v40  ;;  %17621 = vrot.lane.b32.xlu0 %v27319_v19, %s22515_s26  ;;  %v20957_v50 = vpop.f32.mrb[171].mxu1  ;;  %21327 = vmatmul.mubr.msk.f32.vlgmr.msra.gmra.mrb[20].mxu1 %vm13077_vm3, %v28895_v8 }
 0x8fb   : > { %21861 = vmatpush3.bf16.msra.mxu1 %v21860_v35  ;;  %21329 = vmatprep.mubr.msk.f32.mxu1 %vm22512_vm2, %v28776_v36  ;;  %v27582_v26 = vpop.f32.mrb[156].mxu0  ;;  %v28897_v50 = vld [vmem:[#allocation19_spill] sm:$0xff] }
 0x8fc   : > { %v27586_v62 = vpop.permute.xlu0 %16970  ;;  %21385 = vmatmul.mubr.msk.f32.gmra.mrb[254].mxu0 %vm13077_vm3, %v27410_v51  ;;  %v21027_v40 = vpop.f32.mrb[157].mxu0  ;;  %v27591_v19 = vadd.f32 %v27408_v60, %v15178_v38  ;;  %21865 = vmatprep.subr.bf16.mxu1 %v28864_v46  ;;  %v28896_v51 = vld [vmem:[#allocation16_spill] sm:$0xff] }
 0x8fd   : > { %v15137_v10 = vpop.f32.mrb[172].mxu1  ;;  %21387 = vmatprep.mubr.msk.f32.mxu0 %vm22512_vm2, %v28776_v36  ;;  %18069 = vrot.lane.b32.xlu1 %v27359_v31, %s22516_s14  ;;  %v27619_v35 = vpop.permute.xlu1 %17402 }
 0x8fe   : > { %v15179_v21 = vadd.f32 %v15137_v10, %v27231_v1  ;;  %17623 = vrot.lane.b32.xlu0 %v27602_v18, %s22515_s26  ;;  %v20960_v60 = vpop.f32.mrb[173].mxu1  ;;  %21330 = vmatmul.mubr.msk.f32.gmra.mrb[22].mxu1 %vm13077_vm3, %v28896_v51 }
 0x8ff   : > { %21332 = vmatprep.mubr.msk.f32.mxu1 %vm22512_vm2, %v28776_v36 }
 0x900   : > { %v27610_v52 = vpop.permute.xlu0 %16972  ;;  %21388 = vmatmul.mubr.msk.f32.gmra.mrb[0].mxu0 %vm13077_vm3, %v27435_v53  ;;  %v27615_v1 = vadd.f32 %v27433_v33, %v15179_v21 }
 0x901   : > { %v15142_v30 = vpop.f32.mrb[174].mxu1  ;;  %21390 = vmatprep.mubr.msk.f32.mxu0 %vm22512_vm2, %v28776_v36  ;;  %18073 = vrot.lane.b32.xlu1 %v27415_v47, %s22516_s14 }
 0x902   : > { %v15180_v34 = vadd.f32 %v15142_v30, %v27258_v11  ;;  %17625 = vrot.lane.b32.xlu0 %v27359_v31, %s22515_s26  ;;  %v20963_v38 = vpop.f32.mrb[175].mxu1  ;;  %21333 = vmatmul.mubr.msk.f32.gmra.mrb[24].mxu1 %vm13077_vm3, %v28897_v50 }
 0x903   : > { %21335 = vmatprep.mubr.msk.f32.mxu1 %vm22512_vm2, %v28776_v36 }
 0x904   : > { %v27630_v33 = vpop.permute.xlu0 %16974  ;;  %21391 = vmatmul.mubr.msk.f32.gmra.mrb[2].mxu0 %vm13077_vm3, %v27462_v55  ;;  %v27635_v53 = vadd.f32 %v27460_v43, %v15180_v34  ;;  %v27648_v43 = vpop.permute.xlu1 %17404 }
 0x905   : > { %v15147_v8 = vpop.f32.mrb[176].mxu1  ;;  %21393 = vmatprep.mubr.msk.f32.mxu0 %vm22512_vm2, %v28776_v36  ;;  %18077 = vrot.lane.b32.xlu1 %v27467_v54, %s22516_s14 }
 0x906   : > { %v15181_v11 = vadd.f32 %v15147_v8, %v27285_v57  ;;  %17627 = vrot.lane.b32.xlu0 %v27387_v48, %s22515_s26  ;;  %v20966_v31 = vpop.f32.mrb[177].mxu1  ;;  %21336 = vmatmul.mubr.msk.f32.gmra.mrb[26].mxu1 %vm13077_vm3, %v27071_v17 }
 0x907   : > { %21338 = vmatprep.mubr.msk.f32.mxu1 %vm22512_vm2, %v28776_v36 }
 0x908   : > { %v27650_v55 = vpop.permute.xlu0 %16976  ;;  %21394 = vmatmul.mubr.msk.f32.gmra.mrb[4].mxu0 %vm13077_vm3, %v27489_v2  ;;  %v27655_v40 = vadd.f32 %v27487_v56, %v15181_v11 }
 0x909   : > { %v15152_v57 = vpop.f32.mrb[178].mxu1  ;;  %21396 = vmatprep.mubr.msk.f32.mxu0 %vm22512_vm2, %v28776_v36 }
 0x90a   : > { %v15182_v10 = vadd.f32 %v15152_v57, %v27312_v63  ;;  %17629 = vrot.lane.b32.xlu0 %v27415_v47, %s22515_s26  ;;  %v20969_v17 = vpop.f32.mrb[179].mxu1  ;;  %21339 = vmatmul.mubr.msk.f32.gmra.mrb[28].mxu1 %vm13077_vm3, %v27091_v7  ;;  %v27675_v63 = vpop.permute.xlu1 %17406 }
 0x90b   : > { %21341 = vmatprep.mubr.msk.f32.mxu1 %vm22512_vm2, %v28776_v36 }
 0x90c   : > { %v27666_v2 = vpop.permute.xlu0 %16757  ;;  %21397 = vmatmul.mubr.msk.f32.gmra.mrb[6].mxu0 %vm13077_vm3, %v27516_v12  ;;  %v27671_v56 = vadd.f32 %v27512_v49, %v15182_v10  ;;  %v28900_v10 = vld [vmem:[#allocation18_spill] sm:$0xff] }
 0x90d   : > { %v15157_v21 = vpop.f32.mrb[180].mxu1  ;;  %21399 = vmatprep.mubr.msk.f32.mxu0 %vm22512_vm2, %v28776_v36 }
 0x90e   : > { %v15183_v47 = vadd.f32 %v15157_v21, %v27341_v32  ;;  %17631 = vrot.lane.b32.xlu0 %v27440_v25, %s22515_s26  ;;  %v20972_v7 = vpop.f32.mrb[181].mxu1  ;;  %21342 = vmatmul.mubr.msk.f32.gmra.mrb[30].mxu1 %vm13077_vm3, %v27112_v15  ;;  %v27700_v34 = vpop.permute.xlu1 %17408 }
 0x90f   : > { %21344 = vmatprep.mubr.msk.f32.mxu1 %vm22512_vm2, %v28776_v36  ;;  %v15756_v49 = vpop.f32.mrb[158].mxu0  ;;  %v28901_v7 = vld [vmem:[#allocation12_spill] sm:$0xff] }
 0x910   : > { %v27684_v12 = vpop.permute.xlu0 %17171  ;;  %21400 = vmatmul.mubr.msk.f32.gmra.mrb[8].mxu0 %vm13077_vm3, %v27540_v13  ;;  %v21083_v60 = vpop.f32.mrb[159].mxu0  ;;  %v27689_v51 = vadd.f32 %v27537_v16, %v15183_v47 }
 0x911   : > { %v15162_v32 = vpop.f32.mrb[182].mxu1  ;;  %21402 = vmatprep.mubr.msk.f32.mxu0 %vm22512_vm2, %v28776_v36 }
 0x912   : > { %v15184_v30 = vadd.f32 %v15162_v32, %v27364_v39  ;;  %17633 = vrot.lane.b32.xlu0 %v27467_v54, %s22515_s26  ;;  %v20975_v15 = vpop.f32.mrb[183].mxu1  ;;  %21345 = vmatmul.mubr.msk.f32.gmra.mrb[32].mxu1 %vm13077_vm3, %v27140_v37  ;;  %s28898_s26 = smov 122   ;;  %v27727_v31 = vpop.permute.xlu1 %17410 }
 0x913   : > { %21347 = vmatprep.mubr.msk.f32.mxu1 %vm22512_vm2, %v28776_v36  ;;  %v15761_v13 = vpop.f32.mrb[160].mxu0 }
 0x914   : > { %v27702_v16 = vpop.permute.xlu0 %17173  ;;  %21403 = vmatmul.mubr.msk.f32.gmra.mrb[10].mxu0 %vm13077_vm3, %v27564_v45  ;;  %v21086_v38 = vpop.f32.mrb[161].mxu0  ;;  %v27707_v39 = vadd.f32 %v27562_v27, %v15184_v30 }
 0x915   : > { %v15167_v54 = vpop.f32.mrb[184].mxu1  ;;  %21405 = vmatprep.mubr.msk.f32.mxu0 %vm22512_vm2, %v28776_v36  ;;  %v28902_v38 = vld [vmem:[#allocation20_spill] sm:$0xff] }
 0x916   : > { %v15185_v37 = vadd.f32 %v15167_v54, %v27392_v14  ;;  %22430 = vrot.lane.b32.xlu0 %v28889_v42, %s28898_s26  ;;  %v20978_v50 = vpop.f32.mrb[185].mxu1  ;;  %21348 = vmatmul.mubr.msk.f32.gmra.mrb[34].mxu1 %vm13077_vm3, %v27167_v24  ;;  %v27751_v60 = vpop.permute.xlu1 %17412 }
 0x917   : > { %21350 = vmatprep.mubr.msk.f32.mxu1 %vm22512_vm2, %v28776_v36  ;;  %v15766_v45 = vpop.f32.mrb[162].mxu0 }
 0x918   : > { %v27718_v8 = vpop.permute.xlu0 %17175  ;;  %21406 = vmatmul.mubr.msk.f32.gmra.mrb[12].mxu0 %vm13077_vm3, %v27586_v62  ;;  %v21089_v27 = vpop.f32.mrb[163].mxu0  ;;  %v27723_v11 = vadd.f32 %v27582_v26, %v15185_v37 }
 0x919   : > { %v15535_v14 = vpop.f32.mrb[186].mxu1  ;;  %21408 = vmatprep.mubr.msk.f32.mxu0 %vm22512_vm2, %v28776_v36 }
 0x91a   : > { %v15609_v24 = vadd.f32 %v15535_v14, %v27420_v59  ;;  %22435 = vrot.lane.b32.xlu0 %v28889_v42, %s28899_s30  ;;  %v21034_v57 = vpop.f32.mrb[187].mxu1  ;;  %21351 = vmatmul.mubr.msk.f32.gmra.mrb[36].mxu1 %vm13077_vm3, %v28900_v10  ;;  %v27776_v50 = vpop.permute.xlu1 %17414  ;;  %v28903_v14 = vld [vmem:[#allocation21_spill] sm:$0xff] }
 0x91b   : > { %21353 = vmatprep.mubr.msk.f32.mxu1 %vm22512_vm2, %v28776_v36  ;;  %v15771_v26 = vpop.f32.mrb[164].mxu0 }
 0x91c   : > { %v27736_v62 = vpop.permute.xlu0 %17177  ;;  %21409 = vmatmul.mubr.msk.f32.gmra.mrb[14].mxu0 %vm13077_vm3, %v27610_v52  ;;  %v21092_v17 = vpop.f32.mrb[165].mxu0  ;;  %v27740_v21 = vadd.f32 %v15756_v49, %v15609_v24 }
 0x91d   : > { %v15540_v59 = vpop.f32.mrb[188].mxu1  ;;  %21411 = vmatprep.mubr.msk.f32.mxu0 %vm22512_vm2, %v28776_v36 }
 0x91e   : > { %v15610_v42 = vadd.f32 %v15540_v59, %v27445_v22  ;;  %v21037_v47 = vpop.f32.mrb[189].mxu1  ;;  %21354 = vmatmul.mubr.msk.f32.gmra.mrb[38].mxu1 %vm13077_vm3, %v28901_v7  ;;  %18051 = vrot.lane.b32.xlu0 %v27128_v41, %s22516_s14  ;;  %v27800_v59 = vpop.permute.xlu1 %17416 }
 0x91f   : > { %21356 = vmatprep.mubr.msk.f32.mxu1 %vm22512_vm2, %v28776_v36  ;;  %v15776_v52 = vpop.f32.mrb[166].mxu0 }
 0x920   : > { %v27753_v49 = vpop.permute.xlu0 %17179  ;;  %21412 = vmatmul.mubr.msk.f32.gmra.mrb[16].mxu0 %vm13077_vm3, %v27630_v33  ;;  %v21095_v32 = vpop.f32.mrb[167].mxu0  ;;  %v27757_v22 = vadd.f32 %v15761_v13, %v15610_v42 }
 0x921   : > { %v15545_v30 = vpop.f32.mrb[190].mxu1  ;;  %21414 = vmatprep.mubr.msk.f32.mxu0 %vm22512_vm2, %v28776_v36  ;;  %v28905_v32 = vld [vmem:[#allocation23_spill] sm:$0xff] }
 0x922   : > { %v15611_v41 = vadd.f32 %v15545_v30, %v27472_v20  ;;  %v21040_v15 = vpop.f32.mrb[191].mxu1  ;;  %21357 = vmatmul.mubr.msk.f32.gmra.mrb[40].mxu1 %vm13077_vm3, %v28902_v38  ;;  %18055 = vrot.lane.b32.xlu0 %v27182_v28, %s22516_s14 }
 0x923   : > { %21359 = vmatprep.mubr.msk.f32.mxu1 %vm22512_vm2, %v28776_v36  ;;  %v15781_v33 = vpop.f32.mrb[168].mxu0  ;;  %v27825_v15 = vpop.permute.xlu1 %17418 }
 0x924   : > { %v27768_v54 = vpop.permute.xlu0 %17181  ;;  %21415 = vmatmul.mubr.msk.f32.gmra.mrb[18].mxu0 %vm13077_vm3, %v27650_v55  ;;  %v21098_v13 = vpop.f32.mrb[169].mxu0  ;;  %v27772_v37 = vadd.f32 %v15766_v45, %v15611_v41 }
 0x925   : > { %v15550_v20 = vpop.f32.mrb[192].mxu1  ;;  %21417 = vmatprep.mubr.msk.f32.mxu0 %vm22512_vm2, %v28776_v36 }
 0x926   : > { %v15612_v28 = vadd.f32 %v15550_v20, %v27499_v29  ;;  %v21043_v27 = vpop.f32.mrb[193].mxu1  ;;  %21360 = vmatmul.mubr.msk.f32.gmra.mrb[42].mxu1 %vm13077_vm3, %v28903_v14  ;;  %18059 = vrot.lane.b32.xlu0 %v27238_v58, %s22516_s14  ;;  %v28904_v58 = vld [vmem:[#allocation24_spill] sm:$0xff]  ;;  %v28906_v20 = vld [vmem:[#allocation25_spill] sm:$0xff] }
 0x927   : > { %21362 = vmatprep.mubr.msk.f32.mxu1 %vm22512_vm2, %v28776_v36  ;;  %v15786_v55 = vpop.f32.mrb[170].mxu0  ;;  %v27849_v14 = vpop.permute.xlu1 %17199 }
 0x928   : > { %v27785_v45 = vpop.permute.xlu0 %17183  ;;  %21418 = vmatmul.mubr.msk.f32.gmra.mrb[20].mxu0 %vm13077_vm3, %v27368_v6  ;;  %v21101_v24 = vpop.f32.mrb[171].mxu0  ;;  %v27789_v57 = vadd.f32 %v15771_v26, %v15612_v28 }
 0x929   : > { %v15555_v29 = vpop.f32.mrb[194].mxu1  ;;  %21473 = vmatprep.mubr.msk.f32.mxu0 %vm22512_vm2, %v28776_v36 }
 0x92a   : > { %v15613_v10 = vadd.f32 %v15555_v29, %v27521_v4  ;;  %v21046_v17 = vpop.f32.mrb[195].mxu1  ;;  %21363 = vmatmul.mubr.msk.f32.gmra.mrb[44].mxu1 %vm13077_vm3, %v28904_v58  ;;  %18063 = vrot.lane.b32.xlu0 %v27292_v23, %s22516_s14 }
 0x92b   : > { %21365 = vmatprep.mubr.msk.f32.mxu1 %vm22512_vm2, %v28776_v36  ;;  %v15791_v6 = vpop.f32.mrb[172].mxu0 }
 0x92c   : > { %v27802_v26 = vpop.permute.xlu0 %17185  ;;  %21474 = vmatmul.mubr.msk.f32.vlgmr.msra.gmra.mrb[22].mxu0 %vm13077_vm3, %v27403_v3  ;;  %v21104_v42 = vpop.f32.mrb[173].mxu0  ;;  %v27806_v4 = vadd.f32 %v15776_v52, %v15613_v10  ;;  %v28907_v10 = vld [vmem:[#allocation17_spill] sm:$0xff] }
 0x92d   : > { %v15560_v47 = vpop.f32.mrb[196].mxu1  ;;  %21476 = vmatprep.mubr.msk.f32.mxu0 %vm22512_vm2, %v28776_v36 }
 0x92e   : > { %v15614_v23 = vadd.f32 %v15560_v47, %v27545_v0  ;;  %v21049_v7 = vpop.f32.mrb[197].mxu1  ;;  %21366 = vmatmul.mubr.msk.f32.gmra.mrb[46].mxu1 %vm13077_vm3, %v28905_v32  ;;  %18067 = vrot.lane.b32.xlu0 %v27602_v18, %s22516_s14 }
 0x92f   : > { %21368 = vmatprep.mubr.msk.f32.mxu1 %vm22512_vm2, %v28776_v36  ;;  %v15796_v3 = vpop.f32.mrb[174].mxu0 }
 0x930   : > { %v27817_v30 = vpop.permute.xlu0 %17187  ;;  %v21107_v52 = vpop.f32.mrb[175].mxu0  ;;  %21477 = vmatmul.mubr.msk.f32.gmra.mrb[24].mxu0 %vm13077_vm3, %v27478_v44  ;;  %v27821_v41 = vadd.f32 %v15781_v33, %v15614_v23 }
 0x931   : > { %v15565_v0 = vpop.f32.mrb[198].mxu1  ;;  %21479 = vmatprep.mubr.msk.f32.mxu0 %vm22512_vm2, %v28776_v36 }
 0x932   : > { %v15615_v18 = vadd.f32 %v15565_v0, %v27569_v9  ;;  %v21052_v38 = vpop.f32.mrb[199].mxu1  ;;  %21369 = vmatmul.mubr.msk.f32.gmra.mrb[48].mxu1 %vm13077_vm3, %v27666_v2  ;;  %18071 = vrot.lane.b32.xlu0 %v27387_v48, %s22516_s14 }
 0x933   : > { %21424 = vmatprep.mubr.msk.f32.mxu1 %vm22512_vm2, %v28776_v36  ;;  %v15801_v44 = vpop.f32.mrb[176].mxu0 }
 0x934   : > { %v27834_v33 = vpop.permute.xlu0 %17189  ;;  %v21110_v13 = vpop.f32.mrb[177].mxu0  ;;  %21480 = vmatmul.mubr.msk.f32.gmra.mrb[26].mxu0 %vm13077_vm3, %v28906_v20  ;;  %v27838_v28 = vadd.f32 %v15786_v55, %v15615_v18 }
 0x935   : > { %v15570_v9 = vpop.f32.mrb[200].mxu1  ;;  %21482 = vmatprep.mubr.msk.f32.mxu0 %vm22512_vm2, %v28776_v36 }
 0x936   : > { %v15616_v2 = vadd.f32 %v15570_v9, %v27591_v19  ;;  %v21055_v27 = vpop.f32.mrb[201].mxu1  ;;  %21425 = vmatmul.mubr.msk.f32.vlgmr.msra.gmra.mrb[50].mxu1 %vm13077_vm3, %v27684_v12  ;;  %18075 = vrot.lane.b32.xlu0 %v27440_v25, %s22516_s14 }
 0x937   : > { %21427 = vmatprep.mubr.msk.f32.mxu1 %vm22512_vm2, %v28776_v36  ;;  %v15806_v48 = vpop.f32.mrb[178].mxu0 }
 0x938   : > { %v27851_v55 = vpop.permute.xlu0 %17191  ;;  %v21113_v24 = vpop.f32.mrb[179].mxu0  ;;  %21483 = vmatmul.mubr.msk.f32.gmra.mrb[28].mxu0 %vm13077_vm3, %v27553_v5  ;;  %v27855_v19 = vadd.f32 %v15791_v6, %v15616_v2 }
 0x939   : > { %v15575_v29 = vpop.f32.mrb[202].mxu1  ;;  %21485 = vmatprep.mubr.msk.f32.mxu0 %vm22512_vm2, %v28776_v36 }
 0x93a   : > { %v15617_v25 = vadd.f32 %v15575_v29, %v27615_v1  ;;  %v21058_v12 = vpop.f32.mrb[203].mxu1  ;;  %21428 = vmatmul.mubr.msk.f32.gmra.mrb[52].mxu1 %vm13077_vm3, %v27702_v16  ;;  %18079 = vrot.lane.b32.xlu0 %v28907_v10, %s22516_s14  ;;  %v27874_v16 = vpop.permute.xlu1 %17420 }
 0x93b   : > { %21430 = vmatprep.mubr.msk.f32.mxu1 %vm22512_vm2, %v28776_v36  ;;  %v15811_v17 = vpop.f32.mrb[180].mxu0 }
 0x93c   : > { %v27866_v5 = vpop.permute.xlu0 %17193  ;;  %v21116_v58 = vpop.f32.mrb[181].mxu0  ;;  %21486 = vmatmul.mubr.msk.f32.gmra.mrb[30].mxu0 %vm13077_vm3, %v27584_v61  ;;  %v27870_v6 = vadd.f32 %v15796_v3, %v15617_v25 }
 0x93d   : > { %v15580_v1 = vpop.f32.mrb[204].mxu1  ;;  %21488 = vmatprep.mubr.msk.f32.mxu0 %vm22512_vm2, %v28776_v36 }
 0x93e   : > { %v15618_v42 = vadd.f32 %v15580_v1, %v27635_v53  ;;  %v21061_v47 = vpop.f32.mrb[205].mxu1  ;;  %21431 = vmatmul.mubr.msk.f32.gmra.mrb[54].mxu1 %vm13077_vm3, %v27718_v8  ;;  %v27894_v0 = vpop.permute.xlu1 %17830 }
 0x93f   : > { %21433 = vmatprep.mubr.msk.f32.mxu1 %vm22512_vm2, %v28776_v36  ;;  %v15816_v23 = vpop.f32.mrb[182].mxu0 }
 0x940   : > { %v27881_v7 = vpop.permute.xlu0 %17195  ;;  %v21119_v61 = vpop.f32.mrb[183].mxu0  ;;  %21489 = vmatmul.mubr.msk.f32.gmra.mrb[32].mxu0 %vm13077_vm3, %v27619_v35  ;;  %v27885_v32 = vadd.f32 %v15801_v44, %v15618_v42 }
 0x941   : > { %v15585_v3 = vpop.f32.mrb[206].mxu1  ;;  %21491 = vmatprep.mubr.msk.f32.mxu0 %vm22512_vm2, %v28776_v36 }
 0x942   : > { %v15619_v53 = vadd.f32 %v15585_v3, %v27655_v40  ;;  %v21064_v52 = vpop.f32.mrb[207].mxu1  ;;  %21434 = vmatmul.mubr.msk.f32.gmra.mrb[56].mxu1 %vm13077_vm3, %v27736_v62 }
 0x943   : > { %21436 = vmatprep.mubr.msk.f32.mxu1 %vm22512_vm2, %v28776_v36  ;;  %v15821_v8 = vpop.f32.mrb[184].mxu0 }
 0x944   : > { %v27896_v18 = vpop.permute.xlu0 %17197  ;;  %v21122_v35 = vpop.f32.mrb[185].mxu0  ;;  %21492 = vmatmul.mubr.msk.f32.gmra.mrb[34].mxu0 %vm13077_vm3, %v27648_v43  ;;  %v27900_v38 = vadd.f32 %v15806_v48, %v15619_v53 }
 0x945   : > { %v15590_v44 = vpop.f32.mrb[208].mxu1  ;;  %21494 = vmatprep.mubr.msk.f32.mxu0 %vm22512_vm2, %v28776_v36 }
 0x946   : > { %v15620_v40 = vadd.f32 %v15590_v44, %v27671_v56  ;;  %v21067_v62 = vpop.f32.mrb[209].mxu1  ;;  %21437 = vmatmul.mubr.msk.f32.gmra.mrb[58].mxu1 %vm13077_vm3, %v27753_v49  ;;  %v27915_v56 = vpop.permute.xlu1 %17832 }
 0x947   : > { %21439 = vmatprep.mubr.msk.f32.mxu1 %vm22512_vm2, %v28776_v36  ;;  %v15826_v13 = vpop.f32.mrb[186].mxu0 }
 0x948   : > { %v22421_v20 = vpop.permute.xlu0 %22420  ;;  %v21125_v9 = vpop.f32.mrb[187].mxu0  ;;  %21495 = vmatmul.mubr.msk.f32.gmra.mrb[36].mxu0 %vm13077_vm3, %v27675_v63  ;;  %v27911_v43 = vadd.f32 %v15811_v17, %v15620_v40 }
 0x949   : > { %v22423_v2 = vunpack.i.h.bf16 %v22421_v20  ;;  %v22422_v27 = vunpack.i.l.bf16 %v22421_v20  ;;  %v15595_v48 = vpop.f32.mrb[210].mxu1  ;;  %21497 = vmatprep.mubr.msk.f32.mxu0 %vm22512_vm2, %v28776_v36 }
 0x94a   : > { %v15621_v49 = vadd.f32 %v15595_v48, %v27689_v51  ;;  %v21070_v24 = vpop.f32.mrb[211].mxu1  ;;  %21440 = vmatmul.mubr.msk.f32.gmra.mrb[60].mxu1 %vm13077_vm3, %v27768_v54  ;;  %v27934_v47 = vpop.permute.xlu1 %17834 }
 0x94b   : > { %v21866_v29 = vpack.c.bf16 %v22423_v2, %v22422_v27  ;;  %21442 = vmatprep.mubr.msk.f32.mxu1 %vm22512_vm2, %v28776_v36  ;;  %v16198_v63 = vpop.f32.mrb[188].mxu0 }
 0x94c   : > { %v22426_v25 = vpop.permute.xlu0 %22425  ;;  %v21181_v12 = vpop.f32.mrb[189].mxu0  ;;  %21498 = vmatmul.mubr.msk.f32.gmra.mrb[38].mxu0 %vm13077_vm3, %v27700_v34  ;;  %v27924_v10 = vadd.f32 %v15816_v23, %v15621_v49 }
 0x94d   : > { %v22428_v17 = vunpack.i.h.bf16 %v22426_v25  ;;  %v22427_v58 = vunpack.i.l.bf16 %v22426_v25  ;;  %v15600_v1 = vpop.f32.mrb[212].mxu1  ;;  %21867 = vmatpush3.bf16.msra.mxu1 %v21866_v29  ;;  %21500 = vmatprep.mubr.msk.f32.mxu0 %vm22512_vm2, %v28776_v36 }
 0x94e   : > { %v15622_v51 = vadd.f32 %v15600_v1, %v27707_v39  ;;  %v21073_v54 = vpop.f32.mrb[213].mxu1  ;;  %21443 = vmatmul.mubr.msk.f32.gmra.mrb[62].mxu1 %vm13077_vm3, %v27785_v45  ;;  %21871 = vmatprep.subr.bf16.mxu1 %v28864_v46 }
 0x94f   : > { %v21869_v42 = vpack.c.bf16 %v22428_v17, %v22427_v58  ;;  %21445 = vmatprep.mubr.msk.f32.mxu1 %vm22512_vm2, %v28776_v36  ;;  %v16203_v34 = vpop.f32.mrb[190].mxu0 }
 0x950   : > { %v27936_v23 = vpop.permute.xlu0 %17607  ;;  %v21184_v61 = vpop.f32.mrb[191].mxu0  ;;  %21501 = vmatmul.mubr.msk.f32.gmra.mrb[40].mxu0 %vm13077_vm3, %v27727_v31  ;;  %v27940_v39 = vadd.f32 %v15821_v8, %v15622_v51 }
 0x951   : > { %v15605_v3 = vpop.f32.mrb[214].mxu1  ;;  %21870 = vmatpush3.bf16.msra.mxu0 %v21869_v42  ;;  %21503 = vmatprep.mubr.msk.f32.mxu0 %vm22512_vm2, %v28776_v36 }
 0x952   : > { %v15623_v45 = vadd.f32 %v15605_v3, %v27723_v11  ;;  %v21076_v53 = vpop.f32.mrb[215].mxu1  ;;  %21446 = vmatmul.mubr.msk.f32.gmra.mrb[64].mxu1 %vm13077_vm3, %v27802_v26  ;;  %21874 = vmatprep.subr.bf16.mxu0 %v28864_v46  ;;  %v27958_v11 = vpop.permute.xlu1 %17836 }
 0x953   : > { %21448 = vmatprep.mubr.msk.f32.mxu1 %vm22512_vm2, %v28776_v36  ;;  %v16208_v52 = vpop.f32.mrb[192].mxu0 }
 0x954   : > { %v27950_v31 = vadd.f32 %v15826_v13, %v15623_v45  ;;  %v27952_v8 = vpop.permute.xlu0 %17609  ;;  %v21187_v35 = vpop.f32.mrb[193].mxu0  ;;  %21504 = vmatmul.mubr.msk.f32.gmra.mrb[42].mxu0 %vm13077_vm3, %v27751_v60 }
 0x955   : > { %v15977_v44 = vpop.f32.mrb[216].mxu1  ;;  %21506 = vmatprep.mubr.msk.f32.mxu0 %vm22512_vm2, %v28776_v36 }
 0x956   : > { %v16051_v26 = vadd.f32 %v15977_v44, %v27740_v21  ;;  %v21132_v40 = vpop.f32.mrb[217].mxu1  ;;  %21449 = vmatmul.mubr.msk.f32.gmra.mrb[66].mxu1 %vm13077_vm3, %v27817_v30  ;;  %v27978_v27 = vpop.permute.xlu1 %17838 }
 0x957   : > { %21451 = vmatprep.mubr.msk.f32.mxu1 %vm22512_vm2, %v28776_v36  ;;  %v16213_v62 = vpop.f32.mrb[194].mxu0 }
 0x958   : > { %v27965_v13 = vadd.f32 %v16198_v63, %v16051_v26  ;;  %v27967_v20 = vpop.permute.xlu0 %17611  ;;  %v21190_v60 = vpop.f32.mrb[195].mxu0  ;;  %21507 = vmatmul.mubr.msk.f32.gmra.mrb[44].mxu0 %vm13077_vm3, %v27776_v50 }
 0x959   : > { %v15982_v9 = vpop.f32.mrb[218].mxu1  ;;  %21509 = vmatprep.mubr.msk.f32.mxu0 %vm22512_vm2, %v28776_v36 }
 0x95a   : > { %v16052_v21 = vadd.f32 %v15982_v9, %v27757_v22  ;;  %v21135_v2 = vpop.f32.mrb[219].mxu1  ;;  %21452 = vmatmul.mubr.msk.f32.gmra.mrb[68].mxu1 %vm13077_vm3, %v27834_v33 }
 0x95b   : > { %21454 = vmatprep.mubr.msk.f32.mxu1 %vm22512_vm2, %v28776_v36  ;;  %v16218_v30 = vpop.f32.mrb[196].mxu0 }
 0x95c   : > { %v27980_v48 = vadd.f32 %v16203_v34, %v16052_v21  ;;  %v27982_v49 = vpop.permute.xlu0 %17613  ;;  %v21193_v50 = vpop.f32.mrb[197].mxu0  ;;  %21510 = vmatmul.mubr.msk.f32.gmra.mrb[46].mxu0 %vm13077_vm3, %v27800_v59 }
 0x95d   : > { %v15987_v24 = vpop.f32.mrb[220].mxu1  ;;  %21512 = vmatprep.mubr.msk.f32.mxu0 %vm22512_vm2, %v28776_v36 }
 0x95e   : > { %v16053_v22 = vadd.f32 %v15987_v24, %v27772_v37  ;;  %v21138_v33 = vpop.f32.mrb[221].mxu1  ;;  %21455 = vmatmul.mubr.msk.f32.gmra.mrb[70].mxu1 %vm13077_vm3, %v27851_v55  ;;  %v28001_v37 = vpop.permute.xlu1 %17840 }
 0x95f   : > { %21457 = vmatprep.mubr.msk.f32.mxu1 %vm22512_vm2, %v28776_v36  ;;  %v16223_v29 = vpop.f32.mrb[198].mxu0 }
 0x960   : > { %v27993_v63 = vadd.f32 %v16208_v52, %v16053_v22  ;;  %v27995_v25 = vpop.permute.xlu0 %17615  ;;  %v21196_v12 = vpop.f32.mrb[199].mxu0  ;;  %21513 = vmatmul.mubr.msk.f32.gmra.mrb[48].mxu0 %vm13077_vm3, %v27825_v15 }
 0x961   : > { %v15992_v59 = vpop.f32.mrb[222].mxu1  ;;  %21515 = vmatprep.mubr.msk.f32.mxu0 %vm22512_vm2, %v28776_v36 }
 0x962   : > { %v16054_v55 = vadd.f32 %v15992_v59, %v27789_v57  ;;  %v21141_v17 = vpop.f32.mrb[223].mxu1  ;;  %21458 = vmatmul.mubr.msk.f32.gmra.mrb[72].mxu1 %vm13077_vm3, %v27866_v5  ;;  %v28021_v34 = vpop.permute.xlu1 %17842 }
 0x963   : > { %21460 = vmatprep.mubr.msk.f32.mxu1 %vm22512_vm2, %v28776_v36  ;;  %v16228_v58 = vpop.f32.mrb[200].mxu0 }
 0x964   : > { %v28008_v1 = vadd.f32 %v16213_v62, %v16054_v55  ;;  %v28010_v51 = vpop.permute.xlu0 %17617  ;;  %v21199_v15 = vpop.f32.mrb[201].mxu0  ;;  %21516 = vmatmul.mubr.msk.f32.gmra.mrb[50].mxu0 %vm13077_vm3, %v27874_v16 }
 0x965   : > { %v15997_v54 = vpop.f32.mrb[224].mxu1  ;;  %21571 = vmatprep.mubr.msk.f32.mxu0 %vm22512_vm2, %v28776_v36 }
 0x966   : > { %v16055_v57 = vadd.f32 %v15997_v54, %v27806_v4  ;;  %v21144_v42 = vpop.f32.mrb[225].mxu1  ;;  %21461 = vmatmul.mubr.msk.f32.gmra.mrb[74].mxu1 %vm13077_vm3, %v27881_v7 }
 0x967   : > { %21463 = vmatprep.mubr.msk.f32.mxu1 %vm22512_vm2, %v28776_v36  ;;  %v16233_v5 = vpop.f32.mrb[202].mxu0 }
 0x968   : > { %v28023_v61 = vadd.f32 %v16218_v30, %v16055_v57  ;;  %v28025_v3 = vpop.permute.xlu0 %17619  ;;  %v21202_v16 = vpop.f32.mrb[203].mxu0  ;;  %21572 = vmatmul.mubr.msk.f32.vlgmr.msra.gmra.mrb[52].mxu0 %vm13077_vm3, %v27894_v0 }
 0x969   : > { %v16002_v45 = vpop.f32.mrb[226].mxu1  ;;  %21574 = vmatprep.mubr.msk.f32.mxu0 %vm22512_vm2, %v28776_v36 }
 0x96a   : > { %v16056_v4 = vadd.f32 %v16002_v45, %v27821_v41  ;;  %v21147_v7 = vpop.f32.mrb[227].mxu1  ;;  %21464 = vmatmul.mubr.msk.f32.gmra.mrb[76].mxu1 %vm13077_vm3, %v27896_v18  ;;  %v28044_v41 = vpop.permute.xlu1 %17844 }
 0x96b   : > { %21466 = vmatprep.mubr.msk.f32.mxu1 %vm22512_vm2, %v28776_v36  ;;  %v16238_v53 = vpop.f32.mrb[204].mxu0 }
 0x96c   : > { %v28036_v52 = vadd.f32 %v16223_v29, %v16056_v4  ;;  %v28038_v35 = vpop.permute.xlu0 %17621  ;;  %v21205_v44 = vpop.f32.mrb[205].mxu0  ;;  %21575 = vmatmul.mubr.msk.f32.gmra.mrb[54].mxu0 %vm13077_vm3, %v27915_v56 }
 0x96d   : > { %v16007_v0 = vpop.f32.mrb[228].mxu1  ;;  %21577 = vmatprep.mubr.msk.f32.mxu0 %vm22512_vm2, %v28776_v36 }
 0x96e   : > { %v16057_v18 = vadd.f32 %v16007_v0, %v27838_v28  ;;  %v21150_v26 = vpop.f32.mrb[229].mxu1  ;;  %21467 = vmatmul.mubr.msk.f32.gmra.mrb[78].mxu1 %vm13077_vm3, %v27849_v14  ;;  %v17847_v2 = vpop.permute.xlu1 %17846 }
 0x96f   : > { %21522 = vmatprep.mubr.msk.f32.mxu1 %vm22512_vm2, %v28776_v36  ;;  %v16243_v40 = vpop.f32.mrb[206].mxu0 }
 0x970   : > { %v28051_v62 = vadd.f32 %v16228_v58, %v16057_v18  ;;  %v28053_v60 = vpop.permute.xlu0 %17623  ;;  %v21208_v56 = vpop.f32.mrb[207].mxu0  ;;  %21578 = vmatmul.mubr.msk.f32.gmra.mrb[56].mxu0 %vm13077_vm3, %v27934_v47 }
 0x971   : > { %v16012_v9 = vpop.f32.mrb[230].mxu1  ;;  %21580 = vmatprep.mubr.msk.f32.mxu0 %vm22512_vm2, %v28776_v36 }
 0x972   : > { %v16058_v28 = vadd.f32 %v16012_v9, %v27855_v19  ;;  %v21153_v21 = vpop.f32.mrb[231].mxu1  ;;  %21523 = vmatmul.mubr.msk.f32.vlgmr.msra.gmra.mrb[80].mxu1 %vm13077_vm3, %v27936_v23 }
 0x973   : > { %21525 = vmatprep.mubr.msk.f32.mxu1 %vm22512_vm2, %v28776_v36  ;;  %v16248_v14 = vpop.f32.mrb[208].mxu0 }
 0x974   : > { %v28064_v30 = vadd.f32 %v16233_v5, %v16058_v28  ;;  %v28066_v50 = vpop.permute.xlu0 %17625  ;;  %v21211_v47 = vpop.f32.mrb[209].mxu0  ;;  %21581 = vmatmul.mubr.msk.f32.gmra.mrb[58].mxu0 %vm13077_vm3, %v27958_v11 }
 0x975   : > { %v16017_v24 = vpop.f32.mrb[232].mxu1  ;;  %21583 = vmatprep.mubr.msk.f32.mxu0 %vm22512_vm2, %v28776_v36 }
 0x976   : > { %v16059_v19 = vadd.f32 %v16017_v24, %v27870_v6  ;;  %v21156_v23 = vpop.f32.mrb[233].mxu1  ;;  %21526 = vmatmul.mubr.msk.f32.gmra.mrb[82].mxu1 %vm13077_vm3, %v27952_v8  ;;  %v17849_v6 = vpop.permute.xlu1 %17848 }
 0x977   : > { %21528 = vmatprep.mubr.msk.f32.mxu1 %vm22512_vm2, %v28776_v36  ;;  %v16253_v22 = vpop.f32.mrb[210].mxu0 }
 0x978   : > { %v28077_v33 = vadd.f32 %v16238_v53, %v16059_v19  ;;  %v28079_v29 = vpop.permute.xlu0 %17627  ;;  %v21214_v12 = vpop.f32.mrb[211].mxu0  ;;  %21584 = vmatmul.mubr.msk.f32.gmra.mrb[60].mxu0 %vm13077_vm3, %v27978_v27 }
 0x979   : > { %v16022_v11 = vpop.f32.mrb[234].mxu1  ;;  %21586 = vmatprep.mubr.msk.f32.mxu0 %vm22512_vm2, %v28776_v36 }
 0x97a   : > { %v16060_v59 = vadd.f32 %v16022_v11, %v27885_v32  ;;  %v21159_v8 = vpop.f32.mrb[235].mxu1  ;;  %21529 = vmatmul.mubr.msk.f32.gmra.mrb[84].mxu1 %vm13077_vm3, %v27967_v20  ;;  %v17851_v57 = vpop.permute.xlu1 %17850 }
 0x97b   : > { %21531 = vmatprep.mubr.msk.f32.mxu1 %vm22512_vm2, %v28776_v36  ;;  %v16258_v55 = vpop.f32.mrb[212].mxu0 }
 0x97c   : > { %v28090_v17 = vadd.f32 %v16243_v40, %v16060_v59  ;;  %v28092_v58 = vpop.permute.xlu0 %17629  ;;  %v21217_v27 = vpop.f32.mrb[213].mxu0  ;;  %21587 = vmatmul.mubr.msk.f32.gmra.mrb[62].mxu0 %vm13077_vm3, %v28001_v37 }
 0x97d   : > { %v16027_v15 = vpop.f32.mrb[236].mxu1  ;;  %21589 = vmatprep.mubr.msk.f32.mxu0 %vm22512_vm2, %v28776_v36 }
 0x97e   : > { %v16061_v32 = vadd.f32 %v16027_v15, %v27900_v38  ;;  %v21162_v54 = vpop.f32.mrb[237].mxu1  ;;  %21532 = vmatmul.mubr.msk.f32.gmra.mrb[86].mxu1 %vm13077_vm3, %v27982_v49 }
 0x97f   : > { %21534 = vmatprep.mubr.msk.f32.mxu1 %vm22512_vm2, %v28776_v36  ;;  %v16263_v20 = vpop.f32.mrb[214].mxu0 }
 0x980   : > { %v28103_v42 = vadd.f32 %v16248_v14, %v16061_v32  ;;  %v28105_v5 = vpop.permute.xlu0 %17631  ;;  %v21220_v37 = vpop.f32.mrb[215].mxu0  ;;  %21590 = vmatmul.mubr.msk.f32.gmra.mrb[64].mxu0 %vm13077_vm3, %v28021_v34 }
 0x981   : > { %v16032_v16 = vpop.f32.mrb[238].mxu1  ;;  %21592 = vmatprep.mubr.msk.f32.mxu0 %vm22512_vm2, %v28776_v36 }
 0x982   : > { %v16062_v38 = vadd.f32 %v16032_v16, %v27911_v43  ;;  %v21165_v49 = vpop.f32.mrb[239].mxu1  ;;  %21535 = vmatmul.mubr.msk.f32.gmra.mrb[88].mxu1 %vm13077_vm3, %v27995_v25  ;;  %v17853_v43 = vpop.permute.xlu1 %17852 }
 0x983   : > { %21537 = vmatprep.mubr.msk.f32.mxu1 %vm22512_vm2, %v28776_v36  ;;  %v16268_v45 = vpop.f32.mrb[216].mxu0 }
 0x984   : > { %v28116_v4 = vadd.f32 %v16253_v22, %v16062_v38  ;;  %v28118_v7 = vpop.permute.xlu0 %17633  ;;  %21593 = vmatmul.mubr.msk.f32.gmra.mrb[66].mxu0 %vm13077_vm3, %v28044_v41  ;;  %v21223_v34 = vpop.f32.mrb[217].mxu0 }
 0x985   : > { %v16037_v53 = vpop.f32.mrb[240].mxu1  ;;  %21595 = vmatprep.mubr.msk.f32.mxu0 %vm22512_vm2, %v28776_v36 }
 0x986   : > { %v16063_v44 = vadd.f32 %v16037_v53, %v27924_v10  ;;  %v21168_v25 = vpop.f32.mrb[241].mxu1  ;;  %21538 = vmatmul.mubr.msk.f32.gmra.mrb[90].mxu1 %vm13077_vm3, %v28010_v51  ;;  %v17855_v14 = vpop.permute.xlu1 %17854 }
 0x987   : > { %21540 = vmatprep.mubr.msk.f32.mxu1 %vm22512_vm2, %v28776_v36  ;;  %v16640_v0 = vpop.f32.mrb[218].mxu0 }
 0x988   : > { %v28129_v18 = vadd.f32 %v16258_v55, %v16063_v44  ;;  %v22431_v26 = vpop.permute.xlu0 %22430  ;;  %21596 = vmatmul.mubr.msk.f32.gmra.mrb[68].mxu0 %vm13077_vm3, %v17847_v2  ;;  %v21279_v41 = vpop.f32.mrb[219].mxu0 }
 0x989   : > { %v22433_v40 = vunpack.i.h.bf16 %v22431_v26  ;;  %v22432_v56 = vunpack.i.l.bf16 %v22431_v26  ;;  %v16042_v9 = vpop.f32.mrb[242].mxu1  ;;  %21598 = vmatprep.mubr.msk.f32.mxu0 %vm22512_vm2, %v28776_v36 }
 0x98a   : > { %v16064_v10 = vadd.f32 %v16042_v9, %v27940_v39  ;;  %v21171_v28 = vpop.f32.mrb[243].mxu1  ;;  %21541 = vmatmul.mubr.msk.f32.gmra.mrb[92].mxu1 %vm13077_vm3, %v28025_v3 }
 0x98b   : > { %v21872_v51 = vpack.c.bf16 %v22433_v40, %v22432_v56  ;;  %21543 = vmatprep.mubr.msk.f32.mxu1 %vm22512_vm2, %v28776_v36  ;;  %v16645_v21 = vpop.f32.mrb[220].mxu0 }
 0x98c   : > { %v28139_v2 = vadd.f32 %v16263_v20, %v16064_v10  ;;  %v22436_v47 = vpop.permute.xlu0 %22435  ;;  %21599 = vmatmul.mubr.msk.f32.gmra.mrb[70].mxu0 %vm13077_vm3, %v17849_v6  ;;  %v21282_v24 = vpop.f32.mrb[221].mxu0 }
 0x98d   : > { %v22438_v19 = vunpack.i.h.bf16 %v22436_v47  ;;  %v22437_v23 = vunpack.i.l.bf16 %v22436_v47  ;;  %v16047_v22 = vpop.f32.mrb[244].mxu1  ;;  %21873 = vmatpush3.bf16.msra.mxu1 %v21872_v51  ;;  %21601 = vmatprep.mubr.msk.f32.mxu0 %vm22512_vm2, %v28776_v36 }
 0x98e   : > { %v16065_v39 = vadd.f32 %v16047_v22, %v27950_v31  ;;  %v21174_v3 = vpop.f32.mrb[245].mxu1  ;;  %21544 = vmatmul.mubr.msk.f32.gmra.mrb[94].mxu1 %vm13077_vm3, %v28038_v35  ;;  %21877 = vmatprep.subr.bf16.mxu1 %v28864_v46  ;;  %v17857_v31 = vpop.permute.xlu1 %17856 }
 0x98f   : > { %v21875_v12 = vpack.c.bf16 %v22438_v19, %v22437_v23  ;;  %21546 = vmatprep.mubr.msk.f32.mxu1 %vm22512_vm2, %v28776_v36  ;;  %v16650_v11 = vpop.f32.mrb[222].mxu0 }
 0x990   : > { %v28150_v6 = vadd.f32 %v16268_v45, %v16065_v39  ;;  %21602 = vmatmul.mubr.msk.f32.gmra.mrb[72].mxu0 %vm13077_vm3, %v17851_v57  ;;  %v21285_v59 = vpop.f32.mrb[223].mxu0  ;;  %v18052_v19 = vpop.permute.xlu0 %18051 }
 0x991   : > { %v16419_v8 = vpop.f32.mrb[246].mxu1  ;;  %21876 = vmatpush3.bf16.msra.mxu0 %v21875_v12  ;;  %21604 = vmatprep.mubr.msk.f32.mxu0 %vm22512_vm2, %v28776_v36 }
 0x992   : > { %v16493_v35 = vadd.f32 %v16419_v8, %v27965_v13  ;;  %21547 = vmatmul.mubr.msk.f32.gmra.mrb[96].mxu1 %vm13077_vm3, %v28053_v60  ;;  %v21230_v55 = vpop.f32.mrb[247].mxu1  ;;  %v17636_v57 = vpop.permute.xlu1 %17635 }
 0x993   : > { %21549 = vmatprep.mubr.msk.f32.mxu1 %vm22512_vm2, %v28776_v36  ;;  %v16655_v27 = vpop.f32.mrb[224].mxu0 }
 0x994   : > { %v28160_v15 = vadd.f32 %v16640_v0, %v16493_v35  ;;  %21605 = vmatmul.mubr.msk.f32.gmra.mrb[74].mxu0 %vm13077_vm3, %v17853_v43  ;;  %v21288_v32 = vpop.f32.mrb[225].mxu0 }
 0x995   : > { %v16424_v54 = vpop.f32.mrb[248].mxu1  ;;  %21607 = vmatprep.mubr.msk.f32.mxu0 %vm22512_vm2, %v28776_v36 }
 0x996   : > { %v16494_v20 = vadd.f32 %v16424_v54, %v27980_v48  ;;  %v21233_v13 = vpop.f32.mrb[249].mxu1  ;;  %21550 = vmatmul.mubr.msk.f32.gmra.mrb[98].mxu1 %vm13077_vm3, %v28066_v50  ;;  %v17859_v43 = vpop.permute.xlu1 %17858 }
 0x997   : > { %21552 = vmatprep.mubr.msk.f32.mxu1 %vm22512_vm2, %v28776_v36  ;;  %v16660_v60 = vpop.f32.mrb[226].mxu0  ;;  %v18056_v54 = vpop.permute.xlu0 %18055 }
 0x998   : > { %v28170_v37 = vadd.f32 %v16645_v21, %v16494_v20  ;;  %21608 = vmatmul.mubr.msk.f32.gmra.mrb[76].mxu0 %vm13077_vm3, %v17855_v14  ;;  %v21291_v16 = vpop.f32.mrb[227].mxu0 }
 0x999   : > { %v16429_v38 = vpop.f32.mrb[250].mxu1  ;;  %21610 = vmatprep.mubr.msk.f32.mxu0 %vm22512_vm2, %v28776_v36 }
 0x99a   : > { %v16495_v48 = vadd.f32 %v16429_v38, %v27993_v63  ;;  %v21236_v49 = vpop.f32.mrb[251].mxu1  ;;  %21553 = vmatmul.mubr.msk.f32.gmra.mrb[100].mxu1 %vm13077_vm3, %v28079_v29  ;;  %v18054_v59 = vpop.permute.xlu1 %18053 }
 0x99b   : > { %21555 = vmatprep.mubr.msk.f32.mxu1 %vm22512_vm2, %v28776_v36  ;;  %v16665_v50 = vpop.f32.mrb[228].mxu0 }
 0x99c   : > { %v28180_v45 = vadd.f32 %v16650_v11, %v16495_v48  ;;  %21611 = vmatmul.mubr.msk.f32.gmra.mrb[78].mxu0 %vm13077_vm3, %v17857_v31  ;;  %v21294_v34 = vpop.f32.mrb[229].mxu0 }
 0x99d   : > { %v16434_v53 = vpop.f32.mrb[252].mxu1  ;;  %21613 = vmatprep.mubr.msk.f32.mxu0 %vm22512_vm2, %v28776_v36 }
 0x99e   : > { %v16496_v63 = vadd.f32 %v16434_v53, %v28008_v1  ;;  %v21239_v44 = vpop.f32.mrb[253].mxu1  ;;  %21556 = vmatmul.mubr.msk.f32.gmra.mrb[102].mxu1 %vm13077_vm3, %v28092_v58  ;;  %v18272_v1 = vld [vmem:[%s28697_s5 + $0x18] sm:$0xff]  ;;  %v18058_v48 = vpop.permute.xlu1 %18057 }
 0x99f   : > { %21558 = vmatprep.mubr.msk.f32.mxu1 %vm22512_vm2, %v28776_v36  ;;  %v16670_v29 = vpop.f32.mrb[230].mxu0  ;;  %v18060_v44 = vpop.permute.xlu0 %18059 }
 0x9a0   : > { %v28190_v25 = vadd.f32 %v16655_v27, %v16496_v63  ;;  %21614 = vmatmul.mubr.msk.f32.gmra.mrb[80].mxu0 %vm13077_vm3, %v17859_v43  ;;  %v21297_v0 = vpop.f32.mrb[231].mxu0 }
 0x9a1   : > { %v16439_v26 = vpop.f32.mrb[254].mxu1  ;;  %21669 = vmatprep.mubr.msk.f32.mxu0 %vm22512_vm2, %v28776_v36 }
 0x9a2   : > { %v16497_v41 = vadd.f32 %v16439_v26, %v28023_v61  ;;  %v21242_v58 = vpop.f32.mrb[255].mxu1  ;;  %21559 = vmatmul.mubr.msk.f32.gmra.mrb[104].mxu1 %vm13077_vm3, %v28105_v5  ;;  %v18273_v61 = vld [vmem:[%s28697_s5 + $0x38] sm:$0xff] }
 0x9a3   : > { %21561 = vmatprep.mubr.msk.f32.mxu1 %vm22512_vm2, %v28776_v36  ;;  %v16675_v40 = vpop.f32.mrb[232].mxu0 }
 0x9a4   : > { %v28203_v56 = vadd.f32 %v16660_v60, %v16497_v41  ;;  %21670 = vmatmul.mubr.msk.f32.vlgmr.msra.gmra.mrb[82].mxu0 %vm13077_vm3, %v18272_v1  ;;  %v21300_v9 = vpop.f32.mrb[233].mxu0 }
 0x9a5   : > { %v16444_v10 = vpop.f32.mrb[0].mxu1  ;;  %21672 = vmatprep.mubr.msk.f32.mxu0 %vm22512_vm2, %v28776_v36 }
 0x9a6   : > { %v16498_v28 = vadd.f32 %v16444_v10, %v28036_v52  ;;  %v21245_v5 = vpop.f32.mrb[1].mxu1  ;;  %21562 = vmatmul.mubr.msk.f32.gmra.mrb[106].mxu1 %vm13077_vm3, %v28118_v7  ;;  %v18274_v52 = vld [vmem:[%s28697_s5 + $0x58] sm:$0xff] }
 0x9a7   : > { %21564 = vmatprep.mubr.msk.f32.mxu1 %vm22512_vm2, %v28776_v36  ;;  %v16680_v51 = vpop.f32.mrb[234].mxu0 }
 0x9a8   : > { %v28216_v21 = vadd.f32 %v16665_v50, %v16498_v28  ;;  %21673 = vmatmul.mubr.msk.f32.gmra.mrb[84].mxu0 %vm13077_vm3, %v18273_v61  ;;  %v21303_v14 = vpop.f32.mrb[235].mxu0 }
 0x9a9   : > { %v16449_v47 = vpop.f32.mrb[2].mxu1  ;;  %21675 = vmatprep.mubr.msk.f32.mxu0 %vm22512_vm2, %v28776_v36 }
 0x9aa   : > { %v16499_v24 = vadd.f32 %v16449_v47, %v28051_v62  ;;  %v21248_v7 = vpop.f32.mrb[3].mxu1  ;;  %21565 = vmatmul.mubr.msk.f32.gmra.mrb[108].mxu1 %vm13077_vm3, %v17636_v57  ;;  %v18275_v62 = vld [vmem:[%s28697_s5 + $0x78] sm:$0xff]  ;;  %v18064_v47 = vpop.permute.xlu0 %18063 }
 0x9ab   : > { %21620 = vmatprep.mubr.msk.f32.mxu1 %vm22512_vm2, %v28776_v36  ;;  %v16685_v23 = vpop.f32.mrb[236].mxu0 }
 0x9ac   : > { %v28228_v22 = vadd.f32 %v16670_v29, %v16499_v24  ;;  %v21306_v39 = vpop.f32.mrb[237].mxu0  ;;  %21676 = vmatmul.mubr.msk.f32.gmra.mrb[86].mxu0 %vm13077_vm3, %v18274_v52 }
 0x9ad   : > { %v16454_v3 = vpop.f32.mrb[4].mxu1  ;;  %21678 = vmatprep.mubr.msk.f32.mxu0 %vm22512_vm2, %v28776_v36 }
 0x9ae   : > { %v16500_v12 = vadd.f32 %v16454_v3, %v28064_v30  ;;  %v21251_v11 = vpop.f32.mrb[5].mxu1  ;;  %21621 = vmatmul.mubr.msk.f32.vlgmr.msra.gmra.mrb[110].mxu1 %vm13077_vm3, %v18052_v19  ;;  %v18276_v30 = vld [vmem:[%s28697_s5 + $0x98] sm:$0xff] }
 0x9af   : > { %21623 = vmatprep.mubr.msk.f32.mxu1 %vm22512_vm2, %v28776_v36  ;;  %v16690_v8 = vpop.f32.mrb[238].mxu0 }
 0x9b0   : > { %v28240_v31 = vadd.f32 %v16675_v40, %v16500_v12  ;;  %v21309_v35 = vpop.f32.mrb[239].mxu0  ;;  %21679 = vmatmul.mubr.msk.f32.gmra.mrb[88].mxu0 %vm13077_vm3, %v18275_v62  ;;  %v18062_v40 = vpop.permute.xlu1 %18061 }
 0x9b1   : > { %v16459_v55 = vpop.f32.mrb[6].mxu1  ;;  %21681 = vmatprep.mubr.msk.f32.mxu0 %vm22512_vm2, %v28776_v36 }
 0x9b2   : > { %v16501_v27 = vadd.f32 %v16459_v55, %v28077_v33  ;;  %v21254_v32 = vpop.f32.mrb[7].mxu1  ;;  %21624 = vmatmul.mubr.msk.f32.gmra.mrb[112].mxu1 %vm13077_vm3, %v18054_v59  ;;  %v18277_v33 = vld [vmem:[%s28697_s5 + $0xb8] sm:$0xff]  ;;  %v18068_v55 = vpop.permute.xlu0 %18067 }
 0x9b3   : > { %21626 = vmatprep.mubr.msk.f32.mxu1 %vm22512_vm2, %v28776_v36  ;;  %v16695_v20 = vpop.f32.mrb[240].mxu0 }
 0x9b4   : > { %v28252_v13 = vadd.f32 %v16680_v51, %v16501_v27  ;;  %v21312_v60 = vpop.f32.mrb[241].mxu0  ;;  %21682 = vmatmul.mubr.msk.f32.gmra.mrb[90].mxu0 %vm13077_vm3, %v18276_v30  ;;  %v18066_v3 = vpop.permute.xlu1 %18065 }
 0x9b5   : > { %v16464_v57 = vpop.f32.mrb[8].mxu1  ;;  %21684 = vmatprep.mubr.msk.f32.mxu0 %vm22512_vm2, %v28776_v36 }
 0x9b6   : > { %v16502_v16 = vadd.f32 %v16464_v57, %v28090_v17  ;;  %v21257_v38 = vpop.f32.mrb[9].mxu1  ;;  %21627 = vmatmul.mubr.msk.f32.gmra.mrb[114].mxu1 %vm13077_vm3, %v18056_v54  ;;  %v18278_v17 = vld [vmem:[%s28697_s5 + $0xd8] sm:$0xff] }
 0x9b7   : > { %21629 = vmatprep.mubr.msk.f32.mxu1 %vm22512_vm2, %v28776_v36  ;;  %v16700_v49 = vpop.f32.mrb[242].mxu0 }
 0x9b8   : > { %v28264_v50 = vadd.f32 %v16685_v23, %v16502_v16  ;;  %v21315_v34 = vpop.f32.mrb[243].mxu0  ;;  %21685 = vmatmul.mubr.msk.f32.gmra.mrb[92].mxu0 %vm13077_vm3, %v18277_v33  ;;  %v18070_v57 = vpop.permute.xlu1 %18069 }
 0x9b9   : > { %v16469_v53 = vpop.f32.mrb[10].mxu1  ;;  %21687 = vmatprep.mubr.msk.f32.mxu0 %vm22512_vm2, %v28776_v36 }
 0x9ba   : > { %v16503_v43 = vadd.f32 %v16469_v53, %v28103_v42  ;;  %v21260_v63 = vpop.f32.mrb[11].mxu1  ;;  %21630 = vmatmul.mubr.msk.f32.gmra.mrb[116].mxu1 %vm13077_vm3, %v18058_v48  ;;  %v18279_v42 = vld [vmem:[%s28697_s5 + $0xf8] sm:$0xff]  ;;  %v18072_v53 = vpop.permute.xlu0 %18071 }
 0x9bb   : > { %21632 = vmatprep.mubr.msk.f32.mxu1 %vm22512_vm2, %v28776_v36  ;;  %v16705_v29 = vpop.f32.mrb[244].mxu0 }
 0x9bc   : > { %v28276_v0 = vadd.f32 %v16690_v8, %v16503_v43  ;;  %v21318_v26 = vpop.f32.mrb[245].mxu0  ;;  %21688 = vmatmul.mubr.msk.f32.gmra.mrb[94].mxu0 %vm13077_vm3, %v18278_v17 }
 0x9bd   : > { %v16474_v1 = vpop.f32.mrb[12].mxu1  ;;  %21690 = vmatprep.mubr.msk.f32.mxu0 %vm22512_vm2, %v28776_v36 }
 0x9be   : > { %v16504_v41 = vadd.f32 %v16474_v1, %v28116_v4  ;;  %v21263_v58 = vpop.f32.mrb[13].mxu1  ;;  %21633 = vmatmul.mubr.msk.f32.gmra.mrb[118].mxu1 %vm13077_vm3, %v18060_v44  ;;  %v18280_v4 = vld [vmem:[%s28697_s5 + $0x118] sm:$0xff]  ;;  %v18074_v1 = vpop.permute.xlu1 %18073 }
 0x9bf   : > { %v16710_v9 = vpop.f32.mrb[246].mxu0  ;;  %21635 = vmatprep.mubr.msk.f32.mxu1 %vm22512_vm2, %v28776_v36 }
 0x9c0   : > { %v21321_v10 = vpop.f32.mrb[247].mxu0  ;;  %21691 = vmatmul.mubr.msk.f32.gmra.mrb[96].mxu0 %vm13077_vm3, %v18279_v42  ;;  %v28289_v61 = vadd.f32 %v16695_v20, %v16504_v41 }
 0x9c1   : > { %v16479_v28 = vpop.f32.mrb[14].mxu1  ;;  %21693 = vmatprep.mubr.msk.f32.mxu0 %vm22512_vm2, %v28776_v36 }
 0x9c2   : > { %v16505_v5 = vadd.f32 %v16479_v28, %v28129_v18  ;;  %v21266_v51 = vpop.f32.mrb[15].mxu1  ;;  %21636 = vmatmul.mubr.msk.f32.gmra.mrb[120].mxu1 %vm13077_vm3, %v18062_v40  ;;  %v18281_v18 = vld [vmem:[%s28697_s5 + $0x138] sm:$0xff]  ;;  %v18076_v28 = vpop.permute.xlu0 %18075 }
 0x9c3   : > { %v17082_v14 = vpop.f32.mrb[248].mxu0  ;;  %21638 = vmatprep.mubr.msk.f32.mxu1 %vm22512_vm2, %v28776_v36 }
 0x9c4   : > { %v21377_v52 = vpop.f32.mrb[249].mxu0  ;;  %21694 = vmatmul.mubr.msk.f32.gmra.mrb[98].mxu0 %vm13077_vm3, %v18280_v4  ;;  %v28301_v24 = vadd.f32 %v16700_v49, %v16505_v5 }
 0x9c5   : > { %v16484_v7 = vpop.f32.mrb[16].mxu1  ;;  %21696 = vmatprep.mubr.msk.f32.mxu0 %vm22512_vm2, %v28776_v36  ;;  %v18078_v52 = vpop.permute.xlu1 %18077 }
 0x9c6   : > { %v16506_v19 = vadd.f32 %v16484_v7, %v28139_v2  ;;  %v21269_v23 = vpop.f32.mrb[17].mxu1  ;;  %21639 = vmatmul.mubr.msk.f32.gmra.mrb[122].mxu1 %vm13077_vm3, %v18064_v47  ;;  %v18282_v2 = vld [vmem:[%s28697_s5 + $0x158] sm:$0xff] }
 0x9c7   : > { %v17087_v39 = vpop.f32.mrb[250].mxu0  ;;  %21641 = vmatprep.mubr.msk.f32.mxu1 %vm22512_vm2, %v28776_v36 }
 0x9c8   : > { %v21380_v62 = vpop.f32.mrb[251].mxu0  ;;  %21697 = vmatmul.mubr.msk.f32.gmra.mrb[100].mxu0 %vm13077_vm3, %v18281_v18  ;;  %v28313_v12 = vadd.f32 %v16705_v29, %v16506_v19 }
 0x9c9   : > { %v16489_v11 = vpop.f32.mrb[18].mxu1  ;;  %21699 = vmatprep.mubr.msk.f32.mxu0 %vm22512_vm2, %v28776_v36  ;;  %v18080_v62 = vpop.permute.xlu0 %18079 }
 0x9ca   : > { %v16507_v59 = vadd.f32 %v16489_v11, %v28150_v6  ;;  %v21272_v8 = vpop.f32.mrb[19].mxu1  ;;  %21642 = vmatmul.mubr.msk.f32.gmra.mrb[124].mxu1 %vm13077_vm3, %v18066_v3  ;;  %v18283_v6 = vld [vmem:[%s28697_s5 + $0x178] sm:$0xff] }
 0x9cb   : > { %v17092_v35 = vpop.f32.mrb[252].mxu0  ;;  %21644 = vmatprep.mubr.msk.f32.mxu1 %vm22512_vm2, %v28776_v36 }
 0x9cc   : > { %v21383_v30 = vpop.f32.mrb[253].mxu0  ;;  %21700 = vmatmul.mubr.msk.f32.gmra.mrb[102].mxu0 %vm13077_vm3, %v18282_v2  ;;  %v28325_v27 = vadd.f32 %v16710_v9, %v16507_v59 }
 0x9cd   : > { %v16861_v32 = vpop.f32.mrb[20].mxu1  ;;  %21702 = vmatprep.mubr.msk.f32.mxu0 %vm22512_vm2, %v28776_v36 }
 0x9ce   : > { %v16935_v54 = vadd.f32 %v16861_v32, %v28160_v15  ;;  %v21328_v20 = vpop.f32.mrb[21].mxu1  ;;  %21645 = vmatmul.mubr.msk.f32.gmra.mrb[126].mxu1 %vm13077_vm3, %v18068_v55  ;;  %v18284_v15 = vld [vmem:[%s28697_s5 + $0x198] sm:$0xff] }
 0x9cf   : > { %v17097_v60 = vpop.f32.mrb[254].mxu0  ;;  %21647 = vmatprep.mubr.msk.f32.mxu1 %vm22512_vm2, %v28776_v36 }
 0x9d0   : > { %v21386_v33 = vpop.f32.mrb[255].mxu0  ;;  %21703 = vmatmul.mubr.msk.f32.gmra.mrb[104].mxu0 %vm13077_vm3, %v18283_v6  ;;  %v28337_v16 = vadd.f32 %v17082_v14, %v16935_v54 }
 0x9d1   : > { %v16866_v38 = vpop.f32.mrb[22].mxu1  ;;  %21705 = vmatprep.mubr.msk.f32.mxu0 %vm22512_vm2, %v28776_v36 }
 0x9d2   : > { %v16936_v48 = vadd.f32 %v16866_v38, %v28170_v37  ;;  %v21331_v49 = vpop.f32.mrb[23].mxu1  ;;  %21648 = vmatmul.mubr.msk.f32.gmra.mrb[128].mxu1 %vm13077_vm3, %v18070_v57  ;;  %v18285_v37 = vld [vmem:[%s28697_s5 + $0x1b8] sm:$0xff] }
 0x9d3   : > { %v17102_v34 = vpop.f32.mrb[0].mxu0  ;;  %21650 = vmatprep.mubr.msk.f32.mxu1 %vm22512_vm2, %v28776_v36 }
 0x9d4   : > { %v21389_v17 = vpop.f32.mrb[1].mxu0  ;;  %21706 = vmatmul.mubr.msk.f32.gmra.mrb[106].mxu0 %vm13077_vm3, %v18284_v15  ;;  %v28349_v43 = vadd.f32 %v17087_v39, %v16936_v48 }
 0x9d5   : > { %v16871_v63 = vpop.f32.mrb[24].mxu1  ;;  %21708 = vmatprep.mubr.msk.f32.mxu0 %vm22512_vm2, %v28776_v36 }
 0x9d6   : > { %v16937_v44 = vadd.f32 %v16871_v63, %v28180_v45  ;;  %v21334_v29 = vpop.f32.mrb[25].mxu1  ;;  %21651 = vmatmul.mubr.msk.f32.gmra.mrb[130].mxu1 %vm13077_vm3, %v18072_v53  ;;  %v18286_v45 = vld [vmem:[%s28697_s5 + $0x1d8] sm:$0xff] }
 0x9d7   : > { %v17107_v26 = vpop.f32.mrb[2].mxu0  ;;  %21653 = vmatprep.mubr.msk.f32.mxu1 %vm22512_vm2, %v28776_v36 }
 0x9d8   : > { %v21392_v42 = vpop.f32.mrb[3].mxu0  ;;  %21709 = vmatmul.mubr.msk.f32.gmra.mrb[108].mxu0 %vm13077_vm3, %v18285_v37  ;;  %v28361_v41 = vadd.f32 %v17092_v35, %v16937_v44 }
 0x9d9   : > { %v16876_v58 = vpop.f32.mrb[26].mxu1  ;;  %21711 = vmatprep.mubr.msk.f32.mxu0 %vm22512_vm2, %v28776_v36 }
 0x9da   : > { %v16938_v40 = vadd.f32 %v16876_v58, %v28190_v25  ;;  %v21337_v9 = vpop.f32.mrb[27].mxu1  ;;  %21654 = vmatmul.mubr.msk.f32.gmra.mrb[132].mxu1 %vm13077_vm3, %v18074_v1 }
 0x9db   : > { %v17112_v10 = vpop.f32.mrb[4].mxu0  ;;  %21656 = vmatprep.mubr.msk.f32.mxu1 %vm22512_vm2, %v28776_v36 }
 0x9dc   : > { %v21395_v4 = vpop.f32.mrb[5].mxu0  ;;  %21712 = vmatmul.mubr.msk.f32.gmra.mrb[110].mxu0 %vm13077_vm3, %v18286_v45  ;;  %v28373_v5 = vadd.f32 %v17097_v60, %v16938_v40 }
 0x9dd   : > { %v16881_v51 = vpop.f32.mrb[28].mxu1 }
 0x9de   : > { %v16939_v14 = vadd.f32 %v16881_v51, %v28203_v56  ;;  %v21340_v47 = vpop.f32.mrb[29].mxu1  ;;  %21657 = vmatmul.mubr.msk.f32.gmra.mrb[134].mxu1 %vm13077_vm3, %v18076_v28 }
 0x9df   : > { %v17117_v25 = vpop.f32.mrb[6].mxu0  ;;  %21659 = vmatprep.mubr.msk.f32.mxu1 %vm22512_vm2, %v28776_v36 }
 0x9e0   : > { %v21398_v7 = vpop.f32.mrb[7].mxu0  ;;  %v28379_v18 = vadd.f32 %v17102_v34, %v16939_v14 }
 0x9e1   : > { %v16886_v19 = vpop.f32.mrb[30].mxu1 }
 0x9e2   : > { %v16940_v23 = vadd.f32 %v16886_v19, %v28216_v21  ;;  %v21343_v39 = vpop.f32.mrb[31].mxu1  ;;  %21660 = vmatmul.mubr.msk.f32.gmra.mrb[136].mxu1 %vm13077_vm3, %v18078_v52 }
 0x9e3   : > { %v17122_v3 = vpop.f32.mrb[8].mxu0  ;;  %21662 = vmatprep.mubr.msk.f32.mxu1 %vm22512_vm2, %v28776_v36 }
 0x9e4   : > { %v21401_v56 = vpop.f32.mrb[9].mxu0  ;;  %v28385_v11 = vadd.f32 %v17107_v26, %v16940_v23 }
 0x9e5   : > { %v16891_v2 = vpop.f32.mrb[32].mxu1 }
 0x9e6   : > { %v16941_v59 = vadd.f32 %v16891_v2, %v28228_v22  ;;  %v21346_v8 = vpop.f32.mrb[33].mxu1  ;;  %21663 = vmatmul.mubr.msk.f32.gmra.mrb[138].mxu1 %vm13077_vm3, %v18080_v62 }
 0x9e7   : > { %v17127_v35 = vpop.f32.mrb[10].mxu0  ;;  %21744 = vmatprep.mubr.msk.f32.mxu1 %vm22512_vm2, %v28776_v36 }
 0x9e8   : > { %v21404_v21 = vpop.f32.mrb[11].mxu0  ;;  %v28391_v55 = vadd.f32 %v17112_v10, %v16941_v59 }
 0x9e9   : > { %v16896_v30 = vpop.f32.mrb[34].mxu1 }
 0x9ea   : > { %v16942_v32 = vadd.f32 %v16896_v30, %v28240_v31  ;;  %v21349_v6 = vpop.f32.mrb[35].mxu1 }
 0x9eb   : > { %v17132_v54 = vpop.f32.mrb[12].mxu0 }
 0x9ec   : > { %v21407_v20 = vpop.f32.mrb[13].mxu0  ;;  %v28394_v60 = vadd.f32 %v17117_v25, %v16942_v32 }
 0x9ed   : > { %v16901_v57 = vpop.f32.mrb[36].mxu1 }
 0x9ee   : > { %v16943_v22 = vadd.f32 %v16901_v57, %v28252_v13  ;;  %v21352_v33 = vpop.f32.mrb[37].mxu1 }
 0x9ef   : > { %v17137_v38 = vpop.f32.mrb[14].mxu0 }
 0x9f0   : > { %v21410_v15 = vpop.f32.mrb[15].mxu0  ;;  %v28397_v48 = vadd.f32 %v17122_v3, %v16943_v22 }
 0x9f1   : > { %v16906_v49 = vpop.f32.mrb[38].mxu1 }
 0x9f2   : > { %v16944_v34 = vadd.f32 %v16906_v49, %v28264_v50  ;;  %v21355_v53 = vpop.f32.mrb[39].mxu1 }
 0x9f3   : > { %v17142_v17 = vpop.f32.mrb[16].mxu0 }
 0x9f4   : > { %v21413_v63 = vpop.f32.mrb[17].mxu0  ;;  %v28400_v31 = vadd.f32 %v17127_v35, %v16944_v34 }
 0x9f5   : > { %v16911_v37 = vpop.f32.mrb[40].mxu1 }
 0x9f6   : > { %v16945_v44 = vadd.f32 %v16911_v37, %v28276_v0  ;;  %v21358_v29 = vpop.f32.mrb[41].mxu1 }
 0x9f7   : > { %v17147_v26 = vpop.f32.mrb[18].mxu0 }
 0x9f8   : > { %v21416_v1 = vpop.f32.mrb[19].mxu0  ;;  %v28403_v13 = vadd.f32 %v17132_v54, %v16945_v44 }
 0x9f9   : > { %v16916_v42 = vpop.f32.mrb[42].mxu1 }
 0x9fa   : > { %v16946_v58 = vadd.f32 %v16916_v42, %v28289_v61  ;;  %v21361_v45 = vpop.f32.mrb[43].mxu1 }
 0x9fb   : > { %v17152_v40 = vpop.f32.mrb[20].mxu0 }
 0x9fc   : > { %v21419_v9 = vpop.f32.mrb[21].mxu0  ;;  %v28406_v50 = vadd.f32 %v17137_v38, %v16946_v58 }
 0x9fd   : > { %v16921_v10 = vpop.f32.mrb[44].mxu1 }
 0x9fe   : > { %v16947_v28 = vadd.f32 %v16921_v10, %v28301_v24  ;;  %v21364_v4 = vpop.f32.mrb[45].mxu1 }
 0x9ff   : > { %v17518_v51 = vpop.f32.mrb[22].mxu0 }
 0xa00   : > { %v21475_v14 = vpop.f32.mrb[23].mxu0  ;;  %v28409_v0 = vadd.f32 %v17142_v17, %v16947_v28 }
 0xa01   : > { %v16926_v47 = vpop.f32.mrb[46].mxu1 }
 0xa02   : > { %v16948_v25 = vadd.f32 %v16926_v47, %v28313_v12  ;;  %v21367_v52 = vpop.f32.mrb[47].mxu1 }
 0xa03   : > { %v17523_v7 = vpop.f32.mrb[24].mxu0 }
 0xa04   : > { %v21478_v19 = vpop.f32.mrb[25].mxu0  ;;  %v28412_v61 = vadd.f32 %v17147_v26, %v16948_v25 }
 0xa05   : > { %v16931_v23 = vpop.f32.mrb[48].mxu1 }
 0xa06   : > { %v16949_v39 = vadd.f32 %v16931_v23, %v28325_v27  ;;  %v21370_v3 = vpop.f32.mrb[49].mxu1 }
 0xa07   : > { %v17528_v62 = vpop.f32.mrb[26].mxu0 }
 0xa08   : > { %v21481_v56 = vpop.f32.mrb[27].mxu0  ;;  %v28415_v24 = vadd.f32 %v17152_v40, %v16949_v39 }
 0xa09   : > { %v17303_v2 = vpop.f32.mrb[50].mxu1 }
 0xa0a   : > { %v17377_v59 = vadd.f32 %v17303_v2, %v28337_v16  ;;  %v21426_v8 = vpop.f32.mrb[51].mxu1 }
 0xa0b   : > { %v17533_v35 = vpop.f32.mrb[28].mxu0 }
 0xa0c   : > { %v21484_v21 = vpop.f32.mrb[29].mxu0  ;;  %v28418_v12 = vadd.f32 %v17518_v51, %v17377_v59 }
 0xa0d   : > { %v17308_v30 = vpop.f32.mrb[52].mxu1 }
 0xa0e   : > { %v17378_v32 = vadd.f32 %v17308_v30, %v28349_v43  ;;  %v21429_v6 = vpop.f32.mrb[53].mxu1 }
 0xa0f   : > { %v17538_v54 = vpop.f32.mrb[30].mxu0 }
 0xa10   : > { %v28421_v20 = vadd.f32 %v17523_v7, %v17378_v32  ;;  %v21487_v27 = vpop.f32.mrb[31].mxu0 }
 0xa11   : > { %v17313_v57 = vpop.f32.mrb[54].mxu1 }
 0xa12   : > { %v17379_v22 = vadd.f32 %v17313_v57, %v28361_v41  ;;  %v21432_v33 = vpop.f32.mrb[55].mxu1 }
 0xa13   : > { %v17543_v38 = vpop.f32.mrb[32].mxu0 }
 0xa14   : > { %v28424_v15 = vadd.f32 %v17528_v62, %v17379_v22  ;;  %v21490_v16 = vpop.f32.mrb[33].mxu0 }
 0xa15   : > { %v17318_v49 = vpop.f32.mrb[56].mxu1 }
 0xa16   : > { %v17380_v34 = vadd.f32 %v17318_v49, %v28373_v5  ;;  %v21435_v53 = vpop.f32.mrb[57].mxu1 }
 0xa17   : > { %v17548_v17 = vpop.f32.mrb[34].mxu0 }
 0xa18   : > { %v28427_v63 = vadd.f32 %v17533_v35, %v17380_v34  ;;  %v21493_v43 = vpop.f32.mrb[35].mxu0 }
 0xa19   : > { %v17323_v37 = vpop.f32.mrb[58].mxu1 }
 0xa1a   : > { %v17381_v44 = vadd.f32 %v17323_v37, %v28379_v18  ;;  %v21438_v29 = vpop.f32.mrb[59].mxu1 }
 0xa1b   : > { %v17553_v26 = vpop.f32.mrb[36].mxu0 }
 0xa1c   : > { %v28430_v1 = vadd.f32 %v17538_v54, %v17381_v44  ;;  %v21496_v41 = vpop.f32.mrb[37].mxu0 }
 0xa1d   : > { %v17328_v42 = vpop.f32.mrb[60].mxu1 }
 0xa1e   : > { %v17382_v58 = vadd.f32 %v17328_v42, %v28385_v11  ;;  %v21441_v45 = vpop.f32.mrb[61].mxu1 }
 0xa1f   : > { %v17558_v40 = vpop.f32.mrb[38].mxu0 }
 0xa20   : > { %v28433_v9 = vadd.f32 %v17543_v38, %v17382_v58  ;;  %v21499_v5 = vpop.f32.mrb[39].mxu0 }
 0xa21   : > { %v17333_v10 = vpop.f32.mrb[62].mxu1 }
 0xa22   : > { %v17383_v28 = vadd.f32 %v17333_v10, %v28391_v55  ;;  %v21444_v4 = vpop.f32.mrb[63].mxu1 }
 0xa23   : > { %v17563_v51 = vpop.f32.mrb[40].mxu0 }
 0xa24   : > { %v28436_v14 = vadd.f32 %v17548_v17, %v17383_v28  ;;  %v21502_v18 = vpop.f32.mrb[41].mxu0 }
 0xa25   : > { %v17338_v47 = vpop.f32.mrb[64].mxu1 }
 0xa26   : > { %v17384_v25 = vadd.f32 %v17338_v47, %v28394_v60  ;;  %v21447_v52 = vpop.f32.mrb[65].mxu1 }
 0xa27   : > { %v17568_v7 = vpop.f32.mrb[42].mxu0 }
 0xa28   : > { %v28439_v19 = vadd.f32 %v17553_v26, %v17384_v25  ;;  %v21505_v11 = vpop.f32.mrb[43].mxu0 }
 0xa29   : > { %v17343_v23 = vpop.f32.mrb[66].mxu1 }
 0xa2a   : > { %v17385_v39 = vadd.f32 %v17343_v23, %v28397_v48  ;;  %v21450_v3 = vpop.f32.mrb[67].mxu1 }
 0xa2b   : > { %v17573_v62 = vpop.f32.mrb[44].mxu0 }
 0xa2c   : > { %v28442_v56 = vadd.f32 %v17558_v40, %v17385_v39  ;;  %v21508_v55 = vpop.f32.mrb[45].mxu0 }
 0xa2d   : > { %v17348_v2 = vpop.f32.mrb[68].mxu1 }
 0xa2e   : > { %v17386_v59 = vadd.f32 %v17348_v2, %v28400_v31  ;;  %v21453_v8 = vpop.f32.mrb[69].mxu1 }
 0xa2f   : > { %v17578_v35 = vpop.f32.mrb[46].mxu0 }
 0xa30   : > { %v28445_v21 = vadd.f32 %v17563_v51, %v17386_v59  ;;  %v21511_v60 = vpop.f32.mrb[47].mxu0 }
 0xa31   : > { %v17353_v30 = vpop.f32.mrb[70].mxu1 }
 0xa32   : > { %v17387_v32 = vadd.f32 %v17353_v30, %v28403_v13  ;;  %v21456_v6 = vpop.f32.mrb[71].mxu1 }
 0xa33   : > { %v17583_v54 = vpop.f32.mrb[48].mxu0 }
 0xa34   : > { %v28448_v27 = vadd.f32 %v17568_v7, %v17387_v32  ;;  %v21514_v48 = vpop.f32.mrb[49].mxu0 }
 0xa35   : > { %v17358_v57 = vpop.f32.mrb[72].mxu1 }
 0xa36   : > { %v17388_v22 = vadd.f32 %v17358_v57, %v28406_v50  ;;  %v21459_v33 = vpop.f32.mrb[73].mxu1 }
 0xa37   : > { %v17588_v38 = vpop.f32.mrb[50].mxu0 }
 0xa38   : > { %v28451_v16 = vadd.f32 %v17573_v62, %v17388_v22  ;;  %v21517_v31 = vpop.f32.mrb[51].mxu0 }
 0xa39   : > { %v17363_v49 = vpop.f32.mrb[74].mxu1 }
 0xa3a   : > { %v17389_v34 = vadd.f32 %v17363_v49, %v28409_v0  ;;  %v21462_v53 = vpop.f32.mrb[75].mxu1 }
 0xa3b   : > { %v17962_v17 = vpop.f32.mrb[52].mxu0 }
 0xa3c   : > { %v28454_v43 = vadd.f32 %v17578_v35, %v17389_v34  ;;  %v21573_v13 = vpop.f32.mrb[53].mxu0 }
 0xa3d   : > { %v17368_v37 = vpop.f32.mrb[76].mxu1 }
 0xa3e   : > { %v17390_v44 = vadd.f32 %v17368_v37, %v28412_v61  ;;  %v21465_v29 = vpop.f32.mrb[77].mxu1 }
 0xa3f   : > { %v17967_v26 = vpop.f32.mrb[54].mxu0 }
 0xa40   : > { %v28457_v41 = vadd.f32 %v17583_v54, %v17390_v44  ;;  %v21576_v50 = vpop.f32.mrb[55].mxu0 }
 0xa41   : > { %v17373_v42 = vpop.f32.mrb[78].mxu1 }
 0xa42   : > { %v17391_v58 = vadd.f32 %v17373_v42, %v28415_v24  ;;  %v21468_v45 = vpop.f32.mrb[79].mxu1 }
 0xa43   : > { %v17972_v40 = vpop.f32.mrb[56].mxu0 }
 0xa44   : > { %v28460_v5 = vadd.f32 %v17588_v38, %v17391_v58  ;;  %v21579_v0 = vpop.f32.mrb[57].mxu0 }
 0xa45   : > { %v17741_v10 = vpop.f32.mrb[80].mxu1 }
 0xa46   : > { %v17815_v28 = vadd.f32 %v17741_v10, %v28418_v12  ;;  %v21524_v4 = vpop.f32.mrb[81].mxu1 }
 0xa47   : > { %v17977_v51 = vpop.f32.mrb[58].mxu0 }
 0xa48   : > { %v28463_v18 = vadd.f32 %v17962_v17, %v17815_v28  ;;  %v21582_v61 = vpop.f32.mrb[59].mxu0 }
 0xa49   : > { %v17746_v47 = vpop.f32.mrb[82].mxu1 }
 0xa4a   : > { %v17816_v25 = vadd.f32 %v17746_v47, %v28421_v20  ;;  %v21527_v52 = vpop.f32.mrb[83].mxu1 }
 0xa4b   : > { %v17982_v7 = vpop.f32.mrb[60].mxu0 }
 0xa4c   : > { %v28466_v11 = vadd.f32 %v17967_v26, %v17816_v25  ;;  %v21585_v24 = vpop.f32.mrb[61].mxu0 }
 0xa4d   : > { %v17751_v23 = vpop.f32.mrb[84].mxu1 }
 0xa4e   : > { %v17817_v39 = vadd.f32 %v17751_v23, %v28424_v15  ;;  %v21530_v3 = vpop.f32.mrb[85].mxu1 }
 0xa4f   : > { %v17987_v62 = vpop.f32.mrb[62].mxu0 }
 0xa50   : > { %v28469_v55 = vadd.f32 %v17972_v40, %v17817_v39  ;;  %v21588_v12 = vpop.f32.mrb[63].mxu0 }
 0xa51   : > { %v17756_v2 = vpop.f32.mrb[86].mxu1 }
 0xa52   : > { %v17818_v59 = vadd.f32 %v17756_v2, %v28427_v63  ;;  %v21533_v8 = vpop.f32.mrb[87].mxu1 }
 0xa53   : > { %v17992_v35 = vpop.f32.mrb[64].mxu0 }
 0xa54   : > { %v28472_v60 = vadd.f32 %v17977_v51, %v17818_v59  ;;  %v21591_v20 = vpop.f32.mrb[65].mxu0 }
 0xa55   : > { %v17761_v30 = vpop.f32.mrb[88].mxu1 }
 0xa56   : > { %v17819_v32 = vadd.f32 %v17761_v30, %v28430_v1  ;;  %v21536_v6 = vpop.f32.mrb[89].mxu1 }
 0xa57   : > { %v17997_v54 = vpop.f32.mrb[66].mxu0 }
 0xa58   : > { %v28475_v48 = vadd.f32 %v17982_v7, %v17819_v32  ;;  %v21594_v15 = vpop.f32.mrb[67].mxu0 }
 0xa59   : > { %v17766_v57 = vpop.f32.mrb[90].mxu1 }
 0xa5a   : > { %v17820_v22 = vadd.f32 %v17766_v57, %v28433_v9  ;;  %v21539_v33 = vpop.f32.mrb[91].mxu1 }
 0xa5b   : > { %v18002_v38 = vpop.f32.mrb[68].mxu0 }
 0xa5c   : > { %v28478_v31 = vadd.f32 %v17987_v62, %v17820_v22  ;;  %v21597_v63 = vpop.f32.mrb[69].mxu0 }
 0xa5d   : > { %v17771_v49 = vpop.f32.mrb[92].mxu1 }
 0xa5e   : > { %v17821_v34 = vadd.f32 %v17771_v49, %v28436_v14  ;;  %v21542_v53 = vpop.f32.mrb[93].mxu1 }
 0xa5f   : > { %v18007_v17 = vpop.f32.mrb[70].mxu0 }
 0xa60   : > { %v28481_v13 = vadd.f32 %v17992_v35, %v17821_v34  ;;  %v21600_v1 = vpop.f32.mrb[71].mxu0 }
 0xa61   : > { %v17776_v37 = vpop.f32.mrb[94].mxu1 }
 0xa62   : > { %v17822_v44 = vadd.f32 %v17776_v37, %v28439_v19  ;;  %v21545_v29 = vpop.f32.mrb[95].mxu1  ;;  %v18493_v37 = vld [vmem:[%s28698_s6] sm:$0xff] }
 0xa63   : > { %v18012_v26 = vpop.f32.mrb[72].mxu0 }
 0xa64   : > { %v28484_v50 = vadd.f32 %v17997_v54, %v17822_v44  ;;  %v21603_v9 = vpop.f32.mrb[73].mxu0 }
 0xa65   : > { %v17781_v42 = vpop.f32.mrb[96].mxu1 }
 0xa66   : > { %v17823_v58 = vadd.f32 %v17781_v42, %v28442_v56  ;;  %v21548_v45 = vpop.f32.mrb[97].mxu1 }
 0xa67   : > { %v18017_v40 = vpop.f32.mrb[74].mxu0 }
 0xa68   : > { %v28487_v0 = vadd.f32 %v18002_v38, %v17823_v58  ;;  %v21606_v14 = vpop.f32.mrb[75].mxu0 }
 0xa69   : > { %v17786_v10 = vpop.f32.mrb[98].mxu1 }
 0xa6a   : > { %v17824_v28 = vadd.f32 %v17786_v10, %v28445_v21  ;;  %v21551_v4 = vpop.f32.mrb[99].mxu1 }
 0xa6b   : > { %v18022_v51 = vpop.f32.mrb[76].mxu0 }
 0xa6c   : > { %v28490_v61 = vadd.f32 %v18007_v17, %v17824_v28  ;;  %v21609_v19 = vpop.f32.mrb[77].mxu0 }
 0xa6d   : > { %v17791_v47 = vpop.f32.mrb[100].mxu1 }
 0xa6e   : > { %v17825_v25 = vadd.f32 %v17791_v47, %v28448_v27  ;;  %v21554_v52 = vpop.f32.mrb[101].mxu1 }
 0xa6f   : > { %v18027_v7 = vpop.f32.mrb[78].mxu0 }
 0xa70   : > { %v28493_v24 = vadd.f32 %v18012_v26, %v17825_v25  ;;  %v21612_v56 = vpop.f32.mrb[79].mxu0  ;;  %v18494_v26 = vld [vmem:[%s28698_s6 + $0x8] sm:$0xff] }
 0xa71   : > { %v17796_v23 = vpop.f32.mrb[102].mxu1 }
 0xa72   : > { %v17826_v39 = vadd.f32 %v17796_v23, %v28451_v16  ;;  %v21557_v3 = vpop.f32.mrb[103].mxu1  ;;  %v18496_v23 = vld [vmem:[%s28698_s6 + $0x18] sm:$0xff] }
 0xa73   : > { %v18032_v62 = vpop.f32.mrb[80].mxu0 }
 0xa74   : > { %v28496_v12 = vadd.f32 %v18017_v40, %v17826_v39  ;;  %v21615_v21 = vpop.f32.mrb[81].mxu0 }
 0xa75   : > { %v17801_v2 = vpop.f32.mrb[104].mxu1 }
 0xa76   : > { %v17827_v59 = vadd.f32 %v17801_v2, %v28454_v43  ;;  %v21560_v8 = vpop.f32.mrb[105].mxu1 }
 0xa77   : > { %v18404_v35 = vpop.f32.mrb[82].mxu0 }
 0xa78   : > { %v28499_v20 = vadd.f32 %v18022_v51, %v17827_v59  ;;  %v21671_v27 = vpop.f32.mrb[83].mxu0 }
 0xa79   : > { %v17806_v30 = vpop.f32.mrb[106].mxu1 }
 0xa7a   : > { %v17828_v32 = vadd.f32 %v17806_v30, %v28457_v41  ;;  %v21563_v6 = vpop.f32.mrb[107].mxu1 }
 0xa7b   : > { %v18409_v54 = vpop.f32.mrb[84].mxu0  ;;  %v18497_v6 = vld [vmem:[%s28698_s6 + $0x20] sm:$0xff] }
 0xa7c   : > { %v28502_v15 = vadd.f32 %v18027_v7, %v17828_v32  ;;  %v21674_v16 = vpop.f32.mrb[85].mxu0 }
 0xa7d   : > { %v17811_v57 = vpop.f32.mrb[108].mxu1 }
 0xa7e   : > { %v17829_v22 = vadd.f32 %v17811_v57, %v28460_v5  ;;  %v21566_v33 = vpop.f32.mrb[109].mxu1 }
 0xa7f   : > { %v18414_v38 = vpop.f32.mrb[86].mxu0  ;;  %v18498_v33 = vld [vmem:[%s28698_s6 + $0x28] sm:$0xff] }
 0xa80   : > { %v28505_v63 = vadd.f32 %v18032_v62, %v17829_v22  ;;  %v21677_v43 = vpop.f32.mrb[87].mxu0 }
 0xa81   : > { %v18183_v49 = vpop.f32.mrb[110].mxu1 }
 0xa82   : > { %v18257_v34 = vadd.f32 %v18183_v49, %v28463_v18  ;;  %v21622_v53 = vpop.f32.mrb[111].mxu1 }
 0xa83   : > { %v18419_v17 = vpop.f32.mrb[88].mxu0 }
 0xa84   : > { %v18478_v1 = vadd.f32 %v18404_v35, %v18257_v34  ;;  %v21680_v41 = vpop.f32.mrb[89].mxu0 }
 0xa85   : > { %v18188_v44 = vpop.f32.mrb[112].mxu1 }
 0xa86   : > { %v18258_v29 = vadd.f32 %v18188_v44, %v28466_v11  ;;  %v21625_v5 = vpop.f32.mrb[113].mxu1  ;;  %v18508_v42 = vadd.f32 %v18493_v37, %v18478_v1  ;;  %v18495_v11 = vld [vmem:[%s28698_s6 + $0x10] sm:$0xff] }
 0xa87   : > { %v18424_v9 = vpop.f32.mrb[90].mxu0  ;;  %v18499_v5 = vld [vmem:[%s28698_s6 + $0x30] sm:$0xff] }
 0xa88   : > { %v18479_v58 = vadd.f32 %v18409_v54, %v18258_v29  ;;  %v21683_v18 = vpop.f32.mrb[91].mxu0  ;;  %v18523_v4 = vmax.f32 %v18508_v42, 0.0 }
 0xa89   : > { %v18193_v45 = vpop.f32.mrb[114].mxu1  ;;  %v18500_v18 = vld [vmem:[%s28698_s6 + $0x38] sm:$0xff] }
 0xa8a   : > { %v18509_v40 = vadd.f32 %v18494_v26, %v18479_v58  ;;  %v18259_v14 = vadd.f32 %v18193_v45, %v28469_v55  ;;  %v21628_v10 = vpop.f32.mrb[115].mxu1 }
 0xa8b   : > { %v18429_v28 = vpop.f32.mrb[92].mxu0 }
 0xa8c   : > { %v18524_v51 = vmax.f32 %v18509_v40, 0.0  ;;  %v18480_v19 = vadd.f32 %v18414_v38, %v18259_v14  ;;  %v21686_v47 = vpop.f32.mrb[93].mxu0 }
 0xa8d   : > { %v18198_v25 = vpop.f32.mrb[116].mxu1 }
 0xa8e   : > { %v21878_v52 = vpack.c.bf16 %v18524_v51, %v18523_v4  ;;  %v18260_v7 = vadd.f32 %v18198_v25, %v28472_v60  ;;  %v21631_v56 = vpop.f32.mrb[117].mxu1  ;;  %v18510_v39 = vadd.f32 %v18495_v11, %v18480_v19 }
 0xa8f   : > { %v18434_v55 = vpop.f32.mrb[94].mxu0 }
 0xa90   : > { %v18481_v3 = vadd.f32 %v18419_v17, %v18260_v7  ;;  %21879 = vmatpush3.bf16.msra.mxu1 %v21878_v52  ;;  %v21689_v62 = vpop.f32.mrb[95].mxu0  ;;  %v18525_v27 = vmax.f32 %v18510_v39, 0.0  ;;  %v18501_v52 = vld [vmem:[%s28698_s6 + $0x40] sm:$0xff]  ;;  %v18502_v39 = vld [vmem:[%s28698_s6 + $0x48] sm:$0xff] }
 0xa91   : > { %v18203_v21 = vpop.f32.mrb[118].mxu1  ;;  %21880 = vmatprep.subr.bf16.mxu1 %v28864_v46 }
 0xa92   : > { %v18511_v2 = vadd.f32 %v18496_v23, %v18481_v3  ;;  %v18261_v59 = vadd.f32 %v18203_v21, %v28475_v48  ;;  %v21634_v8 = vpop.f32.mrb[119].mxu1 }
 0xa93   : > { %v18439_v35 = vpop.f32.mrb[96].mxu0 }
 0xa94   : > { %v18526_v60 = vmax.f32 %v18511_v2, 0.0  ;;  %v18482_v30 = vadd.f32 %v18424_v9, %v18261_v59  ;;  %v21692_v32 = vpop.f32.mrb[97].mxu0 }
 0xa95   : > { %v18208_v54 = vpop.f32.mrb[120].mxu1 }
 0xa96   : > { %v21881_v16 = vpack.c.bf16 %v18526_v60, %v18525_v27  ;;  %v18262_v57 = vadd.f32 %v18208_v54, %v28478_v31  ;;  %v21637_v22 = vpop.f32.mrb[121].mxu1  ;;  %v18512_v38 = vadd.f32 %v18497_v6, %v18482_v30  ;;  %v18503_v6 = vld [vmem:[%s28698_s6 + $0x50] sm:$0xff] }
 0xa97   : > { %v18444_v48 = vpop.f32.mrb[98].mxu0 }
 0xa98   : > { %v18483_v43 = vadd.f32 %v18429_v28, %v18262_v57  ;;  %21882 = vmatpush3.bf16.msra.mxu1 %v21881_v16  ;;  %v21695_v49 = vpop.f32.mrb[99].mxu0  ;;  %v18527_v37 = vmax.f32 %v18512_v38, 0.0 }
 0xa99   : > { %v18213_v34 = vpop.f32.mrb[122].mxu1  ;;  %21883 = vmatprep.subr.bf16.mxu1 %v28864_v46 }
 0xa9a   : > { %v18513_v53 = vadd.f32 %v18498_v33, %v18483_v43  ;;  %v18263_v17 = vadd.f32 %v18213_v34, %v28481_v13  ;;  %v21640_v1 = vpop.f32.mrb[123].mxu1  ;;  %v18504_v33 = vld [vmem:[%s28698_s6 + $0x58] sm:$0xff] }
 0xa9b   : > { %v18449_v41 = vpop.f32.mrb[100].mxu0 }
 0xa9c   : > { %v18528_v31 = vmax.f32 %v18513_v53, 0.0  ;;  %v18484_v44 = vadd.f32 %v18434_v55, %v18263_v17  ;;  %v21698_v29 = vpop.f32.mrb[101].mxu0 }
 0xa9d   : > { %v18218_v26 = vpop.f32.mrb[124].mxu1 }
 0xa9e   : > { %v21884_v9 = vpack.c.bf16 %v18528_v31, %v18527_v37  ;;  %v18264_v42 = vadd.f32 %v18218_v26, %v28484_v50  ;;  %v21643_v58 = vpop.f32.mrb[125].mxu1  ;;  %v18514_v45 = vadd.f32 %v18499_v5, %v18484_v44  ;;  %v18505_v37 = vld [vmem:[%s28698_s6 + $0x60] sm:$0xff]  ;;  %v18506_v26 = vld [vmem:[%s28698_s6 + $0x68] sm:$0xff] }
 0xa9f   : > { %v18454_v13 = vpop.f32.mrb[102].mxu0 }
 0xaa0   : > { %v18485_v40 = vadd.f32 %v18439_v35, %v18264_v42  ;;  %21885 = vmatpush3.bf16.msra.mxu1 %v21884_v9  ;;  %v21701_v14 = vpop.f32.mrb[103].mxu0  ;;  %v18529_v47 = vmax.f32 %v18514_v45, 0.0  ;;  %v18507_v45 = vld [vmem:[%s28698_s6 + $0x70] sm:$0xff] }
 0xaa1   : > { %v18223_v10 = vpop.f32.mrb[126].mxu1  ;;  %21886 = vmatprep.subr.bf16.mxu1 %v28864_v46 }
 0xaa2   : > { %v18515_v28 = vadd.f32 %v18500_v18, %v18485_v40  ;;  %v18265_v4 = vadd.f32 %v18223_v10, %v28487_v0  ;;  %v21646_v51 = vpop.f32.mrb[127].mxu1 }
 0xaa3   : > { %v18459_v19 = vpop.f32.mrb[104].mxu0  ;;  %v18540_v51 = vld [vmem:[%s28699_s7 + $0x10] sm:$0xff] }
 0xaa4   : > { %v18530_v50 = vmax.f32 %v18515_v28, 0.0  ;;  %v18486_v11 = vadd.f32 %v18444_v48, %v18265_v4  ;;  %v21704_v25 = vpop.f32.mrb[105].mxu0 }
 0xaa5   : > { %v18228_v7 = vpop.f32.mrb[128].mxu1  ;;  %v18545_v25 = vld [vmem:[%s28699_s7 + $0x38] sm:$0xff] }
 0xaa6   : > { %v21887_v56 = vpack.c.bf16 %v18530_v50, %v18529_v47  ;;  %v18266_v23 = vadd.f32 %v18228_v7, %v28490_v61  ;;  %v21649_v55 = vpop.f32.mrb[129].mxu1  ;;  %v18516_v3 = vadd.f32 %v18501_v52, %v18486_v11  ;;  %v18542_v47 = vld [vmem:[%s28699_s7 + $0x20] sm:$0xff]  ;;  %v18543_v50 = vld [vmem:[%s28699_s7 + $0x28] sm:$0xff]  ;;  %v18544_v11 = vld [vmem:[%s28699_s7 + $0x30] sm:$0xff] }
 0xaa7   : > { %v18464_v0 = vpop.f32.mrb[106].mxu0  ;;  %v18546_v52 = vld [vmem:[%s28699_s7 + $0x40] sm:$0xff]  ;;  %v18547_v7 = vld [vmem:[%s28699_s7 + $0x48] sm:$0xff] }
 0xaa8   : > { %v18487_v62 = vadd.f32 %v18449_v41, %v18266_v23  ;;  %21888 = vmatpush3.bf16.msra.mxu1 %v21887_v56  ;;  %v21707_v21 = vpop.f32.mrb[107].mxu0  ;;  %v18531_v60 = vmax.f32 %v18516_v3, 0.0  ;;  %v18548_v56 = vld [vmem:[%s28699_s7 + $0x50] sm:$0xf]  ;;  %v18725_v23 = vld [vmem:[%s28701_s9] sm:$0xff] }
 0xaa9   : > { %v18233_v2 = vpop.f32.mrb[130].mxu1  ;;  %21889 = vmatprep.subr.bf16.mxu1 %v28864_v46  ;;  %21799 = vmatprep.mubr.msk.f32.mxu0 %vm18729_vm0, %v18725_v23  ;;  %v18549_v55 = vld [vmem:[%s28700_s8] sm:$0xff] }
 0xaaa   : > { %v18517_v59 = vadd.f32 %v18502_v39, %v18487_v62  ;;  %v18267_v8 = vadd.f32 %v18233_v2, %v28493_v24  ;;  %v21652_v35 = vpop.f32.mrb[131].mxu1 }
 0xaab   : > { %v18469_v27 = vpop.f32.mrb[108].mxu0  ;;  %v18551_v35 = vld [vmem:[%s28700_s8 + $0x10] sm:$0xff] }
 0xaac   : > { %v18532_v61 = vmax.f32 %v18517_v59, 0.0  ;;  %v18488_v30 = vadd.f32 %v18454_v13, %v18267_v8  ;;  %v21710_v32 = vpop.f32.mrb[109].mxu0 }
 0xaad   : > { %v18238_v54 = vpop.f32.mrb[132].mxu1 }
 0xaae   : > { %v21890_v16 = vpack.c.bf16 %v18532_v61, %v18531_v60  ;;  %v18268_v57 = vadd.f32 %v18238_v54, %v28496_v12  ;;  %v21655_v22 = vpop.f32.mrb[133].mxu1  ;;  %v18518_v48 = vadd.f32 %v18503_v6, %v18488_v30  ;;  %v18552_v30 = vld [vmem:[%s28700_s8 + $0x18] sm:$0xff] }
 0xaaf   : > { %v18474_v24 = vpop.f32.mrb[110].mxu0 }
 0xab0   : > { %v18489_v38 = vadd.f32 %v18459_v19, %v18268_v57  ;;  %21891 = vmatpush3.bf16.msra.mxu1 %v21890_v16  ;;  %v21713_v43 = vpop.f32.mrb[111].mxu0  ;;  %v18533_v1 = vmax.f32 %v18518_v48, 0.0  ;;  %v18541_v19 = vld [vmem:[%s28699_s7 + $0x18] sm:$0xff] }
 0xab1   : > { %v18243_v49 = vpop.f32.mrb[134].mxu1  ;;  %21892 = vmatprep.subr.bf16.mxu1 %v28864_v46  ;;  %v18554_v43 = vld [vmem:[%s28700_s8 + $0x28] sm:$0xff] }
 0xab2   : > { %v18519_v34 = vadd.f32 %v18504_v33, %v18489_v38  ;;  %v18269_v53 = vadd.f32 %v18243_v49, %v28499_v20  ;;  %v21658_v17 = vpop.f32.mrb[135].mxu1  ;;  %v18553_v33 = vld [vmem:[%s28700_s8 + $0x20] sm:$0xff] }
 0xab4   : > { %v18534_v41 = vmax.f32 %v18519_v34, 0.0  ;;  %v18490_v12 = vadd.f32 %v18464_v0, %v18269_v53 }
 0xab5   : > { %v18248_v31 = vpop.f32.mrb[136].mxu1 }
 0xab6   : > { %v21893_v44 = vpack.c.bf16 %v18534_v41, %v18533_v1  ;;  %v18270_v29 = vadd.f32 %v18248_v31, %v28502_v15  ;;  %v21661_v5 = vpop.f32.mrb[137].mxu1  ;;  %v18520_v9 = vadd.f32 %v18505_v37, %v18490_v12  ;;  %v18555_v12 = vld [vmem:[%s28700_s8 + $0x30] sm:$0xff] }
 0xab8   : > { %v18491_v42 = vadd.f32 %v18469_v27, %v18270_v29  ;;  %21894 = vmatpush3.bf16.msra.mxu1 %v21893_v44  ;;  %v18535_v15 = vmax.f32 %v18520_v9, 0.0  ;;  %v18556_v29 = vld [vmem:[%s28700_s8 + $0x38] sm:$0xff] }
 0xab9   : > { %v18253_v20 = vpop.f32.mrb[138].mxu1  ;;  %21895 = vmatprep.subr.bf16.mxu1 %v28864_v46  ;;  %v18538_v46 = vld [vmem:[%s28699_s7] sm:$0xff] }
 0xaba   : > { %v18521_v58 = vadd.f32 %v18506_v26, %v18491_v42  ;;  %v18271_v18 = vadd.f32 %v18253_v20, %v28505_v63  ;;  %v21664_v13 = vpop.f32.mrb[139].mxu1  ;;  %v18539_v63 = vld [vmem:[%s28699_s7 + $0x8] sm:$0xff] }
 0xabc   : > { %v18536_v40 = vmax.f32 %v18521_v58, 0.0  ;;  %v18492_v14 = vadd.f32 %v18474_v24, %v18271_v18  ;;  %v18557_v18 = vld [vmem:[%s28700_s8 + $0x40] sm:$0xff] }
 0xabe   : > { %v21896_v10 = vpack.c.bf16 %v18536_v40, %v18535_v15  ;;  %v18522_v28 = vadd.f32 %v18507_v45, %v18492_v14  ;;  %v18558_v40 = vld [vmem:[%s28700_s8 + $0x48] sm:$0xff] }
 0xac0   : > { %21897 = vmatpush3.bf16.msra.mxu1 %v21896_v10  ;;  %v18537_v4 = vmax.f32 %v18522_v28, 0.0 }
 0xac1   : > { %21742 = vmatprep.subr.mxu1 %v28776_v36 }
 0xac4   : > { %21743 = vmatpush3.msra.mxu1 %v18537_v4 }
 0xac5   : > { %21745 = vmatmul.mubr.msk.f32.vlgmr.msra.gmra.mrb[140].mxu1 %vm18560_vm7, %v18538_v46  ;;  %v18559_v46 = vld [vmem:[%s28700_s8 + $0x50] sm:$0xf] }
 0xac6   : > { %21747 = vmatprep.mubr.msk.f32.mxu1 %vm22512_vm2, %v28776_v36 }
 0xac9   : > { %21748 = vmatmul.mubr.msk.f32.gmra.mrb[142].mxu1 %vm18560_vm7, %v18539_v63 }
 0xaca   : > { %21750 = vmatprep.mubr.msk.f32.mxu1 %vm22512_vm2, %v28776_v36 }
 0xacd   : > { %21751 = vmatmul.mubr.msk.f32.gmra.mrb[144].mxu1 %vm18560_vm7, %v18540_v51 }
 0xace   : > { %21753 = vmatprep.mubr.msk.f32.mxu1 %vm22512_vm2, %v28776_v36 }
 0xad1   : > { %21754 = vmatmul.mubr.msk.f32.gmra.mrb[146].mxu1 %vm18560_vm7, %v18541_v19 }
 0xad2   : > { %21756 = vmatprep.mubr.msk.f32.mxu1 %vm22512_vm2, %v28776_v36 }
 0xad5   : > { %21757 = vmatmul.mubr.msk.f32.gmra.mrb[148].mxu1 %vm18560_vm7, %v18542_v47 }
 0xad6   : > { %21759 = vmatprep.mubr.msk.f32.mxu1 %vm22512_vm2, %v28776_v36 }
 0xad9   : > { %21760 = vmatmul.mubr.msk.f32.gmra.mrb[150].mxu1 %vm18560_vm7, %v18543_v50 }
 0xada   : > { %21762 = vmatprep.mubr.msk.f32.mxu1 %vm22512_vm2, %v28776_v36 }
 0xadd   : > { %21763 = vmatmul.mubr.msk.f32.gmra.mrb[152].mxu1 %vm18560_vm7, %v18544_v11 }
 0xade   : > { %21765 = vmatprep.mubr.msk.f32.mxu1 %vm22512_vm2, %v28776_v36 }
 0xae1   : > { %21766 = vmatmul.mubr.msk.f32.gmra.mrb[154].mxu1 %vm18560_vm7, %v18545_v25 }
 0xae2   : > { %21768 = vmatprep.mubr.msk.f32.mxu1 %vm22512_vm2, %v28776_v36 }
 0xae5   : > { %21769 = vmatmul.mubr.msk.f32.gmra.mrb[156].mxu1 %vm18560_vm7, %v18546_v52  ;;  %v18726_v52 = vld [vmem:[%s28701_s9 + $0x8] sm:$0x3] }
 0xae6   : > { %21771 = vmatprep.mubr.msk.f32.mxu1 %vm22512_vm2, %v28776_v36 }
 0xae9   : > { %21772 = vmatmul.mubr.msk.f32.gmra.mrb[158].mxu1 %vm18560_vm7, %v18547_v7  ;;  %v18728_v7 = vld [vmem:[%s28702_s10 + $0x8] sm:$0x3] }
 0xaea   : > { %21774 = vmatprep.mubr.msk.f32.mxu1 %vm22512_vm2, %v28776_v36  ;;  %v18550_v36 = vld [vmem:[%s28700_s8 + $0x8] sm:$0xff] }
 0xaed   : > { %21775 = vmatmul.mubr.msk.f32.gmra.mrb[160].mxu1 %vm18560_vm7, %v18548_v56  ;;  %v18727_v56 = vld [vmem:[%s28702_s10] sm:$0xff] }
 0xb98   : > { %v18660_v39 = vpop.f32.mrb[140].mxu1 }
 0xb99   : > { %v21746_v0 = vpop.f32.mrb[141].mxu1  ;;  %v18661_v3 = vadd.f32 %v18660_v39, %v18549_v55 }
 0xb9b   : > { %v18714_v59 = vmax.f32 %v18661_v3, 0.0 }
 0xb9c   : > { %v18665_v62 = vpop.f32.mrb[142].mxu1 }
 0xb9d   : > { %v18666_v21 = vadd.f32 %v18665_v62, %v18550_v36  ;;  %v21749_v2 = vpop.f32.mrb[143].mxu1 }
 0xb9f   : > { %v18715_v8 = vmax.f32 %v18666_v21, 0.0 }
 0xba0   : > { %v18670_v27 = vpop.f32.mrb[144].mxu1 }
 0xba1   : > { %v21898_v60 = vpack.c.bf16 %v18715_v8, %v18714_v59  ;;  %v21752_v61 = vpop.f32.mrb[145].mxu1  ;;  %v18671_v32 = vadd.f32 %v18670_v27, %v18551_v35 }
 0xba3   : > { %21899 = vmatprep.subr.bf16.mxu0 %v21898_v60  ;;  %v18716_v57 = vmax.f32 %v18671_v32, 0.0 }
 0xba4   : > { %21901 = vmatpush3.bf16.msra.mxu0 %v21898_v60  ;;  %v18675_v6 = vpop.f32.mrb[146].mxu1 }
 0xba5   : > { %v18676_v54 = vadd.f32 %v18675_v6, %v18552_v30  ;;  %v21755_v16 = vpop.f32.mrb[147].mxu1 }
 0xba7   : > { %v18717_v22 = vmax.f32 %v18676_v54, 0.0 }
 0xba8   : > { %v18680_v24 = vpop.f32.mrb[148].mxu1 }
 0xba9   : > { %v21902_v48 = vpack.c.bf16 %v18717_v22, %v18716_v57  ;;  %v21758_v38 = vpop.f32.mrb[149].mxu1  ;;  %v18681_v49 = vadd.f32 %v18680_v24, %v18553_v33 }
 0xbab   : > { %21903 = vmatprep.subr.bf16.mxu0 %v21902_v48  ;;  %v18718_v1 = vmax.f32 %v18681_v49, 0.0 }
 0xbac   : > { %21905 = vmatpush3.bf16.msra.mxu0 %v21902_v48  ;;  %v18685_v34 = vpop.f32.mrb[150].mxu1 }
 0xbad   : > { %v18686_v53 = vadd.f32 %v18685_v34, %v18554_v43  ;;  %v21761_v17 = vpop.f32.mrb[151].mxu1 }
 0xbaf   : > { %v18719_v41 = vmax.f32 %v18686_v53, 0.0 }
 0xbb0   : > { %v18690_v37 = vpop.f32.mrb[152].mxu1 }
 0xbb1   : > { %v21906_v31 = vpack.c.bf16 %v18719_v41, %v18718_v1  ;;  %v21764_v44 = vpop.f32.mrb[153].mxu1  ;;  %v18691_v5 = vadd.f32 %v18690_v37, %v18555_v12 }
 0xbb3   : > { %21907 = vmatprep.subr.bf16.mxu0 %v21906_v31  ;;  %v18720_v20 = vmax.f32 %v18691_v5, 0.0 }
 0xbb4   : > { %21909 = vmatpush3.bf16.msra.mxu0 %v21906_v31  ;;  %v18695_v26 = vpop.f32.mrb[154].mxu1 }
 0xbb5   : > { %v18696_v9 = vadd.f32 %v18695_v26, %v18556_v29  ;;  %v21767_v42 = vpop.f32.mrb[155].mxu1 }
 0xbb7   : > { %v18721_v58 = vmax.f32 %v18696_v9, 0.0 }
 0xbb8   : > { %v18700_v13 = vpop.f32.mrb[156].mxu1 }
 0xbb9   : > { %v21910_v45 = vpack.c.bf16 %v18721_v58, %v18720_v20  ;;  %v21770_v15 = vpop.f32.mrb[157].mxu1  ;;  %v18701_v14 = vadd.f32 %v18700_v13, %v18557_v18 }
 0xbbb   : > { %21911 = vmatprep.subr.bf16.mxu0 %v21910_v45  ;;  %v18722_v63 = vmax.f32 %v18701_v14, 0.0 }
 0xbbc   : > { %21913 = vmatpush3.bf16.msra.mxu0 %v21910_v45  ;;  %v18705_v10 = vpop.f32.mrb[158].mxu1 }
 0xbbd   : > { %v18706_v28 = vadd.f32 %v18705_v10, %v18558_v40  ;;  %v21773_v4 = vpop.f32.mrb[159].mxu1 }
 0xbbf   : > { %v18723_v51 = vmax.f32 %v18706_v28, 0.0 }
 0xbc0   : > { %v18710_v19 = vpop.f32.mrb[160].mxu1 }
 0xbc1   : > { %v21914_v47 = vpack.c.bf16 %v18723_v51, %v18722_v63  ;;  %v18711_v50 = vadd.f32 %v18710_v19, %v18559_v46  ;;  %v21776_v11 = vpop.f32.mrb[161].mxu1 }
 0xbc3   : > { %21915 = vmatprep.subr.bf16.mxu0 %v21914_v47  ;;  %v18724_v25 = vmax.f32 %v18711_v50, 0.0 }
 0xbc4   : > { %21917 = vmatpush3.bf16.msra.mxu0 %v21914_v47 }
 0xbc5   : > { %21797 = vmatprep.subr.msk.mxu0 %vm18736_vm1, %v18724_v25 }
 0xbc8   : > { %21798 = vmatpush3.msk.msra.mxu0 %vm18736_vm1, %v18724_v25 }
 0xbc9   : > { %21800 = vmatmul.mubr.msk.f32.vlgmr.msra.gmra.mrb[112].mxu0 %vm18729_vm0, %v18726_v52 }
 0xc9c   : > { %v21801_v23 = vpop.f32.mrb[112].mxu0 }
 0xc9d   : > { %v18812_v55 = vadd.f32 %v21801_v23, %v18728_v7  ;;  %v18806_v39 = vpop.f32.mrb[113].mxu0 }
 0xc9e   : > { %v18807_v0 = vadd.f32 %v18806_v39, %v18727_v56 }
 0xc9f   : > { %18818 = vst.msk [vmem:[%s386_s19 + $0x8] sm:$0x3] %vm18817_vm4, %v18812_v55 }
 0xca0   : > { %18816 = vst.msk [vmem:[%s386_s19] sm:$0xff] %vm18815_vm5, %v18807_v0 }
 0xca1 PF: > { %s21_s17 = sadd.s32 1, %s22482_s17  }
 0xca2   : > { %p18_p4 = scmp.ge.s32.totalorder %s21_s17, 4  }
 0xca4   :  { %20 = sbr.rel (!%p18_p4) target bundleno = 1 (0x1), region = 143 }

</bundles_post_ra>
